<compile_context>
chip_gen: v6e
topology: v6e:2x2x1
jax: 0.10.0
libtpu: 0.0.40
codegen_flags: <defaults>
</compile_context>

<pallas_src>
import jax
import jax.numpy as jnp
from jax import lax
from jax.experimental import pallas as pl
from jax.experimental.pallas import tpu as pltpu


# ---------------------------------------------------------------------------
# Fused kernel: conv1 + LN + ReLU + conv2 + LN + ReLU + flatten + Linear
# ---------------------------------------------------------------------------
def _make_fused_kernel(*, th, c, emb, l1, f1, f2, layer_norm, eps=1e-6):
    rt1 = 2 * th + 1          # conv1 rows needed per time block (with halo)
    pa = f2 + 1               # conv1 cols at freq 2p-1 (conv2 "even" taps)
    pb = f2                   # conv1 cols at freq 2p   (conv2 "odd"  taps)
    prec = lax.Precision.HIGHEST

    def bias_ln_relu(y, b_ref, g_ref, t_ref):
        lead = (1,) * (y.ndim - 1)
        y = y + b_ref[...].reshape(lead + (c,))
        if layer_norm:
            g = g_ref[...].reshape(lead + (c,))
            t = t_ref[...].reshape(lead + (c,))
            mu = jnp.mean(y, axis=-1, keepdims=True)
            d = y - mu
            var = jnp.mean(d * d, axis=-1, keepdims=True)   # two-pass (stable)
            y = d * lax.rsqrt(var + eps) * g + t
        return jnp.maximum(y, 0.0)

    def kernel(xm_ref, xh_ref, w1_ref, w2_ref, b1_ref, g1_ref, t1_ref,
               b2_ref, g2_ref, t2_ref, wd_ref, bd_ref, o_ref):
        # ---------------- conv1 (cin == 1): VPU broadcast MACs --------------
        # bases[parity][phase] holds padded raw rows (2*hr+parity, 4*q+phase)
        bases = []
        for par in range(2):
            row = []
            for ph in range(4):
                pp = par * 4 + ph
                row.append(jnp.concatenate(
                    [xm_ref[0, pp], xh_ref[0, pp, 0:2]], axis=0))  # [2*th+2, pa]
            bases.append(row)

        def tap(kh, ph):                       # [rt1, pa] contiguous slice
            off = 1 if kh == 2 else 0
            return bases[kh % 2][ph][off:off + rt1]

        # hoist broadcast weights (JAX does not CSE broadcast_in_dim)
        w1v = [[w1_ref[kh * 3 + kw:kh * 3 + kw + 1, :].reshape(1, 1, c)
                for kw in range(3)] for kh in range(3)]

        ca = jnp.zeros((rt1, pa, c), jnp.float32)
        cb = jnp.zeros((rt1, pb, c), jnp.float32)
        for kh in range(3):
            t0, t1, t2, t3 = tap(kh, 0), tap(kh, 1), tap(kh, 2), tap(kh, 3)
            ca = (ca + t0[:, :, None] * w1v[kh][0]
                     + t1[:, :, None] * w1v[kh][1]
                     + t2[:, :, None] * w1v[kh][2])
            cb = (cb + t2[:, 0:pb, None] * w1v[kh][0]
                     + t3[:, 0:pb, None] * w1v[kh][1]
                     + t0[:, 1:pb + 1, None] * w1v[kh][2])

        z1a = bias_ln_relu(ca, b1_ref, g1_ref, t1_ref)
        z1b = bias_ln_relu(cb, b1_ref, g1_ref, t1_ref)

        # zero the rows/cols that fall into conv2's zero-padding region
        i0 = 2 * th * pl.program_id(1) - 1
        ra = lax.broadcasted_iota(jnp.int32, (rt1, pa, c), 0) + i0
        qa = lax.broadcasted_iota(jnp.int32, (rt1, pa, c), 1)
        z1a = jnp.where((ra >= 0) & (ra < l1) & (qa >= 1) & (qa <= f1 // 2),
                        z1a, 0.0)
        rb = lax.broadcasted_iota(jnp.int32, (rt1, pb, c), 0) + i0
        qb = lax.broadcasted_iota(jnp.int32, (rt1, pb, c), 1)
        z1b = jnp.where((rb >= 0) & (rb < l1) & (qb <= (f1 - 1) // 2),
                        z1b, 0.0)

        # -------- conv2 + LN + ReLU: fused K = 3*C taps, one row per t ------
        w2k = [w2_ref[kh] for kh in range(3)]               # [3c, c] each
        z2_rows = []
        for t in range(th):
            y2 = None
            for kh in range(3):
                a = z1a[2 * t + kh]                          # [pa, c]
                b = z1b[2 * t + kh]                          # [pb, c]
                patch = jnp.concatenate([a[0:f2], b, a[1:pa]], axis=-1)
                d = jnp.dot(patch, w2k[kh],
                            preferred_element_type=jnp.float32, precision=prec)
                y2 = d if y2 is None else y2 + d             # [f2, c]
            z2_rows.append(bias_ln_relu(y2, b2_ref, g2_ref, t2_ref))
        z2 = jnp.stack(z2_rows, axis=0)                      # [th, f2, c]

        # -------------- flatten + Linear: M = th matmuls --------------------
        acc = jnp.zeros((th, emb), jnp.float32)
        for f in range(f2):
            acc = acc + jnp.dot(z2[:, f, :], wd_ref[f],
                                preferred_element_type=jnp.float32,
                                precision=prec)
        o_ref[0] = acc + bd_ref[...]

    return kernel


# ---------------------------------------------------------------------------
# Module-equivalent forward
# ---------------------------------------------------------------------------
def audio_conv_subsampling_forward(inputs, params, *, kernel_size=3, strides=2,
                                   layer_norm=True, time_block=8):
    """inputs: [B, L, F, 1] -> [B, L2, embedding_dim] (float32)."""
    assert inputs.ndim == 4
    assert kernel_size == 3 and strides == 2, \
        "only the module defaults kernel_size=3, strides=2 are implemented"
    b, l, f, cin = inputs.shape
    assert cin == 1, "input_channels == 1 (module default) is assumed"

    c = params["w1"].shape[-1]
    emb = params["bd"].shape[-1]
    l1, f1 = -(-l // 2), -(-f // 2)
    l2, f2 = -(-l1 // 2), -(-f1 // 2)

    th = time_block
    assert th % 8 == 0 and th >= 8, "time_block must be a multiple of 8"
    n2 = -(-l2 // th)
    wq = f2 + 1                     # width of each frequency-phase array
    lph = 2 * th * n2 + 8           # time rows after the parity split (+halo)
    ltot = 2 * lph                  # padded raw time rows
    wtot = 4 * wq                   # padded raw frequency cols

    # Zero-pad (3 = composed conv1+conv2 left/top padding through the strides)
    # and de-interleave into (time parity x 4 frequency phases) so that every
    # conv tap inside the kernel is a contiguous static slice.
    xp = jnp.pad(inputs.reshape(b, l, f).astype(jnp.float32),
                 ((0, 0), (3, ltot - 3 - l), (3, wtot - 3 - f)))
    xr = (xp.reshape(b, lph, 2, wq, 4)
            .transpose(0, 2, 4, 1, 3)
            .reshape(b, 8, lph, wq))

    w1r = params["w1"].reshape(9, c)           # (kh*3+kw, cout), cin == 1
    w2r = params["w2"].reshape(3, 3 * c, c)    # (kh, kw*C+cin, cout)
    wd3 = params["wd"].reshape(f2, c, emb)     # (f, cin, emb)

    if layer_norm:
        g1, t1 = params["ln1_g"], params["ln1_b"]
        g2, t2 = params["ln2_g"], params["ln2_b"]
    else:
        g1 = g2 = jnp.ones((c,), jnp.float32)
        t1 = t2 = jnp.zeros((c,), jnp.float32)

    kern = _make_fused_kernel(th=th, c=c, emb=emb, l1=l1, f1=f1, f2=f2,
                              layer_norm=layer_norm)

    flops = int(2 * b * (9 * l1 * f1 * c + 9 * l2 * f2 * c * c
                         + l2 * f2 * c * emb))
    transcendentals = int(b * (l1 * f1 + l2 * f2))
    bytes_accessed = int(4 * (b * l * f + b * l2 * emb + 9 * c + 9 * c * c
                              + f2 * c * emb + 6 * c + emb))

    zero2 = lambda bi, ji: (0, 0)
    zero3 = lambda bi, ji: (0, 0, 0)
    in_specs = [
        # raw input, main time block + 8-row halo (same array, two views)
        pl.BlockSpec((1, 8, 2 * th, wq), lambda bi, ji: (bi, 0, ji, 0)),
        pl.BlockSpec((1, 8, 8, wq),
                     lambda bi, ji: (bi, 0, (th // 4) * (ji + 1), 0)),
        pl.BlockSpec((9, c), zero2),          # w1
        pl.BlockSpec((3, 3 * c, c), zero3),   # w2 (tap-fused)
        pl.BlockSpec((1, c), zero2),          # b1
        pl.BlockSpec((1, c), zero2),          # ln1 gamma
        pl.BlockSpec((1, c), zero2),          # ln1 beta
        pl.BlockSpec((1, c), zero2),          # b2
        pl.BlockSpec((1, c), zero2),          # ln2 gamma
        pl.BlockSpec((1, c), zero2),          # ln2 beta
        pl.BlockSpec((f2, c, emb), zero3),    # dense weight
        pl.BlockSpec((1, emb), zero2),        # dense bias
    ]

    out = pl.pallas_call(
        kern,
        out_shape=jax.ShapeDtypeStruct((b, th * n2, emb), jnp.float32),
        grid=(b, n2),
        in_specs=in_specs,
        out_specs=pl.BlockSpec((1, th, emb), lambda bi, ji: (bi, ji, 0)),
        compiler_params=pltpu.CompilerParams(
            dimension_semantics=("parallel", "parallel"),
            vmem_limit_bytes=32 * 1024 * 1024),
        cost_estimate=pl.CostEstimate(flops=flops,
                                      transcendentals=transcendentals,
                                      bytes_accessed=bytes_accessed),
    )(xr, xr, w1r, w2r,
      params["b1"].reshape(1, c), g1.reshape(1, c), t1.reshape(1, c),
      params["b2"].reshape(1, c), g2.reshape(1, c), t2.reshape(1, c),
      wd3, params["bd"].reshape(1, emb))

    return out[:, :l2, :]


# ---------------------------------------------------------------------------
# Pure-JAX reference (for correctness check)
# ---------------------------------------------------------------------------
def _reference_forward(inputs, params, *, layer_norm=True):
    dn = ("NHWC", "HWIO", "NHWC")
    prec = lax.Precision.HIGHEST

    def ln(x, g, b):
        mu = jnp.mean(x, -1, keepdims=True)
        var = jnp.mean((x - mu) ** 2, -1, keepdims=True)
        return (x - mu) * lax.rsqrt(var + 1e-6) * g + b

    y = lax.conv_general_dilated(inputs, params["w1"], (2, 2),
                                 [(1, 1), (1, 1)], dimension_numbers=dn,
                                 precision=prec) + params["b1"]
    if layer_norm:
        y = ln(y, params["ln1_g"], params["ln1_b"])
    y = jnp.maximum(y, 0.0)
    y = lax.conv_general_dilated(y, params["w2"], (2, 2),
                                 [(1, 1), (1, 1)], dimension_numbers=dn,
                                 precision=prec) + params["b2"]
    if layer_norm:
        y = ln(y, params["ln2_g"], params["ln2_b"])
    y = jnp.maximum(y, 0.0)
    bb, l2, f2, c = y.shape
    return jnp.dot(y.reshape(bb, l2, f2 * c), params["wd"],
                   precision=prec) + params["bd"]


# ---------------------------------------------------------------------------
# Main
# ---------------------------------------------------------------------------
if __name__ == "__main__":
    def make_params(key, f, c, emb):
        f1 = -(-f // 2)
        f2 = -(-f1 // 2)
        ks = jax.random.split(key, 10)
        return {
            # conv weights stored in HWIO layout (kh, kw, cin, cout)
            "w1": 0.1 * jax.random.normal(ks[0], (3, 3, 1, c), jnp.float32),
            "b1": 0.1 * jax.random.normal(ks[1], (c,), jnp.float32),
            "w2": 0.1 * jax.random.normal(ks[2], (3, 3, c, c), jnp.float32),
            "b2": 0.1 * jax.random.normal(ks[3], (c,), jnp.float32),
            "ln1_g": 1.0 + 0.05 * jax.random.normal(ks[4], (c,), jnp.float32),
            "ln1_b": 0.05 * jax.random.normal(ks[5], (c,), jnp.float32),
            "ln2_g": 1.0 + 0.05 * jax.random.normal(ks[6], (c,), jnp.float32),
            "ln2_b": 0.05 * jax.random.normal(ks[7], (c,), jnp.float32),
            "wd": 0.1 * jax.random.normal(ks[8], (f2 * c, emb), jnp.float32),
            "bd": 0.1 * jax.random.normal(ks[9], (emb,), jnp.float32),
        }

    root = jax.random.PRNGKey(0)
    configs = [
        dict(b=2, l=12, f=16, c=8, emb=32),   # even time / freq sizes
        dict(b=1, l=9, f=14, c=8, emb=16),    # odd L / odd F1 (masking paths)
    ]
    for idx, cfg in enumerate(configs):
        kp, kx = jax.random.split(jax.random.fold_in(root, idx))
        params = make_params(kp, cfg["f"], cfg["c"], cfg["emb"])
        x = jax.random.normal(kx, (cfg["b"], cfg["l"], cfg["f"], 1),
                              jnp.float32)

        out = audio_conv_subsampling_forward(x, params, layer_norm=True)
        out = jax.block_until_ready(out)
        ref = jax.block_until_ready(_reference_forward(x, params,
                                                       layer_norm=True))
        assert out.shape == ref.shape, (out.shape, ref.shape)
        err = float(jnp.max(jnp.abs(out - ref)))
        assert err < 2e-3, f"config {idx}: max abs err {err}"

    print("KERNEL_OK")
</pallas_src>

<mosaic_0001>
module attributes {stable_mosaic.version = 11 : i64} {
  func.func @kernel(%arg0: i32, %arg1: i32, %arg2: memref<1x8x16x5xf32, #tpu.memory_space<vmem>>, %arg3: memref<1x8x8x5xf32, #tpu.memory_space<vmem>>, %arg4: memref<9x8xf32, #tpu.memory_space<vmem>>, %arg5: memref<3x24x8xf32, #tpu.memory_space<vmem>>, %arg6: memref<1x8xf32, #tpu.memory_space<vmem>>, %arg7: memref<1x8xf32, #tpu.memory_space<vmem>>, %arg8: memref<1x8xf32, #tpu.memory_space<vmem>>, %arg9: memref<1x8xf32, #tpu.memory_space<vmem>>, %arg10: memref<1x8xf32, #tpu.memory_space<vmem>>, %arg11: memref<1x8xf32, #tpu.memory_space<vmem>>, %arg12: memref<4x8x32xf32, #tpu.memory_space<vmem>>, %arg13: memref<1x32xf32, #tpu.memory_space<vmem>>, %arg14: memref<1x8x32xf32, #tpu.memory_space<vmem>>) attributes {dimension_semantics = [#tpu.dimension_semantics<parallel>, #tpu.dimension_semantics<parallel>], iteration_bounds = array<i64: 2, 1>, scalar_prefetch = 0 : i64, scratch_operands = 0 : i64, tpu.core_type = #tpu.core_type<tc>, window_params = [{transform_indices = @transform_0, window_bounds = array<i64: 1, 8, 16, 5>}, {transform_indices = @transform_1, window_bounds = array<i64: 1, 8, 8, 5>}, {pipeline_mode = #tpu.pipeline_mode<synchronous>, transform_indices = @transform_2, window_bounds = array<i64: 9, 8>}, {pipeline_mode = #tpu.pipeline_mode<synchronous>, transform_indices = @transform_3, window_bounds = array<i64: 3, 24, 8>}, {pipeline_mode = #tpu.pipeline_mode<synchronous>, transform_indices = @transform_4, window_bounds = array<i64: 1, 8>}, {pipeline_mode = #tpu.pipeline_mode<synchronous>, transform_indices = @transform_5, window_bounds = array<i64: 1, 8>}, {pipeline_mode = #tpu.pipeline_mode<synchronous>, transform_indices = @transform_6, window_bounds = array<i64: 1, 8>}, {pipeline_mode = #tpu.pipeline_mode<synchronous>, transform_indices = @transform_7, window_bounds = array<i64: 1, 8>}, {pipeline_mode = #tpu.pipeline_mode<synchronous>, transform_indices = @transform_8, window_bounds = array<i64: 1, 8>}, {pipeline_mode = #tpu.pipeline_mode<synchronous>, transform_indices = @transform_9, window_bounds = array<i64: 1, 8>}, {pipeline_mode = #tpu.pipeline_mode<synchronous>, transform_indices = @transform_10, window_bounds = array<i64: 4, 8, 32>}, {pipeline_mode = #tpu.pipeline_mode<synchronous>, transform_indices = @transform_11, window_bounds = array<i64: 1, 32>}, {transform_indices = @transform_12, window_bounds = array<i64: 1, 8, 32>}]} {
    %c0 = arith.constant 0 : index
    %c0_0 = arith.constant 0 : index
    %c0_1 = arith.constant 0 : index
    %c0_2 = arith.constant 0 : index
    %0 = vector.load %arg2[%c0, %c0_0, %c0_1, %c0_2] : memref<1x8x16x5xf32, #tpu.memory_space<vmem>>, vector<1x1x16x5xf32>
    %1 = vector.shape_cast %0 : vector<1x1x16x5xf32> to vector<16x5xf32>
    %c0_3 = arith.constant 0 : index
    %c0_4 = arith.constant 0 : index
    %c0_5 = arith.constant 0 : index
    %c0_6 = arith.constant 0 : index
    %2 = vector.load %arg3[%c0_3, %c0_4, %c0_5, %c0_6] : memref<1x8x8x5xf32, #tpu.memory_space<vmem>>, vector<1x1x2x5xf32>
    %3 = vector.shape_cast %2 : vector<1x1x2x5xf32> to vector<2x5xf32>
    %4 = tpu.concatenate %1, %3 in 0 : vector<16x5xf32>, vector<2x5xf32> -> vector<18x5xf32>
    %c0_7 = arith.constant 0 : index
    %c1 = arith.constant 1 : index
    %c0_8 = arith.constant 0 : index
    %c0_9 = arith.constant 0 : index
    %5 = vector.load %arg2[%c0_7, %c1, %c0_8, %c0_9] : memref<1x8x16x5xf32, #tpu.memory_space<vmem>>, vector<1x1x16x5xf32>
    %6 = vector.shape_cast %5 : vector<1x1x16x5xf32> to vector<16x5xf32>
    %c0_10 = arith.constant 0 : index
    %c1_11 = arith.constant 1 : index
    %c0_12 = arith.constant 0 : index
    %c0_13 = arith.constant 0 : index
    %7 = vector.load %arg3[%c0_10, %c1_11, %c0_12, %c0_13] : memref<1x8x8x5xf32, #tpu.memory_space<vmem>>, vector<1x1x2x5xf32>
    %8 = vector.shape_cast %7 : vector<1x1x2x5xf32> to vector<2x5xf32>
    %9 = tpu.concatenate %6, %8 in 0 : vector<16x5xf32>, vector<2x5xf32> -> vector<18x5xf32>
    %c0_14 = arith.constant 0 : index
    %c2 = arith.constant 2 : index
    %c0_15 = arith.constant 0 : index
    %c0_16 = arith.constant 0 : index
    %10 = vector.load %arg2[%c0_14, %c2, %c0_15, %c0_16] : memref<1x8x16x5xf32, #tpu.memory_space<vmem>>, vector<1x1x16x5xf32>
    %11 = vector.shape_cast %10 : vector<1x1x16x5xf32> to vector<16x5xf32>
    %c0_17 = arith.constant 0 : index
    %c2_18 = arith.constant 2 : index
    %c0_19 = arith.constant 0 : index
    %c0_20 = arith.constant 0 : index
    %12 = vector.load %arg3[%c0_17, %c2_18, %c0_19, %c0_20] : memref<1x8x8x5xf32, #tpu.memory_space<vmem>>, vector<1x1x2x5xf32>
    %13 = vector.shape_cast %12 : vector<1x1x2x5xf32> to vector<2x5xf32>
    %14 = tpu.concatenate %11, %13 in 0 : vector<16x5xf32>, vector<2x5xf32> -> vector<18x5xf32>
    %c0_21 = arith.constant 0 : index
    %c3 = arith.constant 3 : index
    %c0_22 = arith.constant 0 : index
    %c0_23 = arith.constant 0 : index
    %15 = vector.load %arg2[%c0_21, %c3, %c0_22, %c0_23] : memref<1x8x16x5xf32, #tpu.memory_space<vmem>>, vector<1x1x16x5xf32>
    %16 = vector.shape_cast %15 : vector<1x1x16x5xf32> to vector<16x5xf32>
    %c0_24 = arith.constant 0 : index
    %c3_25 = arith.constant 3 : index
    %c0_26 = arith.constant 0 : index
    %c0_27 = arith.constant 0 : index
    %17 = vector.load %arg3[%c0_24, %c3_25, %c0_26, %c0_27] : memref<1x8x8x5xf32, #tpu.memory_space<vmem>>, vector<1x1x2x5xf32>
    %18 = vector.shape_cast %17 : vector<1x1x2x5xf32> to vector<2x5xf32>
    %19 = tpu.concatenate %16, %18 in 0 : vector<16x5xf32>, vector<2x5xf32> -> vector<18x5xf32>
    %c0_28 = arith.constant 0 : index
    %c4 = arith.constant 4 : index
    %c0_29 = arith.constant 0 : index
    %c0_30 = arith.constant 0 : index
    %20 = vector.load %arg2[%c0_28, %c4, %c0_29, %c0_30] : memref<1x8x16x5xf32, #tpu.memory_space<vmem>>, vector<1x1x16x5xf32>
    %21 = vector.shape_cast %20 : vector<1x1x16x5xf32> to vector<16x5xf32>
    %c0_31 = arith.constant 0 : index
    %c4_32 = arith.constant 4 : index
    %c0_33 = arith.constant 0 : index
    %c0_34 = arith.constant 0 : index
    %22 = vector.load %arg3[%c0_31, %c4_32, %c0_33, %c0_34] : memref<1x8x8x5xf32, #tpu.memory_space<vmem>>, vector<1x1x2x5xf32>
    %23 = vector.shape_cast %22 : vector<1x1x2x5xf32> to vector<2x5xf32>
    %24 = tpu.concatenate %21, %23 in 0 : vector<16x5xf32>, vector<2x5xf32> -> vector<18x5xf32>
    %c0_35 = arith.constant 0 : index
    %c5 = arith.constant 5 : index
    %c0_36 = arith.constant 0 : index
    %c0_37 = arith.constant 0 : index
    %25 = vector.load %arg2[%c0_35, %c5, %c0_36, %c0_37] : memref<1x8x16x5xf32, #tpu.memory_space<vmem>>, vector<1x1x16x5xf32>
    %26 = vector.shape_cast %25 : vector<1x1x16x5xf32> to vector<16x5xf32>
    %c0_38 = arith.constant 0 : index
    %c5_39 = arith.constant 5 : index
    %c0_40 = arith.constant 0 : index
    %c0_41 = arith.constant 0 : index
    %27 = vector.load %arg3[%c0_38, %c5_39, %c0_40, %c0_41] : memref<1x8x8x5xf32, #tpu.memory_space<vmem>>, vector<1x1x2x5xf32>
    %28 = vector.shape_cast %27 : vector<1x1x2x5xf32> to vector<2x5xf32>
    %29 = tpu.concatenate %26, %28 in 0 : vector<16x5xf32>, vector<2x5xf32> -> vector<18x5xf32>
    %c0_42 = arith.constant 0 : index
    %c6 = arith.constant 6 : index
    %c0_43 = arith.constant 0 : index
    %c0_44 = arith.constant 0 : index
    %30 = vector.load %arg2[%c0_42, %c6, %c0_43, %c0_44] : memref<1x8x16x5xf32, #tpu.memory_space<vmem>>, vector<1x1x16x5xf32>
    %31 = vector.shape_cast %30 : vector<1x1x16x5xf32> to vector<16x5xf32>
    %c0_45 = arith.constant 0 : index
    %c6_46 = arith.constant 6 : index
    %c0_47 = arith.constant 0 : index
    %c0_48 = arith.constant 0 : index
    %32 = vector.load %arg3[%c0_45, %c6_46, %c0_47, %c0_48] : memref<1x8x8x5xf32, #tpu.memory_space<vmem>>, vector<1x1x2x5xf32>
    %33 = vector.shape_cast %32 : vector<1x1x2x5xf32> to vector<2x5xf32>
    %34 = tpu.concatenate %31, %33 in 0 : vector<16x5xf32>, vector<2x5xf32> -> vector<18x5xf32>
    %c0_49 = arith.constant 0 : index
    %c7 = arith.constant 7 : index
    %c0_50 = arith.constant 0 : index
    %c0_51 = arith.constant 0 : index
    %35 = vector.load %arg2[%c0_49, %c7, %c0_50, %c0_51] : memref<1x8x16x5xf32, #tpu.memory_space<vmem>>, vector<1x1x16x5xf32>
    %36 = vector.shape_cast %35 : vector<1x1x16x5xf32> to vector<16x5xf32>
    %c0_52 = arith.constant 0 : index
    %c7_53 = arith.constant 7 : index
    %c0_54 = arith.constant 0 : index
    %c0_55 = arith.constant 0 : index
    %37 = vector.load %arg3[%c0_52, %c7_53, %c0_54, %c0_55] : memref<1x8x8x5xf32, #tpu.memory_space<vmem>>, vector<1x1x2x5xf32>
    %38 = vector.shape_cast %37 : vector<1x1x2x5xf32> to vector<2x5xf32>
    %39 = tpu.concatenate %36, %38 in 0 : vector<16x5xf32>, vector<2x5xf32> -> vector<18x5xf32>
    %c0_56 = arith.constant 0 : index
    %c0_57 = arith.constant 0 : index
    %40 = vector.load %arg4[%c0_56, %c0_57] : memref<9x8xf32, #tpu.memory_space<vmem>>, vector<1x8xf32>
    %41 = vector.shape_cast %40 : vector<1x8xf32> to vector<1x1x8xf32>
    %c1_58 = arith.constant 1 : index
    %c0_59 = arith.constant 0 : index
    %42 = vector.load %arg4[%c1_58, %c0_59] : memref<9x8xf32, #tpu.memory_space<vmem>>, vector<1x8xf32>
    %43 = vector.shape_cast %42 : vector<1x8xf32> to vector<1x1x8xf32>
    %c2_60 = arith.constant 2 : index
    %c0_61 = arith.constant 0 : index
    %44 = vector.load %arg4[%c2_60, %c0_61] : memref<9x8xf32, #tpu.memory_space<vmem>>, vector<1x8xf32>
    %45 = vector.shape_cast %44 : vector<1x8xf32> to vector<1x1x8xf32>
    %c3_62 = arith.constant 3 : index
    %c0_63 = arith.constant 0 : index
    %46 = vector.load %arg4[%c3_62, %c0_63] : memref<9x8xf32, #tpu.memory_space<vmem>>, vector<1x8xf32>
    %47 = vector.shape_cast %46 : vector<1x8xf32> to vector<1x1x8xf32>
    %c4_64 = arith.constant 4 : index
    %c0_65 = arith.constant 0 : index
    %48 = vector.load %arg4[%c4_64, %c0_65] : memref<9x8xf32, #tpu.memory_space<vmem>>, vector<1x8xf32>
    %49 = vector.shape_cast %48 : vector<1x8xf32> to vector<1x1x8xf32>
    %c5_66 = arith.constant 5 : index
    %c0_67 = arith.constant 0 : index
    %50 = vector.load %arg4[%c5_66, %c0_67] : memref<9x8xf32, #tpu.memory_space<vmem>>, vector<1x8xf32>
    %51 = vector.shape_cast %50 : vector<1x8xf32> to vector<1x1x8xf32>
    %c6_68 = arith.constant 6 : index
    %c0_69 = arith.constant 0 : index
    %52 = vector.load %arg4[%c6_68, %c0_69] : memref<9x8xf32, #tpu.memory_space<vmem>>, vector<1x8xf32>
    %53 = vector.shape_cast %52 : vector<1x8xf32> to vector<1x1x8xf32>
    %c7_70 = arith.constant 7 : index
    %c0_71 = arith.constant 0 : index
    %54 = vector.load %arg4[%c7_70, %c0_71] : memref<9x8xf32, #tpu.memory_space<vmem>>, vector<1x8xf32>
    %55 = vector.shape_cast %54 : vector<1x8xf32> to vector<1x1x8xf32>
    %c8 = arith.constant 8 : index
    %c0_72 = arith.constant 0 : index
    %56 = vector.load %arg4[%c8, %c0_72] : memref<9x8xf32, #tpu.memory_space<vmem>>, vector<1x8xf32>
    %57 = vector.shape_cast %56 : vector<1x8xf32> to vector<1x1x8xf32>
    %cst = arith.constant 0.000000e+00 : f32
    %58 = vector.broadcast %cst : f32 to vector<17x5x8xf32>
    %cst_73 = arith.constant 0.000000e+00 : f32
    %59 = vector.broadcast %cst_73 : f32 to vector<17x4x8xf32>
    %60 = vector.extract_strided_slice %4 {offsets = [0, 0], sizes = [17, 5], strides = [1, 1]} : vector<18x5xf32> to vector<17x5xf32>
    %61 = vector.extract_strided_slice %9 {offsets = [0, 0], sizes = [17, 5], strides = [1, 1]} : vector<18x5xf32> to vector<17x5xf32>
    %62 = vector.extract_strided_slice %14 {offsets = [0, 0], sizes = [17, 5], strides = [1, 1]} : vector<18x5xf32> to vector<17x5xf32>
    %63 = vector.extract_strided_slice %19 {offsets = [0, 0], sizes = [17, 5], strides = [1, 1]} : vector<18x5xf32> to vector<17x5xf32>
    %64 = vector.shape_cast %60 : vector<17x5xf32> to vector<17x5x1xf32>
    %65 = vector.broadcast %64 : vector<17x5x1xf32> to vector<17x5x8xf32>
    %66 = vector.broadcast %41 : vector<1x1x8xf32> to vector<17x5x8xf32>
    %67 = arith.mulf %65, %66 : vector<17x5x8xf32>
    %68 = arith.addf %58, %67 : vector<17x5x8xf32>
    %69 = vector.shape_cast %61 : vector<17x5xf32> to vector<17x5x1xf32>
    %70 = vector.broadcast %69 : vector<17x5x1xf32> to vector<17x5x8xf32>
    %71 = vector.broadcast %43 : vector<1x1x8xf32> to vector<17x5x8xf32>
    %72 = arith.mulf %70, %71 : vector<17x5x8xf32>
    %73 = arith.addf %68, %72 : vector<17x5x8xf32>
    %74 = vector.shape_cast %62 : vector<17x5xf32> to vector<17x5x1xf32>
    %75 = vector.broadcast %74 : vector<17x5x1xf32> to vector<17x5x8xf32>
    %76 = vector.broadcast %45 : vector<1x1x8xf32> to vector<17x5x8xf32>
    %77 = arith.mulf %75, %76 : vector<17x5x8xf32>
    %78 = arith.addf %73, %77 : vector<17x5x8xf32>
    %79 = vector.extract_strided_slice %62 {offsets = [0, 0], sizes = [17, 4], strides = [1, 1]} : vector<17x5xf32> to vector<17x4xf32>
    %80 = vector.shape_cast %79 : vector<17x4xf32> to vector<17x4x1xf32>
    %81 = vector.broadcast %80 : vector<17x4x1xf32> to vector<17x4x8xf32>
    %82 = vector.broadcast %41 : vector<1x1x8xf32> to vector<17x4x8xf32>
    %83 = arith.mulf %81, %82 : vector<17x4x8xf32>
    %84 = arith.addf %59, %83 : vector<17x4x8xf32>
    %85 = vector.extract_strided_slice %63 {offsets = [0, 0], sizes = [17, 4], strides = [1, 1]} : vector<17x5xf32> to vector<17x4xf32>
    %86 = vector.shape_cast %85 : vector<17x4xf32> to vector<17x4x1xf32>
    %87 = vector.broadcast %86 : vector<17x4x1xf32> to vector<17x4x8xf32>
    %88 = vector.broadcast %43 : vector<1x1x8xf32> to vector<17x4x8xf32>
    %89 = arith.mulf %87, %88 : vector<17x4x8xf32>
    %90 = arith.addf %84, %89 : vector<17x4x8xf32>
    %91 = vector.extract_strided_slice %60 {offsets = [0, 1], sizes = [17, 4], strides = [1, 1]} : vector<17x5xf32> to vector<17x4xf32>
    %92 = vector.shape_cast %91 : vector<17x4xf32> to vector<17x4x1xf32>
    %93 = vector.broadcast %92 : vector<17x4x1xf32> to vector<17x4x8xf32>
    %94 = vector.broadcast %45 : vector<1x1x8xf32> to vector<17x4x8xf32>
    %95 = arith.mulf %93, %94 : vector<17x4x8xf32>
    %96 = arith.addf %90, %95 : vector<17x4x8xf32>
    %97 = vector.extract_strided_slice %24 {offsets = [0, 0], sizes = [17, 5], strides = [1, 1]} : vector<18x5xf32> to vector<17x5xf32>
    %98 = vector.extract_strided_slice %29 {offsets = [0, 0], sizes = [17, 5], strides = [1, 1]} : vector<18x5xf32> to vector<17x5xf32>
    %99 = vector.extract_strided_slice %34 {offsets = [0, 0], sizes = [17, 5], strides = [1, 1]} : vector<18x5xf32> to vector<17x5xf32>
    %100 = vector.extract_strided_slice %39 {offsets = [0, 0], sizes = [17, 5], strides = [1, 1]} : vector<18x5xf32> to vector<17x5xf32>
    %101 = vector.shape_cast %97 : vector<17x5xf32> to vector<17x5x1xf32>
    %102 = vector.broadcast %101 : vector<17x5x1xf32> to vector<17x5x8xf32>
    %103 = vector.broadcast %47 : vector<1x1x8xf32> to vector<17x5x8xf32>
    %104 = arith.mulf %102, %103 : vector<17x5x8xf32>
    %105 = arith.addf %78, %104 : vector<17x5x8xf32>
    %106 = vector.shape_cast %98 : vector<17x5xf32> to vector<17x5x1xf32>
    %107 = vector.broadcast %106 : vector<17x5x1xf32> to vector<17x5x8xf32>
    %108 = vector.broadcast %49 : vector<1x1x8xf32> to vector<17x5x8xf32>
    %109 = arith.mulf %107, %108 : vector<17x5x8xf32>
    %110 = arith.addf %105, %109 : vector<17x5x8xf32>
    %111 = vector.shape_cast %99 : vector<17x5xf32> to vector<17x5x1xf32>
    %112 = vector.broadcast %111 : vector<17x5x1xf32> to vector<17x5x8xf32>
    %113 = vector.broadcast %51 : vector<1x1x8xf32> to vector<17x5x8xf32>
    %114 = arith.mulf %112, %113 : vector<17x5x8xf32>
    %115 = arith.addf %110, %114 : vector<17x5x8xf32>
    %116 = vector.extract_strided_slice %99 {offsets = [0, 0], sizes = [17, 4], strides = [1, 1]} : vector<17x5xf32> to vector<17x4xf32>
    %117 = vector.shape_cast %116 : vector<17x4xf32> to vector<17x4x1xf32>
    %118 = vector.broadcast %117 : vector<17x4x1xf32> to vector<17x4x8xf32>
    %119 = vector.broadcast %47 : vector<1x1x8xf32> to vector<17x4x8xf32>
    %120 = arith.mulf %118, %119 : vector<17x4x8xf32>
    %121 = arith.addf %96, %120 : vector<17x4x8xf32>
    %122 = vector.extract_strided_slice %100 {offsets = [0, 0], sizes = [17, 4], strides = [1, 1]} : vector<17x5xf32> to vector<17x4xf32>
    %123 = vector.shape_cast %122 : vector<17x4xf32> to vector<17x4x1xf32>
    %124 = vector.broadcast %123 : vector<17x4x1xf32> to vector<17x4x8xf32>
    %125 = vector.broadcast %49 : vector<1x1x8xf32> to vector<17x4x8xf32>
    %126 = arith.mulf %124, %125 : vector<17x4x8xf32>
    %127 = arith.addf %121, %126 : vector<17x4x8xf32>
    %128 = vector.extract_strided_slice %97 {offsets = [0, 1], sizes = [17, 4], strides = [1, 1]} : vector<17x5xf32> to vector<17x4xf32>
    %129 = vector.shape_cast %128 : vector<17x4xf32> to vector<17x4x1xf32>
    %130 = vector.broadcast %129 : vector<17x4x1xf32> to vector<17x4x8xf32>
    %131 = vector.broadcast %51 : vector<1x1x8xf32> to vector<17x4x8xf32>
    %132 = arith.mulf %130, %131 : vector<17x4x8xf32>
    %133 = arith.addf %127, %132 : vector<17x4x8xf32>
    %134 = vector.extract_strided_slice %4 {offsets = [1, 0], sizes = [17, 5], strides = [1, 1]} : vector<18x5xf32> to vector<17x5xf32>
    %135 = vector.extract_strided_slice %9 {offsets = [1, 0], sizes = [17, 5], strides = [1, 1]} : vector<18x5xf32> to vector<17x5xf32>
    %136 = vector.extract_strided_slice %14 {offsets = [1, 0], sizes = [17, 5], strides = [1, 1]} : vector<18x5xf32> to vector<17x5xf32>
    %137 = vector.extract_strided_slice %19 {offsets = [1, 0], sizes = [17, 5], strides = [1, 1]} : vector<18x5xf32> to vector<17x5xf32>
    %138 = vector.shape_cast %134 : vector<17x5xf32> to vector<17x5x1xf32>
    %139 = vector.broadcast %138 : vector<17x5x1xf32> to vector<17x5x8xf32>
    %140 = vector.broadcast %53 : vector<1x1x8xf32> to vector<17x5x8xf32>
    %141 = arith.mulf %139, %140 : vector<17x5x8xf32>
    %142 = arith.addf %115, %141 : vector<17x5x8xf32>
    %143 = vector.shape_cast %135 : vector<17x5xf32> to vector<17x5x1xf32>
    %144 = vector.broadcast %143 : vector<17x5x1xf32> to vector<17x5x8xf32>
    %145 = vector.broadcast %55 : vector<1x1x8xf32> to vector<17x5x8xf32>
    %146 = arith.mulf %144, %145 : vector<17x5x8xf32>
    %147 = arith.addf %142, %146 : vector<17x5x8xf32>
    %148 = vector.shape_cast %136 : vector<17x5xf32> to vector<17x5x1xf32>
    %149 = vector.broadcast %148 : vector<17x5x1xf32> to vector<17x5x8xf32>
    %150 = vector.broadcast %57 : vector<1x1x8xf32> to vector<17x5x8xf32>
    %151 = arith.mulf %149, %150 : vector<17x5x8xf32>
    %152 = arith.addf %147, %151 : vector<17x5x8xf32>
    %153 = vector.extract_strided_slice %136 {offsets = [0, 0], sizes = [17, 4], strides = [1, 1]} : vector<17x5xf32> to vector<17x4xf32>
    %154 = vector.shape_cast %153 : vector<17x4xf32> to vector<17x4x1xf32>
    %155 = vector.broadcast %154 : vector<17x4x1xf32> to vector<17x4x8xf32>
    %156 = vector.broadcast %53 : vector<1x1x8xf32> to vector<17x4x8xf32>
    %157 = arith.mulf %155, %156 : vector<17x4x8xf32>
    %158 = arith.addf %133, %157 : vector<17x4x8xf32>
    %159 = vector.extract_strided_slice %137 {offsets = [0, 0], sizes = [17, 4], strides = [1, 1]} : vector<17x5xf32> to vector<17x4xf32>
    %160 = vector.shape_cast %159 : vector<17x4xf32> to vector<17x4x1xf32>
    %161 = vector.broadcast %160 : vector<17x4x1xf32> to vector<17x4x8xf32>
    %162 = vector.broadcast %55 : vector<1x1x8xf32> to vector<17x4x8xf32>
    %163 = arith.mulf %161, %162 : vector<17x4x8xf32>
    %164 = arith.addf %158, %163 : vector<17x4x8xf32>
    %165 = vector.extract_strided_slice %134 {offsets = [0, 1], sizes = [17, 4], strides = [1, 1]} : vector<17x5xf32> to vector<17x4xf32>
    %166 = vector.shape_cast %165 : vector<17x4xf32> to vector<17x4x1xf32>
    %167 = vector.broadcast %166 : vector<17x4x1xf32> to vector<17x4x8xf32>
    %168 = vector.broadcast %57 : vector<1x1x8xf32> to vector<17x4x8xf32>
    %169 = arith.mulf %167, %168 : vector<17x4x8xf32>
    %170 = arith.addf %164, %169 : vector<17x4x8xf32>
    %c0_74 = arith.constant 0 : index
    %c0_75 = arith.constant 0 : index
    %171 = vector.load %arg6[%c0_74, %c0_75] : memref<1x8xf32, #tpu.memory_space<vmem>>, vector<1x8xf32>
    %172 = vector.shape_cast %171 : vector<1x8xf32> to vector<1x1x8xf32>
    %173 = vector.broadcast %172 : vector<1x1x8xf32> to vector<17x5x8xf32>
    %174 = arith.addf %152, %173 : vector<17x5x8xf32>
    %c0_76 = arith.constant 0 : index
    %c0_77 = arith.constant 0 : index
    %175 = vector.load %arg7[%c0_76, %c0_77] : memref<1x8xf32, #tpu.memory_space<vmem>>, vector<1x8xf32>
    %176 = vector.shape_cast %175 : vector<1x8xf32> to vector<1x1x8xf32>
    %c0_78 = arith.constant 0 : index
    %c0_79 = arith.constant 0 : index
    %177 = vector.load %arg8[%c0_78, %c0_79] : memref<1x8xf32, #tpu.memory_space<vmem>>, vector<1x8xf32>
    %178 = vector.shape_cast %177 : vector<1x8xf32> to vector<1x1x8xf32>
    %cst_80 = arith.constant dense<0.000000e+00> : vector<17x5xf32>
    %179 = vector.multi_reduction <add>, %174, %cst_80 [2] : vector<17x5x8xf32> to vector<17x5xf32>
    %180 = vector.shape_cast %179 : vector<17x5xf32> to vector<17x5x1xf32>
    %cst_81 = arith.constant 8.000000e+00 : f32
    %181 = vector.broadcast %cst_81 : f32 to vector<17x5x1xf32>
    %182 = arith.divf %180, %181 : vector<17x5x1xf32>
    %183 = vector.broadcast %182 : vector<17x5x1xf32> to vector<17x5x8xf32>
    %184 = arith.subf %174, %183 : vector<17x5x8xf32>
    %185 = arith.mulf %184, %184 : vector<17x5x8xf32>
    %cst_82 = arith.constant dense<0.000000e+00> : vector<17x5xf32>
    %186 = vector.multi_reduction <add>, %185, %cst_82 [2] : vector<17x5x8xf32> to vector<17x5xf32>
    %187 = vector.shape_cast %186 : vector<17x5xf32> to vector<17x5x1xf32>
    %cst_83 = arith.constant 8.000000e+00 : f32
    %188 = vector.broadcast %cst_83 : f32 to vector<17x5x1xf32>
    %189 = arith.divf %187, %188 : vector<17x5x1xf32>
    %cst_84 = arith.constant 9.99999997E-7 : f32
    %190 = vector.broadcast %cst_84 : f32 to vector<17x5x1xf32>
    %191 = arith.addf %189, %190 : vector<17x5x1xf32>
    %192 = math.rsqrt %191 : vector<17x5x1xf32>
    %193 = vector.broadcast %192 : vector<17x5x1xf32> to vector<17x5x8xf32>
    %194 = arith.mulf %184, %193 : vector<17x5x8xf32>
    %195 = vector.broadcast %176 : vector<1x1x8xf32> to vector<17x5x8xf32>
    %196 = arith.mulf %194, %195 : vector<17x5x8xf32>
    %197 = vector.broadcast %178 : vector<1x1x8xf32> to vector<17x5x8xf32>
    %198 = arith.addf %196, %197 : vector<17x5x8xf32>
    %cst_85 = arith.constant 0.000000e+00 : f32
    %199 = vector.broadcast %cst_85 : f32 to vector<17x5x8xf32>
    %200 = arith.maximumf %198, %199 : vector<17x5x8xf32>
    %c0_86 = arith.constant 0 : index
    %c0_87 = arith.constant 0 : index
    %201 = vector.load %arg6[%c0_86, %c0_87] : memref<1x8xf32, #tpu.memory_space<vmem>>, vector<1x8xf32>
    %202 = vector.shape_cast %201 : vector<1x8xf32> to vector<1x1x8xf32>
    %203 = vector.broadcast %202 : vector<1x1x8xf32> to vector<17x4x8xf32>
    %204 = arith.addf %170, %203 : vector<17x4x8xf32>
    %c0_88 = arith.constant 0 : index
    %c0_89 = arith.constant 0 : index
    %205 = vector.load %arg7[%c0_88, %c0_89] : memref<1x8xf32, #tpu.memory_space<vmem>>, vector<1x8xf32>
    %206 = vector.shape_cast %205 : vector<1x8xf32> to vector<1x1x8xf32>
    %c0_90 = arith.constant 0 : index
    %c0_91 = arith.constant 0 : index
    %207 = vector.load %arg8[%c0_90, %c0_91] : memref<1x8xf32, #tpu.memory_space<vmem>>, vector<1x8xf32>
    %208 = vector.shape_cast %207 : vector<1x8xf32> to vector<1x1x8xf32>
    %cst_92 = arith.constant dense<0.000000e+00> : vector<17x4xf32>
    %209 = vector.multi_reduction <add>, %204, %cst_92 [2] : vector<17x4x8xf32> to vector<17x4xf32>
    %210 = vector.shape_cast %209 : vector<17x4xf32> to vector<17x4x1xf32>
    %cst_93 = arith.constant 8.000000e+00 : f32
    %211 = vector.broadcast %cst_93 : f32 to vector<17x4x1xf32>
    %212 = arith.divf %210, %211 : vector<17x4x1xf32>
    %213 = vector.broadcast %212 : vector<17x4x1xf32> to vector<17x4x8xf32>
    %214 = arith.subf %204, %213 : vector<17x4x8xf32>
    %215 = arith.mulf %214, %214 : vector<17x4x8xf32>
    %cst_94 = arith.constant dense<0.000000e+00> : vector<17x4xf32>
    %216 = vector.multi_reduction <add>, %215, %cst_94 [2] : vector<17x4x8xf32> to vector<17x4xf32>
    %217 = vector.shape_cast %216 : vector<17x4xf32> to vector<17x4x1xf32>
    %cst_95 = arith.constant 8.000000e+00 : f32
    %218 = vector.broadcast %cst_95 : f32 to vector<17x4x1xf32>
    %219 = arith.divf %217, %218 : vector<17x4x1xf32>
    %cst_96 = arith.constant 9.99999997E-7 : f32
    %220 = vector.broadcast %cst_96 : f32 to vector<17x4x1xf32>
    %221 = arith.addf %219, %220 : vector<17x4x1xf32>
    %222 = math.rsqrt %221 : vector<17x4x1xf32>
    %223 = vector.broadcast %222 : vector<17x4x1xf32> to vector<17x4x8xf32>
    %224 = arith.mulf %214, %223 : vector<17x4x8xf32>
    %225 = vector.broadcast %206 : vector<1x1x8xf32> to vector<17x4x8xf32>
    %226 = arith.mulf %224, %225 : vector<17x4x8xf32>
    %227 = vector.broadcast %208 : vector<1x1x8xf32> to vector<17x4x8xf32>
    %228 = arith.addf %226, %227 : vector<17x4x8xf32>
    %cst_97 = arith.constant 0.000000e+00 : f32
    %229 = vector.broadcast %cst_97 : f32 to vector<17x4x8xf32>
    %230 = arith.maximumf %228, %229 : vector<17x4x8xf32>
    %c16_i32 = arith.constant 16 : i32
    %231 = arith.muli %c16_i32, %arg1 : i32
    %c1_i32 = arith.constant 1 : i32
    %232 = arith.subi %231, %c1_i32 : i32
    %233 = tpu.iota {dimensions = array<i32: 0>} : vector<17x5x8xi32>
    %234 = vector.broadcast %232 : i32 to vector<17x5x8xi32>
    %235 = arith.addi %233, %234 : vector<17x5x8xi32>
    %236 = tpu.iota {dimensions = array<i32: 1>} : vector<17x5x8xi32>
    %c0_i32 = arith.constant 0 : i32
    %237 = vector.broadcast %c0_i32 : i32 to vector<17x5x8xi32>
    %238 = arith.cmpi sge, %235, %237 : vector<17x5x8xi32>
    %c6_i32 = arith.constant 6 : i32
    %239 = vector.broadcast %c6_i32 : i32 to vector<17x5x8xi32>
    %240 = arith.cmpi slt, %235, %239 : vector<17x5x8xi32>
    %241 = arith.andi %238, %240 : vector<17x5x8xi1>
    %c1_i32_98 = arith.constant 1 : i32
    %242 = vector.broadcast %c1_i32_98 : i32 to vector<17x5x8xi32>
    %243 = arith.cmpi sge, %236, %242 : vector<17x5x8xi32>
    %244 = arith.andi %241, %243 : vector<17x5x8xi1>
    %c4_i32 = arith.constant 4 : i32
    %245 = vector.broadcast %c4_i32 : i32 to vector<17x5x8xi32>
    %246 = arith.cmpi sle, %236, %245 : vector<17x5x8xi32>
    %247 = arith.andi %244, %246 : vector<17x5x8xi1>
    %cst_99 = arith.constant 0.000000e+00 : f32
    %248 = vector.broadcast %cst_99 : f32 to vector<17x5x8xf32>
    %249 = arith.select %247, %200, %248 : vector<17x5x8xi1>, vector<17x5x8xf32>
    %250 = tpu.iota {dimensions = array<i32: 0>} : vector<17x4x8xi32>
    %251 = vector.broadcast %232 : i32 to vector<17x4x8xi32>
    %252 = arith.addi %250, %251 : vector<17x4x8xi32>
    %253 = tpu.iota {dimensions = array<i32: 1>} : vector<17x4x8xi32>
    %c0_i32_100 = arith.constant 0 : i32
    %254 = vector.broadcast %c0_i32_100 : i32 to vector<17x4x8xi32>
    %255 = arith.cmpi sge, %252, %254 : vector<17x4x8xi32>
    %c6_i32_101 = arith.constant 6 : i32
    %256 = vector.broadcast %c6_i32_101 : i32 to vector<17x4x8xi32>
    %257 = arith.cmpi slt, %252, %256 : vector<17x4x8xi32>
    %258 = arith.andi %255, %257 : vector<17x4x8xi1>
    %c3_i32 = arith.constant 3 : i32
    %259 = vector.broadcast %c3_i32 : i32 to vector<17x4x8xi32>
    %260 = arith.cmpi sle, %253, %259 : vector<17x4x8xi32>
    %261 = arith.andi %258, %260 : vector<17x4x8xi1>
    %cst_102 = arith.constant 0.000000e+00 : f32
    %262 = vector.broadcast %cst_102 : f32 to vector<17x4x8xf32>
    %263 = arith.select %261, %230, %262 : vector<17x4x8xi1>, vector<17x4x8xf32>
    %c0_103 = arith.constant 0 : index
    %c0_104 = arith.constant 0 : index
    %c0_105 = arith.constant 0 : index
    %264 = vector.load %arg5[%c0_103, %c0_104, %c0_105] : memref<3x24x8xf32, #tpu.memory_space<vmem>>, vector<1x24x8xf32>
    %265 = vector.shape_cast %264 : vector<1x24x8xf32> to vector<24x8xf32>
    %c1_106 = arith.constant 1 : index
    %c0_107 = arith.constant 0 : index
    %c0_108 = arith.constant 0 : index
    %266 = vector.load %arg5[%c1_106, %c0_107, %c0_108] : memref<3x24x8xf32, #tpu.memory_space<vmem>>, vector<1x24x8xf32>
    %267 = vector.shape_cast %266 : vector<1x24x8xf32> to vector<24x8xf32>
    %c2_109 = arith.constant 2 : index
    %c0_110 = arith.constant 0 : index
    %c0_111 = arith.constant 0 : index
    %268 = vector.load %arg5[%c2_109, %c0_110, %c0_111] : memref<3x24x8xf32, #tpu.memory_space<vmem>>, vector<1x24x8xf32>
    %269 = vector.shape_cast %268 : vector<1x24x8xf32> to vector<24x8xf32>
    %270 = vector.extract_strided_slice %249 {offsets = [0, 0, 0], sizes = [1, 5, 8], strides = [1, 1, 1]} : vector<17x5x8xf32> to vector<1x5x8xf32>
    %271 = vector.shape_cast %270 : vector<1x5x8xf32> to vector<5x8xf32>
    %272 = vector.extract_strided_slice %263 {offsets = [0, 0, 0], sizes = [1, 4, 8], strides = [1, 1, 1]} : vector<17x4x8xf32> to vector<1x4x8xf32>
    %273 = vector.shape_cast %272 : vector<1x4x8xf32> to vector<4x8xf32>
    %274 = vector.extract_strided_slice %271 {offsets = [0, 0], sizes = [4, 8], strides = [1, 1]} : vector<5x8xf32> to vector<4x8xf32>
    %275 = vector.extract_strided_slice %271 {offsets = [1, 0], sizes = [4, 8], strides = [1, 1]} : vector<5x8xf32> to vector<4x8xf32>
    %276 = tpu.concatenate %274, %273, %275 in 1 : vector<4x8xf32>, vector<4x8xf32>, vector<4x8xf32> -> vector<4x24xf32>
    %cst_112 = arith.constant dense<0.000000e+00> : vector<4x8xf32>
    %277 = tpu.matmul %276, %265, %cst_112 {dimension_numbers = #tpu.dot_dimension_numbers<[1], [0], [0], [1], [0, 0, 1, 1], [], []>, precision = #tpu.contract_precision<fp32>} : vector<4x24xf32>, vector<24x8xf32>, vector<4x8xf32> -> vector<4x8xf32>
    %278 = vector.extract_strided_slice %249 {offsets = [1, 0, 0], sizes = [1, 5, 8], strides = [1, 1, 1]} : vector<17x5x8xf32> to vector<1x5x8xf32>
    %279 = vector.shape_cast %278 : vector<1x5x8xf32> to vector<5x8xf32>
    %280 = vector.extract_strided_slice %263 {offsets = [1, 0, 0], sizes = [1, 4, 8], strides = [1, 1, 1]} : vector<17x4x8xf32> to vector<1x4x8xf32>
    %281 = vector.shape_cast %280 : vector<1x4x8xf32> to vector<4x8xf32>
    %282 = vector.extract_strided_slice %279 {offsets = [0, 0], sizes = [4, 8], strides = [1, 1]} : vector<5x8xf32> to vector<4x8xf32>
    %283 = vector.extract_strided_slice %279 {offsets = [1, 0], sizes = [4, 8], strides = [1, 1]} : vector<5x8xf32> to vector<4x8xf32>
    %284 = tpu.concatenate %282, %281, %283 in 1 : vector<4x8xf32>, vector<4x8xf32>, vector<4x8xf32> -> vector<4x24xf32>
    %cst_113 = arith.constant dense<0.000000e+00> : vector<4x8xf32>
    %285 = tpu.matmul %284, %267, %cst_113 {dimension_numbers = #tpu.dot_dimension_numbers<[1], [0], [0], [1], [0, 0, 1, 1], [], []>, precision = #tpu.contract_precision<fp32>} : vector<4x24xf32>, vector<24x8xf32>, vector<4x8xf32> -> vector<4x8xf32>
    %286 = arith.addf %277, %285 : vector<4x8xf32>
    %287 = vector.extract_strided_slice %249 {offsets = [2, 0, 0], sizes = [1, 5, 8], strides = [1, 1, 1]} : vector<17x5x8xf32> to vector<1x5x8xf32>
    %288 = vector.shape_cast %287 : vector<1x5x8xf32> to vector<5x8xf32>
    %289 = vector.extract_strided_slice %263 {offsets = [2, 0, 0], sizes = [1, 4, 8], strides = [1, 1, 1]} : vector<17x4x8xf32> to vector<1x4x8xf32>
    %290 = vector.shape_cast %289 : vector<1x4x8xf32> to vector<4x8xf32>
    %291 = vector.extract_strided_slice %288 {offsets = [0, 0], sizes = [4, 8], strides = [1, 1]} : vector<5x8xf32> to vector<4x8xf32>
    %292 = vector.extract_strided_slice %288 {offsets = [1, 0], sizes = [4, 8], strides = [1, 1]} : vector<5x8xf32> to vector<4x8xf32>
    %293 = tpu.concatenate %291, %290, %292 in 1 : vector<4x8xf32>, vector<4x8xf32>, vector<4x8xf32> -> vector<4x24xf32>
    %cst_114 = arith.constant dense<0.000000e+00> : vector<4x8xf32>
    %294 = tpu.matmul %293, %269, %cst_114 {dimension_numbers = #tpu.dot_dimension_numbers<[1], [0], [0], [1], [0, 0, 1, 1], [], []>, precision = #tpu.contract_precision<fp32>} : vector<4x24xf32>, vector<24x8xf32>, vector<4x8xf32> -> vector<4x8xf32>
    %295 = arith.addf %286, %294 : vector<4x8xf32>
    %c0_115 = arith.constant 0 : index
    %c0_116 = arith.constant 0 : index
    %296 = vector.load %arg9[%c0_115, %c0_116] : memref<1x8xf32, #tpu.memory_space<vmem>>, vector<1x8xf32>
    %297 = vector.broadcast %296 : vector<1x8xf32> to vector<4x8xf32>
    %298 = arith.addf %295, %297 : vector<4x8xf32>
    %c0_117 = arith.constant 0 : index
    %c0_118 = arith.constant 0 : index
    %299 = vector.load %arg10[%c0_117, %c0_118] : memref<1x8xf32, #tpu.memory_space<vmem>>, vector<1x8xf32>
    %c0_119 = arith.constant 0 : index
    %c0_120 = arith.constant 0 : index
    %300 = vector.load %arg11[%c0_119, %c0_120] : memref<1x8xf32, #tpu.memory_space<vmem>>, vector<1x8xf32>
    %cst_121 = arith.constant dense<0.000000e+00> : vector<4xf32>
    %301 = vector.multi_reduction <add>, %298, %cst_121 [1] : vector<4x8xf32> to vector<4xf32>
    %302 = vector.shape_cast %301 : vector<4xf32> to vector<4x1xf32>
    %cst_122 = arith.constant 8.000000e+00 : f32
    %303 = vector.broadcast %cst_122 : f32 to vector<4x1xf32>
    %304 = arith.divf %302, %303 : vector<4x1xf32>
    %305 = vector.broadcast %304 : vector<4x1xf32> to vector<4x8xf32>
    %306 = arith.subf %298, %305 : vector<4x8xf32>
    %307 = arith.mulf %306, %306 : vector<4x8xf32>
    %cst_123 = arith.constant dense<0.000000e+00> : vector<4xf32>
    %308 = vector.multi_reduction <add>, %307, %cst_123 [1] : vector<4x8xf32> to vector<4xf32>
    %309 = vector.shape_cast %308 : vector<4xf32> to vector<4x1xf32>
    %cst_124 = arith.constant 8.000000e+00 : f32
    %310 = vector.broadcast %cst_124 : f32 to vector<4x1xf32>
    %311 = arith.divf %309, %310 : vector<4x1xf32>
    %cst_125 = arith.constant 9.99999997E-7 : f32
    %312 = vector.broadcast %cst_125 : f32 to vector<4x1xf32>
    %313 = arith.addf %311, %312 : vector<4x1xf32>
    %314 = math.rsqrt %313 : vector<4x1xf32>
    %315 = vector.broadcast %314 : vector<4x1xf32> to vector<4x8xf32>
    %316 = arith.mulf %306, %315 : vector<4x8xf32>
    %317 = vector.broadcast %299 : vector<1x8xf32> to vector<4x8xf32>
    %318 = arith.mulf %316, %317 : vector<4x8xf32>
    %319 = vector.broadcast %300 : vector<1x8xf32> to vector<4x8xf32>
    %320 = arith.addf %318, %319 : vector<4x8xf32>
    %cst_126 = arith.constant 0.000000e+00 : f32
    %321 = vector.broadcast %cst_126 : f32 to vector<4x8xf32>
    %322 = arith.maximumf %320, %321 : vector<4x8xf32>
    %323 = vector.extract_strided_slice %249 {offsets = [2, 0, 0], sizes = [1, 5, 8], strides = [1, 1, 1]} : vector<17x5x8xf32> to vector<1x5x8xf32>
    %324 = vector.shape_cast %323 : vector<1x5x8xf32> to vector<5x8xf32>
    %325 = vector.extract_strided_slice %263 {offsets = [2, 0, 0], sizes = [1, 4, 8], strides = [1, 1, 1]} : vector<17x4x8xf32> to vector<1x4x8xf32>
    %326 = vector.shape_cast %325 : vector<1x4x8xf32> to vector<4x8xf32>
    %327 = vector.extract_strided_slice %324 {offsets = [0, 0], sizes = [4, 8], strides = [1, 1]} : vector<5x8xf32> to vector<4x8xf32>
    %328 = vector.extract_strided_slice %324 {offsets = [1, 0], sizes = [4, 8], strides = [1, 1]} : vector<5x8xf32> to vector<4x8xf32>
    %329 = tpu.concatenate %327, %326, %328 in 1 : vector<4x8xf32>, vector<4x8xf32>, vector<4x8xf32> -> vector<4x24xf32>
    %cst_127 = arith.constant dense<0.000000e+00> : vector<4x8xf32>
    %330 = tpu.matmul %329, %265, %cst_127 {dimension_numbers = #tpu.dot_dimension_numbers<[1], [0], [0], [1], [0, 0, 1, 1], [], []>, precision = #tpu.contract_precision<fp32>} : vector<4x24xf32>, vector<24x8xf32>, vector<4x8xf32> -> vector<4x8xf32>
    %331 = vector.extract_strided_slice %249 {offsets = [3, 0, 0], sizes = [1, 5, 8], strides = [1, 1, 1]} : vector<17x5x8xf32> to vector<1x5x8xf32>
    %332 = vector.shape_cast %331 : vector<1x5x8xf32> to vector<5x8xf32>
    %333 = vector.extract_strided_slice %263 {offsets = [3, 0, 0], sizes = [1, 4, 8], strides = [1, 1, 1]} : vector<17x4x8xf32> to vector<1x4x8xf32>
    %334 = vector.shape_cast %333 : vector<1x4x8xf32> to vector<4x8xf32>
    %335 = vector.extract_strided_slice %332 {offsets = [0, 0], sizes = [4, 8], strides = [1, 1]} : vector<5x8xf32> to vector<4x8xf32>
    %336 = vector.extract_strided_slice %332 {offsets = [1, 0], sizes = [4, 8], strides = [1, 1]} : vector<5x8xf32> to vector<4x8xf32>
    %337 = tpu.concatenate %335, %334, %336 in 1 : vector<4x8xf32>, vector<4x8xf32>, vector<4x8xf32> -> vector<4x24xf32>
    %cst_128 = arith.constant dense<0.000000e+00> : vector<4x8xf32>
    %338 = tpu.matmul %337, %267, %cst_128 {dimension_numbers = #tpu.dot_dimension_numbers<[1], [0], [0], [1], [0, 0, 1, 1], [], []>, precision = #tpu.contract_precision<fp32>} : vector<4x24xf32>, vector<24x8xf32>, vector<4x8xf32> -> vector<4x8xf32>
    %339 = arith.addf %330, %338 : vector<4x8xf32>
    %340 = vector.extract_strided_slice %249 {offsets = [4, 0, 0], sizes = [1, 5, 8], strides = [1, 1, 1]} : vector<17x5x8xf32> to vector<1x5x8xf32>
    %341 = vector.shape_cast %340 : vector<1x5x8xf32> to vector<5x8xf32>
    %342 = vector.extract_strided_slice %263 {offsets = [4, 0, 0], sizes = [1, 4, 8], strides = [1, 1, 1]} : vector<17x4x8xf32> to vector<1x4x8xf32>
    %343 = vector.shape_cast %342 : vector<1x4x8xf32> to vector<4x8xf32>
    %344 = vector.extract_strided_slice %341 {offsets = [0, 0], sizes = [4, 8], strides = [1, 1]} : vector<5x8xf32> to vector<4x8xf32>
    %345 = vector.extract_strided_slice %341 {offsets = [1, 0], sizes = [4, 8], strides = [1, 1]} : vector<5x8xf32> to vector<4x8xf32>
    %346 = tpu.concatenate %344, %343, %345 in 1 : vector<4x8xf32>, vector<4x8xf32>, vector<4x8xf32> -> vector<4x24xf32>
    %cst_129 = arith.constant dense<0.000000e+00> : vector<4x8xf32>
    %347 = tpu.matmul %346, %269, %cst_129 {dimension_numbers = #tpu.dot_dimension_numbers<[1], [0], [0], [1], [0, 0, 1, 1], [], []>, precision = #tpu.contract_precision<fp32>} : vector<4x24xf32>, vector<24x8xf32>, vector<4x8xf32> -> vector<4x8xf32>
    %348 = arith.addf %339, %347 : vector<4x8xf32>
    %c0_130 = arith.constant 0 : index
    %c0_131 = arith.constant 0 : index
    %349 = vector.load %arg9[%c0_130, %c0_131] : memref<1x8xf32, #tpu.memory_space<vmem>>, vector<1x8xf32>
    %350 = vector.broadcast %349 : vector<1x8xf32> to vector<4x8xf32>
    %351 = arith.addf %348, %350 : vector<4x8xf32>
    %c0_132 = arith.constant 0 : index
    %c0_133 = arith.constant 0 : index
    %352 = vector.load %arg10[%c0_132, %c0_133] : memref<1x8xf32, #tpu.memory_space<vmem>>, vector<1x8xf32>
    %c0_134 = arith.constant 0 : index
    %c0_135 = arith.constant 0 : index
    %353 = vector.load %arg11[%c0_134, %c0_135] : memref<1x8xf32, #tpu.memory_space<vmem>>, vector<1x8xf32>
    %cst_136 = arith.constant dense<0.000000e+00> : vector<4xf32>
    %354 = vector.multi_reduction <add>, %351, %cst_136 [1] : vector<4x8xf32> to vector<4xf32>
    %355 = vector.shape_cast %354 : vector<4xf32> to vector<4x1xf32>
    %cst_137 = arith.constant 8.000000e+00 : f32
    %356 = vector.broadcast %cst_137 : f32 to vector<4x1xf32>
    %357 = arith.divf %355, %356 : vector<4x1xf32>
    %358 = vector.broadcast %357 : vector<4x1xf32> to vector<4x8xf32>
    %359 = arith.subf %351, %358 : vector<4x8xf32>
    %360 = arith.mulf %359, %359 : vector<4x8xf32>
    %cst_138 = arith.constant dense<0.000000e+00> : vector<4xf32>
    %361 = vector.multi_reduction <add>, %360, %cst_138 [1] : vector<4x8xf32> to vector<4xf32>
    %362 = vector.shape_cast %361 : vector<4xf32> to vector<4x1xf32>
    %cst_139 = arith.constant 8.000000e+00 : f32
    %363 = vector.broadcast %cst_139 : f32 to vector<4x1xf32>
    %364 = arith.divf %362, %363 : vector<4x1xf32>
    %cst_140 = arith.constant 9.99999997E-7 : f32
    %365 = vector.broadcast %cst_140 : f32 to vector<4x1xf32>
    %366 = arith.addf %364, %365 : vector<4x1xf32>
    %367 = math.rsqrt %366 : vector<4x1xf32>
    %368 = vector.broadcast %367 : vector<4x1xf32> to vector<4x8xf32>
    %369 = arith.mulf %359, %368 : vector<4x8xf32>
    %370 = vector.broadcast %352 : vector<1x8xf32> to vector<4x8xf32>
    %371 = arith.mulf %369, %370 : vector<4x8xf32>
    %372 = vector.broadcast %353 : vector<1x8xf32> to vector<4x8xf32>
    %373 = arith.addf %371, %372 : vector<4x8xf32>
    %cst_141 = arith.constant 0.000000e+00 : f32
    %374 = vector.broadcast %cst_141 : f32 to vector<4x8xf32>
    %375 = arith.maximumf %373, %374 : vector<4x8xf32>
    %376 = vector.extract_strided_slice %249 {offsets = [4, 0, 0], sizes = [1, 5, 8], strides = [1, 1, 1]} : vector<17x5x8xf32> to vector<1x5x8xf32>
    %377 = vector.shape_cast %376 : vector<1x5x8xf32> to vector<5x8xf32>
    %378 = vector.extract_strided_slice %263 {offsets = [4, 0, 0], sizes = [1, 4, 8], strides = [1, 1, 1]} : vector<17x4x8xf32> to vector<1x4x8xf32>
    %379 = vector.shape_cast %378 : vector<1x4x8xf32> to vector<4x8xf32>
    %380 = vector.extract_strided_slice %377 {offsets = [0, 0], sizes = [4, 8], strides = [1, 1]} : vector<5x8xf32> to vector<4x8xf32>
    %381 = vector.extract_strided_slice %377 {offsets = [1, 0], sizes = [4, 8], strides = [1, 1]} : vector<5x8xf32> to vector<4x8xf32>
    %382 = tpu.concatenate %380, %379, %381 in 1 : vector<4x8xf32>, vector<4x8xf32>, vector<4x8xf32> -> vector<4x24xf32>
    %cst_142 = arith.constant dense<0.000000e+00> : vector<4x8xf32>
    %383 = tpu.matmul %382, %265, %cst_142 {dimension_numbers = #tpu.dot_dimension_numbers<[1], [0], [0], [1], [0, 0, 1, 1], [], []>, precision = #tpu.contract_precision<fp32>} : vector<4x24xf32>, vector<24x8xf32>, vector<4x8xf32> -> vector<4x8xf32>
    %384 = vector.extract_strided_slice %249 {offsets = [5, 0, 0], sizes = [1, 5, 8], strides = [1, 1, 1]} : vector<17x5x8xf32> to vector<1x5x8xf32>
    %385 = vector.shape_cast %384 : vector<1x5x8xf32> to vector<5x8xf32>
    %386 = vector.extract_strided_slice %263 {offsets = [5, 0, 0], sizes = [1, 4, 8], strides = [1, 1, 1]} : vector<17x4x8xf32> to vector<1x4x8xf32>
    %387 = vector.shape_cast %386 : vector<1x4x8xf32> to vector<4x8xf32>
    %388 = vector.extract_strided_slice %385 {offsets = [0, 0], sizes = [4, 8], strides = [1, 1]} : vector<5x8xf32> to vector<4x8xf32>
    %389 = vector.extract_strided_slice %385 {offsets = [1, 0], sizes = [4, 8], strides = [1, 1]} : vector<5x8xf32> to vector<4x8xf32>
    %390 = tpu.concatenate %388, %387, %389 in 1 : vector<4x8xf32>, vector<4x8xf32>, vector<4x8xf32> -> vector<4x24xf32>
    %cst_143 = arith.constant dense<0.000000e+00> : vector<4x8xf32>
    %391 = tpu.matmul %390, %267, %cst_143 {dimension_numbers = #tpu.dot_dimension_numbers<[1], [0], [0], [1], [0, 0, 1, 1], [], []>, precision = #tpu.contract_precision<fp32>} : vector<4x24xf32>, vector<24x8xf32>, vector<4x8xf32> -> vector<4x8xf32>
    %392 = arith.addf %383, %391 : vector<4x8xf32>
    %393 = vector.extract_strided_slice %249 {offsets = [6, 0, 0], sizes = [1, 5, 8], strides = [1, 1, 1]} : vector<17x5x8xf32> to vector<1x5x8xf32>
    %394 = vector.shape_cast %393 : vector<1x5x8xf32> to vector<5x8xf32>
    %395 = vector.extract_strided_slice %263 {offsets = [6, 0, 0], sizes = [1, 4, 8], strides = [1, 1, 1]} : vector<17x4x8xf32> to vector<1x4x8xf32>
    %396 = vector.shape_cast %395 : vector<1x4x8xf32> to vector<4x8xf32>
    %397 = vector.extract_strided_slice %394 {offsets = [0, 0], sizes = [4, 8], strides = [1, 1]} : vector<5x8xf32> to vector<4x8xf32>
    %398 = vector.extract_strided_slice %394 {offsets = [1, 0], sizes = [4, 8], strides = [1, 1]} : vector<5x8xf32> to vector<4x8xf32>
    %399 = tpu.concatenate %397, %396, %398 in 1 : vector<4x8xf32>, vector<4x8xf32>, vector<4x8xf32> -> vector<4x24xf32>
    %cst_144 = arith.constant dense<0.000000e+00> : vector<4x8xf32>
    %400 = tpu.matmul %399, %269, %cst_144 {dimension_numbers = #tpu.dot_dimension_numbers<[1], [0], [0], [1], [0, 0, 1, 1], [], []>, precision = #tpu.contract_precision<fp32>} : vector<4x24xf32>, vector<24x8xf32>, vector<4x8xf32> -> vector<4x8xf32>
    %401 = arith.addf %392, %400 : vector<4x8xf32>
    %c0_145 = arith.constant 0 : index
    %c0_146 = arith.constant 0 : index
    %402 = vector.load %arg9[%c0_145, %c0_146] : memref<1x8xf32, #tpu.memory_space<vmem>>, vector<1x8xf32>
    %403 = vector.broadcast %402 : vector<1x8xf32> to vector<4x8xf32>
    %404 = arith.addf %401, %403 : vector<4x8xf32>
    %c0_147 = arith.constant 0 : index
    %c0_148 = arith.constant 0 : index
    %405 = vector.load %arg10[%c0_147, %c0_148] : memref<1x8xf32, #tpu.memory_space<vmem>>, vector<1x8xf32>
    %c0_149 = arith.constant 0 : index
    %c0_150 = arith.constant 0 : index
    %406 = vector.load %arg11[%c0_149, %c0_150] : memref<1x8xf32, #tpu.memory_space<vmem>>, vector<1x8xf32>
    %cst_151 = arith.constant dense<0.000000e+00> : vector<4xf32>
    %407 = vector.multi_reduction <add>, %404, %cst_151 [1] : vector<4x8xf32> to vector<4xf32>
    %408 = vector.shape_cast %407 : vector<4xf32> to vector<4x1xf32>
    %cst_152 = arith.constant 8.000000e+00 : f32
    %409 = vector.broadcast %cst_152 : f32 to vector<4x1xf32>
    %410 = arith.divf %408, %409 : vector<4x1xf32>
    %411 = vector.broadcast %410 : vector<4x1xf32> to vector<4x8xf32>
    %412 = arith.subf %404, %411 : vector<4x8xf32>
    %413 = arith.mulf %412, %412 : vector<4x8xf32>
    %cst_153 = arith.constant dense<0.000000e+00> : vector<4xf32>
    %414 = vector.multi_reduction <add>, %413, %cst_153 [1] : vector<4x8xf32> to vector<4xf32>
    %415 = vector.shape_cast %414 : vector<4xf32> to vector<4x1xf32>
    %cst_154 = arith.constant 8.000000e+00 : f32
    %416 = vector.broadcast %cst_154 : f32 to vector<4x1xf32>
    %417 = arith.divf %415, %416 : vector<4x1xf32>
    %cst_155 = arith.constant 9.99999997E-7 : f32
    %418 = vector.broadcast %cst_155 : f32 to vector<4x1xf32>
    %419 = arith.addf %417, %418 : vector<4x1xf32>
    %420 = math.rsqrt %419 : vector<4x1xf32>
    %421 = vector.broadcast %420 : vector<4x1xf32> to vector<4x8xf32>
    %422 = arith.mulf %412, %421 : vector<4x8xf32>
    %423 = vector.broadcast %405 : vector<1x8xf32> to vector<4x8xf32>
    %424 = arith.mulf %422, %423 : vector<4x8xf32>
    %425 = vector.broadcast %406 : vector<1x8xf32> to vector<4x8xf32>
    %426 = arith.addf %424, %425 : vector<4x8xf32>
    %cst_156 = arith.constant 0.000000e+00 : f32
    %427 = vector.broadcast %cst_156 : f32 to vector<4x8xf32>
    %428 = arith.maximumf %426, %427 : vector<4x8xf32>
    %429 = vector.extract_strided_slice %249 {offsets = [6, 0, 0], sizes = [1, 5, 8], strides = [1, 1, 1]} : vector<17x5x8xf32> to vector<1x5x8xf32>
    %430 = vector.shape_cast %429 : vector<1x5x8xf32> to vector<5x8xf32>
    %431 = vector.extract_strided_slice %263 {offsets = [6, 0, 0], sizes = [1, 4, 8], strides = [1, 1, 1]} : vector<17x4x8xf32> to vector<1x4x8xf32>
    %432 = vector.shape_cast %431 : vector<1x4x8xf32> to vector<4x8xf32>
    %433 = vector.extract_strided_slice %430 {offsets = [0, 0], sizes = [4, 8], strides = [1, 1]} : vector<5x8xf32> to vector<4x8xf32>
    %434 = vector.extract_strided_slice %430 {offsets = [1, 0], sizes = [4, 8], strides = [1, 1]} : vector<5x8xf32> to vector<4x8xf32>
    %435 = tpu.concatenate %433, %432, %434 in 1 : vector<4x8xf32>, vector<4x8xf32>, vector<4x8xf32> -> vector<4x24xf32>
    %cst_157 = arith.constant dense<0.000000e+00> : vector<4x8xf32>
    %436 = tpu.matmul %435, %265, %cst_157 {dimension_numbers = #tpu.dot_dimension_numbers<[1], [0], [0], [1], [0, 0, 1, 1], [], []>, precision = #tpu.contract_precision<fp32>} : vector<4x24xf32>, vector<24x8xf32>, vector<4x8xf32> -> vector<4x8xf32>
    %437 = vector.extract_strided_slice %249 {offsets = [7, 0, 0], sizes = [1, 5, 8], strides = [1, 1, 1]} : vector<17x5x8xf32> to vector<1x5x8xf32>
    %438 = vector.shape_cast %437 : vector<1x5x8xf32> to vector<5x8xf32>
    %439 = vector.extract_strided_slice %263 {offsets = [7, 0, 0], sizes = [1, 4, 8], strides = [1, 1, 1]} : vector<17x4x8xf32> to vector<1x4x8xf32>
    %440 = vector.shape_cast %439 : vector<1x4x8xf32> to vector<4x8xf32>
    %441 = vector.extract_strided_slice %438 {offsets = [0, 0], sizes = [4, 8], strides = [1, 1]} : vector<5x8xf32> to vector<4x8xf32>
    %442 = vector.extract_strided_slice %438 {offsets = [1, 0], sizes = [4, 8], strides = [1, 1]} : vector<5x8xf32> to vector<4x8xf32>
    %443 = tpu.concatenate %441, %440, %442 in 1 : vector<4x8xf32>, vector<4x8xf32>, vector<4x8xf32> -> vector<4x24xf32>
    %cst_158 = arith.constant dense<0.000000e+00> : vector<4x8xf32>
    %444 = tpu.matmul %443, %267, %cst_158 {dimension_numbers = #tpu.dot_dimension_numbers<[1], [0], [0], [1], [0, 0, 1, 1], [], []>, precision = #tpu.contract_precision<fp32>} : vector<4x24xf32>, vector<24x8xf32>, vector<4x8xf32> -> vector<4x8xf32>
    %445 = arith.addf %436, %444 : vector<4x8xf32>
    %446 = vector.extract_strided_slice %249 {offsets = [8, 0, 0], sizes = [1, 5, 8], strides = [1, 1, 1]} : vector<17x5x8xf32> to vector<1x5x8xf32>
    %447 = vector.shape_cast %446 : vector<1x5x8xf32> to vector<5x8xf32>
    %448 = vector.extract_strided_slice %263 {offsets = [8, 0, 0], sizes = [1, 4, 8], strides = [1, 1, 1]} : vector<17x4x8xf32> to vector<1x4x8xf32>
    %449 = vector.shape_cast %448 : vector<1x4x8xf32> to vector<4x8xf32>
    %450 = vector.extract_strided_slice %447 {offsets = [0, 0], sizes = [4, 8], strides = [1, 1]} : vector<5x8xf32> to vector<4x8xf32>
    %451 = vector.extract_strided_slice %447 {offsets = [1, 0], sizes = [4, 8], strides = [1, 1]} : vector<5x8xf32> to vector<4x8xf32>
    %452 = tpu.concatenate %450, %449, %451 in 1 : vector<4x8xf32>, vector<4x8xf32>, vector<4x8xf32> -> vector<4x24xf32>
    %cst_159 = arith.constant dense<0.000000e+00> : vector<4x8xf32>
    %453 = tpu.matmul %452, %269, %cst_159 {dimension_numbers = #tpu.dot_dimension_numbers<[1], [0], [0], [1], [0, 0, 1, 1], [], []>, precision = #tpu.contract_precision<fp32>} : vector<4x24xf32>, vector<24x8xf32>, vector<4x8xf32> -> vector<4x8xf32>
    %454 = arith.addf %445, %453 : vector<4x8xf32>
    %c0_160 = arith.constant 0 : index
    %c0_161 = arith.constant 0 : index
    %455 = vector.load %arg9[%c0_160, %c0_161] : memref<1x8xf32, #tpu.memory_space<vmem>>, vector<1x8xf32>
    %456 = vector.broadcast %455 : vector<1x8xf32> to vector<4x8xf32>
    %457 = arith.addf %454, %456 : vector<4x8xf32>
    %c0_162 = arith.constant 0 : index
    %c0_163 = arith.constant 0 : index
    %458 = vector.load %arg10[%c0_162, %c0_163] : memref<1x8xf32, #tpu.memory_space<vmem>>, vector<1x8xf32>
    %c0_164 = arith.constant 0 : index
    %c0_165 = arith.constant 0 : index
    %459 = vector.load %arg11[%c0_164, %c0_165] : memref<1x8xf32, #tpu.memory_space<vmem>>, vector<1x8xf32>
    %cst_166 = arith.constant dense<0.000000e+00> : vector<4xf32>
    %460 = vector.multi_reduction <add>, %457, %cst_166 [1] : vector<4x8xf32> to vector<4xf32>
    %461 = vector.shape_cast %460 : vector<4xf32> to vector<4x1xf32>
    %cst_167 = arith.constant 8.000000e+00 : f32
    %462 = vector.broadcast %cst_167 : f32 to vector<4x1xf32>
    %463 = arith.divf %461, %462 : vector<4x1xf32>
    %464 = vector.broadcast %463 : vector<4x1xf32> to vector<4x8xf32>
    %465 = arith.subf %457, %464 : vector<4x8xf32>
    %466 = arith.mulf %465, %465 : vector<4x8xf32>
    %cst_168 = arith.constant dense<0.000000e+00> : vector<4xf32>
    %467 = vector.multi_reduction <add>, %466, %cst_168 [1] : vector<4x8xf32> to vector<4xf32>
    %468 = vector.shape_cast %467 : vector<4xf32> to vector<4x1xf32>
    %cst_169 = arith.constant 8.000000e+00 : f32
    %469 = vector.broadcast %cst_169 : f32 to vector<4x1xf32>
    %470 = arith.divf %468, %469 : vector<4x1xf32>
    %cst_170 = arith.constant 9.99999997E-7 : f32
    %471 = vector.broadcast %cst_170 : f32 to vector<4x1xf32>
    %472 = arith.addf %470, %471 : vector<4x1xf32>
    %473 = math.rsqrt %472 : vector<4x1xf32>
    %474 = vector.broadcast %473 : vector<4x1xf32> to vector<4x8xf32>
    %475 = arith.mulf %465, %474 : vector<4x8xf32>
    %476 = vector.broadcast %458 : vector<1x8xf32> to vector<4x8xf32>
    %477 = arith.mulf %475, %476 : vector<4x8xf32>
    %478 = vector.broadcast %459 : vector<1x8xf32> to vector<4x8xf32>
    %479 = arith.addf %477, %478 : vector<4x8xf32>
    %cst_171 = arith.constant 0.000000e+00 : f32
    %480 = vector.broadcast %cst_171 : f32 to vector<4x8xf32>
    %481 = arith.maximumf %479, %480 : vector<4x8xf32>
    %482 = vector.extract_strided_slice %249 {offsets = [8, 0, 0], sizes = [1, 5, 8], strides = [1, 1, 1]} : vector<17x5x8xf32> to vector<1x5x8xf32>
    %483 = vector.shape_cast %482 : vector<1x5x8xf32> to vector<5x8xf32>
    %484 = vector.extract_strided_slice %263 {offsets = [8, 0, 0], sizes = [1, 4, 8], strides = [1, 1, 1]} : vector<17x4x8xf32> to vector<1x4x8xf32>
    %485 = vector.shape_cast %484 : vector<1x4x8xf32> to vector<4x8xf32>
    %486 = vector.extract_strided_slice %483 {offsets = [0, 0], sizes = [4, 8], strides = [1, 1]} : vector<5x8xf32> to vector<4x8xf32>
    %487 = vector.extract_strided_slice %483 {offsets = [1, 0], sizes = [4, 8], strides = [1, 1]} : vector<5x8xf32> to vector<4x8xf32>
    %488 = tpu.concatenate %486, %485, %487 in 1 : vector<4x8xf32>, vector<4x8xf32>, vector<4x8xf32> -> vector<4x24xf32>
    %cst_172 = arith.constant dense<0.000000e+00> : vector<4x8xf32>
    %489 = tpu.matmul %488, %265, %cst_172 {dimension_numbers = #tpu.dot_dimension_numbers<[1], [0], [0], [1], [0, 0, 1, 1], [], []>, precision = #tpu.contract_precision<fp32>} : vector<4x24xf32>, vector<24x8xf32>, vector<4x8xf32> -> vector<4x8xf32>
    %490 = vector.extract_strided_slice %249 {offsets = [9, 0, 0], sizes = [1, 5, 8], strides = [1, 1, 1]} : vector<17x5x8xf32> to vector<1x5x8xf32>
    %491 = vector.shape_cast %490 : vector<1x5x8xf32> to vector<5x8xf32>
    %492 = vector.extract_strided_slice %263 {offsets = [9, 0, 0], sizes = [1, 4, 8], strides = [1, 1, 1]} : vector<17x4x8xf32> to vector<1x4x8xf32>
    %493 = vector.shape_cast %492 : vector<1x4x8xf32> to vector<4x8xf32>
    %494 = vector.extract_strided_slice %491 {offsets = [0, 0], sizes = [4, 8], strides = [1, 1]} : vector<5x8xf32> to vector<4x8xf32>
    %495 = vector.extract_strided_slice %491 {offsets = [1, 0], sizes = [4, 8], strides = [1, 1]} : vector<5x8xf32> to vector<4x8xf32>
    %496 = tpu.concatenate %494, %493, %495 in 1 : vector<4x8xf32>, vector<4x8xf32>, vector<4x8xf32> -> vector<4x24xf32>
    %cst_173 = arith.constant dense<0.000000e+00> : vector<4x8xf32>
    %497 = tpu.matmul %496, %267, %cst_173 {dimension_numbers = #tpu.dot_dimension_numbers<[1], [0], [0], [1], [0, 0, 1, 1], [], []>, precision = #tpu.contract_precision<fp32>} : vector<4x24xf32>, vector<24x8xf32>, vector<4x8xf32> -> vector<4x8xf32>
    %498 = arith.addf %489, %497 : vector<4x8xf32>
    %499 = vector.extract_strided_slice %249 {offsets = [10, 0, 0], sizes = [1, 5, 8], strides = [1, 1, 1]} : vector<17x5x8xf32> to vector<1x5x8xf32>
    %500 = vector.shape_cast %499 : vector<1x5x8xf32> to vector<5x8xf32>
    %501 = vector.extract_strided_slice %263 {offsets = [10, 0, 0], sizes = [1, 4, 8], strides = [1, 1, 1]} : vector<17x4x8xf32> to vector<1x4x8xf32>
    %502 = vector.shape_cast %501 : vector<1x4x8xf32> to vector<4x8xf32>
    %503 = vector.extract_strided_slice %500 {offsets = [0, 0], sizes = [4, 8], strides = [1, 1]} : vector<5x8xf32> to vector<4x8xf32>
    %504 = vector.extract_strided_slice %500 {offsets = [1, 0], sizes = [4, 8], strides = [1, 1]} : vector<5x8xf32> to vector<4x8xf32>
    %505 = tpu.concatenate %503, %502, %504 in 1 : vector<4x8xf32>, vector<4x8xf32>, vector<4x8xf32> -> vector<4x24xf32>
    %cst_174 = arith.constant dense<0.000000e+00> : vector<4x8xf32>
    %506 = tpu.matmul %505, %269, %cst_174 {dimension_numbers = #tpu.dot_dimension_numbers<[1], [0], [0], [1], [0, 0, 1, 1], [], []>, precision = #tpu.contract_precision<fp32>} : vector<4x24xf32>, vector<24x8xf32>, vector<4x8xf32> -> vector<4x8xf32>
    %507 = arith.addf %498, %506 : vector<4x8xf32>
    %c0_175 = arith.constant 0 : index
    %c0_176 = arith.constant 0 : index
    %508 = vector.load %arg9[%c0_175, %c0_176] : memref<1x8xf32, #tpu.memory_space<vmem>>, vector<1x8xf32>
    %509 = vector.broadcast %508 : vector<1x8xf32> to vector<4x8xf32>
    %510 = arith.addf %507, %509 : vector<4x8xf32>
    %c0_177 = arith.constant 0 : index
    %c0_178 = arith.constant 0 : index
    %511 = vector.load %arg10[%c0_177, %c0_178] : memref<1x8xf32, #tpu.memory_space<vmem>>, vector<1x8xf32>
    %c0_179 = arith.constant 0 : index
    %c0_180 = arith.constant 0 : index
    %512 = vector.load %arg11[%c0_179, %c0_180] : memref<1x8xf32, #tpu.memory_space<vmem>>, vector<1x8xf32>
    %cst_181 = arith.constant dense<0.000000e+00> : vector<4xf32>
    %513 = vector.multi_reduction <add>, %510, %cst_181 [1] : vector<4x8xf32> to vector<4xf32>
    %514 = vector.shape_cast %513 : vector<4xf32> to vector<4x1xf32>
    %cst_182 = arith.constant 8.000000e+00 : f32
    %515 = vector.broadcast %cst_182 : f32 to vector<4x1xf32>
    %516 = arith.divf %514, %515 : vector<4x1xf32>
    %517 = vector.broadcast %516 : vector<4x1xf32> to vector<4x8xf32>
    %518 = arith.subf %510, %517 : vector<4x8xf32>
    %519 = arith.mulf %518, %518 : vector<4x8xf32>
    %cst_183 = arith.constant dense<0.000000e+00> : vector<4xf32>
    %520 = vector.multi_reduction <add>, %519, %cst_183 [1] : vector<4x8xf32> to vector<4xf32>
    %521 = vector.shape_cast %520 : vector<4xf32> to vector<4x1xf32>
    %cst_184 = arith.constant 8.000000e+00 : f32
    %522 = vector.broadcast %cst_184 : f32 to vector<4x1xf32>
    %523 = arith.divf %521, %522 : vector<4x1xf32>
    %cst_185 = arith.constant 9.99999997E-7 : f32
    %524 = vector.broadcast %cst_185 : f32 to vector<4x1xf32>
    %525 = arith.addf %523, %524 : vector<4x1xf32>
    %526 = math.rsqrt %525 : vector<4x1xf32>
    %527 = vector.broadcast %526 : vector<4x1xf32> to vector<4x8xf32>
    %528 = arith.mulf %518, %527 : vector<4x8xf32>
    %529 = vector.broadcast %511 : vector<1x8xf32> to vector<4x8xf32>
    %530 = arith.mulf %528, %529 : vector<4x8xf32>
    %531 = vector.broadcast %512 : vector<1x8xf32> to vector<4x8xf32>
    %532 = arith.addf %530, %531 : vector<4x8xf32>
    %cst_186 = arith.constant 0.000000e+00 : f32
    %533 = vector.broadcast %cst_186 : f32 to vector<4x8xf32>
    %534 = arith.maximumf %532, %533 : vector<4x8xf32>
    %535 = vector.extract_strided_slice %249 {offsets = [10, 0, 0], sizes = [1, 5, 8], strides = [1, 1, 1]} : vector<17x5x8xf32> to vector<1x5x8xf32>
    %536 = vector.shape_cast %535 : vector<1x5x8xf32> to vector<5x8xf32>
    %537 = vector.extract_strided_slice %263 {offsets = [10, 0, 0], sizes = [1, 4, 8], strides = [1, 1, 1]} : vector<17x4x8xf32> to vector<1x4x8xf32>
    %538 = vector.shape_cast %537 : vector<1x4x8xf32> to vector<4x8xf32>
    %539 = vector.extract_strided_slice %536 {offsets = [0, 0], sizes = [4, 8], strides = [1, 1]} : vector<5x8xf32> to vector<4x8xf32>
    %540 = vector.extract_strided_slice %536 {offsets = [1, 0], sizes = [4, 8], strides = [1, 1]} : vector<5x8xf32> to vector<4x8xf32>
    %541 = tpu.concatenate %539, %538, %540 in 1 : vector<4x8xf32>, vector<4x8xf32>, vector<4x8xf32> -> vector<4x24xf32>
    %cst_187 = arith.constant dense<0.000000e+00> : vector<4x8xf32>
    %542 = tpu.matmul %541, %265, %cst_187 {dimension_numbers = #tpu.dot_dimension_numbers<[1], [0], [0], [1], [0, 0, 1, 1], [], []>, precision = #tpu.contract_precision<fp32>} : vector<4x24xf32>, vector<24x8xf32>, vector<4x8xf32> -> vector<4x8xf32>
    %543 = vector.extract_strided_slice %249 {offsets = [11, 0, 0], sizes = [1, 5, 8], strides = [1, 1, 1]} : vector<17x5x8xf32> to vector<1x5x8xf32>
    %544 = vector.shape_cast %543 : vector<1x5x8xf32> to vector<5x8xf32>
    %545 = vector.extract_strided_slice %263 {offsets = [11, 0, 0], sizes = [1, 4, 8], strides = [1, 1, 1]} : vector<17x4x8xf32> to vector<1x4x8xf32>
    %546 = vector.shape_cast %545 : vector<1x4x8xf32> to vector<4x8xf32>
    %547 = vector.extract_strided_slice %544 {offsets = [0, 0], sizes = [4, 8], strides = [1, 1]} : vector<5x8xf32> to vector<4x8xf32>
    %548 = vector.extract_strided_slice %544 {offsets = [1, 0], sizes = [4, 8], strides = [1, 1]} : vector<5x8xf32> to vector<4x8xf32>
    %549 = tpu.concatenate %547, %546, %548 in 1 : vector<4x8xf32>, vector<4x8xf32>, vector<4x8xf32> -> vector<4x24xf32>
    %cst_188 = arith.constant dense<0.000000e+00> : vector<4x8xf32>
    %550 = tpu.matmul %549, %267, %cst_188 {dimension_numbers = #tpu.dot_dimension_numbers<[1], [0], [0], [1], [0, 0, 1, 1], [], []>, precision = #tpu.contract_precision<fp32>} : vector<4x24xf32>, vector<24x8xf32>, vector<4x8xf32> -> vector<4x8xf32>
    %551 = arith.addf %542, %550 : vector<4x8xf32>
    %552 = vector.extract_strided_slice %249 {offsets = [12, 0, 0], sizes = [1, 5, 8], strides = [1, 1, 1]} : vector<17x5x8xf32> to vector<1x5x8xf32>
    %553 = vector.shape_cast %552 : vector<1x5x8xf32> to vector<5x8xf32>
    %554 = vector.extract_strided_slice %263 {offsets = [12, 0, 0], sizes = [1, 4, 8], strides = [1, 1, 1]} : vector<17x4x8xf32> to vector<1x4x8xf32>
    %555 = vector.shape_cast %554 : vector<1x4x8xf32> to vector<4x8xf32>
    %556 = vector.extract_strided_slice %553 {offsets = [0, 0], sizes = [4, 8], strides = [1, 1]} : vector<5x8xf32> to vector<4x8xf32>
    %557 = vector.extract_strided_slice %553 {offsets = [1, 0], sizes = [4, 8], strides = [1, 1]} : vector<5x8xf32> to vector<4x8xf32>
    %558 = tpu.concatenate %556, %555, %557 in 1 : vector<4x8xf32>, vector<4x8xf32>, vector<4x8xf32> -> vector<4x24xf32>
    %cst_189 = arith.constant dense<0.000000e+00> : vector<4x8xf32>
    %559 = tpu.matmul %558, %269, %cst_189 {dimension_numbers = #tpu.dot_dimension_numbers<[1], [0], [0], [1], [0, 0, 1, 1], [], []>, precision = #tpu.contract_precision<fp32>} : vector<4x24xf32>, vector<24x8xf32>, vector<4x8xf32> -> vector<4x8xf32>
    %560 = arith.addf %551, %559 : vector<4x8xf32>
    %c0_190 = arith.constant 0 : index
    %c0_191 = arith.constant 0 : index
    %561 = vector.load %arg9[%c0_190, %c0_191] : memref<1x8xf32, #tpu.memory_space<vmem>>, vector<1x8xf32>
    %562 = vector.broadcast %561 : vector<1x8xf32> to vector<4x8xf32>
    %563 = arith.addf %560, %562 : vector<4x8xf32>
    %c0_192 = arith.constant 0 : index
    %c0_193 = arith.constant 0 : index
    %564 = vector.load %arg10[%c0_192, %c0_193] : memref<1x8xf32, #tpu.memory_space<vmem>>, vector<1x8xf32>
    %c0_194 = arith.constant 0 : index
    %c0_195 = arith.constant 0 : index
    %565 = vector.load %arg11[%c0_194, %c0_195] : memref<1x8xf32, #tpu.memory_space<vmem>>, vector<1x8xf32>
    %cst_196 = arith.constant dense<0.000000e+00> : vector<4xf32>
    %566 = vector.multi_reduction <add>, %563, %cst_196 [1] : vector<4x8xf32> to vector<4xf32>
    %567 = vector.shape_cast %566 : vector<4xf32> to vector<4x1xf32>
    %cst_197 = arith.constant 8.000000e+00 : f32
    %568 = vector.broadcast %cst_197 : f32 to vector<4x1xf32>
    %569 = arith.divf %567, %568 : vector<4x1xf32>
    %570 = vector.broadcast %569 : vector<4x1xf32> to vector<4x8xf32>
    %571 = arith.subf %563, %570 : vector<4x8xf32>
    %572 = arith.mulf %571, %571 : vector<4x8xf32>
    %cst_198 = arith.constant dense<0.000000e+00> : vector<4xf32>
    %573 = vector.multi_reduction <add>, %572, %cst_198 [1] : vector<4x8xf32> to vector<4xf32>
    %574 = vector.shape_cast %573 : vector<4xf32> to vector<4x1xf32>
    %cst_199 = arith.constant 8.000000e+00 : f32
    %575 = vector.broadcast %cst_199 : f32 to vector<4x1xf32>
    %576 = arith.divf %574, %575 : vector<4x1xf32>
    %cst_200 = arith.constant 9.99999997E-7 : f32
    %577 = vector.broadcast %cst_200 : f32 to vector<4x1xf32>
    %578 = arith.addf %576, %577 : vector<4x1xf32>
    %579 = math.rsqrt %578 : vector<4x1xf32>
    %580 = vector.broadcast %579 : vector<4x1xf32> to vector<4x8xf32>
    %581 = arith.mulf %571, %580 : vector<4x8xf32>
    %582 = vector.broadcast %564 : vector<1x8xf32> to vector<4x8xf32>
    %583 = arith.mulf %581, %582 : vector<4x8xf32>
    %584 = vector.broadcast %565 : vector<1x8xf32> to vector<4x8xf32>
    %585 = arith.addf %583, %584 : vector<4x8xf32>
    %cst_201 = arith.constant 0.000000e+00 : f32
    %586 = vector.broadcast %cst_201 : f32 to vector<4x8xf32>
    %587 = arith.maximumf %585, %586 : vector<4x8xf32>
    %588 = vector.extract_strided_slice %249 {offsets = [12, 0, 0], sizes = [1, 5, 8], strides = [1, 1, 1]} : vector<17x5x8xf32> to vector<1x5x8xf32>
    %589 = vector.shape_cast %588 : vector<1x5x8xf32> to vector<5x8xf32>
    %590 = vector.extract_strided_slice %263 {offsets = [12, 0, 0], sizes = [1, 4, 8], strides = [1, 1, 1]} : vector<17x4x8xf32> to vector<1x4x8xf32>
    %591 = vector.shape_cast %590 : vector<1x4x8xf32> to vector<4x8xf32>
    %592 = vector.extract_strided_slice %589 {offsets = [0, 0], sizes = [4, 8], strides = [1, 1]} : vector<5x8xf32> to vector<4x8xf32>
    %593 = vector.extract_strided_slice %589 {offsets = [1, 0], sizes = [4, 8], strides = [1, 1]} : vector<5x8xf32> to vector<4x8xf32>
    %594 = tpu.concatenate %592, %591, %593 in 1 : vector<4x8xf32>, vector<4x8xf32>, vector<4x8xf32> -> vector<4x24xf32>
    %cst_202 = arith.constant dense<0.000000e+00> : vector<4x8xf32>
    %595 = tpu.matmul %594, %265, %cst_202 {dimension_numbers = #tpu.dot_dimension_numbers<[1], [0], [0], [1], [0, 0, 1, 1], [], []>, precision = #tpu.contract_precision<fp32>} : vector<4x24xf32>, vector<24x8xf32>, vector<4x8xf32> -> vector<4x8xf32>
    %596 = vector.extract_strided_slice %249 {offsets = [13, 0, 0], sizes = [1, 5, 8], strides = [1, 1, 1]} : vector<17x5x8xf32> to vector<1x5x8xf32>
    %597 = vector.shape_cast %596 : vector<1x5x8xf32> to vector<5x8xf32>
    %598 = vector.extract_strided_slice %263 {offsets = [13, 0, 0], sizes = [1, 4, 8], strides = [1, 1, 1]} : vector<17x4x8xf32> to vector<1x4x8xf32>
    %599 = vector.shape_cast %598 : vector<1x4x8xf32> to vector<4x8xf32>
    %600 = vector.extract_strided_slice %597 {offsets = [0, 0], sizes = [4, 8], strides = [1, 1]} : vector<5x8xf32> to vector<4x8xf32>
    %601 = vector.extract_strided_slice %597 {offsets = [1, 0], sizes = [4, 8], strides = [1, 1]} : vector<5x8xf32> to vector<4x8xf32>
    %602 = tpu.concatenate %600, %599, %601 in 1 : vector<4x8xf32>, vector<4x8xf32>, vector<4x8xf32> -> vector<4x24xf32>
    %cst_203 = arith.constant dense<0.000000e+00> : vector<4x8xf32>
    %603 = tpu.matmul %602, %267, %cst_203 {dimension_numbers = #tpu.dot_dimension_numbers<[1], [0], [0], [1], [0, 0, 1, 1], [], []>, precision = #tpu.contract_precision<fp32>} : vector<4x24xf32>, vector<24x8xf32>, vector<4x8xf32> -> vector<4x8xf32>
    %604 = arith.addf %595, %603 : vector<4x8xf32>
    %605 = vector.extract_strided_slice %249 {offsets = [14, 0, 0], sizes = [1, 5, 8], strides = [1, 1, 1]} : vector<17x5x8xf32> to vector<1x5x8xf32>
    %606 = vector.shape_cast %605 : vector<1x5x8xf32> to vector<5x8xf32>
    %607 = vector.extract_strided_slice %263 {offsets = [14, 0, 0], sizes = [1, 4, 8], strides = [1, 1, 1]} : vector<17x4x8xf32> to vector<1x4x8xf32>
    %608 = vector.shape_cast %607 : vector<1x4x8xf32> to vector<4x8xf32>
    %609 = vector.extract_strided_slice %606 {offsets = [0, 0], sizes = [4, 8], strides = [1, 1]} : vector<5x8xf32> to vector<4x8xf32>
    %610 = vector.extract_strided_slice %606 {offsets = [1, 0], sizes = [4, 8], strides = [1, 1]} : vector<5x8xf32> to vector<4x8xf32>
    %611 = tpu.concatenate %609, %608, %610 in 1 : vector<4x8xf32>, vector<4x8xf32>, vector<4x8xf32> -> vector<4x24xf32>
    %cst_204 = arith.constant dense<0.000000e+00> : vector<4x8xf32>
    %612 = tpu.matmul %611, %269, %cst_204 {dimension_numbers = #tpu.dot_dimension_numbers<[1], [0], [0], [1], [0, 0, 1, 1], [], []>, precision = #tpu.contract_precision<fp32>} : vector<4x24xf32>, vector<24x8xf32>, vector<4x8xf32> -> vector<4x8xf32>
    %613 = arith.addf %604, %612 : vector<4x8xf32>
    %c0_205 = arith.constant 0 : index
    %c0_206 = arith.constant 0 : index
    %614 = vector.load %arg9[%c0_205, %c0_206] : memref<1x8xf32, #tpu.memory_space<vmem>>, vector<1x8xf32>
    %615 = vector.broadcast %614 : vector<1x8xf32> to vector<4x8xf32>
    %616 = arith.addf %613, %615 : vector<4x8xf32>
    %c0_207 = arith.constant 0 : index
    %c0_208 = arith.constant 0 : index
    %617 = vector.load %arg10[%c0_207, %c0_208] : memref<1x8xf32, #tpu.memory_space<vmem>>, vector<1x8xf32>
    %c0_209 = arith.constant 0 : index
    %c0_210 = arith.constant 0 : index
    %618 = vector.load %arg11[%c0_209, %c0_210] : memref<1x8xf32, #tpu.memory_space<vmem>>, vector<1x8xf32>
    %cst_211 = arith.constant dense<0.000000e+00> : vector<4xf32>
    %619 = vector.multi_reduction <add>, %616, %cst_211 [1] : vector<4x8xf32> to vector<4xf32>
    %620 = vector.shape_cast %619 : vector<4xf32> to vector<4x1xf32>
    %cst_212 = arith.constant 8.000000e+00 : f32
    %621 = vector.broadcast %cst_212 : f32 to vector<4x1xf32>
    %622 = arith.divf %620, %621 : vector<4x1xf32>
    %623 = vector.broadcast %622 : vector<4x1xf32> to vector<4x8xf32>
    %624 = arith.subf %616, %623 : vector<4x8xf32>
    %625 = arith.mulf %624, %624 : vector<4x8xf32>
    %cst_213 = arith.constant dense<0.000000e+00> : vector<4xf32>
    %626 = vector.multi_reduction <add>, %625, %cst_213 [1] : vector<4x8xf32> to vector<4xf32>
    %627 = vector.shape_cast %626 : vector<4xf32> to vector<4x1xf32>
    %cst_214 = arith.constant 8.000000e+00 : f32
    %628 = vector.broadcast %cst_214 : f32 to vector<4x1xf32>
    %629 = arith.divf %627, %628 : vector<4x1xf32>
    %cst_215 = arith.constant 9.99999997E-7 : f32
    %630 = vector.broadcast %cst_215 : f32 to vector<4x1xf32>
    %631 = arith.addf %629, %630 : vector<4x1xf32>
    %632 = math.rsqrt %631 : vector<4x1xf32>
    %633 = vector.broadcast %632 : vector<4x1xf32> to vector<4x8xf32>
    %634 = arith.mulf %624, %633 : vector<4x8xf32>
    %635 = vector.broadcast %617 : vector<1x8xf32> to vector<4x8xf32>
    %636 = arith.mulf %634, %635 : vector<4x8xf32>
    %637 = vector.broadcast %618 : vector<1x8xf32> to vector<4x8xf32>
    %638 = arith.addf %636, %637 : vector<4x8xf32>
    %cst_216 = arith.constant 0.000000e+00 : f32
    %639 = vector.broadcast %cst_216 : f32 to vector<4x8xf32>
    %640 = arith.maximumf %638, %639 : vector<4x8xf32>
    %641 = vector.extract_strided_slice %249 {offsets = [14, 0, 0], sizes = [1, 5, 8], strides = [1, 1, 1]} : vector<17x5x8xf32> to vector<1x5x8xf32>
    %642 = vector.shape_cast %641 : vector<1x5x8xf32> to vector<5x8xf32>
    %643 = vector.extract_strided_slice %263 {offsets = [14, 0, 0], sizes = [1, 4, 8], strides = [1, 1, 1]} : vector<17x4x8xf32> to vector<1x4x8xf32>
    %644 = vector.shape_cast %643 : vector<1x4x8xf32> to vector<4x8xf32>
    %645 = vector.extract_strided_slice %642 {offsets = [0, 0], sizes = [4, 8], strides = [1, 1]} : vector<5x8xf32> to vector<4x8xf32>
    %646 = vector.extract_strided_slice %642 {offsets = [1, 0], sizes = [4, 8], strides = [1, 1]} : vector<5x8xf32> to vector<4x8xf32>
    %647 = tpu.concatenate %645, %644, %646 in 1 : vector<4x8xf32>, vector<4x8xf32>, vector<4x8xf32> -> vector<4x24xf32>
    %cst_217 = arith.constant dense<0.000000e+00> : vector<4x8xf32>
    %648 = tpu.matmul %647, %265, %cst_217 {dimension_numbers = #tpu.dot_dimension_numbers<[1], [0], [0], [1], [0, 0, 1, 1], [], []>, precision = #tpu.contract_precision<fp32>} : vector<4x24xf32>, vector<24x8xf32>, vector<4x8xf32> -> vector<4x8xf32>
    %649 = vector.extract_strided_slice %249 {offsets = [15, 0, 0], sizes = [1, 5, 8], strides = [1, 1, 1]} : vector<17x5x8xf32> to vector<1x5x8xf32>
    %650 = vector.shape_cast %649 : vector<1x5x8xf32> to vector<5x8xf32>
    %651 = vector.extract_strided_slice %263 {offsets = [15, 0, 0], sizes = [1, 4, 8], strides = [1, 1, 1]} : vector<17x4x8xf32> to vector<1x4x8xf32>
    %652 = vector.shape_cast %651 : vector<1x4x8xf32> to vector<4x8xf32>
    %653 = vector.extract_strided_slice %650 {offsets = [0, 0], sizes = [4, 8], strides = [1, 1]} : vector<5x8xf32> to vector<4x8xf32>
    %654 = vector.extract_strided_slice %650 {offsets = [1, 0], sizes = [4, 8], strides = [1, 1]} : vector<5x8xf32> to vector<4x8xf32>
    %655 = tpu.concatenate %653, %652, %654 in 1 : vector<4x8xf32>, vector<4x8xf32>, vector<4x8xf32> -> vector<4x24xf32>
    %cst_218 = arith.constant dense<0.000000e+00> : vector<4x8xf32>
    %656 = tpu.matmul %655, %267, %cst_218 {dimension_numbers = #tpu.dot_dimension_numbers<[1], [0], [0], [1], [0, 0, 1, 1], [], []>, precision = #tpu.contract_precision<fp32>} : vector<4x24xf32>, vector<24x8xf32>, vector<4x8xf32> -> vector<4x8xf32>
    %657 = arith.addf %648, %656 : vector<4x8xf32>
    %658 = vector.extract_strided_slice %249 {offsets = [16, 0, 0], sizes = [1, 5, 8], strides = [1, 1, 1]} : vector<17x5x8xf32> to vector<1x5x8xf32>
    %659 = vector.shape_cast %658 : vector<1x5x8xf32> to vector<5x8xf32>
    %660 = vector.extract_strided_slice %263 {offsets = [16, 0, 0], sizes = [1, 4, 8], strides = [1, 1, 1]} : vector<17x4x8xf32> to vector<1x4x8xf32>
    %661 = vector.shape_cast %660 : vector<1x4x8xf32> to vector<4x8xf32>
    %662 = vector.extract_strided_slice %659 {offsets = [0, 0], sizes = [4, 8], strides = [1, 1]} : vector<5x8xf32> to vector<4x8xf32>
    %663 = vector.extract_strided_slice %659 {offsets = [1, 0], sizes = [4, 8], strides = [1, 1]} : vector<5x8xf32> to vector<4x8xf32>
    %664 = tpu.concatenate %662, %661, %663 in 1 : vector<4x8xf32>, vector<4x8xf32>, vector<4x8xf32> -> vector<4x24xf32>
    %cst_219 = arith.constant dense<0.000000e+00> : vector<4x8xf32>
    %665 = tpu.matmul %664, %269, %cst_219 {dimension_numbers = #tpu.dot_dimension_numbers<[1], [0], [0], [1], [0, 0, 1, 1], [], []>, precision = #tpu.contract_precision<fp32>} : vector<4x24xf32>, vector<24x8xf32>, vector<4x8xf32> -> vector<4x8xf32>
    %666 = arith.addf %657, %665 : vector<4x8xf32>
    %c0_220 = arith.constant 0 : index
    %c0_221 = arith.constant 0 : index
    %667 = vector.load %arg9[%c0_220, %c0_221] : memref<1x8xf32, #tpu.memory_space<vmem>>, vector<1x8xf32>
    %668 = vector.broadcast %667 : vector<1x8xf32> to vector<4x8xf32>
    %669 = arith.addf %666, %668 : vector<4x8xf32>
    %c0_222 = arith.constant 0 : index
    %c0_223 = arith.constant 0 : index
    %670 = vector.load %arg10[%c0_222, %c0_223] : memref<1x8xf32, #tpu.memory_space<vmem>>, vector<1x8xf32>
    %c0_224 = arith.constant 0 : index
    %c0_225 = arith.constant 0 : index
    %671 = vector.load %arg11[%c0_224, %c0_225] : memref<1x8xf32, #tpu.memory_space<vmem>>, vector<1x8xf32>
    %cst_226 = arith.constant dense<0.000000e+00> : vector<4xf32>
    %672 = vector.multi_reduction <add>, %669, %cst_226 [1] : vector<4x8xf32> to vector<4xf32>
    %673 = vector.shape_cast %672 : vector<4xf32> to vector<4x1xf32>
    %cst_227 = arith.constant 8.000000e+00 : f32
    %674 = vector.broadcast %cst_227 : f32 to vector<4x1xf32>
    %675 = arith.divf %673, %674 : vector<4x1xf32>
    %676 = vector.broadcast %675 : vector<4x1xf32> to vector<4x8xf32>
    %677 = arith.subf %669, %676 : vector<4x8xf32>
    %678 = arith.mulf %677, %677 : vector<4x8xf32>
    %cst_228 = arith.constant dense<0.000000e+00> : vector<4xf32>
    %679 = vector.multi_reduction <add>, %678, %cst_228 [1] : vector<4x8xf32> to vector<4xf32>
    %680 = vector.shape_cast %679 : vector<4xf32> to vector<4x1xf32>
    %cst_229 = arith.constant 8.000000e+00 : f32
    %681 = vector.broadcast %cst_229 : f32 to vector<4x1xf32>
    %682 = arith.divf %680, %681 : vector<4x1xf32>
    %cst_230 = arith.constant 9.99999997E-7 : f32
    %683 = vector.broadcast %cst_230 : f32 to vector<4x1xf32>
    %684 = arith.addf %682, %683 : vector<4x1xf32>
    %685 = math.rsqrt %684 : vector<4x1xf32>
    %686 = vector.broadcast %685 : vector<4x1xf32> to vector<4x8xf32>
    %687 = arith.mulf %677, %686 : vector<4x8xf32>
    %688 = vector.broadcast %670 : vector<1x8xf32> to vector<4x8xf32>
    %689 = arith.mulf %687, %688 : vector<4x8xf32>
    %690 = vector.broadcast %671 : vector<1x8xf32> to vector<4x8xf32>
    %691 = arith.addf %689, %690 : vector<4x8xf32>
    %cst_231 = arith.constant 0.000000e+00 : f32
    %692 = vector.broadcast %cst_231 : f32 to vector<4x8xf32>
    %693 = arith.maximumf %691, %692 : vector<4x8xf32>
    %694 = vector.shape_cast %322 : vector<4x8xf32> to vector<1x4x8xf32>
    %695 = vector.shape_cast %375 : vector<4x8xf32> to vector<1x4x8xf32>
    %696 = vector.shape_cast %428 : vector<4x8xf32> to vector<1x4x8xf32>
    %697 = vector.shape_cast %481 : vector<4x8xf32> to vector<1x4x8xf32>
    %698 = vector.shape_cast %534 : vector<4x8xf32> to vector<1x4x8xf32>
    %699 = vector.shape_cast %587 : vector<4x8xf32> to vector<1x4x8xf32>
    %700 = vector.shape_cast %640 : vector<4x8xf32> to vector<1x4x8xf32>
    %701 = vector.shape_cast %693 : vector<4x8xf32> to vector<1x4x8xf32>
    %702 = tpu.concatenate %694, %695, %696, %697, %698, %699, %700, %701 in 0 : vector<1x4x8xf32>, vector<1x4x8xf32>, vector<1x4x8xf32>, vector<1x4x8xf32>, vector<1x4x8xf32>, vector<1x4x8xf32>, vector<1x4x8xf32>, vector<1x4x8xf32> -> vector<8x4x8xf32>
    %cst_232 = arith.constant 0.000000e+00 : f32
    %703 = vector.broadcast %cst_232 : f32 to vector<8x32xf32>
    %704 = vector.extract_strided_slice %702 {offsets = [0, 0, 0], sizes = [8, 1, 8], strides = [1, 1, 1]} : vector<8x4x8xf32> to vector<8x1x8xf32>
    %705 = vector.shape_cast %704 : vector<8x1x8xf32> to vector<8x8xf32>
    %c0_233 = arith.constant 0 : index
    %c0_234 = arith.constant 0 : index
    %c0_235 = arith.constant 0 : index
    %706 = vector.load %arg12[%c0_233, %c0_234, %c0_235] : memref<4x8x32xf32, #tpu.memory_space<vmem>>, vector<1x8x32xf32>
    %707 = vector.shape_cast %706 : vector<1x8x32xf32> to vector<8x32xf32>
    %cst_236 = arith.constant dense<0.000000e+00> : vector<8x32xf32>
    %708 = tpu.matmul %705, %707, %cst_236 {dimension_numbers = #tpu.dot_dimension_numbers<[1], [0], [0], [1], [0, 0, 1, 1], [], []>, precision = #tpu.contract_precision<fp32>} : vector<8x8xf32>, vector<8x32xf32>, vector<8x32xf32> -> vector<8x32xf32>
    %709 = arith.addf %703, %708 : vector<8x32xf32>
    %710 = vector.extract_strided_slice %702 {offsets = [0, 1, 0], sizes = [8, 1, 8], strides = [1, 1, 1]} : vector<8x4x8xf32> to vector<8x1x8xf32>
    %711 = vector.shape_cast %710 : vector<8x1x8xf32> to vector<8x8xf32>
    %c1_237 = arith.constant 1 : index
    %c0_238 = arith.constant 0 : index
    %c0_239 = arith.constant 0 : index
    %712 = vector.load %arg12[%c1_237, %c0_238, %c0_239] : memref<4x8x32xf32, #tpu.memory_space<vmem>>, vector<1x8x32xf32>
    %713 = vector.shape_cast %712 : vector<1x8x32xf32> to vector<8x32xf32>
    %cst_240 = arith.constant dense<0.000000e+00> : vector<8x32xf32>
    %714 = tpu.matmul %711, %713, %cst_240 {dimension_numbers = #tpu.dot_dimension_numbers<[1], [0], [0], [1], [0, 0, 1, 1], [], []>, precision = #tpu.contract_precision<fp32>} : vector<8x8xf32>, vector<8x32xf32>, vector<8x32xf32> -> vector<8x32xf32>
    %715 = arith.addf %709, %714 : vector<8x32xf32>
    %716 = vector.extract_strided_slice %702 {offsets = [0, 2, 0], sizes = [8, 1, 8], strides = [1, 1, 1]} : vector<8x4x8xf32> to vector<8x1x8xf32>
    %717 = vector.shape_cast %716 : vector<8x1x8xf32> to vector<8x8xf32>
    %c2_241 = arith.constant 2 : index
    %c0_242 = arith.constant 0 : index
    %c0_243 = arith.constant 0 : index
    %718 = vector.load %arg12[%c2_241, %c0_242, %c0_243] : memref<4x8x32xf32, #tpu.memory_space<vmem>>, vector<1x8x32xf32>
    %719 = vector.shape_cast %718 : vector<1x8x32xf32> to vector<8x32xf32>
    %cst_244 = arith.constant dense<0.000000e+00> : vector<8x32xf32>
    %720 = tpu.matmul %717, %719, %cst_244 {dimension_numbers = #tpu.dot_dimension_numbers<[1], [0], [0], [1], [0, 0, 1, 1], [], []>, precision = #tpu.contract_precision<fp32>} : vector<8x8xf32>, vector<8x32xf32>, vector<8x32xf32> -> vector<8x32xf32>
    %721 = arith.addf %715, %720 : vector<8x32xf32>
    %722 = vector.extract_strided_slice %702 {offsets = [0, 3, 0], sizes = [8, 1, 8], strides = [1, 1, 1]} : vector<8x4x8xf32> to vector<8x1x8xf32>
    %723 = vector.shape_cast %722 : vector<8x1x8xf32> to vector<8x8xf32>
    %c3_245 = arith.constant 3 : index
    %c0_246 = arith.constant 0 : index
    %c0_247 = arith.constant 0 : index
    %724 = vector.load %arg12[%c3_245, %c0_246, %c0_247] : memref<4x8x32xf32, #tpu.memory_space<vmem>>, vector<1x8x32xf32>
    %725 = vector.shape_cast %724 : vector<1x8x32xf32> to vector<8x32xf32>
    %cst_248 = arith.constant dense<0.000000e+00> : vector<8x32xf32>
    %726 = tpu.matmul %723, %725, %cst_248 {dimension_numbers = #tpu.dot_dimension_numbers<[1], [0], [0], [1], [0, 0, 1, 1], [], []>, precision = #tpu.contract_precision<fp32>} : vector<8x8xf32>, vector<8x32xf32>, vector<8x32xf32> -> vector<8x32xf32>
    %727 = arith.addf %721, %726 : vector<8x32xf32>
    %c0_249 = arith.constant 0 : index
    %c0_250 = arith.constant 0 : index
    %728 = vector.load %arg13[%c0_249, %c0_250] : memref<1x32xf32, #tpu.memory_space<vmem>>, vector<1x32xf32>
    %729 = vector.broadcast %728 : vector<1x32xf32> to vector<8x32xf32>
    %730 = arith.addf %727, %729 : vector<8x32xf32>
    %c0_251 = arith.constant 0 : index
    %c0_252 = arith.constant 0 : index
    %c0_253 = arith.constant 0 : index
    %731 = vector.load %arg14[%c0_251, %c0_252, %c0_253] : memref<1x8x32xf32, #tpu.memory_space<vmem>>, vector<1x8x32xf32>
    %732 = vector.shape_cast %731 : vector<1x8x32xf32> to vector<8x32xf32>
    %733 = vector.shape_cast %730 : vector<8x32xf32> to vector<1x8x32xf32>
    tpu.vector_store %arg14[%c0_251, %c0_252, %c0_253], %733 {strides = array<i32>} : memref<1x8x32xf32, #tpu.memory_space<vmem>>, vector<1x8x32xf32>,
    return
  }
  func.func @transform_0(%arg0: i32, %arg1: i32) -> (i32, i32, i32, i32) {
    %c0_i32 = arith.constant 0 : i32
    %c0_i32_0 = arith.constant 0 : i32
    %c0_i32_1 = arith.constant 0 : i32
    return %arg0, %c0_i32, %arg1, %c0_i32_0 : i32, i32, i32, i32
  }
  func.func @transform_1(%arg0: i32, %arg1: i32) -> (i32, i32, i32, i32) {
    %c1_i32 = arith.constant 1 : i32
    %0 = arith.addi %arg1, %c1_i32 : i32
    %c2_i32 = arith.constant 2 : i32
    %1 = arith.muli %c2_i32, %0 : i32
    %c0_i32 = arith.constant 0 : i32
    %c0_i32_0 = arith.constant 0 : i32
    %c0_i32_1 = arith.constant 0 : i32
    return %arg0, %c0_i32, %1, %c0_i32_0 : i32, i32, i32, i32
  }
  func.func @transform_2(%arg0: i32, %arg1: i32) -> (i32, i32) {
    %c0_i32 = arith.constant 0 : i32
    %c0_i32_0 = arith.constant 0 : i32
    %c0_i32_1 = arith.constant 0 : i32
    return %c0_i32, %c0_i32_0 : i32, i32
  }
  func.func @transform_3(%arg0: i32, %arg1: i32) -> (i32, i32, i32) {
    %c0_i32 = arith.constant 0 : i32
    %c0_i32_0 = arith.constant 0 : i32
    %c0_i32_1 = arith.constant 0 : i32
    %c0_i32_2 = arith.constant 0 : i32
    return %c0_i32, %c0_i32_0, %c0_i32_1 : i32, i32, i32
  }
  func.func @transform_4(%arg0: i32, %arg1: i32) -> (i32, i32) {
    %c0_i32 = arith.constant 0 : i32
    %c0_i32_0 = arith.constant 0 : i32
    %c0_i32_1 = arith.constant 0 : i32
    return %c0_i32, %c0_i32_0 : i32, i32
  }
  func.func @transform_5(%arg0: i32, %arg1: i32) -> (i32, i32) {
    %c0_i32 = arith.constant 0 : i32
    %c0_i32_0 = arith.constant 0 : i32
    %c0_i32_1 = arith.constant 0 : i32
    return %c0_i32, %c0_i32_0 : i32, i32
  }
  func.func @transform_6(%arg0: i32, %arg1: i32) -> (i32, i32) {
    %c0_i32 = arith.constant 0 : i32
    %c0_i32_0 = arith.constant 0 : i32
    %c0_i32_1 = arith.constant 0 : i32
    return %c0_i32, %c0_i32_0 : i32, i32
  }
  func.func @transform_7(%arg0: i32, %arg1: i32) -> (i32, i32) {
    %c0_i32 = arith.constant 0 : i32
    %c0_i32_0 = arith.constant 0 : i32
    %c0_i32_1 = arith.constant 0 : i32
    return %c0_i32, %c0_i32_0 : i32, i32
  }
  func.func @transform_8(%arg0: i32, %arg1: i32) -> (i32, i32) {
    %c0_i32 = arith.constant 0 : i32
    %c0_i32_0 = arith.constant 0 : i32
    %c0_i32_1 = arith.constant 0 : i32
    return %c0_i32, %c0_i32_0 : i32, i32
  }
  func.func @transform_9(%arg0: i32, %arg1: i32) -> (i32, i32) {
    %c0_i32 = arith.constant 0 : i32
    %c0_i32_0 = arith.constant 0 : i32
    %c0_i32_1 = arith.constant 0 : i32
    return %c0_i32, %c0_i32_0 : i32, i32
  }
  func.func @transform_10(%arg0: i32, %arg1: i32) -> (i32, i32, i32) {
    %c0_i32 = arith.constant 0 : i32
    %c0_i32_0 = arith.constant 0 : i32
    %c0_i32_1 = arith.constant 0 : i32
    %c0_i32_2 = arith.constant 0 : i32
    return %c0_i32, %c0_i32_0, %c0_i32_1 : i32, i32, i32
  }
  func.func @transform_11(%arg0: i32, %arg1: i32) -> (i32, i32) {
    %c0_i32 = arith.constant 0 : i32
    %c0_i32_0 = arith.constant 0 : i32
    %c0_i32_1 = arith.constant 0 : i32
    return %c0_i32, %c0_i32_0 : i32, i32
  }
  func.func @transform_12(%arg0: i32, %arg1: i32) -> (i32, i32, i32) {
    %c0_i32 = arith.constant 0 : i32
    %c0_i32_0 = arith.constant 0 : i32
    return %arg0, %arg1, %c0_i32 : i32, i32, i32
  }
}

</mosaic_0001>

<bundles_post_ra>
// kernel: tpu_custom_call.1
= control target key start
LH: loop header
LB: loop body
LE: loop exit
PB: predicated region body
PF: predicated region fallthrough
CT: control target
= control target key end

     0   :  { %s22353_s0 = inlined_call_operand.vmem [shape: f32[2,8,24,5], index: 0, kind: input, shape index: {}]   ;;  %s22354_s1 = inlined_call_operand.vmem [shape: f32[2,8,24,5], index: 1, kind: input, shape index: {}]   ;;  %s22355_s2 = inlined_call_operand.vmem [shape: f32[9,8], index: 2, kind: input, shape index: {}]   ;;  %s22356_s3 = inlined_call_operand.vmem [shape: f32[3,24,8], index: 3, kind: input, shape index: {}]   ;;  %s22357_s4 = inlined_call_operand.vmem [shape: f32[1,8], index: 4, kind: input, shape index: {}]   ;;  %s22358_s5 = inlined_call_operand.vmem [shape: f32[1,8], index: 5, kind: input, shape index: {}]   ;;  %s22359_s6 = inlined_call_operand.vmem [shape: f32[1,8], index: 6, kind: input, shape index: {}]   ;;  %s22360_s7 = inlined_call_operand.vmem [shape: f32[1,8], index: 7, kind: input, shape index: {}]   ;;  %s22361_s8 = inlined_call_operand.vmem [shape: f32[1,8], index: 8, kind: input, shape index: {}]   ;;  %s22362_s9 = inlined_call_operand.vmem [shape: f32[1,8], index: 9, kind: input, shape index: {}]   ;;  %s22363_s10 = inlined_call_operand.vmem [shape: f32[4,8,32], index: 10, kind: input, shape index: {}]   ;;  %s22364_s11 = inlined_call_operand.vmem [shape: f32[1,32], index: 11, kind: input, shape index: {}]   ;;  %s22365_s12 = inlined_call_operand.hbm [shape: f32[2,8,32], index: 12, kind: output, shape index: {}]  }
   0x1   :  { %22367 = sst [smem:[#allocation7_spill]] %s22353_s0 }
   0x2   :  { %22368 = sst [smem:[#allocation8_spill]] %s22355_s2 }
   0x3   :  { %22369 = sst [smem:[#allocation9_spill]] %s22356_s3 }
   0x4   :  { %17 = vsyncpa [#allocation5], 0 }
   0x5   :  { %19 = vsyncpa [#allocation5 + $0x1], 0  ;;  %s19513_s20 = smov 0   ;;  %s19515_s21 = smov 0  }
   0x6   :  { %s19517_s22 = smov 0   ;;  %s19519_s23 = smov 0  }
   0x7   :  { %s19521_s24 = smov 0   ;;  %s19523_s25 = smov 0  }
   0x8 LB: > { %s17094_s26 = sadd.s32 4294967295, %s19437_s25   ;;  %s17095_s27 = sadd.s32 4294967294, %s19437_s25   ;;  %s19437_s25 = sphi %s19523_s25, %s25_s25   ;;  %s19433_s24 = sphi %s19521_s24, %s22382_s24   ;;  %s19429_s23 = sphi %s19519_s23, %s22381_s23   ;;  %s19425_s22 = sphi %s19517_s22, %s22380_s22   ;;  %s19421_s21 = sphi %s19515_s21, %s22379_s21   ;;  %s19417_s20 = sphi %s19513_s20, %s22378_s20  }
   0x9   : > { %s37_s28 = sadd.s32 1, %s19433_s24  ;;  %s46_s29 = sadd.s32 1, %s19425_s22 }
   0xa   : > { %p39_p0 = scmp.ge.s32.totalorder %s37_s28, 2  ;;  %p53_p1 = scmp.ne.s32.totalorder %s19425_s22, %s19421_s21 }
   0xb   : > { %p54_p2 = scmp.eq.s32.totalorder %s19437_s25, 0  ;;  %p327_p3 = scmp.eq.s32.totalorder %s17094_s26, 1 }
   0xc   : > { %s22384_s28 = smov (%p39_p0, %s37_s28), 0  ;;  %p332_p6 = scmp.ne.s32.totalorder %s19421_s21, %s19417_s20 }
   0xd   : > { %p55_p4 = por %p54_p2, %p53_p1  ;;  %p19552_p5 = por %p327_p3, %p53_p1 }
   0xe   : > { %s41_s30 = ssub.s32 %s19433_s24, %s22384_s28  ;;  %p333_p8 = scmp.eq.s32.totalorder %s17095_s27, 1 }
   0xf   : > { %p44_p7 = scmp.eq.s32.totalorder %s41_s30, 0  ;;  %p22366_p10 = scmp.ge.s32.totalorder %s19437_s25, 2 }
  0x10   : > { %p19563_p9 = por %p333_p8, %p332_p6 }
  0x11   : > { %s19561_s13 = scalar_select %p44_p7, %s19425_s22, %s46_s29  }
  0x12   : > { %379 = sbr.rel (%p22366_p10) target bundleno = 41 (0x29), region = 56 }
  0x17   : > { %382 = sbr.rel (!%p55_p4) target bundleno = 41 (0x29), region = 60  ;;  %s384_s15 = sand.u32 (%p55_p4), 1, %s19425_s22  }
  0x18   : > { %s19212_s16 = smul.u32 (%p55_p4), 192, %s19433_s24  ;;  %s17098_s17 = sshll.u32 (%p55_p4), %s384_s15, 7 }
  0x19   : > { %s22372_s0 = sld [smem:[#allocation7_spill]] (%p55_p4)  ;;  %s19577_s27 = scalar_lea.vmem (%p55_p4), [#allocation2], %s17098_s17  }
  0x1a   : > { %s19579_s29 = smov (%p55_p4), 0  }
  0x1f   : > { %s19575_s26 = scalar_lea.vmem %s22372_s0, %s19212_s16  }
  0x20 LB: >> { %v506_v0 = vld [vmem:[%s19575_s26] sm:$0xff]  ;;  %v508_v1 = vld [vmem:[%s19575_s26 + $0x8] sm:$0xff]  ;;  %v510_v2 = vld [vmem:[%s19575_s26 + $0x18] sm:$0xff]  ;;  %s500_s29 = sadd.s32 1, %s19441_s29   ;;  %s19441_s29 = sphi %s19579_s29, %s500_s29  }
  0x21   : >> { %507 = vst [vmem:[%s19577_s27] sm:$0xff] %v506_v0  ;;  %509 = vst [vmem:[%s19577_s27 + $0x8] sm:$0xff] %v508_v1  ;;  %v512_v3 = vld [vmem:[%s19575_s26 + $0x20] sm:$0xff]  ;;  %v514_v4 = vld [vmem:[%s19575_s26 + $0x30] sm:$0xff]  ;;  %p499_p11 = scmp.ge.s32.totalorder %s500_s29, 1 }
  0x22   : >> { %511 = vst [vmem:[%s19577_s27 + $0x10] sm:$0xff] %v510_v2  ;;  %v516_v5 = vld [vmem:[%s19575_s26 + $0x38] sm:$0xff]  ;;  %513 = vst [vmem:[%s19577_s27 + $0x18] sm:$0xff] %v512_v3  ;;  %v518_v6 = vld [vmem:[%s19575_s26 + $0x48] sm:$0xff] }
  0x23   : >> { %515 = vst [vmem:[%s19577_s27 + $0x20] sm:$0xff] %v514_v4  ;;  %517 = vst [vmem:[%s19577_s27 + $0x28] sm:$0xff] %v516_v5  ;;  %v520_v7 = vld [vmem:[%s19575_s26 + $0x50] sm:$0xff]  ;;  %v522_v8 = vld [vmem:[%s19575_s26 + $0x60] sm:$0xff] }
  0x24   : >> { %519 = vst [vmem:[%s19577_s27 + $0x30] sm:$0xff] %v518_v6  ;;  %521 = vst [vmem:[%s19577_s27 + $0x38] sm:$0xff] %v520_v7  ;;  %v524_v9 = vld [vmem:[%s19575_s26 + $0x68] sm:$0xff]  ;;  %v526_v10 = vld [vmem:[%s19575_s26 + $0x78] sm:$0xff]  ;;  %502 = sbr.rel (!%p499_p11) target bundleno = 32 (0x20), region = 233 }
  0x25   : >> { %523 = vst [vmem:[%s19577_s27 + $0x40] sm:$0xff] %v522_v8  ;;  %v528_v11 = vld [vmem:[%s19575_s26 + $0x80] sm:$0xff]  ;;  %525 = vst [vmem:[%s19577_s27 + $0x48] sm:$0xff] %v524_v9  ;;  %v530_v12 = vld [vmem:[%s19575_s26 + $0x90] sm:$0xff] }
  0x26   : >> { %527 = vst [vmem:[%s19577_s27 + $0x50] sm:$0xff] %v526_v10  ;;  %529 = vst [vmem:[%s19577_s27 + $0x58] sm:$0xff] %v528_v11  ;;  %v532_v13 = vld [vmem:[%s19575_s26 + $0x98] sm:$0xff]  ;;  %v534_v14 = vld [vmem:[%s19575_s26 + $0xa8] sm:$0xff] }
  0x27   : >> { %531 = vst [vmem:[%s19577_s27 + $0x60] sm:$0xff] %v530_v12  ;;  %533 = vst [vmem:[%s19577_s27 + $0x68] sm:$0xff] %v532_v13  ;;  %v536_v15 = vld [vmem:[%s19575_s26 + $0xb0] sm:$0xff] }
  0x28   : >> { %535 = vst [vmem:[%s19577_s27 + $0x70] sm:$0xff] %v534_v14  ;;  %537 = vst [vmem:[%s19577_s27 + $0x78] sm:$0xff] %v536_v15 }
  0x29 PF: > { %p17118_p12 = scmp.ge.s32.totalorder %s19437_s25, 1  ;;  %p662_p13 = scmp.lt.s32.totalorder %s19437_s25, 3 }
  0x2b   : > { %p663_p0 = pnand %p17118_p12, %p662_p13 }
  0x2c   : > { %s19622_s30 = sand.u32 (!%p663_p0), 1, %s19421_s21   ;;  %s22373_s2 = sld [smem:[#allocation8_spill]] (!%p663_p0) }
  0x2d   : > { %666 = sbr.rel (%p663_p0) target bundleno = 2100 (0x834), region = 150  ;;  %s17119_s15 = sshll.u32 (!%p663_p0), %s19622_s30, 7 }
  0x2e   : > { %s671_s16 = scalar_lea.vmem (!%p663_p0), [#allocation2], %s17119_s15  ;;  %s22374_s3 = sld [smem:[#allocation9_spill]] (!%p663_p0) }
  0x2f   : > { %s19444_s15 = smov (!%p663_p0), 16   ;;  %s17169_s18 = sshll.u32 (!%p663_p0), %s19429_s23, 7 }
  0x30   : > { %s16945_s0 = scalar_lea.hbm (!%p663_p0), %s22365_s12, %s17169_s18 }
  0x32   : > { %v775_v16 = vlaneseq  ;;  %v19627_v18 = vld [vmem:[%s671_s16 + $0x20] sm:$0xff]  ;;  %v19632_v21 = vld [vmem:[%s671_s16 + $0x30] sm:$0xff]  ;;  %vm2569_vm0 = vcmask 61440   ;;  %vm2872_vm1 = vcmask 60416   ;;  %vm19446_vm6 = vmmov 0  }
  0x33   : > { %v19629_v19 = vld [vmem:[%s671_s16] sm:$0xff]  ;;  %v19634_v22 = vld [vmem:[%s671_s16 + $0x10] sm:$0xff]  ;;  %vm3325_vm7 = vcmask 64512   ;;  %vm3327_vm8 = vcmask 130048   ;;  %vm3340_vm9 = vcmask 195584   ;;  %vm15062_vm10 = vcmask 1041409  }
  0x34   : > { %v19625_v17 = vshrl.u32 %v775_v16, 7  ;;  %v19640_v27 = vld [vmem:[%s671_s16 + $0x40] sm:$0xff]  ;;  %v19643_v29 = vld [vmem:[%s671_s16 + $0x50] sm:$0xff]  ;;  %vm15065_vm11 = vcmask 1042434   ;;  %vm15068_vm12 = vcmask 1043459   ;;  %vm15074_vm13 = vcmask 1045509  }
  0x35   : > { %v19645_v30 = vld [vmem:[%s671_s16 + $0x60] sm:$0xff]  ;;  %v19649_v33 = vld [vmem:[%s671_s16 + $0x70] sm:$0xff]  ;;  %s19445_s16 = smov 8   ;;  %vm15071_vm14 = vcmask 1044484   ;;  %vm15077_vm15 = vcmask 1046534  }
  0x36   : > { %v784_v20 = vsub.s32 1, %v19625_v17  ;;  %v791_v35 = vsub.s32 2, %v19625_v17  ;;  %v798_v44 = vsub.s32 3, %v19625_v17  ;;  %v805_v53 = vsub.s32 4, %v19625_v17  ;;  %v19702_v8 = vld [vmem:[%s22373_s2 + $0x1] ss:$0 sm:$0xff] }
  0x37   : > { %v19680_v62 = vsub.s32 5, %v19625_v17  ;;  %v19707_v9 = vld [vmem:[%s22373_s2] ss:$0 sm:$0xff]  ;;  %v19713_v13 = vld [vmem:[%s22373_s2 + $0x2] ss:$0 sm:$0xff]  ;;  %vm3217_vm2 = vcmp.ge.s32.totalorder %v19625_v17, 1 }
  0x38   : > { %v1099_v23 = vrot.slane %v19627_v18, %v784_v20  ;;  %v785_v24 = vrot.slane %v19629_v19, %v784_v20  ;;  %v1290_v25 = vrot.slane %v19632_v21, %v784_v20  ;;  %v942_v26 = vrot.slane %v19634_v22, %v784_v20 }
  0x39   : > { %v1545_v28 = vrot.slane %v19640_v27, %v784_v20  ;;  %v1702_v31 = vrot.slane %v19643_v29, %v784_v20  ;;  %v1859_v32 = vrot.slane %v19645_v30, %v784_v20  ;;  %v2050_v34 = vrot.slane %v19649_v33, %v784_v20 }
  0x3a   : > { %1101 = vbcast.lane.b32.xlu1 %v1099_v23, 256  ;;  %787 = vbcast.lane.b32.xlu0 %v785_v24, 256  ;;  %v1106_v36 = vrot.slane %v19627_v18, %v791_v35  ;;  %v792_v37 = vrot.slane %v19629_v19, %v791_v35  ;;  %v1297_v38 = vrot.slane %v19632_v21, %v791_v35  ;;  %vm3235_vm3 = vcmp.le.s32.totalorder %v19625_v17, 4 }
  0x3b   : > { %v949_v39 = vrot.slane %v19634_v22, %v791_v35  ;;  %v1552_v40 = vrot.slane %v19640_v27, %v791_v35  ;;  %v1709_v41 = vrot.slane %v19643_v29, %v791_v35  ;;  %v1866_v42 = vrot.slane %v19645_v30, %v791_v35  ;;  %vm20154_vm4 = vmand %vm3217_vm2, %vm3235_vm3 }
  0x3c   : > { %v2057_v43 = vrot.slane %v19649_v33, %v791_v35  ;;  %v1113_v45 = vrot.slane %v19627_v18, %v798_v44  ;;  %v799_v46 = vrot.slane %v19629_v19, %v798_v44  ;;  %v1304_v47 = vrot.slane %v19632_v21, %v798_v44 }
  0x3d   : > { %v956_v48 = vrot.slane %v19634_v22, %v798_v44  ;;  %v1559_v49 = vrot.slane %v19640_v27, %v798_v44  ;;  %v1716_v50 = vrot.slane %v19643_v29, %v798_v44  ;;  %v1873_v51 = vrot.slane %v19645_v30, %v798_v44 }
  0x3e   : > { %1292 = vbcast.lane.b32.xlu1 %v1290_v25, 256  ;;  %944 = vbcast.lane.b32.xlu0 %v942_v26, 256  ;;  %v2064_v52 = vrot.slane %v19649_v33, %v798_v44  ;;  %v1120_v54 = vrot.slane %v19627_v18, %v805_v53  ;;  %v806_v55 = vrot.slane %v19629_v19, %v805_v53  ;;  %v19722_v26 = vld [vmem:[%s22373_s2 + $0x3] ss:$0 sm:$0xff]  ;;  %vm3270_vm5 = vcmp.le.s32.totalorder %v19625_v17, 3 }
  0x3f   : > { %v1311_v56 = vrot.slane %v19632_v21, %v805_v53  ;;  %v963_v57 = vrot.slane %v19634_v22, %v805_v53  ;;  %v1880_v58 = vrot.slane %v19645_v30, %v805_v53  ;;  %v1566_v59 = vrot.slane %v19640_v27, %v805_v53 }
  0x40   : > { %v1723_v60 = vrot.slane %v19643_v29, %v805_v53  ;;  %v2071_v61 = vrot.slane %v19649_v33, %v805_v53  ;;  %v813_v63 = vrot.slane %v19629_v19, %v19680_v62  ;;  %v1127_v0 = vrot.slane %v19627_v18, %v19680_v62 }
  0x41   : > { %v970_v1 = vrot.slane %v19634_v22, %v19680_v62  ;;  %v1318_v2 = vrot.slane %v19632_v21, %v19680_v62  ;;  %v19692_v3 = vrot.slane %v19640_v27, %v19680_v62  ;;  %v1730_v4 = vrot.slane %v19643_v29, %v19680_v62 }
  0x42   : > { %1547 = vbcast.lane.b32.xlu1 %v1545_v28, 256  ;;  %1439 = vbcast.lane.b32.xlu0 %v785_v24, 257  ;;  %v1887_v5 = vrot.slane %v19645_v30, %v19680_v62 }
  0x46   : > { %1704 = vbcast.lane.b32.xlu1 %v1702_v31, 256  ;;  %1861 = vbcast.lane.b32.xlu0 %v1859_v32, 256  ;;  %v19728_v32 = vld [vmem:[%s22373_s2 + $0x4] ss:$0 sm:$0xff] }
  0x4a   : > { %2199 = vbcast.lane.b32.xlu1 %v1545_v28, 257  ;;  %2052 = vbcast.lane.b32.xlu0 %v2050_v34, 256 }
  0x4e   : > { %1108 = vbcast.lane.b32.xlu1 %v1106_v36, 256  ;;  %794 = vbcast.lane.b32.xlu0 %v792_v37, 256 }
  0x52   : > { %1299 = vbcast.lane.b32.xlu1 %v1297_v38, 256  ;;  %951 = vbcast.lane.b32.xlu0 %v949_v39, 256 }
  0x56   : > { %1554 = vbcast.lane.b32.xlu1 %v1552_v40, 256  ;;  %1443 = vbcast.lane.b32.xlu0 %v792_v37, 257 }
  0x5a   : > { %1711 = vbcast.lane.b32.xlu1 %v1709_v41, 256  ;;  %1868 = vbcast.lane.b32.xlu0 %v1866_v42, 256 }
  0x5e   : > { %2203 = vbcast.lane.b32.xlu1 %v1552_v40, 257  ;;  %2059 = vbcast.lane.b32.xlu0 %v2057_v43, 256 }
  0x62   : > { %1115 = vbcast.lane.b32.xlu1 %v1113_v45, 256  ;;  %801 = vbcast.lane.b32.xlu0 %v799_v46, 256 }
  0x66   : > { %1306 = vbcast.lane.b32.xlu1 %v1304_v47, 256  ;;  %958 = vbcast.lane.b32.xlu0 %v956_v48, 256  ;;  %v19742_v47 = vld [vmem:[%s22373_s2 + $0x6] ss:$0 sm:$0xff] }
  0x6a   : > { %1561 = vbcast.lane.b32.xlu1 %v1559_v49, 256  ;;  %1447 = vbcast.lane.b32.xlu0 %v799_v46, 257  ;;  %v19737_v46 = vld [vmem:[%s22373_s2 + $0x5] ss:$0 sm:$0xff] }
  0x6e   : > { %1718 = vbcast.lane.b32.xlu1 %v1716_v50, 256  ;;  %1875 = vbcast.lane.b32.xlu0 %v1873_v51, 256 }
  0x72   : > { %2207 = vbcast.lane.b32.xlu1 %v1559_v49, 257  ;;  %2066 = vbcast.lane.b32.xlu0 %v2064_v52, 256 }
  0x76   : > { %1122 = vbcast.lane.b32.xlu1 %v1120_v54, 256  ;;  %808 = vbcast.lane.b32.xlu0 %v806_v55, 256 }
  0x7a   : > { %1313 = vbcast.lane.b32.xlu1 %v1311_v56, 256  ;;  %965 = vbcast.lane.b32.xlu0 %v963_v57, 256 }
  0x7e   : > { %1451 = vbcast.lane.b32.xlu0 %v806_v55, 257  ;;  %1882 = vbcast.lane.b32.xlu1 %v1880_v58, 256  ;;  %v19752_v55 = vld [vmem:[%s22373_s2 + $0x7] ss:$0 sm:$0xff] }
  0x82   : > { %1568 = vbcast.lane.b32.xlu0 %v1566_v59, 256  ;;  %1725 = vbcast.lane.b32.xlu1 %v1723_v60, 256 }
  0x86   : > { %2073 = vbcast.lane.b32.xlu0 %v2071_v61, 256  ;;  %2211 = vbcast.lane.b32.xlu1 %v1566_v59, 257  ;;  %v19759_v59 = vld [vmem:[%s22373_s2 + $0x8] ss:$0 sm:$0xff]  ;;  %s16933_s2 = scalar_lea.sflag [#allocation5], %s19622_s30 }
  0x8a   : > { %815 = vbcast.lane.b32.xlu0 %v813_v63, 256  ;;  %1129 = vbcast.lane.b32.xlu1 %v1127_v0, 256 }
  0x8e   : > { %972 = vbcast.lane.b32.xlu0 %v970_v1, 256  ;;  %1320 = vbcast.lane.b32.xlu1 %v1318_v2, 256 }
  0x92   : > { %1455 = vbcast.lane.b32.xlu0 %v813_v63, 257  ;;  %1575 = vbcast.lane.b32.xlu1 %v19692_v3, 256 }
  0x96   : > { %1732 = vbcast.lane.b32.xlu1 %v1730_v4, 256  ;;  %1889 = vbcast.lane.b32.xlu0 %v1887_v5, 256 }
  0xac   : > { %v1102_v6 = vpop.permute.xlu1 %1101  ;;  %v788_v7 = vpop.permute.xlu0 %787 }
  0xad   : > { %v1247_v14 = vmul.f32 %v19707_v9, %v1102_v6  ;;  %v899_v15 = vmul.f32 %v19707_v9, %v788_v7  ;;  %v1213_v24 = vmul.f32 %v19713_v13, %v1102_v6 }
  0xb0   : > { %v1293_v10 = vpop.permute.xlu1 %1292  ;;  %v945_v11 = vpop.permute.xlu0 %944 }
  0xb1   : > { %v1056_v12 = vmul.f32 %v19702_v8, %v945_v11  ;;  %v1400_v16 = vmul.f32 %v19702_v8, %v1293_v10 }
  0xb3   : > { %v1073_v25 = vadd.f32 %v1056_v12, %v899_v15  ;;  %v1417_v28 = vadd.f32 %v1400_v16, %v1247_v14 }
  0xb4   : > { %v1548_v20 = vpop.permute.xlu1 %1547  ;;  %v1440_v23 = vpop.permute.xlu0 %1439 }
  0xb5   : > { %v1502_v31 = vmul.f32 %v19713_v13, %v1440_v23  ;;  %v1230_v36 = vadd.f32 %v1213_v24, %v1073_v25  ;;  %v1659_v37 = vmul.f32 %v19722_v26, %v1548_v20  ;;  %v19773_v20 = vld [vmem:[%s22357_s4] ss:$0 sm:$0xff] }
  0xb7   : > { %v1519_v39 = vadd.f32 %v1502_v31, %v1417_v28  ;;  %v1676_v43 = vadd.f32 %v1659_v37, %v1230_v36 }
  0xb8   : > { %v1705_v34 = vpop.permute.xlu1 %1704  ;;  %v1862_v35 = vpop.permute.xlu0 %1861 }
  0xb9   : > { %v2007_v38 = vmul.f32 %v19722_v26, %v1862_v35  ;;  %v1816_v40 = vmul.f32 %v19728_v32, %v1705_v34  ;;  %v1973_v53 = vmul.f32 %v19737_v46, %v1862_v35 }
  0xbb   : > { %v2024_v44 = vadd.f32 %v2007_v38, %v1519_v39  ;;  %v1833_v48 = vadd.f32 %v1816_v40, %v1676_v43 }
  0xbc   : > { %v2200_v41 = vpop.permute.xlu1 %2199  ;;  %v2053_v42 = vpop.permute.xlu0 %2052 }
  0xbd   : > { %v2160_v45 = vmul.f32 %v19728_v32, %v2053_v42  ;;  %v2262_v49 = vmul.f32 %v19737_v46, %v2200_v41  ;;  %v1990_v56 = vadd.f32 %v1973_v53, %v1833_v48 }
  0xbf   : > { %v2177_v50 = vadd.f32 %v2160_v45, %v2024_v44 }
  0xc0   : > { %v19745_v51 = vpop.permute.xlu1 %1108  ;;  %v795_v52 = vpop.permute.xlu0 %794 }
  0xc1   : > { %v2307_v54 = vmul.f32 %v19742_v47, %v795_v52  ;;  %v2279_v57 = vadd.f32 %v2262_v49, %v2177_v50  ;;  %v2431_v58 = vmul.f32 %v19742_v47, %v19745_v51  ;;  %v2397_v4 = vmul.f32 %v19759_v59, %v19745_v51 }
  0xc2   : > { %v900_v5 = vmul.f32 %v19707_v9, %v795_v52  ;;  %v1214_v15 = vmul.f32 %v19713_v13, %v19745_v51 }
  0xc3   : > { %v2324_v63 = vadd.f32 %v2307_v54, %v1990_v56  ;;  %v2448_v6 = vadd.f32 %v2431_v58, %v2279_v57 }
  0xc4   : > { %v1300_v60 = vpop.permute.xlu1 %1299  ;;  %v952_v61 = vpop.permute.xlu0 %951 }
  0xc5   : > { %v2472_v0 = vmul.f32 %v19752_v55, %v1300_v60  ;;  %v1057_v1 = vmul.f32 %v19702_v8, %v952_v61  ;;  %v2352_v2 = vmul.f32 %v19752_v55, %v952_v61 }
  0xc7   : > { %v2369_v7 = vadd.f32 %v2352_v2, %v2324_v63  ;;  %v2489_v12 = vadd.f32 %v2472_v0, %v2448_v6  ;;  %v1074_v14 = vadd.f32 %v1057_v1, %v900_v5  ;;  %v2078_v6 = vrot.slane %v19649_v33, %v19680_v62 }
  0xc8   : > { %v1555_v10 = vpop.permute.xlu1 %1554  ;;  %v1444_v11 = vpop.permute.xlu0 %1443 }
  0xc9   : > { %v2510_v16 = vmul.f32 %v19759_v59, %v1444_v11  ;;  %v2414_v23 = vadd.f32 %v2397_v4, %v2369_v7  ;;  %v1231_v34 = vadd.f32 %v1214_v15, %v1074_v14  ;;  %v1660_v35 = vmul.f32 %v19722_v26, %v1555_v10 }
  0xca   : > { %v1248_v7 = vmul.f32 %v19707_v9, %v19745_v51  ;;  %v1401_v10 = vmul.f32 %v19702_v8, %v1300_v60 }
  0xcb   : > { %v2527_v24 = vadd.f32 %v2510_v16, %v2489_v12  ;;  %v19776_v31 = vadd.f32 %v19773_v20, %v2414_v23  ;;  %v1677_v42 = vadd.f32 %v1660_v35, %v1231_v34  ;;  %v1503_v16 = vmul.f32 %v19713_v13, %v1444_v11 }
  0xcc   : > { %v1712_v25 = vpop.permute.xlu1 %1711  ;;  %v1869_v28 = vpop.permute.xlu0 %1868  ;;  %v1418_v15 = vadd.f32 %v1401_v10, %v1248_v7  ;;  %v19838_v11 = vsub.s32 6, %v19625_v17 }
  0xcd   : > { %v19780_v36 = vadd.f32 %v19773_v20, %v2527_v24  ;;  %v2573_v37 = vsel %vm2569_vm0, %v19776_v31, 0.0  ;;  %v1817_v38 = vmul.f32 %v19728_v32, %v1712_v25  ;;  %v1974_v48 = vmul.f32 %v19737_v46, %v1869_v28 }
  0xce   : > { %2574 = vadd.xlane.f32.xlu1 %v2573_v37  ;;  %v2008_v62 = vmul.f32 %v19722_v26, %v1869_v28  ;;  %v1520_v60 = vadd.f32 %v1503_v16, %v1418_v15 }
  0xcf   : > { %v2876_v39 = vsel %vm2872_vm1, %v19780_v36, 0.0  ;;  %v1834_v43 = vadd.f32 %v1817_v38, %v1677_v42 }
  0xd0   : > { %v2204_v40 = vpop.permute.xlu1 %2203  ;;  %2877 = vadd.xlane.f32.xlu0 %v2876_v39  ;;  %v2060_v41 = vpop.permute.xlu0 %2059  ;;  %v2025_v39 = vadd.f32 %v2008_v62, %v1520_v60 }
  0xd1   : > { %v1991_v50 = vadd.f32 %v1974_v48, %v1834_v43  ;;  %v2161_v34 = vmul.f32 %v19728_v32, %v2060_v41 }
  0xd3   : > { %v2178_v41 = vadd.f32 %v2161_v34, %v2025_v39  ;;  %v1325_v39 = vrot.slane %v19632_v21, %v19838_v11 }
  0xd4   : > { %v19787_v44 = vpop.permute.xlu1 %1115  ;;  %v19789_v45 = vpop.permute.xlu0 %801 }
  0xd5   : > { %v2308_v49 = vmul.f32 %v19742_v47, %v19789_v45  ;;  %v2398_v57 = vmul.f32 %v19759_v59, %v19787_v44  ;;  %v2432_v7 = vmul.f32 %v19742_v47, %v19787_v44 }
  0xd7   : > { %v2325_v54 = vadd.f32 %v2308_v49, %v1991_v50  ;;  %v2263_v49 = vmul.f32 %v19737_v46, %v2204_v40  ;;  %v1134_v40 = vrot.slane %v19627_v18, %v19838_v11 }
  0xd8   : > { %v19794_v52 = vpop.permute.xlu1 %1306  ;;  %v19796_v53 = vpop.permute.xlu0 %958 }
  0xd9   : > { %v2353_v56 = vmul.f32 %v19752_v55, %v19796_v53 }
  0xdb   : > { %v2370_v58 = vadd.f32 %v2353_v56, %v2325_v54  ;;  %v820_v54 = vrot.slane %v19629_v19, %v19838_v11 }
  0xdc   : > { %v19802_v61 = vpop.permute.xlu1 %1561  ;;  %v19804_v63 = vpop.permute.xlu0 %1447 }
  0xdd   : > { %v2415_v0 = vadd.f32 %v2398_v57, %v2370_v58 }
  0xdf   : > { %v19811_v4 = vadd.f32 %v19773_v20, %v2415_v0 }
  0xe0   : > { %v19806_v1 = vpop.permute.xlu1 %1718  ;;  %v19808_v2 = vpop.permute.xlu0 %1875 }
  0xe1   : > { %v2576_v5 = vsel %vm2569_vm0, %v19811_v4, 0.0 }
  0xe2   : > { %2577 = vadd.xlane.f32.xlu1 %v2576_v5 }
  0xe4   : > { %v19820_v12 = vpop.permute.xlu1 %2207  ;;  %v19822_v14 = vpop.permute.xlu0 %2066 }
  0xe6   : > { %2080 = vbcast.lane.b32.xlu0 %v2078_v6, 256  ;;  %v2280_v6 = vadd.f32 %v2263_v49, %v2178_v41 }
  0xe8   : > { %v19825_v23 = vpop.permute.xlu1 %1122  ;;  %v19827_v24 = vpop.permute.xlu0 %808 }
  0xe9   : > { %v902_v25 = vmul.f32 %v19707_v9, %v19827_v24  ;;  %v1250_v51 = vmul.f32 %v19707_v9, %v19825_v23  ;;  %v1216_v42 = vmul.f32 %v19713_v13, %v19825_v23 }
  0xec   : > { %v19835_v35 = vpop.permute.xlu1 %1313  ;;  %v966_v37 = vpop.permute.xlu0 %965 }
  0xed   : > { %v1403_v38 = vmul.f32 %v19702_v8, %v19835_v35  ;;  %v1059_v28 = vmul.f32 %v19702_v8, %v966_v37 }
  0xef   : > { %v1420_v43 = vadd.f32 %v1403_v38, %v1250_v51  ;;  %v1076_v48 = vadd.f32 %v1059_v28, %v902_v25  ;;  %v2473_v51 = vmul.f32 %v19752_v55, %v19794_v52  ;;  %v2449_v38 = vadd.f32 %v2432_v7, %v2280_v6 }
  0xf0   : > { %v19846_v50 = vpop.permute.xlu0 %1451  ;;  %v1883_v56 = vpop.permute.xlu1 %1882  ;;  %v2511_v28 = vmul.f32 %v19759_v59, %v19804_v63 }
  0xf1   : > { %v1505_v57 = vmul.f32 %v19713_v13, %v19846_v50  ;;  %v2010_v58 = vmul.f32 %v19722_v26, %v1883_v56  ;;  %v1233_v5 = vadd.f32 %v1216_v42, %v1076_v48  ;;  %v1976_v60 = vmul.f32 %v19737_v46, %v1883_v56 }
  0xf2   : > { %v2490_v48 = vadd.f32 %v2473_v51, %v2449_v38  ;;  %v1058_v56 = vmul.f32 %v19702_v8, %v19796_v53  ;;  %v2309_v38 = vmul.f32 %v19742_v47, %v19827_v24 }
  0xf3   : > { %v1522_v0 = vadd.f32 %v1505_v57, %v1420_v43  ;;  %822 = vbcast.lane.b32.xlu1 %v820_v54, 256 }
  0xf4   : > { %v1569_v10 = vpop.permute.xlu0 %1568  ;;  %v1726_v15 = vpop.permute.xlu1 %1725  ;;  %v2528_v57 = vadd.f32 %v2511_v28, %v2490_v48  ;;  %v2399_v48 = vmul.f32 %v19759_v59, %v19825_v23 }
  0xf5   : > { %v19857_v16 = vadd.f32 %v2010_v58, %v1522_v0  ;;  %v1662_v62 = vmul.f32 %v19722_v26, %v1569_v10  ;;  %v1819_v25 = vmul.f32 %v19728_v32, %v1726_v15  ;;  %v901_v58 = vmul.f32 %v19707_v9, %v19789_v45 }
  0xf7   : > { %v1679_v34 = vadd.f32 %v1662_v62, %v1233_v5  ;;  %1136 = vbcast.lane.b32.xlu1 %v1134_v40, 256  ;;  %v19881_v5 = vadd.f32 %v19773_v20, %v2528_v57  ;;  %v1075_v7 = vadd.f32 %v1058_v56, %v901_v58  ;;  %v1215_v40 = vmul.f32 %v19713_v13, %v19787_v44 }
  0xf8   : > { %v19868_v42 = vpop.permute.xlu1 %2211  ;;  %v1661_v62 = vmul.f32 %v19722_v26, %v19802_v61  ;;  %v1402_v58 = vmul.f32 %v19702_v8, %v19794_v52  ;;  %v1894_v52 = vrot.slane %v19645_v30, %v19838_v11  ;;  %v826_v30 = vsub.s32 7, %v19625_v17 }
  0xf9   : > { %v1836_v43 = vadd.f32 %v1819_v25, %v1679_v34  ;;  %v2879_v45 = vsel %vm2872_vm1, %v19881_v5, 0.0  ;;  %v1232_v53 = vadd.f32 %v1215_v40, %v1075_v7  ;;  %v1818_v25 = vmul.f32 %v19728_v32, %v19806_v1 }
  0xfa   : > { %v1975_v34 = vmul.f32 %v19737_v46, %v19808_v2  ;;  %v977_v1 = vrot.slane %v19634_v22, %v19838_v11  ;;  %v2009_v7 = vmul.f32 %v19722_v26, %v19808_v2  ;;  %v2474_v2 = vmul.f32 %v19752_v55, %v19835_v35 }
  0xfb   : > { %v19870_v49 = vadd.f32 %v1976_v60, %v1836_v43  ;;  %1327 = vbcast.lane.b32.xlu1 %v1325_v39, 256  ;;  %v1678_v51 = vadd.f32 %v1661_v62, %v1232_v53  ;;  %v2354_v39 = vmul.f32 %v19752_v55, %v966_v37  ;;  %v1249_v37 = vmul.f32 %v19707_v9, %v19787_v44 }
  0xfc   : > { %v19872_v41 = vpop.permute.xlu1 %1129  ;;  %v2264_v53 = vmul.f32 %v19737_v46, %v19820_v12  ;;  %v2433_v62 = vmul.f32 %v19742_v47, %v19825_v23  ;;  %v1580_v12 = vrot.slane %v19640_v27, %v19838_v11  ;;  %v1141_v23 = vrot.slane %v19627_v18, %v826_v30 }
  0xfd   : > { %v1251_v0 = vmul.f32 %v19707_v9, %v19872_v41  ;;  %v1835_v60 = vadd.f32 %v1818_v25, %v1678_v51  ;;  %v2512_v25 = vmul.f32 %v19759_v59, %v19846_v50  ;;  %v2085_v27 = vrot.slane %v19649_v33, %v19838_v11 }
  0xfe   : > { %v1332_v33 = vrot.slane %v19632_v21, %v826_v30 }
  0xff   : > { %v1992_v28 = vadd.f32 %v1975_v34, %v1835_v60 }
 0x100   : > { %v19883_v6 = vpop.permute.xlu1 %1320 }
 0x101   : > { %v1404_v10 = vmul.f32 %v19702_v8, %v19883_v6  ;;  %v2326_v43 = vadd.f32 %v2309_v38, %v1992_v28 }
 0x103   : > { %v19889_v15 = vadd.f32 %v1404_v10, %v1251_v0  ;;  %v2371_v61 = vadd.f32 %v2354_v39, %v2326_v43  ;;  %v1419_v0 = vadd.f32 %v1402_v58, %v1249_v37  ;;  %v2162_v10 = vmul.f32 %v19728_v32, %v19822_v14  ;;  %v2074_v43 = vpop.permute.xlu0 %2073 }
 0x104   : > { %v1576_v50 = vpop.permute.xlu1 %1575  ;;  %v827_v39 = vrot.slane %v19629_v19, %v826_v30  ;;  %v2163_v19 = vmul.f32 %v19728_v32, %v2074_v43 }
 0x105   : > { %2880 = vadd.xlane.f32.xlu0 %v2879_v45  ;;  %v2416_v57 = vadd.f32 %v2399_v48, %v2371_v61  ;;  %v1663_v43 = vmul.f32 %v19722_v26, %v1576_v50 }
 0x107   : > { %v19908_v56 = vadd.f32 %v19773_v20, %v2416_v57  ;;  %v984_v57 = vrot.slane %v19634_v22, %v826_v30  ;;  %v2265_v22 = vmul.f32 %v19737_v46, %v19868_v42  ;;  %v2400_v42 = vmul.f32 %v19759_v59, %v19872_v41 }
 0x108   : > { %v19943_v34 = vpop.permute.xlu1 %1732 }
 0x109   : > { %v2579_v24 = vsel %vm2569_vm0, %v19908_v56, 0.0 }
 0x11b   : > { %2215 = vbcast.lane.b32.xlu0 %v19692_v3, 257  ;;  %v1504_v3 = vmul.f32 %v19713_v13, %v19804_v63  ;;  %v1737_v63 = vrot.slane %v19643_v29, %v19838_v11 }
 0x11d   : > { %v1521_v40 = vadd.f32 %v1504_v3, %v1419_v0  ;;  %v2180_v3 = vadd.f32 %v2163_v19, %v19857_v16 }
 0x11f   : > { %979 = vbcast.lane.b32.xlu0 %v977_v1, 256  ;;  %2580 = vadd.xlane.f32.xlu1 %v2579_v24  ;;  %v2026_v45 = vadd.f32 %v2009_v7, %v1521_v40  ;;  %v816_v1 = vpop.permute.xlu0 %815 }
 0x120   : > { %v2310_v7 = vmul.f32 %v19742_v47, %v816_v1 }
 0x121   : > { %v2179_v44 = vadd.f32 %v2162_v10, %v2026_v45  ;;  %v2282_v10 = vadd.f32 %v2265_v22, %v2180_v3 }
 0x123   : > { %1459 = vbcast.lane.b32.xlu0 %v820_v54, 257  ;;  %v2281_v54 = vadd.f32 %v2264_v53, %v2179_v44  ;;  %v2327_v44 = vadd.f32 %v2310_v7, %v19870_v49  ;;  %v903_v49 = vmul.f32 %v19707_v9, %v816_v1 }
 0x125   : > { %v2450_v14 = vadd.f32 %v2433_v62, %v2281_v54 }
 0x127   : > { %v2491_v51 = vadd.f32 %v2474_v2, %v2450_v14  ;;  %v2475_v14 = vmul.f32 %v19752_v55, %v19883_v6 }
 0x129   : > { %v2529_v60 = vadd.f32 %v2512_v25, %v2491_v51 }
 0x12b   : > { %v19939_v29 = vadd.f32 %v19773_v20, %v2529_v60 }
 0x12d   : > { %v2882_v35 = vsel %vm2872_vm1, %v19939_v29, 0.0 }
 0x130   : > { %1896 = vbcast.lane.b32.xlu1 %v1894_v52, 256  ;;  %v2434_v52 = vmul.f32 %v19742_v47, %v19872_v41 }
 0x132   : > { %v2451_v2 = vadd.f32 %v2434_v52, %v2282_v10 }
 0x134   : > { %1739 = vbcast.lane.b32.xlu1 %v1737_v63, 256  ;;  %v2492_v30 = vadd.f32 %v2475_v14, %v2451_v2 }
 0x138   : > { %2219 = vbcast.lane.b32.xlu1 %v1580_v12, 257 }
 0x13c   : > { %1143 = vbcast.lane.b32.xlu1 %v1141_v23, 256 }
 0x142   : > { %2883 = vadd.xlane.f32.xlu0 %v2882_v35  ;;  %v1217_v35 = vmul.f32 %v19713_v13, %v19872_v41 }
 0x157   : > { %v2575_v38 = vpop.xlane.xlu1 %2574 }
 0x158   : > { %1582 = vbcast.lane.b32.xlu0 %v1580_v12, 256  ;;  %v2623_v28 = vmul.f32 0.125, %v2575_v38 }
 0x15a   : > { %v19948_v18 = vsub.f32 %v19776_v31, %v2623_v28  ;;  %v973_v31 = vpop.permute.xlu0 %972 }
 0x15b   : > { %v2355_v16 = vmul.f32 %v19752_v55, %v973_v31  ;;  %v1060_v12 = vmul.f32 %v19702_v8, %v973_v31  ;;  %v1820_v31 = vmul.f32 %v19728_v32, %v19943_v34 }
 0x15c   : > { %2087 = vbcast.lane.b32.xlu0 %v2085_v27, 256  ;;  %v2657_v48 = vmul.f32 %v19948_v18, %v19948_v18 }
 0x15d   : > { %v2372_v63 = vadd.f32 %v2355_v16, %v2327_v44  ;;  %v1077_v38 = vadd.f32 %v1060_v12, %v903_v49 }
 0x15e   : > { %v2676_v61 = vsel %vm2569_vm0, %v2657_v48, 0.0  ;;  %v1456_v24 = vpop.permute.xlu0 %1455 }
 0x15f   : > { %v2513_v51 = vmul.f32 %v19759_v59, %v1456_v24  ;;  %v2417_v60 = vadd.f32 %v2400_v42, %v2372_v63  ;;  %v1506_v28 = vmul.f32 %v19713_v13, %v1456_v24 }
 0x160   : > { %829 = vbcast.lane.b32.xlu0 %v827_v39, 256  ;;  %2677 = vadd.xlane.f32.xlu1 %v2676_v61 }
 0x161   : > { %v2530_v27 = vadd.f32 %v2513_v51, %v2492_v30  ;;  %v1523_v1 = vadd.f32 %v1506_v28, %v19889_v15 }
 0x162   : > { %v1890_v58 = vpop.permute.xlu0 %1889 }
 0x163   : > { %v19995_v41 = vadd.f32 %v19773_v20, %v2530_v27  ;;  %v2011_v24 = vmul.f32 %v19722_v26, %v1890_v58  ;;  %v1977_v7 = vmul.f32 %v19737_v46, %v1890_v58 }
 0x164   : > { %986 = vbcast.lane.b32.xlu0 %v984_v57, 256 }
 0x165   : > { %v2028_v15 = vadd.f32 %v2011_v24, %v1523_v1 }
 0x166   : > { %v2878_v21 = vpop.xlane.xlu0 %2877 }
 0x167   : > { %v2925_v54 = vmul.f32 0.125, %v2878_v21 }
 0x168   : > { %1334 = vbcast.lane.b32.xlu0 %v1332_v33, 256 }
 0x169   : > { %v19977_v25 = vsub.f32 %v19780_v36, %v2925_v54  ;;  %v19988_v36 = vadd.f32 %v19773_v20, %v2417_v60 }
 0x16a   : > { %v2081_v61 = vpop.permute.xlu0 %2080 }
 0x16b   : > { %v2578_v11 = vpop.xlane.xlu1 %2577  ;;  %v2959_v23 = vmul.f32 %v19977_v25, %v19977_v25  ;;  %v2582_v57 = vsel %vm2569_vm0, %v19988_v36, 0.0  ;;  %v2164_v3 = vmul.f32 %v19728_v32, %v2081_v61 }
 0x16c   : > { %v2624_v48 = vmul.f32 0.125, %v2578_v11  ;;  %v2885_v11 = vsel %vm2872_vm1, %v19995_v41, 0.0 }
 0x16d   : > { %v2978_v6 = vsel %vm2872_vm1, %v2959_v23, 0.0  ;;  %v2181_v10 = vadd.f32 %v2164_v3, %v2028_v15 }
 0x16e   : > { %v20002_v19 = vsub.f32 %v19811_v4, %v2624_v48 }
 0x16f   : > { %v19956_v37 = vpop.permute.xlu1 %822 }
 0x170   : > { %v2658_v21 = vmul.f32 %v20002_v19, %v20002_v19  ;;  %v2311_v4 = vmul.f32 %v19742_v47, %v19956_v37 }
 0x171   : > { %1463 = vbcast.lane.b32.xlu1 %v827_v39, 257  ;;  %v1234_v39 = vadd.f32 %v1217_v35, %v1077_v38 }
 0x172   : > { %v2679_v16 = vsel %vm2569_vm0, %v2658_v21, 0.0 }
 0x173   : > { %v19959_v0 = vpop.permute.xlu1 %1136  ;;  %v1680_v33 = vadd.f32 %v1663_v43, %v1234_v39 }
 0x174   : > { %v1252_v45 = vmul.f32 %v19707_v9, %v19959_v0  ;;  %v2435_v44 = vmul.f32 %v19742_v47, %v19959_v0  ;;  %v2401_v2 = vmul.f32 %v19759_v59, %v19959_v0 }
 0x175   : > { %v1837_v22 = vadd.f32 %v1820_v31, %v1680_v33  ;;  %v19443_v31 = vmov 0.0  }
 0x176   : > { %17805 = vmatprep.subr.mxu1 %v19443_v31  ;;  %17796 = vmatprep.subr.mxu0 %v19443_v31 }
 0x177   : > { %v1328_v40 = vpop.permute.xlu1 %1327  ;;  %17811 = vmatprep.mubr.msk.f32.mxu1 %vm19446_vm6, %v19443_v31  ;;  %17802 = vmatprep.mubr.msk.f32.mxu0 %vm19446_vm6, %v19443_v31 }
 0x178   : > { %v1405_v53 = vmul.f32 %v19702_v8, %v1328_v40  ;;  %v2476_v14 = vmul.f32 %v19752_v55, %v1328_v40 }
 0x17a   : > { %v1422_v62 = vadd.f32 %v1405_v53, %v1252_v45  ;;  %v1994_v53 = vadd.f32 %v1977_v7, %v1837_v22  ;;  %v1218_v7 = vmul.f32 %v19713_v13, %v19959_v0 }
 0x17c   : > { %v2328_v54 = vadd.f32 %v2311_v4, %v1994_v53 }
 0x187   : > { %2979 = vadd.xlane.f32.xlu0 %v2978_v6 }
 0x18b   : > { %2583 = vadd.xlane.f32.xlu0 %v2582_v57 }
 0x18e   : > { %v2881_v50 = vpop.xlane.xlu0 %2880 }
 0x18f   : > { %2886 = vadd.xlane.f32.xlu0 %v2885_v11  ;;  %v2926_v12 = vmul.f32 0.125, %v2881_v50  ;;  %v904_v11 = vmul.f32 %v19707_v9, %v19956_v37 }
 0x191   : > { %v20026_v28 = vsub.f32 %v19881_v5, %v2926_v12 }
 0x192   : > { %v2216_v34 = vpop.permute.xlu0 %2215 }
 0x193   : > { %v2266_v45 = vmul.f32 %v19737_v46, %v2216_v34 }
 0x195   : > { %v2283_v52 = vadd.f32 %v2266_v45, %v2181_v10  ;;  %2680 = vadd.xlane.f32.xlu1 %v2679_v16 }
 0x196   : > { %v980_v58 = vpop.permute.xlu0 %979 }
 0x197   : > { %v2452_v42 = vadd.f32 %v2435_v44, %v2283_v52  ;;  %v2356_v63 = vmul.f32 %v19752_v55, %v980_v58  ;;  %v1061_v24 = vmul.f32 %v19702_v8, %v980_v58 }
 0x199   : > { %v2373_v49 = vadd.f32 %v2356_v63, %v2328_v54  ;;  %v2493_v51 = vadd.f32 %v2476_v14, %v2452_v42 }
 0x19a   : > { %v1460_v30 = vpop.permute.xlu0 %1459 }
 0x19b   : > { %v1507_v23 = vmul.f32 %v19713_v13, %v1460_v30  ;;  %v2514_v60 = vmul.f32 %v19759_v59, %v1460_v30  ;;  %v2418_v35 = vadd.f32 %v2401_v2, %v2373_v49 }
 0x19d   : > { %v1524_v38 = vadd.f32 %v1507_v23, %v1422_v62  ;;  %v2531_v6 = vadd.f32 %v2514_v60, %v2493_v51  ;;  %v20023_v27 = vadd.f32 %v19773_v20, %v2418_v35  ;;  %v2960_v62 = vmul.f32 %v20026_v28, %v20026_v28 }
 0x19f   : > { %v2585_v40 = vsel %vm2569_vm0, %v20023_v27, 0.0  ;;  %v20031_v39 = vadd.f32 %v19773_v20, %v2531_v6  ;;  %v2981_v48 = vsel %vm2872_vm1, %v2960_v62, 0.0 }
 0x1a0   : > { %2586 = vadd.xlane.f32.xlu0 %v2585_v40 }
 0x1a1   : > { %v2888_v43 = vsel %vm2872_vm1, %v20031_v39, 0.0 }
 0x1a4   : > { %2889 = vadd.xlane.f32.xlu0 %v2888_v43 }
 0x1a8   : > { %2982 = vadd.xlane.f32.xlu0 %v2981_v48  ;;  %v2581_v61 = vpop.xlane.xlu1 %2580 }
 0x1a9   : > { %v2625_v5 = vmul.f32 0.125, %v2581_v61 }
 0x1ab   : > { %v20039_v57 = vsub.f32 %v19908_v56, %v2625_v5  ;;  %v1078_v56 = vadd.f32 %v1061_v24, %v904_v11 }
 0x1ac   : > { %v1897_v50 = vpop.permute.xlu1 %1896 }
 0x1ad   : > { %v2659_v1 = vmul.f32 %v20039_v57, %v20039_v57  ;;  %v1235_v10 = vadd.f32 %v1218_v7, %v1078_v56  ;;  %v2012_v49 = vmul.f32 %v19722_v26, %v1897_v50 }
 0x1af   : > { %v2682_v33 = vsel %vm2569_vm0, %v2659_v1, 0.0  ;;  %v2029_v23 = vadd.f32 %v2012_v49, %v1524_v38 }
 0x1b0   : > { %2683 = vadd.xlane.f32.xlu0 %v2682_v33  ;;  %v1740_v21 = vpop.permute.xlu1 %1739 }
 0x1b1   : > { %v1821_v53 = vmul.f32 %v19728_v32, %v1740_v21 }
 0x1b4   : > { %v2220_v44 = vpop.permute.xlu1 %2219 }
 0x1b5   : > { %v2267_v6 = vmul.f32 %v19737_v46, %v2220_v44 }
 0x1b8   : > { %v1144_v58 = vpop.permute.xlu1 %1143 }
 0x1b9   : > { %v2402_v2 = vmul.f32 %v19759_v59, %v1144_v58  ;;  %v2436_v48 = vmul.f32 %v19742_v47, %v1144_v58 }
 0x1cb   : > { %v2884_v3 = vpop.xlane.xlu0 %2883 }
 0x1cc   : > { %v2927_v22 = vmul.f32 0.125, %v2884_v3 }
 0x1ce   : > { %v20052_v15 = vsub.f32 %v19939_v29, %v2927_v22  ;;  %v1978_v29 = vmul.f32 %v19737_v46, %v1897_v50 }
 0x1cf   : > { %v1583_v34 = vpop.permute.xlu0 %1582 }
 0x1d0   : > { %v1664_v4 = vmul.f32 %v19722_v26, %v1583_v34  ;;  %v2961_v8 = vmul.f32 %v20052_v15, %v20052_v15 }
 0x1d2   : > { %v1681_v45 = vadd.f32 %v1664_v4, %v1235_v10  ;;  %v2984_v9 = vsel %vm2872_vm1, %v2961_v8, 0.0 }
 0x1d3   : > { %2985 = vadd.xlane.f32.xlu0 %v2984_v9  ;;  %v2088_v37 = vpop.permute.xlu0 %2087 }
 0x1d4   : > { %v1838_v13 = vadd.f32 %v1821_v53, %v1681_v45  ;;  %v2165_v30 = vmul.f32 %v19728_v32, %v2088_v37 }
 0x1d6   : > { %v1995_v16 = vadd.f32 %v1978_v29, %v1838_v13  ;;  %v2182_v35 = vadd.f32 %v2165_v30, %v2029_v23  ;;  %v20114_v30 = vld [vmem:[%s22359_s6] ss:$0 sm:$0xff] }
 0x1d7   : > { %v830_v0 = vpop.permute.xlu0 %829 }
 0x1d8   : > { %v2312_v52 = vmul.f32 %v19742_v47, %v830_v0  ;;  %v2284_v43 = vadd.f32 %v2267_v6, %v2182_v35 }
 0x1da   : > { %v2329_v42 = vadd.f32 %v2312_v52, %v1995_v16  ;;  %v2453_v61 = vadd.f32 %v2436_v48, %v2284_v43 }
 0x1db   : > { %v987_v54 = vpop.permute.xlu0 %986 }
 0x1dc   : > { %v2357_v63 = vmul.f32 %v19752_v55, %v987_v54 }
 0x1de   : > { %v2374_v14 = vadd.f32 %v2357_v63, %v2329_v42 }
 0x1df   : > { %v1335_v40 = vpop.permute.xlu0 %1334 }
 0x1e0   : > { %v2419_v12 = vadd.f32 %v2402_v2, %v2374_v14  ;;  %v2477_v26 = vmul.f32 %v19752_v55, %v1335_v40 }
 0x1e2   : > { %v20066_v51 = vadd.f32 %v19773_v20, %v2419_v12  ;;  %v2494_v5 = vadd.f32 %v2477_v26, %v2453_v61 }
 0x1e4   : > { %v2588_v60 = vsel %vm2569_vm0, %v20066_v51, 0.0 }
 0x1e5   : > { %2589 = vadd.xlane.f32.xlu0 %v2588_v60 }
 0x1e9   : > { %v2678_v62 = vpop.xlane.xlu1 %2677 }
 0x1ea   : > { %v2725_v22 = vmul.f32 0.125, %v2678_v62  ;;  %v17155_v62 = vld [vmem:[%s22374_s3 + $0x18] sm:$0xff] }
 0x1eb   : > { %v20146_v61 = vand.u32 4294901760, %v17155_v62 }
 0x1ed   : > { %v1464_v32 = vpop.permute.xlu1 %1463 }
 0x1ee   : > { %v2515_v1 = vmul.f32 %v19759_v59, %v1464_v32  ;;  %v20150_v32 = vrot.slane %v19443_v31, 1 }
 0x1f0   : > { %v2532_v38 = vadd.f32 %v2515_v1, %v2494_v5 }
 0x1f2   : > { %v20075_v33 = vadd.f32 %v19773_v20, %v2532_v38 }
 0x1f4   : > { %v2891_v24 = vsel %vm2872_vm1, %v20075_v33, 0.0 }
 0x1f5   : > { %2892 = vadd.xlane.f32.xlu0 %v2891_v24 }
 0x210   : > { %v2980_v46 = vpop.xlane.xlu0 %2979 }
 0x211   : > { %v3027_v4 = vmul.f32 0.125, %v2980_v46 }
 0x213   : > { %v3044_v45 = vadd.f32 1e-06, %v3027_v4 }
 0x214   : > { %v2584_v50 = vpop.xlane.xlu0 %2583 }
 0x215   : > { %v2626_v11 = vmul.f32 0.125, %v2584_v50 }
 0x217   : > { %v20080_v47 = vsub.f32 %v19988_v36, %v2626_v11  ;;  %v2742_v36 = vadd.f32 1e-06, %v2725_v22  ;;  %v20165_v11 = vsub.f32 %v17155_v62, %v20146_v61 }
 0x218   : > { %v2887_v55 = vpop.xlane.xlu0 %2886 }
 0x219   : > { %v2928_v3 = vmul.f32 0.125, %v2887_v55  ;;  %v2660_v56 = vmul.f32 %v20080_v47, %v20080_v47  ;;  %19304 = vrsqrt.f32 %v2742_v36  ;;  %v20175_v22 = vand.u32 4294901760, %v20165_v11 }
 0x21b   : > { %v20085_v59 = vsub.f32 %v19995_v41, %v2928_v3  ;;  %v2685_v20 = vsel %vm2569_vm0, %v2660_v56, 0.0 }
 0x21c   : > { %2686 = vadd.xlane.f32.xlu0 %v2685_v20 }
 0x21d   : > { %v2962_v7 = vmul.f32 %v20085_v59, %v20085_v59 }
 0x21e   : > { %v2681_v21 = vpop.xlane.xlu1 %2680 }
 0x21f   : > { %v2987_v34 = vsel %vm2872_vm1, %v2962_v7, 0.0  ;;  %v2726_v10 = vmul.f32 0.125, %v2681_v21 }
 0x220   : > { %2988 = vadd.xlane.f32.xlu0 %v2987_v34 }
 0x221   : > { %v2743_v8 = vadd.f32 1e-06, %v2726_v10  ;;  %v3466_v10 = vsub.f32 %v20165_v11, %v20175_v22 }
 0x223   : > { %19306 = vrsqrt.f32 %v2743_v8 }
 0x224   : > { %19308 = vrsqrt.f32 %v3044_v45  ;;  %v20196_v45 = vand.u32 4294901760, %v3466_v10 }
 0x226   : > { %v19305_v16 = vpop.eup %19304 }
 0x227   : > { %v2776_v63 = vmul.f32 %v19305_v16, %v19948_v18  ;;  %v17157_v18 = vld [vmem:[%s22374_s3 + $0x28] sm:$0xff] }
 0x228   : > { %v20120_v60 = vand.u32 4294901760, %v17157_v18 }
 0x229   : > { %v2587_v41 = vpop.xlane.xlu0 %2586 }
 0x22a   : > { %v2627_v9 = vmul.f32 0.125, %v2587_v41  ;;  %v20129_v43 = vsub.f32 %v17157_v18, %v20120_v60  ;;  %17797 = vmatpush3.msra.mxu0 %v20120_v60 }
 0x22b   : > { %17798 = vmatprep.subr.mxu0 %v19443_v31 }
 0x22c   : > { %v20092_v37 = vsub.f32 %v20023_v27, %v2627_v9  ;;  %v20141_v48 = vand.u32 4294901760, %v20129_v43 }
 0x22d   : > { %v2890_v53 = vpop.xlane.xlu0 %2889 }
 0x22e   : > { %v2929_v44 = vmul.f32 0.125, %v2890_v53  ;;  %v2661_v13 = vmul.f32 %v20092_v37, %v20092_v37  ;;  %v3452_v46 = vsub.f32 %v20129_v43, %v20141_v48 }
 0x230   : > { %v20097_v0 = vsub.f32 %v20031_v39, %v2929_v44  ;;  %v2688_v29 = vsel %vm2569_vm0, %v2661_v13, 0.0  ;;  %v19307_v2 = vpop.eup %19306  ;;  %v20107_v39 = vld [vmem:[%s22358_s5] ss:$0 sm:$0xff]  ;;  %v20170_v56 = vand.u32 4294901760, %v3452_v46 }
 0x231   : > { %2689 = vadd.xlane.f32.xlu0 %v2688_v29  ;;  %v2983_v52 = vpop.xlane.xlu0 %2982  ;;  %v19309_v14 = vpop.eup %19308  ;;  %v2799_v49 = vmul.f32 %v20107_v39, %v2776_v63  ;;  %v2777_v12 = vmul.f32 %v19307_v2, %v20002_v19  ;;  %v17156_v19 = vld [vmem:[%s22374_s3 + $0x20] sm:$0xff] }
 0x232   : > { %v3028_v58 = vmul.f32 0.125, %v2983_v52  ;;  %v2963_v54 = vmul.f32 %v20097_v0, %v20097_v0  ;;  %v3078_v23 = vmul.f32 %v19309_v14, %v19977_v25  ;;  %v20131_v25 = vand.u32 4294901760, %v17156_v19  ;;  %17806 = vmatpush3.msra.mxu1 %v20170_v56 }
 0x233   : > { %v2822_v35 = vadd.f32 %v20114_v30, %v2799_v49  ;;  %v2800_v6 = vmul.f32 %v20107_v39, %v2777_v12  ;;  %17807 = vmatprep.subr.mxu1 %v19443_v31 }
 0x234   : > { %v3045_v42 = vadd.f32 1e-06, %v3028_v58  ;;  %v2990_v27 = vsel %vm2872_vm1, %v2963_v54, 0.0  ;;  %v3095_v40 = vmul.f32 %v20107_v39, %v3078_v23  ;;  %v20144_v26 = vsub.f32 %v17156_v19, %v20131_v25  ;;  %17799 = vmatpush3.msra.mxu0 %v20131_v25 }
 0x235   : > { %2991 = vadd.xlane.f32.xlu1 %v2990_v27  ;;  %v2839_v5 = vmax.f32 %v2822_v35, 0.0  ;;  %v2823_v1 = vadd.f32 %v20114_v30, %v2800_v6  ;;  %17800 = vmatprep.subr.mxu0 %v19443_v31 }
 0x236   : > { %19310 = vrsqrt.f32 %v3045_v42  ;;  %v3112_v24 = vadd.f32 %v20114_v30, %v3095_v40  ;;  %v20162_v50 = vand.u32 4294901760, %v20144_v26  ;;  %17801 = vmatpush3.msra.mxu0 %v20146_v61 }
 0x237   : > { %17814 = vmatprep.subr.mxu0 %v19443_v31  ;;  %v20179_v7 = vsel %vm20154_vm4, %v2839_v5, 0.0  ;;  %v2840_v21 = vmax.f32 %v2823_v1, 0.0 }
 0x238   : > { %v3459_v20 = vsub.f32 %v20144_v26, %v20162_v50  ;;  %v3129_v34 = vmax.f32 %v3112_v24, 0.0  ;;  %v3334_v4 = vrot.slane %v20179_v7, 1 }
 0x239   : > { %v20200_v41 = vsel %vm20154_vm4, %v2840_v21, 0.0  ;;  %v2684_v29 = vpop.xlane.xlu0 %2683 }
 0x23a   : > { %v20185_v36 = vand.u32 4294901760, %v3459_v20  ;;  %v3289_v9 = vsel %vm3270_vm5, %v3129_v34, 0.0  ;;  %v4296_v44 = vrot.slane %v20200_v41, 1  ;;  %v2727_v54 = vmul.f32 0.125, %v2684_v29 }
 0x23c   : > { %17808 = vmatpush3.msra.mxu1 %v20185_v36  ;;  %v2744_v27 = vadd.f32 1e-06, %v2727_v54 }
 0x23d   : > { %17809 = vmatprep.subr.mxu1 %v19443_v31 }
 0x23e   : > { %17810 = vmatpush3.msra.mxu1 %v20196_v45 }
 0x23f   : > { %17823 = vmatprep.subr.mxu1 %v19443_v31 }
 0x243   : > { %v19311_v55 = vpop.eup %19310 }
 0x244   : > { %v3079_v3 = vmul.f32 %v19311_v55, %v20026_v28 }
 0x246   : > { %3322 = vrot.lane.b32.xlu1 %v20150_v32, %s19444_s15  ;;  %v3096_v28 = vmul.f32 %v20107_v39, %v3079_v3 }
 0x247   : > { %3317 = vrot.lane.b32.xlu0 %v19443_v31, %s19445_s16 }
 0x248   : > { %v3113_v8 = vadd.f32 %v20114_v30, %v3096_v28 }
 0x24a   : > { %3335 = vrot.lane.b32.xlu1 %v3334_v4, %s19444_s15  ;;  %v3130_v53 = vmax.f32 %v3113_v8, 0.0 }
 0x24b   : > { %3330 = vrot.lane.b32.xlu0 %v3289_v9, %s19445_s16 }
 0x24c   : > { %v3290_v13 = vsel %vm3270_vm5, %v3130_v53, 0.0 }
 0x24e   : > { %4297 = vrot.lane.b32.xlu1 %v4296_v44, %s19444_s15 }
 0x24f   : > { %4292 = vrot.lane.b32.xlu0 %v3290_v13, %s19445_s16 }
 0x25c   : > { %v2986_v52 = vpop.xlane.xlu0 %2985 }
 0x25d   : > { %v3029_v16 = vmul.f32 0.125, %v2986_v52 }
 0x25f   : > { %v3046_v58 = vadd.f32 1e-06, %v3029_v16 }
 0x261   : > { %19312 = vrsqrt.f32 %v3046_v58 }
 0x262   : > { %19314 = vrsqrt.f32 %v2744_v27 }
 0x26e   : > { %v2590_v42 = vpop.xlane.xlu0 %2589  ;;  %v19313_v12 = vpop.eup %19312 }
 0x26f   : > { %v2628_v63 = vmul.f32 0.125, %v2590_v42  ;;  %v3080_v23 = vmul.f32 %v19313_v12, %v20052_v15  ;;  %v19315_v6 = vpop.eup %19314 }
 0x270   : > { %v2778_v62 = vmul.f32 %v19315_v6, %v20039_v57 }
 0x271   : > { %v20219_v2 = vsub.f32 %v20066_v51, %v2628_v63  ;;  %v3097_v35 = vmul.f32 %v20107_v39, %v3080_v23 }
 0x272   : > { %v2801_v15 = vmul.f32 %v20107_v39, %v2778_v62  ;;  %v3306_v62 = vld [vmem:[%s22374_s3 + $0x8] sm:$0xff] }
 0x273   : > { %v2662_v14 = vmul.f32 %v20219_v2, %v20219_v2  ;;  %v3114_v51 = vadd.f32 %v20114_v30, %v3097_v35 }
 0x274   : > { %v2824_v55 = vadd.f32 %v20114_v30, %v2801_v15 }
 0x275   : > { %v2691_v49 = vsel %vm2569_vm0, %v2662_v14, 0.0  ;;  %v3131_v24 = vmax.f32 %v3114_v51, 0.0  ;;  %vm15080_vm0 = vcmask 1047559  }
 0x276   : > { %2692 = vadd.xlane.f32.xlu0 %v2691_v49 }
 0x277   : > { %v3291_v46 = vsel %vm3270_vm5, %v3131_v24, 0.0 }
 0x27e   : > { %v2893_v18 = vpop.xlane.xlu0 %2892 }
 0x27f   : > { %v2930_v19 = vmul.f32 0.125, %v2893_v18 }
 0x281   : > { %v20227_v40 = vsub.f32 %v20075_v33, %v2930_v19  ;;  %v2841_v33 = vmax.f32 %v2824_v55, 0.0  ;;  %v3305_v55 = vld [vmem:[%s22374_s3] sm:$0xff] }
 0x283   : > { %v2964_v5 = vmul.f32 %v20227_v40, %v20227_v40  ;;  %v20241_v57 = vsel %vm20154_vm4, %v2841_v33, 0.0 }
 0x284   : > { %v4821_v3 = vrot.slane %v20241_v57, 1 }
 0x285   : > { %v2993_v1 = vsel %vm2872_vm1, %v2964_v5, 0.0 }
 0x286   : > { %2994 = vadd.xlane.f32.xlu1 %v2993_v1 }
 0x28c   : > { %4817 = vrot.lane.b32.xlu0 %v3291_v46, %s19445_s16  ;;  %v20272_v46 = vand.u32 4294901760, %v3306_v62 }
 0x297   : > { %4822 = vrot.lane.b32.xlu1 %v4821_v3, %s19444_s15 }
 0x2a5   : > { %v2687_v20 = vpop.xlane.xlu0 %2686 }
 0x2a6   : > { %v2728_v21 = vmul.f32 0.125, %v2687_v20 }
 0x2a8   : > { %v2745_v34 = vadd.f32 1e-06, %v2728_v21 }
 0x2a9   : > { %v2989_v28 = vpop.xlane.xlu0 %2988 }
 0x2aa   : > { %19316 = vrsqrt.f32 %v2745_v34  ;;  %v3030_v10 = vmul.f32 0.125, %v2989_v28  ;;  %v20290_v34 = vsub.f32 %v3306_v62, %v20272_v46 }
 0x2ac   : > { %v3047_v4 = vadd.f32 1e-06, %v3030_v10 }
 0x2ae   : > { %19318 = vrsqrt.f32 %v3047_v4 }
 0x2b7   : > { %v19317_v8 = vpop.eup %19316 }
 0x2b8   : > { %v2779_v9 = vmul.f32 %v19317_v8, %v20080_v47 }
 0x2ba   : > { %v2690_v53 = vpop.xlane.xlu0 %2689  ;;  %v2802_v44 = vmul.f32 %v20107_v39, %v2779_v9 }
 0x2bb   : > { %v19319_v13 = vpop.eup %19318  ;;  %v2729_v29 = vmul.f32 0.125, %v2690_v53 }
 0x2bc   : > { %v2825_v52 = vadd.f32 %v20114_v30, %v2802_v44  ;;  %v3081_v16 = vmul.f32 %v19319_v13, %v20085_v59  ;;  %v3307_v59 = vld [vmem:[%s22374_s3 + $0x10] sm:$0xff] }
 0x2bd   : > { %v2746_v58 = vadd.f32 1e-06, %v2729_v29  ;;  %v20263_v51 = vand.u32 4294901760, %v3307_v59  ;;  %v20306_v29 = vand.u32 4294901760, %v20290_v34 }
 0x2be   : > { %v2992_v54 = vpop.xlane.xlu1 %2991  ;;  %v3318_v42 = vpop.permute.xlu0 %3317  ;;  %v2842_v27 = vmax.f32 %v2825_v52, 0.0  ;;  %v3098_v63 = vmul.f32 %v20107_v39, %v3081_v16 }
 0x2bf   : > { %19320 = vrsqrt.f32 %v2746_v58  ;;  %v3031_v14 = vmul.f32 0.125, %v2992_v54  ;;  %v20280_v3 = vsub.f32 %v3307_v59, %v20263_v51  ;;  %v3326_v13 = vsel %vm3325_vm7, 0.0, %v3318_v42 }
 0x2c0   : > { %v20252_v47 = vsel %vm20154_vm4, %v2842_v27, 0.0  ;;  %v3115_v49 = vadd.f32 %v20114_v30, %v3098_v63 }
 0x2c1   : > { %v3048_v12 = vadd.f32 1e-06, %v3031_v14  ;;  %v5779_v23 = vrot.slane %v20252_v47, 1  ;;  %v20294_v10 = vand.u32 4294901760, %v20280_v3 }
 0x2c2   : > { %v3323_v18 = vpop.permute.xlu1 %3322  ;;  %v3132_v35 = vmax.f32 %v3115_v49, 0.0  ;;  %v3331_v6 = vpop.permute.xlu0 %3330 }
 0x2c3   : > { %19322 = vrsqrt.f32 %v3048_v12  ;;  %5780 = vrot.lane.b32.xlu1 %v5779_v23, %s19444_s15  ;;  %v3338_v5 = vsel %vm3325_vm7, %v20179_v7, %v3331_v6  ;;  %v20284_v7 = vand.u32 4294901760, %v3305_v55  ;;  %v3927_v52 = vsub.f32 %v20280_v3, %v20294_v10 }
 0x2c4   : > { %v3292_v19 = vsel %vm3270_vm5, %v3132_v35, 0.0  ;;  %v3328_v54 = vsel %vm3327_vm8, %v3326_v13, %v3323_v18 }
 0x2c5   : > { %5775 = vrot.lane.b32.xlu0 %v3292_v19, %s19445_s16  ;;  %v20301_v53 = vsub.f32 %v3305_v55, %v20284_v7  ;;  %v20328_v14 = vand.u32 4294901760, %v3927_v52  ;;  %v3817_v23 = vsel %vm3340_vm9, %v3328_v54, 0  ;;  %v17159_v55 = vld [vmem:[%s22374_s3 + $0x38] sm:$0xff] }
 0x2c6   : > { %v3336_v1 = vpop.permute.xlu1 %3335  ;;  %v20347_v19 = vand.u32 4294901760, %v3817_v23  ;;  %v4293_v13 = vpop.permute.xlu0 %4292 }
 0x2c7   : > { %v3339_v24 = vsel %vm3327_vm8, %v3338_v5, %v3336_v1  ;;  %v20320_v63 = vand.u32 4294901760, %v20301_v53  ;;  %v17160_v1 = vld [vmem:[%s22374_s3 + $0x40] sm:$0xff]  ;;  %v4300_v54 = vsel %vm3325_vm7, %v20200_v41, %v4293_v13 }
 0x2c8   : > { %v3342_v15 = vsel %vm3340_vm9, %v3339_v24, 0  ;;  %v20365_v24 = vsub.f32 %v3817_v23, %v20347_v19 }
 0x2c9   : > { %v20277_v33 = vand.u32 4294901760, %v3342_v15  ;;  %v3941_v59 = vsub.f32 %v20301_v53, %v20320_v63 }
 0x2ca   : > { %v4298_v52 = vpop.permute.xlu1 %4297 }
 0x2cb   : > { %v3413_v20 = vsub.f32 %v3342_v15, %v20277_v33  ;;  %17812 = vmatmul.mubr.f32.vlgmr.msra.gmra.mxu1 %v20277_v33  ;;  %v20357_v5 = vand.u32 4294901760, %v3941_v59  ;;  %v20371_v15 = vand.u32 4294901760, %v17160_v1 }
 0x2cc   : > { %v19321_v21 = vpop.eup %19320  ;;  %17824 = vmatpush3.msra.mxu1 %v20120_v60  ;;  %17829 = vmatprep.mubr.msk.f32.mxu1 %vm19446_vm6, %v19443_v31 }
 0x2cd   : > { %17825 = vmatprep.subr.mxu1 %v19443_v31  ;;  %v3414_v28 = vand.u32 4294901760, %v3413_v20  ;;  %v2780_v4 = vmul.f32 %v19321_v21, %v20092_v37  ;;  %v3889_v21 = vand.u32 4294901760, %v20365_v24 }
 0x2ce   : > { %17826 = vmatpush3.msra.mxu1 %v20131_v25 }
 0x2cf   : > { %17827 = vmatprep.subr.mxu1 %v19443_v31  ;;  %v3415_v8 = vsub.f32 %v3413_v20, %v3414_v28  ;;  %v2803_v9 = vmul.f32 %v20107_v39, %v2780_v4  ;;  %v20393_v4 = vsub.f32 %v17160_v1, %v20371_v15 }
 0x2d0   : > { %v19323_v44 = vpop.eup %19322  ;;  %17828 = vmatpush3.msra.mxu1 %v20146_v61 }
 0x2d1   : > { %17830 = vmatmul.mubr.f32.vlgmr.msra.gmra.mxu1 %v3414_v28  ;;  %17841 = vmatprep.subr.mxu1 %v19443_v31  ;;  %v3416_v37 = vand.u32 4294901760, %v3415_v8  ;;  %v2826_v16 = vadd.f32 %v20114_v30, %v2803_v9  ;;  %v3082_v58 = vmul.f32 %v19323_v44, %v20097_v0  ;;  %v3934_v0 = vsub.f32 %v20290_v34, %v20306_v29 }
 0x2d2   : > { %17842 = vmatpush3.msra.mxu1 %v20120_v60  ;;  %17847 = vmatprep.mubr.msk.f32.mxu1 %vm19446_vm6, %v19443_v31  ;;  %v20387_v28 = vand.u32 4294901760, %v17159_v55  ;;  %v3890_v9 = vsub.f32 %v20365_v24, %v3889_v21 }
 0x2d3   : > { %17843 = vmatprep.subr.mxu1 %v19443_v31  ;;  %17803 = vmatmul.mubr.f32.vlgmr.msra.gmra.mxu0 %v3416_v37  ;;  %v2843_v42 = vmax.f32 %v2826_v16, 0.0  ;;  %v3099_v27 = vmul.f32 %v20107_v39, %v3082_v58  ;;  %v20345_v6 = vand.u32 4294901760, %v3934_v0 }
 0x2d4   : > { %17815 = vmatpush3.msra.mxu0 %v20129_v43  ;;  %17844 = vmatpush3.msra.mxu1 %v20131_v25  ;;  %v20405_v44 = vsub.f32 %v17159_v55, %v20387_v28  ;;  %v3891_v16 = vand.u32 4294901760, %v3890_v9 }
 0x2d5   : > { %17816 = vmatprep.subr.mxu0 %v19443_v31  ;;  %17845 = vmatprep.subr.mxu1 %v19443_v31  ;;  %v20332_v49 = vsel %vm20154_vm4, %v2843_v42, 0.0  ;;  %v3116_v12 = vadd.f32 %v20114_v30, %v3099_v27  ;;  %v4301_v27 = vsel %vm3327_vm8, %v4300_v54, %v4298_v52 }
 0x2d6   : > { %17817 = vmatpush3.msra.mxu0 %v20144_v26  ;;  %17846 = vmatpush3.msra.mxu1 %v20146_v61  ;;  %v6283_v18 = vrot.slane %v20332_v49, 1  ;;  %v20422_v58 = vand.u32 4294901760, %v20405_v44 }
 0x2d7   : > { %17818 = vmatprep.subr.mxu0 %v19443_v31  ;;  %17848 = vmatmul.mubr.f32.vlgmr.msra.gmra.mxu1 %v20277_v33  ;;  %v3133_v35 = vmax.f32 %v3116_v12, 0.0  ;;  %v4303_v12 = vsel %vm3340_vm9, %v4301_v27, 0 }
 0x2d8   : > { %17859 = vmatprep.subr.mxu1 %v19443_v31  ;;  %17819 = vmatpush3.msra.mxu0 %v20165_v11  ;;  %v4420_v41 = vsub.f32 %v20405_v44, %v20422_v58 }
 0x2d9   : > { %17820 = vmatprep.mubr.msk.f32.mxu0 %vm19446_vm6, %v19443_v31  ;;  %17860 = vmatpush3.msra.mxu1 %v20328_v14  ;;  %v3293_v62 = vsel %vm3270_vm5, %v3133_v35, 0.0  ;;  %v20454_v35 = vand.u32 4294901760, %v4303_v12 }
 0x2da   : > { %6284 = vrot.lane.b32.xlu1 %v6283_v18, %s19444_s15  ;;  %17821 = vmatmul.mubr.f32.vlgmr.msra.gmra.mxu0 %v3413_v20  ;;  %v17158_v20 = vld [vmem:[%s22374_s3 + $0x30] sm:$0xff]  ;;  %v20458_v59 = vand.u32 4294901760, %v4420_v41 }
 0x2db   : > { %17832 = vmatprep.subr.mxu0 %v19443_v31  ;;  %17861 = vmatprep.subr.mxu1 %v19443_v31  ;;  %v20397_v8 = vand.u32 4294901760, %v17158_v20  ;;  %v20470_v1 = vsub.f32 %v4303_v12, %v20454_v35 }
 0x2dc   : > { %17833 = vmatpush3.msra.mxu0 %v20141_v48  ;;  %17862 = vmatpush3.msra.mxu1 %v20345_v6 }
 0x2dd   : > { %6279 = vrot.lane.b32.xlu0 %v3293_v62, %s19445_s16  ;;  %17834 = vmatprep.subr.mxu0 %v19443_v31  ;;  %v20416_v37 = vsub.f32 %v17158_v20, %v20397_v8 }
 0x2de   : > { %17863 = vmatprep.subr.mxu1 %v19443_v31  ;;  %17835 = vmatpush3.msra.mxu0 %v20162_v50 }
 0x2df   : > { %17864 = vmatpush3.msra.mxu1 %v20357_v5  ;;  %17865 = vmatprep.mubr.msk.f32.mxu1 %vm19446_vm6, %v19443_v31  ;;  %v20434_v0 = vand.u32 4294901760, %v20416_v37 }
 0x2e0   : > { %17836 = vmatprep.subr.mxu0 %v19443_v31  ;;  %17866 = vmatmul.mubr.f32.vlgmr.msra.gmra.mxu1 %v20347_v19 }
 0x2e1   : > { %17877 = vmatprep.subr.mxu1 %v19443_v31  ;;  %17837 = vmatpush3.msra.mxu0 %v20175_v22  ;;  %v4427_v18 = vsub.f32 %v20416_v37, %v20434_v0 }
 0x2e2   : > { %17838 = vmatprep.mubr.msk.f32.mxu0 %vm19446_vm6, %v19443_v31  ;;  %17878 = vmatpush3.msra.mxu1 %v20263_v51 }
 0x2e3   : > { %17839 = vmatmul.mubr.f32.vlgmr.msra.gmra.mxu0 %v20277_v33  ;;  %17850 = vmatprep.subr.mxu0 %v19443_v31  ;;  %v20410_v33 = vand.u32 4294901760, %v20393_v4  ;;  %v20465_v62 = vand.u32 4294901760, %v4427_v18 }
 0x2e4   : > { %17879 = vmatprep.subr.mxu1 %v19443_v31  ;;  %17851 = vmatpush3.msra.mxu0 %v20263_v51 }
 0x2e5   : > { %17880 = vmatpush3.msra.mxu1 %v20272_v46  ;;  %17852 = vmatprep.subr.mxu0 %v19443_v31  ;;  %v4413_v42 = vsub.f32 %v20393_v4, %v20410_v33 }
 0x2e6   : > { %17881 = vmatprep.subr.mxu1 %v19443_v31  ;;  %17853 = vmatpush3.msra.mxu0 %v20272_v46 }
 0x2e7   : > { %17882 = vmatpush3.msra.mxu1 %v20284_v7  ;;  %17883 = vmatprep.mubr.msk.f32.mxu1 %vm19446_vm6, %v19443_v31  ;;  %v20445_v23 = vand.u32 4294901760, %v4413_v42 }
 0x2e8   : > { %17854 = vmatprep.subr.mxu0 %v19443_v31  ;;  %17884 = vmatmul.mubr.f32.vlgmr.msra.gmra.mxu1 %v3889_v21 }
 0x2e9   : > { %17895 = vmatprep.subr.mxu1 %v19443_v31  ;;  %17855 = vmatpush3.msra.mxu0 %v20284_v7 }
 0x2ea   : > { %17856 = vmatprep.mubr.msk.f32.mxu0 %vm19446_vm6, %v19443_v31  ;;  %17896 = vmatpush3.msra.mxu1 %v20263_v51 }
 0x2eb   : > { %17857 = vmatmul.mubr.f32.vlgmr.msra.gmra.mxu0 %v3891_v16  ;;  %17868 = vmatprep.subr.mxu0 %v19443_v31 }
 0x2ec   : > { %17897 = vmatprep.subr.mxu1 %v19443_v31  ;;  %17869 = vmatpush3.msra.mxu0 %v20280_v3 }
 0x2ed   : > { %17898 = vmatpush3.msra.mxu1 %v20272_v46  ;;  %17870 = vmatprep.subr.mxu0 %v19443_v31 }
 0x2ee   : > { %17899 = vmatprep.subr.mxu1 %v19443_v31  ;;  %17871 = vmatpush3.msra.mxu0 %v20290_v34 }
 0x2ef   : > { %17900 = vmatpush3.msra.mxu1 %v20284_v7  ;;  %17901 = vmatprep.mubr.msk.f32.mxu1 %vm19446_vm6, %v19443_v31 }
 0x2f0   : > { %17872 = vmatprep.subr.mxu0 %v19443_v31  ;;  %17902 = vmatmul.mubr.f32.vlgmr.msra.gmra.mxu1 %v20347_v19 }
 0x2f1   : > { %17913 = vmatprep.subr.mxu1 %v19443_v31  ;;  %17873 = vmatpush3.msra.mxu0 %v20301_v53 }
 0x2f2   : > { %17874 = vmatprep.mubr.msk.f32.mxu0 %vm19446_vm6, %v19443_v31  ;;  %17914 = vmatpush3.msra.mxu1 %v20445_v23 }
 0x2f3   : > { %17875 = vmatmul.mubr.f32.vlgmr.msra.gmra.mxu0 %v20365_v24  ;;  %17886 = vmatprep.subr.mxu0 %v19443_v31  ;;  %v20484_v24 = vand.u32 4294901760, %v20470_v1 }
 0x2f4   : > { %17915 = vmatprep.subr.mxu1 %v19443_v31  ;;  %17887 = vmatpush3.msra.mxu0 %v20294_v10 }
 0x2f5   : > { %17916 = vmatpush3.msra.mxu1 %v20458_v59  ;;  %17888 = vmatprep.subr.mxu0 %v19443_v31  ;;  %v4376_v55 = vsub.f32 %v20470_v1, %v20484_v24 }
 0x2f6   : > { %17917 = vmatprep.subr.mxu1 %v19443_v31  ;;  %17889 = vmatpush3.msra.mxu0 %v20306_v29 }
 0x2f7   : > { %17918 = vmatpush3.msra.mxu1 %v20465_v62  ;;  %17919 = vmatprep.mubr.msk.f32.mxu1 %vm19446_vm6, %v19443_v31  ;;  %v20506_v21 = vand.u32 4294901760, %v4376_v55 }
 0x2f8   : > { %17890 = vmatprep.subr.mxu0 %v19443_v31  ;;  %17920 = vmatmul.mubr.f32.vlgmr.msra.gmra.mxu1 %v20454_v35 }
 0x2f9   : > { %17931 = vmatprep.subr.mxu1 %v19443_v31  ;;  %17891 = vmatpush3.msra.mxu0 %v20320_v63 }
 0x2fa   : > { %17892 = vmatprep.mubr.msk.f32.mxu0 %vm19446_vm6, %v19443_v31  ;;  %17932 = vmatpush3.msra.mxu1 %v20371_v15 }
 0x2fb   : > { %17893 = vmatmul.mubr.f32.vlgmr.msra.gmra.mxu0 %v20347_v19  ;;  %17904 = vmatprep.subr.mxu0 %v19443_v31 }
 0x2fc   : > { %17933 = vmatprep.subr.mxu1 %v19443_v31  ;;  %17905 = vmatpush3.msra.mxu0 %v20371_v15 }
 0x2fd   : > { %17934 = vmatpush3.msra.mxu1 %v20387_v28  ;;  %17906 = vmatprep.subr.mxu0 %v19443_v31 }
 0x2fe   : > { %17935 = vmatprep.subr.mxu1 %v19443_v31  ;;  %17907 = vmatpush3.msra.mxu0 %v20387_v28 }
 0x2ff   : > { %17936 = vmatpush3.msra.mxu1 %v20397_v8  ;;  %17937 = vmatprep.mubr.msk.f32.mxu1 %vm19446_vm6, %v19443_v31  ;;  %v2693_v19 = vpop.xlane.xlu0 %2692 }
 0x300   : > { %17908 = vmatprep.subr.mxu0 %v19443_v31  ;;  %17938 = vmatmul.mubr.f32.vlgmr.msra.gmra.mxu1 %v20484_v24  ;;  %v2730_v20 = vmul.f32 0.125, %v2693_v19 }
 0x301   : > { %17949 = vmatprep.subr.mxu1 %v19443_v31  ;;  %17909 = vmatpush3.msra.mxu0 %v20397_v8 }
 0x302   : > { %17910 = vmatprep.mubr.msk.f32.mxu0 %vm19446_vm6, %v19443_v31  ;;  %17950 = vmatpush3.msra.mxu1 %v20371_v15  ;;  %v2747_v9 = vadd.f32 1e-06, %v2730_v20 }
 0x303   : > { %17911 = vmatmul.mubr.f32.vlgmr.msra.gmra.mxu0 %v20506_v21  ;;  %17922 = vmatprep.subr.mxu0 %v19443_v31  ;;  %v4818_v16 = vpop.permute.xlu0 %4817 }
 0x304   : > { %17951 = vmatprep.subr.mxu1 %v19443_v31  ;;  %17923 = vmatpush3.msra.mxu0 %v20393_v4  ;;  %19324 = vrsqrt.f32 %v2747_v9  ;;  %v4825_v41 = vsel %vm3325_vm7, %v20241_v57, %v4818_v16 }
 0x305   : > { %17952 = vmatpush3.msra.mxu1 %v20387_v28  ;;  %17924 = vmatprep.subr.mxu0 %v19443_v31 }
 0x306   : > { %17953 = vmatprep.subr.mxu1 %v19443_v31  ;;  %17925 = vmatpush3.msra.mxu0 %v20405_v44 }
 0x307   : > { %17954 = vmatpush3.msra.mxu1 %v20397_v8  ;;  %17955 = vmatprep.mubr.msk.f32.mxu1 %vm19446_vm6, %v19443_v31 }
 0x308   : > { %17926 = vmatprep.subr.mxu0 %v19443_v31  ;;  %17956 = vmatmul.mubr.f32.vlgmr.msra.gmra.mxu1 %v20454_v35 }
 0x309   : > { %17927 = vmatpush3.msra.mxu0 %v20416_v37  ;;  %17928 = vmatprep.mubr.msk.f32.mxu0 %vm19446_vm6, %v19443_v31 }
 0x30a   : > { %17929 = vmatmul.mubr.f32.vlgmr.msra.gmra.mxu0 %v20470_v1  ;;  %17940 = vmatprep.subr.mxu0 %v19443_v31 }
 0x30b   : > { %17941 = vmatpush3.msra.mxu0 %v20410_v33  ;;  %17946 = vmatprep.mubr.msk.f32.mxu0 %vm19446_vm6, %v19443_v31 }
 0x30c   : > { %17942 = vmatprep.subr.mxu0 %v19443_v31  ;;  %17967 = vmatprep.subr.mxu1 %v19443_v31 }
 0x30d   : > { %17943 = vmatpush3.msra.mxu0 %v20422_v58  ;;  %17968 = vmatpush3.msra.mxu1 %v20170_v56 }
 0x30e   : > { %17944 = vmatprep.subr.mxu0 %v19443_v31  ;;  %17969 = vmatprep.subr.mxu1 %v19443_v31 }
 0x30f   : > { %17945 = vmatpush3.msra.mxu0 %v20434_v0  ;;  %17970 = vmatpush3.msra.mxu1 %v20185_v36  ;;  %v2995_v13 = vpop.xlane.xlu1 %2994 }
 0x310   : > { %17947 = vmatmul.mubr.f32.vlgmr.msra.gmra.mxu0 %v20454_v35  ;;  %17971 = vmatprep.subr.mxu1 %v19443_v31  ;;  %v3032_v54 = vmul.f32 0.125, %v2995_v13 }
 0x311   : > { %v19325_v52 = vpop.eup %19324  ;;  %17972 = vmatpush3.msra.mxu1 %v20196_v45  ;;  %17973 = vmatprep.mubr.msk.f32.mxu1 %vm19446_vm6, %v19443_v31 }
 0x312   : > { %17985 = vmatprep.subr.mxu1 %v19443_v31  ;;  %17958 = vmatprep.subr.mxu0 %v19443_v31  ;;  %v2781_v42 = vmul.f32 %v19325_v52, %v20219_v2  ;;  %v3049_v27 = vadd.f32 1e-06, %v3032_v54 }
 0x313   : > { %17959 = vmatpush3.msra.mxu0 %v20120_v60  ;;  %17964 = vmatprep.mubr.msk.f32.mxu0 %vm19446_vm6, %v19443_v31  ;;  %v4823_v12 = vpop.permute.xlu1 %4822 }
 0x314   : > { %17960 = vmatprep.subr.mxu0 %v19443_v31  ;;  %v2804_v18 = vmul.f32 %v20107_v39, %v2781_v42  ;;  %19326 = vrsqrt.f32 %v3049_v27  ;;  %v4826_v55 = vsel %vm3327_vm8, %v4825_v41, %v4823_v12 }
 0x315   : > { %17961 = vmatpush3.msra.mxu0 %v20131_v25  ;;  %v4828_v2 = vsel %vm3340_vm9, %v4826_v55, 0 }
 0x316   : > { %17962 = vmatprep.subr.mxu0 %v19443_v31  ;;  %v2827_v19 = vadd.f32 %v20114_v30, %v2804_v18  ;;  %v4898_v20 = vand.u32 4294901760, %v4828_v2 }
 0x317   : > { %17963 = vmatpush3.msra.mxu0 %v20146_v61 }
 0x318   : > { %v2844_v57 = vmax.f32 %v2827_v19, 0.0  ;;  %17976 = vmatprep.subr.mxu0 %v19443_v31  ;;  %v4899_v9 = vsub.f32 %v4828_v2, %v4898_v20  ;;  %17974 = vmatmul.mubr.f32.vlgmr.msra.gmra.mxu1 %v4898_v20 }
 0x319   : > { %17986 = vmatpush3.msra.mxu1 %v20120_v60  ;;  %17991 = vmatprep.mubr.msk.f32.mxu1 %vm19446_vm6, %v19443_v31 }
 0x31a   : > { %v20567_v13 = vsel %vm20154_vm4, %v2844_v57, 0.0  ;;  %17987 = vmatprep.subr.mxu1 %v19443_v31  ;;  %v4900_v16 = vand.u32 4294901760, %v4899_v9 }
 0x31b   : > { %v7241_v52 = vrot.slane %v20567_v13, 1  ;;  %17988 = vmatpush3.msra.mxu1 %v20131_v25 }
 0x31c   : > { %17989 = vmatprep.subr.mxu1 %v19443_v31  ;;  %v4901_v54 = vsub.f32 %v4899_v9, %v4900_v16 }
 0x31d   : > { %7242 = vrot.lane.b32.xlu1 %v7241_v52, %s19444_s15  ;;  %17990 = vmatpush3.msra.mxu1 %v20146_v61 }
 0x31e   : > { %17992 = vmatmul.mubr.f32.vlgmr.msra.gmra.mxu1 %v4900_v16  ;;  %18003 = vmatprep.subr.mxu1 %v19443_v31  ;;  %v4902_v38 = vand.u32 4294901760, %v4901_v54 }
 0x31f   : > { %18004 = vmatpush3.msra.mxu1 %v20120_v60  ;;  %18009 = vmatprep.mubr.msk.f32.mxu1 %vm19446_vm6, %v19443_v31 }
 0x320   : > { %18005 = vmatprep.subr.mxu1 %v19443_v31  ;;  %17965 = vmatmul.mubr.f32.vlgmr.msra.gmra.mxu0 %v4902_v38 }
 0x321   : > { %v19327_v42 = vpop.eup %19326  ;;  %17977 = vmatpush3.msra.mxu0 %v20129_v43  ;;  %18006 = vmatpush3.msra.mxu1 %v20131_v25 }
 0x322   : > { %17978 = vmatprep.subr.mxu0 %v19443_v31  ;;  %18007 = vmatprep.subr.mxu1 %v19443_v31  ;;  %v3083_v27 = vmul.f32 %v19327_v42, %v20227_v40 }
 0x323   : > { %17979 = vmatpush3.msra.mxu0 %v20144_v26  ;;  %18008 = vmatpush3.msra.mxu1 %v20146_v61 }
 0x324   : > { %17980 = vmatprep.subr.mxu0 %v19443_v31  ;;  %18010 = vmatmul.mubr.f32.vlgmr.msra.gmra.mxu1 %v4898_v20  ;;  %v3100_v41 = vmul.f32 %v20107_v39, %v3083_v27 }
 0x325   : > { %18021 = vmatprep.subr.mxu1 %v19443_v31  ;;  %17981 = vmatpush3.msra.mxu0 %v20165_v11 }
 0x326   : > { %17982 = vmatprep.mubr.msk.f32.mxu0 %vm19446_vm6, %v19443_v31  ;;  %18022 = vmatpush3.msra.mxu1 %v20328_v14  ;;  %v3117_v40 = vadd.f32 %v20114_v30, %v3100_v41 }
 0x327   : > { %17983 = vmatmul.mubr.f32.vlgmr.msra.gmra.mxu0 %v4899_v9  ;;  %17994 = vmatprep.subr.mxu0 %v19443_v31 }
 0x328   : > { %18023 = vmatprep.subr.mxu1 %v19443_v31  ;;  %17995 = vmatpush3.msra.mxu0 %v20141_v48  ;;  %v3134_v12 = vmax.f32 %v3117_v40, 0.0 }
 0x329   : > { %18024 = vmatpush3.msra.mxu1 %v20345_v6  ;;  %17996 = vmatprep.subr.mxu0 %v19443_v31 }
 0x32a   : > { %18025 = vmatprep.subr.mxu1 %v19443_v31  ;;  %17997 = vmatpush3.msra.mxu0 %v20162_v50  ;;  %v3294_v39 = vsel %vm3270_vm5, %v3134_v12, 0.0 }
 0x32b   : > { %18026 = vmatpush3.msra.mxu1 %v20357_v5  ;;  %18027 = vmatprep.mubr.msk.f32.mxu1 %vm19446_vm6, %v19443_v31 }
 0x32c   : > { %17998 = vmatprep.subr.mxu0 %v19443_v31  ;;  %18028 = vmatmul.mubr.f32.vlgmr.msra.gmra.mxu1 %v20454_v35 }
 0x32d   : > { %18039 = vmatprep.subr.mxu1 %v19443_v31  ;;  %17999 = vmatpush3.msra.mxu0 %v20175_v22 }
 0x32e   : > { %18000 = vmatprep.mubr.msk.f32.mxu0 %vm19446_vm6, %v19443_v31  ;;  %18040 = vmatpush3.msra.mxu1 %v20263_v51 }
 0x32f   : > { %7237 = vrot.lane.b32.xlu0 %v3294_v39, %s19445_s16  ;;  %18001 = vmatmul.mubr.f32.vlgmr.msra.gmra.mxu0 %v4898_v20 }
 0x330   : > { %18012 = vmatprep.subr.mxu0 %v19443_v31  ;;  %18041 = vmatprep.subr.mxu1 %v19443_v31 }
 0x331   : > { %18013 = vmatpush3.msra.mxu0 %v20263_v51  ;;  %18042 = vmatpush3.msra.mxu1 %v20272_v46 }
 0x332   : > { %18014 = vmatprep.subr.mxu0 %v19443_v31  ;;  %18043 = vmatprep.subr.mxu1 %v19443_v31 }
 0x333   : > { %18015 = vmatpush3.msra.mxu0 %v20272_v46  ;;  %18044 = vmatpush3.msra.mxu1 %v20284_v7 }
 0x334   : > { %18045 = vmatprep.mubr.msk.f32.mxu1 %vm19446_vm6, %v19443_v31  ;;  %18016 = vmatprep.subr.mxu0 %v19443_v31 }
 0x335   : > { %18046 = vmatmul.mubr.f32.vlgmr.msra.gmra.mxu1 %v20484_v24  ;;  %18057 = vmatprep.subr.mxu1 %v19443_v31  ;;  %v5781_v30 = vpop.permute.xlu1 %5780 }
 0x336   : > { %18017 = vmatpush3.msra.mxu0 %v20284_v7  ;;  %18018 = vmatprep.mubr.msk.f32.mxu0 %vm19446_vm6, %v19443_v31 }
 0x337   : > { %v5776_v17 = vpop.permute.xlu0 %5775  ;;  %18058 = vmatpush3.msra.mxu1 %v20263_v51  ;;  %18019 = vmatmul.mubr.f32.vlgmr.msra.gmra.mxu0 %v20506_v21 }
 0x338   : > { %v5783_v18 = vsel %vm3325_vm7, %v20252_v47, %v5776_v17  ;;  %18030 = vmatprep.subr.mxu0 %v19443_v31  ;;  %18059 = vmatprep.subr.mxu1 %v19443_v31 }
 0x339   : > { %v5784_v24 = vsel %vm3327_vm8, %v5783_v18, %v5781_v30  ;;  %18031 = vmatpush3.msra.mxu0 %v20280_v3  ;;  %18060 = vmatpush3.msra.mxu1 %v20272_v46 }
 0x33a   : > { %18032 = vmatprep.subr.mxu0 %v19443_v31  ;;  %18061 = vmatprep.subr.mxu1 %v19443_v31  ;;  %v5786_v21 = vsel %vm3340_vm9, %v5784_v24, 0 }
 0x33b   : > { %18033 = vmatpush3.msra.mxu0 %v20290_v34  ;;  %18062 = vmatpush3.msra.mxu1 %v20284_v7  ;;  %v20650_v47 = vand.u32 4294901760, %v5786_v21 }
 0x33c   : > { %18063 = vmatprep.mubr.msk.f32.mxu1 %vm19446_vm6, %v19443_v31  ;;  %18034 = vmatprep.subr.mxu0 %v19443_v31 }
 0x33d   : > { %18064 = vmatmul.mubr.f32.vlgmr.msra.gmra.mxu1 %v20454_v35  ;;  %18035 = vmatpush3.msra.mxu0 %v20301_v53  ;;  %v20660_v55 = vsub.f32 %v5786_v21, %v20650_v47 }
 0x33e   : > { %18036 = vmatprep.mubr.msk.f32.mxu0 %vm19446_vm6, %v19443_v31  ;;  %18075 = vmatprep.subr.mxu1 %v19443_v31 }
 0x33f   : > { %18037 = vmatmul.mubr.f32.vlgmr.msra.gmra.mxu0 %v20470_v1  ;;  %18048 = vmatprep.subr.mxu0 %v19443_v31  ;;  %v20675_v1 = vand.u32 4294901760, %v20660_v55 }
 0x340   : > { %18076 = vmatpush3.msra.mxu1 %v20445_v23  ;;  %18049 = vmatpush3.msra.mxu0 %v20294_v10 }
 0x341   : > { %18077 = vmatprep.subr.mxu1 %v19443_v31  ;;  %7741 = vrot.lane.b32.xlu0 %v19443_v31, %s19445_s16  ;;  %v5859_v2 = vsub.f32 %v20660_v55, %v20675_v1 }
 0x342   : > { %18050 = vmatprep.subr.mxu0 %v19443_v31  ;;  %18078 = vmatpush3.msra.mxu1 %v20458_v59 }
 0x343   : > { %7746 = vrot.lane.b32.xlu1 %v20150_v32, %s19444_s15  ;;  %18051 = vmatpush3.msra.mxu0 %v20306_v29 }
 0x344   : > { %18079 = vmatprep.subr.mxu1 %v19443_v31  ;;  %18052 = vmatprep.subr.mxu0 %v19443_v31 }
 0x345   : > { %18080 = vmatpush3.msra.mxu1 %v20465_v62  ;;  %18053 = vmatpush3.msra.mxu0 %v20320_v63 }
 0x346   : > { %18054 = vmatprep.mubr.msk.f32.mxu0 %vm19446_vm6, %v19443_v31  ;;  %18081 = vmatprep.mubr.msk.f32.mxu1 %vm19446_vm6, %v19443_v31 }
 0x347   : > { %18093 = vmatprep.subr.mxu1 %v19443_v31  ;;  %18055 = vmatmul.mubr.f32.vlgmr.msra.gmra.mxu0 %v20454_v35  ;;  %v20698_v35 = vand.u32 4294901760, %v5859_v2 }
 0x348   : > { %18082 = vmatmul.mubr.f32.vlgmr.msra.gmra.mxu1 %v20650_v47  ;;  %18066 = vmatprep.subr.mxu0 %v19443_v31 }
 0x349   : > { %18094 = vmatpush3.msra.mxu1 %v20371_v15  ;;  %18067 = vmatpush3.msra.mxu0 %v20371_v15 }
 0x34a   : > { %18095 = vmatprep.subr.mxu1 %v19443_v31  ;;  %18068 = vmatprep.subr.mxu0 %v19443_v31 }
 0x34b   : > { %18096 = vmatpush3.msra.mxu1 %v20387_v28  ;;  %18069 = vmatpush3.msra.mxu0 %v20387_v28 }
 0x34c   : > { %18097 = vmatprep.subr.mxu1 %v19443_v31  ;;  %18099 = vmatprep.mubr.msk.f32.mxu1 %vm19446_vm6, %v19443_v31  ;;  %v6285_v20 = vpop.permute.xlu1 %6284 }
 0x34d   : > { %18098 = vmatpush3.msra.mxu1 %v20397_v8  ;;  %18070 = vmatprep.subr.mxu0 %v19443_v31 }
 0x34e   : > { %18100 = vmatmul.mubr.f32.vlgmr.msra.gmra.mxu1 %v20675_v1  ;;  %18111 = vmatprep.subr.mxu1 %v19443_v31 }
 0x34f   : > { %v6280_v19 = vpop.permute.xlu0 %6279  ;;  %18071 = vmatpush3.msra.mxu0 %v20397_v8  ;;  %18112 = vmatpush3.msra.mxu1 %v20371_v15 }
 0x350   : > { %v6287_v57 = vsel %vm3325_vm7, %v20332_v49, %v6280_v19  ;;  %18072 = vmatprep.mubr.msk.f32.mxu0 %vm19446_vm6, %v19443_v31  ;;  %18084 = vmatprep.subr.mxu0 %v19443_v31 }
 0x351   : > { %v6288_v9 = vsel %vm3327_vm8, %v6287_v57, %v6285_v20  ;;  %18113 = vmatprep.subr.mxu1 %v19443_v31  ;;  %18073 = vmatmul.mubr.f32.vlgmr.msra.gmra.mxu0 %v20698_v35 }
 0x352   : > { %18085 = vmatpush3.msra.mxu0 %v20393_v4  ;;  %18114 = vmatpush3.msra.mxu1 %v20387_v28  ;;  %v6290_v52 = vsel %vm3340_vm9, %v6288_v9, 0 }
 0x353   : > { %18086 = vmatprep.subr.mxu0 %v19443_v31  ;;  %18115 = vmatprep.subr.mxu1 %v19443_v31  ;;  %v20722_v49 = vand.u32 4294901760, %v6290_v52 }
 0x354   : > { %18087 = vmatpush3.msra.mxu0 %v20405_v44  ;;  %18116 = vmatpush3.msra.mxu1 %v20397_v8 }
 0x355   : > { %18117 = vmatprep.mubr.msk.f32.mxu1 %vm19446_vm6, %v19443_v31  ;;  %18088 = vmatprep.subr.mxu0 %v19443_v31  ;;  %v6361_v16 = vsub.f32 %v6290_v52, %v20722_v49 }
 0x356   : > { %18118 = vmatmul.mubr.f32.vlgmr.msra.gmra.mxu1 %v20650_v47  ;;  %18089 = vmatpush3.msra.mxu0 %v20416_v37 }
 0x357   : > { %18090 = vmatprep.mubr.msk.f32.mxu0 %vm19446_vm6, %v19443_v31  ;;  %18102 = vmatprep.subr.mxu0 %v19443_v31  ;;  %v6362_v54 = vand.u32 4294901760, %v6361_v16 }
 0x358   : > { %18091 = vmatmul.mubr.f32.vlgmr.msra.gmra.mxu0 %v20660_v55  ;;  %18129 = vmatprep.subr.mxu1 %v19443_v31 }
 0x359   : > { %18103 = vmatpush3.msra.mxu0 %v20410_v33  ;;  %18130 = vmatpush3.msra.mxu1 %v20170_v56  ;;  %v6363_v38 = vsub.f32 %v6361_v16, %v6362_v54 }
 0x35a   : > { %18104 = vmatprep.subr.mxu0 %v19443_v31  ;;  %18131 = vmatprep.subr.mxu1 %v19443_v31 }
 0x35b   : > { %18105 = vmatpush3.msra.mxu0 %v20422_v58  ;;  %18132 = vmatpush3.msra.mxu1 %v20185_v36  ;;  %v6364_v42 = vand.u32 4294901760, %v6363_v38 }
 0x35c   : > { %18106 = vmatprep.subr.mxu0 %v19443_v31  ;;  %18108 = vmatprep.mubr.msk.f32.mxu0 %vm19446_vm6, %v19443_v31 }
 0x35d   : > { %18107 = vmatpush3.msra.mxu0 %v20434_v0  ;;  %18133 = vmatprep.subr.mxu1 %v19443_v31 }
 0x35e   : > { %18109 = vmatmul.mubr.f32.vlgmr.msra.gmra.mxu0 %v20650_v47  ;;  %18134 = vmatpush3.msra.mxu1 %v20196_v45 }
 0x35f   : > { %18135 = vmatprep.mubr.msk.f32.mxu1 %vm19446_vm6, %v19443_v31  ;;  %18147 = vmatprep.subr.mxu1 %v19443_v31 }
 0x360   : > { %18136 = vmatmul.mubr.f32.vlgmr.msra.gmra.mxu1 %v20722_v49  ;;  %18120 = vmatprep.subr.mxu0 %v19443_v31 }
 0x361   : > { %18148 = vmatpush3.msra.mxu1 %v20120_v60  ;;  %18121 = vmatpush3.msra.mxu0 %v20120_v60 }
 0x362   : > { %18149 = vmatprep.subr.mxu1 %v19443_v31  ;;  %18122 = vmatprep.subr.mxu0 %v19443_v31 }
 0x363   : > { %18150 = vmatpush3.msra.mxu1 %v20131_v25  ;;  %18123 = vmatpush3.msra.mxu0 %v20131_v25 }
 0x364   : > { %18151 = vmatprep.subr.mxu1 %v19443_v31  ;;  %18153 = vmatprep.mubr.msk.f32.mxu1 %vm19446_vm6, %v19443_v31 }
 0x365   : > { %18152 = vmatpush3.msra.mxu1 %v20146_v61  ;;  %18124 = vmatprep.subr.mxu0 %v19443_v31 }
 0x366   : > { %18154 = vmatmul.mubr.f32.vlgmr.msra.gmra.mxu1 %v6362_v54  ;;  %18165 = vmatprep.subr.mxu1 %v19443_v31 }
 0x367   : > { %18125 = vmatpush3.msra.mxu0 %v20146_v61  ;;  %18166 = vmatpush3.msra.mxu1 %v20120_v60 }
 0x368   : > { %18126 = vmatprep.mubr.msk.f32.mxu0 %vm19446_vm6, %v19443_v31  ;;  %18138 = vmatprep.subr.mxu0 %v19443_v31 }
 0x369   : > { %18167 = vmatprep.subr.mxu1 %v19443_v31  ;;  %18127 = vmatmul.mubr.f32.vlgmr.msra.gmra.mxu0 %v6364_v42 }
 0x36a   : > { %18139 = vmatpush3.msra.mxu0 %v20129_v43  ;;  %18168 = vmatpush3.msra.mxu1 %v20131_v25 }
 0x36b   : > { %18140 = vmatprep.subr.mxu0 %v19443_v31  ;;  %18169 = vmatprep.subr.mxu1 %v19443_v31 }
 0x36c   : > { %18141 = vmatpush3.msra.mxu0 %v20144_v26  ;;  %18170 = vmatpush3.msra.mxu1 %v20146_v61 }
 0x36d   : > { %18171 = vmatprep.mubr.msk.f32.mxu1 %vm19446_vm6, %v19443_v31  ;;  %8699 = vrot.lane.b32.xlu0 %v19443_v31, %s19445_s16 }
 0x36e   : > { %18142 = vmatprep.subr.mxu0 %v19443_v31  ;;  %18172 = vmatmul.mubr.f32.vlgmr.msra.gmra.mxu1 %v20722_v49 }
 0x36f   : > { %18183 = vmatprep.subr.mxu1 %v19443_v31  ;;  %8704 = vrot.lane.b32.xlu1 %v20150_v32, %s19444_s15 }
 0x370   : > { %18143 = vmatpush3.msra.mxu0 %v20165_v11  ;;  %18144 = vmatprep.mubr.msk.f32.mxu0 %vm19446_vm6, %v19443_v31 }
 0x371   : > { %18184 = vmatpush3.msra.mxu1 %v20328_v14  ;;  %18145 = vmatmul.mubr.f32.vlgmr.msra.gmra.mxu0 %v6361_v16 }
 0x372   : > { %18156 = vmatprep.subr.mxu0 %v19443_v31  ;;  %18185 = vmatprep.subr.mxu1 %v19443_v31 }
 0x373   : > { %18157 = vmatpush3.msra.mxu0 %v20141_v48  ;;  %18186 = vmatpush3.msra.mxu1 %v20345_v6 }
 0x374   : > { %18158 = vmatprep.subr.mxu0 %v19443_v31  ;;  %18187 = vmatprep.subr.mxu1 %v19443_v31 }
 0x375   : > { %18159 = vmatpush3.msra.mxu0 %v20162_v50  ;;  %18188 = vmatpush3.msra.mxu1 %v20357_v5 }
 0x376   : > { %18189 = vmatprep.mubr.msk.f32.mxu1 %vm19446_vm6, %v19443_v31  ;;  %18160 = vmatprep.subr.mxu0 %v19443_v31 }
 0x377   : > { %18190 = vmatmul.mubr.f32.vlgmr.msra.gmra.mxu1 %v20650_v47  ;;  %18201 = vmatprep.subr.mxu1 %v19443_v31 }
 0x378   : > { %18161 = vmatpush3.msra.mxu0 %v20175_v22  ;;  %18162 = vmatprep.mubr.msk.f32.mxu0 %vm19446_vm6, %v19443_v31 }
 0x379   : > { %18202 = vmatpush3.msra.mxu1 %v20263_v51  ;;  %18163 = vmatmul.mubr.f32.vlgmr.msra.gmra.mxu0 %v20722_v49 }
 0x37a   : > { %18174 = vmatprep.subr.mxu0 %v19443_v31  ;;  %18203 = vmatprep.subr.mxu1 %v19443_v31 }
 0x37b   : > { %18175 = vmatpush3.msra.mxu0 %v20263_v51  ;;  %18204 = vmatpush3.msra.mxu1 %v20272_v46 }
 0x37c   : > { %18176 = vmatprep.subr.mxu0 %v19443_v31  ;;  %18205 = vmatprep.subr.mxu1 %v19443_v31 }
 0x37d   : > { %18177 = vmatpush3.msra.mxu0 %v20272_v46  ;;  %18206 = vmatpush3.msra.mxu1 %v20284_v7 }
 0x37e   : > { %18207 = vmatprep.mubr.msk.f32.mxu1 %vm19446_vm6, %v19443_v31  ;;  %18178 = vmatprep.subr.mxu0 %v19443_v31 }
 0x37f   : > { %18208 = vmatmul.mubr.f32.vlgmr.msra.gmra.mxu1 %v20675_v1  ;;  %18219 = vmatprep.subr.mxu1 %v19443_v31 }
 0x380   : > { %18179 = vmatpush3.msra.mxu0 %v20284_v7  ;;  %18180 = vmatprep.mubr.msk.f32.mxu0 %vm19446_vm6, %v19443_v31 }
 0x381   : > { %18220 = vmatpush3.msra.mxu1 %v20263_v51  ;;  %18181 = vmatmul.mubr.f32.vlgmr.msra.gmra.mxu0 %v20698_v35 }
 0x382   : > { %18192 = vmatprep.subr.mxu0 %v19443_v31  ;;  %18221 = vmatprep.subr.mxu1 %v19443_v31 }
 0x383   : > { %18193 = vmatpush3.msra.mxu0 %v20280_v3  ;;  %18222 = vmatpush3.msra.mxu1 %v20272_v46 }
 0x384   : > { %18194 = vmatprep.subr.mxu0 %v19443_v31  ;;  %18223 = vmatprep.subr.mxu1 %v19443_v31 }
 0x385   : > { %18195 = vmatpush3.msra.mxu0 %v20290_v34  ;;  %18224 = vmatpush3.msra.mxu1 %v20284_v7 }
 0x386   : > { %18225 = vmatprep.mubr.msk.f32.mxu1 %vm19446_vm6, %v19443_v31  ;;  %9203 = vrot.lane.b32.xlu0 %v19443_v31, %s19445_s16 }
 0x387   : > { %18196 = vmatprep.subr.mxu0 %v19443_v31  ;;  %18226 = vmatmul.mubr.f32.vlgmr.msra.gmra.mxu1 %v20650_v47 }
 0x388   : > { %9208 = vrot.lane.b32.xlu1 %v20150_v32, %s19444_s15  ;;  %18197 = vmatpush3.msra.mxu0 %v20301_v53 }
 0x389   : > { %18198 = vmatprep.mubr.msk.f32.mxu0 %vm19446_vm6, %v19443_v31  ;;  %18210 = vmatprep.subr.mxu0 %v19443_v31 }
 0x38a   : > { %18199 = vmatmul.mubr.f32.vlgmr.msra.gmra.mxu0 %v20660_v55  ;;  %10161 = vrot.lane.b32.xlu0 %v19443_v31, %s19445_s16 }
 0x38b   : > { %v20844_v27 = vpop.f32.mrf.mxu1  ;;  %18211 = vmatpush3.msra.mxu0 %v20294_v10  ;;  %18216 = vmatprep.mubr.msk.f32.mxu0 %vm19446_vm6, %v19443_v31 }
 0x38c   : > { %18212 = vmatprep.subr.mxu0 %v19443_v31  ;;  %10166 = vrot.lane.b32.xlu1 %v20150_v32, %s19444_s15 }
 0x38d   : > { %v17813_v41 = vpop.f32.mrf.mxu1  ;;  %18213 = vmatpush3.msra.mxu0 %v20306_v29  ;;  %18237 = vmatprep.subr.mxu1 %v19443_v31 }
 0x38e   : > { %18214 = vmatprep.subr.mxu0 %v19443_v31  ;;  %10665 = vrot.lane.b32.xlu0 %v19443_v31, %s19445_s16 }
 0x38f   : > { %18215 = vmatpush3.msra.mxu0 %v20320_v63  ;;  %18238 = vmatpush3.msra.mxu1 %v20445_v23  ;;  %v7243_v2 = vpop.permute.xlu1 %7242 }
 0x390   : > { %18217 = vmatmul.mubr.f32.vlgmr.msra.gmra.mxu0 %v20650_v47  ;;  %18239 = vmatprep.subr.mxu1 %v19443_v31 }
 0x391   : > { %v20862_v40 = vpop.f32.mrf.mxu1  ;;  %18240 = vmatpush3.msra.mxu1 %v20458_v59  ;;  %18243 = vmatprep.mubr.msk.f32.mxu1 %vm19446_vm6, %v19443_v31 }
 0x392   : > { %11623 = vrot.lane.b32.xlu0 %v19443_v31, %s19445_s16  ;;  %18241 = vmatprep.subr.mxu1 %v19443_v31 }
 0x393   : > { %v17831_v12 = vpop.f32.mrf.mxu1  ;;  %v20868_v39 = vpop.f32.mrf.mxu0  ;;  %18242 = vmatpush3.msra.mxu1 %v20465_v62  ;;  %18228 = vmatprep.subr.mxu0 %v19443_v31 }
 0x394   : > { %18255 = vmatprep.subr.mxu1 %v19443_v31  ;;  %18229 = vmatpush3.msra.mxu0 %v20371_v15 }
 0x395   : > { %v17804_v17 = vpop.f32.mrf.mxu0  ;;  %10670 = vrot.lane.b32.xlu1 %v20150_v32, %s19444_s15  ;;  %18230 = vmatprep.subr.mxu0 %v19443_v31 }
 0x396   : > { %12127 = vrot.lane.b32.xlu0 %v19443_v31, %s19445_s16  ;;  %18231 = vmatpush3.msra.mxu0 %v20387_v28 }
 0x397   : > { %v20880_v30 = vpop.f32.mrf.mxu1  ;;  %18232 = vmatprep.subr.mxu0 %v19443_v31  ;;  %18234 = vmatprep.mubr.msk.f32.mxu0 %vm19446_vm6, %v19443_v31 }
 0x398   : > { %18233 = vmatpush3.msra.mxu0 %v20397_v8 }
 0x399   : > { %v17849_v18 = vpop.f32.mrf.mxu1  ;;  %18246 = vmatprep.subr.mxu0 %v19443_v31  ;;  %11628 = vrot.lane.b32.xlu1 %v20150_v32, %s19444_s15 }
 0x39a   : > { %v3582_v24 = vpop.f32.mrf.mxu0  ;;  %13085 = vrot.lane.b32.xlu0 %v19443_v31, %s19445_s16 }
 0x39c   : > { %v17822_v21 = vpop.f32.mrf.mxu0 }
 0x39d   : > { %12132 = vrot.lane.b32.xlu1 %v20150_v32, %s19444_s15 }
 0x39e   : > { %13589 = vrot.lane.b32.xlu0 %v19443_v31, %s19445_s16 }
 0x3a0   : > { %v20898_v47 = vpop.f32.mrf.mxu1 }
 0x3a1   : > { %v7238_v55 = vpop.permute.xlu0 %7237  ;;  %13090 = vrot.lane.b32.xlu1 %v20150_v32, %s19444_s15 }
 0x3a2   : > { %v17867_v1 = vpop.f32.mrf.mxu1  ;;  %v7245_v35 = vsel %vm3325_vm7, %v20567_v13, %v7238_v55  ;;  %14547 = vrot.lane.b32.xlu0 %v19443_v31, %s19445_s16  ;;  %v3505_v55 = vadd.f32 %v20844_v27, %v20868_v39  ;;  %s19447_s16 = smov [#allocation4]  }
 0x3a3   : > { %v20904_v19 = vpop.f32.mrf.mxu0  ;;  %v7246_v20 = vsel %vm3327_vm8, %v7245_v35, %v7243_v2  ;;  %s19349_s17 = sshll.u32 %s19447_s16, 4  ;;  %s19350_s17 = int_to_ptr.vmem [resolvable:$false] %s19349_s17 }
 0x3a4   : > { %v7248_v57 = vsel %vm3340_vm9, %v7246_v20, 0  ;;  %v3583_v20 = vadd.f32 %v3582_v24, %v3505_v55  ;;  %s19351_s23 = scalar_lea.vmem %s19350_s17, 256 }
 0x3a5   : > { %v17840_v9 = vpop.f32.mrf.mxu0  ;;  %v20910_v52 = vand.u32 4294901760, %v7248_v57  ;;  %13594 = vrot.lane.b32.xlu1 %v20150_v32, %s19444_s15 }
 0x3a7   : > { %v20915_v49 = vsub.f32 %v7248_v57, %v20910_v52  ;;  %18244 = vmatmul.mubr.f32.vlgmr.msra.gmra.mxu1 %v20910_v52 }
 0x3a8   : > { %v20917_v16 = vpop.f32.mrf.mxu1  ;;  %18256 = vmatpush3.msra.mxu1 %v20371_v15  ;;  %18261 = vmatprep.mubr.msk.f32.mxu1 %vm19446_vm6, %v19443_v31 }
 0x3a9   : > { %18257 = vmatprep.subr.mxu1 %v19443_v31  ;;  %v20925_v54 = vand.u32 4294901760, %v20915_v49  ;;  %14552 = vrot.lane.b32.xlu1 %v20150_v32, %s19444_s15  ;;  %s17121_s15 = sshll.u32 %s19622_s30, 3 }
 0x3aa   : > { %v17885_v13 = vpop.f32.mrf.mxu1  ;;  %18258 = vmatpush3.msra.mxu1 %v20387_v28  ;;  %s720_s19 = scalar_lea.vmem [#allocation4], %s17121_s15 }
 0x3ab   : > { %v20929_v38 = vpop.f32.mrf.mxu0  ;;  %18259 = vmatprep.subr.mxu1 %v19443_v31  ;;  %v7321_v42 = vsub.f32 %v20915_v49, %v20925_v54  ;;  %v3659_v13 = vadd.f32 %v20862_v40, %v3583_v20  ;;  %s16947_s26 = sshll.u32 %s720_s19, 4  ;;  %s16948_s26 = int_to_ptr.vmem [resolvable:$true] %s16947_s26 }
 0x3ac   : > { %18260 = vmatpush3.msra.mxu1 %v20397_v8  ;;  %s19345_s3 = scalar_lea.vmem %s16948_s26, 128  ;;  %p19352_p4 = scmp.lt.s32.totalorder %s16948_s26, %s19350_s17 }
 0x3ad   : > { %v17858_v41 = vpop.f32.mrf.mxu0  ;;  %18262 = vmatmul.mubr.f32.vlgmr.msra.gmra.mxu1 %v20925_v54  ;;  %18273 = vmatprep.subr.mxu1 %v19443_v31  ;;  %v20938_v12 = vand.u32 4294901760, %v7321_v42  ;;  %p19346_p1 = scmp.ne.s32.totalorder %s16948_s26, %s19345_s3  ;;  %p19353_p6 = scmp.lt.s32.totalorder %s19351_s23, %s19345_s3 }
 0x3ae   : > { %18274 = vmatpush3.msra.mxu1 %v20371_v15  ;;  %18279 = vmatprep.mubr.msk.f32.mxu1 %vm19446_vm6, %v19443_v31 }
 0x3af   : > { %18275 = vmatprep.subr.mxu1 %v19443_v31  ;;  %18235 = vmatmul.mubr.f32.vlgmr.msra.gmra.mxu0 %v20938_v12  ;;  %p19347_p2 = pnand %p19346_p1, %p19552_p5  ;;  %p19354_p7 = por %p19353_p6, %p19352_p4 }
 0x3b0   : > { %v20943_v32 = vpop.f32.mrf.mxu1  ;;  %18247 = vmatpush3.msra.mxu0 %v20393_v4  ;;  %18276 = vmatpush3.msra.mxu1 %v20387_v28 }
 0x3b1   : > { %18248 = vmatprep.subr.mxu0 %v19443_v31  ;;  %18277 = vmatprep.subr.mxu1 %v19443_v31  ;;  %p19348_p3 = pneg %p19347_p2 }
 0x3b2   : > { %v17903_v17 = vpop.f32.mrf.mxu1  ;;  %18249 = vmatpush3.msra.mxu0 %v20405_v44  ;;  %18278 = vmatpush3.msra.mxu1 %v20397_v8 }
 0x3b3   : > { %v20951_v18 = vpop.f32.mrf.mxu0  ;;  %v7742_v21 = vpop.permute.xlu0 %7741  ;;  %18250 = vmatprep.subr.mxu0 %v19443_v31  ;;  %18280 = vmatmul.mubr.f32.vlgmr.msra.gmra.mxu1 %v20910_v52  ;;  %v3739_v17 = vadd.f32 %v20904_v19, %v3659_v13  ;;  %p19355_p8 = pnand %p19354_p7, %p19348_p3 }
 0x3b4   : > { %v7749_v1 = vsel %vm3325_vm7, 0.0, %v7742_v21  ;;  %18291 = vmatprep.subr.mxu1 %v19443_v31  ;;  %18251 = vmatpush3.msra.mxu0 %v20416_v37 }
 0x3b5   : > { %v17876_v2 = vpop.f32.mrf.mxu0  ;;  %v7747_v35 = vpop.permute.xlu1 %7746  ;;  %18252 = vmatprep.mubr.msk.f32.mxu0 %vm19446_vm6, %v19443_v31  ;;  %18292 = vmatpush3.msra.mxu1 %v20170_v56  ;;  %v3813_v19 = vadd.f32 %v20880_v30, %v3739_v17 }
 0x3b6   : > { %v7750_v57 = vsel %vm3327_vm8, %v7749_v1, %v7747_v35  ;;  %18253 = vmatmul.mubr.f32.vlgmr.msra.gmra.mxu0 %v20915_v49  ;;  %18264 = vmatprep.subr.mxu0 %v19443_v31 }
 0x3b7   : > { %v7752_v27 = vsel %vm3340_vm9, %v7750_v57, 0  ;;  %18293 = vmatprep.subr.mxu1 %v19443_v31  ;;  %18265 = vmatpush3.msra.mxu0 %v20410_v33  ;;  %v3894_v35 = vadd.f32 %v20929_v38, %v3813_v19 }
 0x3b8   : > { %v4465_v39 = vpop.f32.mrf.mxu1  ;;  %v20971_v9 = vand.u32 4294901760, %v7752_v27  ;;  %18294 = vmatpush3.msra.mxu1 %v20185_v36  ;;  %18266 = vmatprep.subr.mxu0 %v19443_v31 }
 0x3b9   : > { %18295 = vmatprep.subr.mxu1 %v19443_v31  ;;  %18267 = vmatpush3.msra.mxu0 %v20422_v58  ;;  %v3980_v38 = vadd.f32 %v20898_v47, %v3894_v35 }
 0x3ba   : > { %v17921_v24 = vpop.f32.mrf.mxu1  ;;  %v20979_v42 = vsub.f32 %v7752_v27, %v20971_v9  ;;  %18296 = vmatpush3.msra.mxu1 %v20196_v45  ;;  %18297 = vmatprep.mubr.msk.f32.mxu1 %vm19446_vm6, %v19443_v31 }
 0x3bb   : > { %v4213_v41 = vpop.f32.mrf.mxu0  ;;  %18268 = vmatprep.subr.mxu0 %v19443_v31  ;;  %18298 = vmatmul.mubr.f32.vlgmr.msra.gmra.mxu1 %v20971_v9  ;;  %v4058_v24 = vadd.f32 %v20951_v18, %v3980_v38 }
 0x3bc   : > { %18309 = vmatprep.subr.mxu1 %v19443_v31  ;;  %18269 = vmatpush3.msra.mxu0 %v20434_v0  ;;  %v7824_v40 = vand.u32 4294901760, %v20979_v42 }
 0x3bd   : > { %v17894_v21 = vpop.f32.mrf.mxu0  ;;  %18270 = vmatprep.mubr.msk.f32.mxu0 %vm19446_vm6, %v19443_v31  ;;  %18310 = vmatpush3.msra.mxu1 %v20120_v60  ;;  %v4134_v18 = vadd.f32 %v20917_v16, %v4058_v24 }
 0x3be   : > { %18271 = vmatmul.mubr.f32.vlgmr.msra.gmra.mxu0 %v20910_v52  ;;  %18282 = vmatprep.subr.mxu0 %v19443_v31  ;;  %v7825_v1 = vsub.f32 %v20979_v42, %v7824_v40 }
 0x3bf   : > { %18311 = vmatprep.subr.mxu1 %v19443_v31  ;;  %18283 = vmatpush3.msra.mxu0 %v20120_v60 }
 0x3c0   : > { %v4619_v55 = vpop.f32.mrf.mxu1  ;;  %18312 = vmatpush3.msra.mxu1 %v20131_v25  ;;  %18284 = vmatprep.subr.mxu0 %v19443_v31  ;;  %v7826_v57 = vand.u32 4294901760, %v7825_v1 }
 0x3c1   : > { %18313 = vmatprep.subr.mxu1 %v19443_v31  ;;  %18285 = vmatpush3.msra.mxu0 %v20131_v25 }
 0x3c2   : > { %v17939_v2 = vpop.f32.mrf.mxu1  ;;  %18314 = vmatpush3.msra.mxu1 %v20146_v61  ;;  %18315 = vmatprep.mubr.msk.f32.mxu1 %vm19446_vm6, %v19443_v31 }
 0x3c3   : > { %v4379_v20 = vpop.f32.mrf.mxu0  ;;  %18286 = vmatprep.subr.mxu0 %v19443_v31  ;;  %18316 = vmatmul.mubr.f32.vlgmr.msra.gmra.mxu1 %v7824_v40 }
 0x3c4   : > { %18327 = vmatprep.subr.mxu1 %v19443_v31  ;;  %18287 = vmatpush3.msra.mxu0 %v20146_v61  ;;  %v4466_v13 = vadd.f32 %v4465_v39, %v4379_v20  ;;  %v4214_v39 = vadd.f32 %v4213_v41, %v4134_v18 }
 0x3c5   : > { %v17912_v30 = vpop.f32.mrf.mxu0  ;;  %18288 = vmatprep.mubr.msk.f32.mxu0 %vm19446_vm6, %v19443_v31  ;;  %18328 = vmatpush3.msra.mxu1 %v20120_v60 }
 0x3c6   : > { %18289 = vmatmul.mubr.f32.vlgmr.msra.gmra.mxu0 %v7826_v57  ;;  %18300 = vmatprep.subr.mxu0 %v19443_v31  ;;  %v4288_v41 = vadd.f32 %v20943_v32, %v4214_v39 }
 0x3c7   : > { %18329 = vmatprep.subr.mxu1 %v19443_v31  ;;  %18301 = vmatpush3.msra.mxu0 %v20129_v43 }
 0x3c8   : > { %v4773_v27 = vpop.f32.mrf.mxu1  ;;  %18330 = vmatpush3.msra.mxu1 %v20131_v25  ;;  %18302 = vmatprep.subr.mxu0 %v19443_v31 }
 0x3c9   : > { %18331 = vmatprep.subr.mxu1 %v19443_v31  ;;  %18303 = vmatpush3.msra.mxu0 %v20144_v26 }
 0x3ca   : > { %v4543_v17 = vpop.f32.mrf.mxu0  ;;  %v17957_v21 = vpop.f32.mrf.mxu1  ;;  %18332 = vmatpush3.msra.mxu1 %v20146_v61  ;;  %18333 = vmatprep.mubr.msk.f32.mxu1 %vm19446_vm6, %v19443_v31 }
 0x3cb   : > { %v4544_v47 = vadd.f32 %v4543_v17, %v4466_v13  ;;  %18304 = vmatprep.subr.mxu0 %v19443_v31  ;;  %18334 = vmatmul.mubr.f32.vlgmr.msra.gmra.mxu1 %v20971_v9 }
 0x3cc   : > { %v17930_v40 = vpop.f32.mrf.mxu0  ;;  %18345 = vmatprep.subr.mxu1 %v19443_v31  ;;  %18305 = vmatpush3.msra.mxu0 %v20165_v11 }
 0x3cd   : > { %18306 = vmatprep.mubr.msk.f32.mxu0 %vm19446_vm6, %v19443_v31  ;;  %18346 = vmatpush3.msra.mxu1 %v20328_v14  ;;  %v4620_v19 = vadd.f32 %v4619_v55, %v4544_v47  ;;  %v21050_v55 = vld [vmem:[%s22360_s7] ss:$0 sm:$0xff] }
 0x3ce   : > { %18307 = vmatmul.mubr.f32.vlgmr.msra.gmra.mxu0 %v20979_v42  ;;  %18318 = vmatprep.subr.mxu0 %v19443_v31 }
 0x3cf   : > { %18347 = vmatprep.subr.mxu1 %v19443_v31  ;;  %18319 = vmatpush3.msra.mxu0 %v20141_v48 }
 0x3d0   : > { %v4699_v1 = vpop.f32.mrf.mxu0  ;;  %18348 = vmatpush3.msra.mxu1 %v20345_v6  ;;  %18320 = vmatprep.subr.mxu0 %v19443_v31 }
 0x3d1   : > { %v4700_v16 = vadd.f32 %v4699_v1, %v4620_v19  ;;  %18349 = vmatprep.subr.mxu1 %v19443_v31  ;;  %18321 = vmatpush3.msra.mxu0 %v20162_v50 }
 0x3d2   : > { %v17948_v2 = vpop.f32.mrf.mxu0  ;;  %18350 = vmatpush3.msra.mxu1 %v20357_v5  ;;  %18351 = vmatprep.mubr.msk.f32.mxu1 %vm19446_vm6, %v19443_v31 }
 0x3d3   : > { %v4774_v42 = vadd.f32 %v4773_v27, %v4700_v16  ;;  %18322 = vmatprep.subr.mxu0 %v19443_v31  ;;  %18352 = vmatmul.mubr.f32.vlgmr.msra.gmra.mxu1 %v20910_v52 }
 0x3d4   : > { %18363 = vmatprep.subr.mxu1 %v19443_v31  ;;  %18323 = vmatpush3.msra.mxu0 %v20175_v22 }
 0x3d5   : > { %v4777_v35 = vadd.f32 %v4774_v42, %v4288_v41  ;;  %18324 = vmatprep.mubr.msk.f32.mxu0 %vm19446_vm6, %v19443_v31  ;;  %18364 = vmatpush3.msra.mxu1 %v20263_v51 }
 0x3d6   : > { %18325 = vmatmul.mubr.f32.vlgmr.msra.gmra.mxu0 %v20971_v9  ;;  %18336 = vmatprep.subr.mxu0 %v19443_v31 }
 0x3d7   : > { %v21060_v32 = vadd.f32 %v21050_v55, %v4777_v35  ;;  %18365 = vmatprep.subr.mxu1 %v19443_v31  ;;  %18337 = vmatpush3.msra.mxu0 %v20263_v51 }
 0x3d8   : > { %18366 = vmatpush3.msra.mxu1 %v20272_v46  ;;  %18338 = vmatprep.subr.mxu0 %v19443_v31  ;;  %v4990_v30 = vpop.f32.mrf.mxu1 }
 0x3d9   : > { %v4788_v20 = vsel %vm2872_vm1, %v21060_v32, 0.0  ;;  %18367 = vmatprep.subr.mxu1 %v19443_v31  ;;  %18339 = vmatpush3.msra.mxu0 %v20272_v46 }
 0x3da   : > { %18368 = vmatpush3.msra.mxu1 %v20284_v7  ;;  %18369 = vmatprep.mubr.msk.f32.mxu1 %vm19446_vm6, %v19443_v31  ;;  %v17975_v9 = vpop.f32.mrf.mxu1 }
 0x3db   : > { %4789 = vadd.xlane.f32.xlu0 %v4788_v20  ;;  %18340 = vmatprep.subr.mxu0 %v19443_v31 }
 0x3dc   : > { %18370 = vmatmul.mubr.f32.vlgmr.msra.gmra.mxu1 %v20925_v54  ;;  %18381 = vmatprep.subr.mxu1 %v19443_v31 }
 0x3dd   : > { %18341 = vmatpush3.msra.mxu0 %v20284_v7  ;;  %18342 = vmatprep.mubr.msk.f32.mxu0 %vm19446_vm6, %v19443_v31 }
 0x3de   : > { %18382 = vmatpush3.msra.mxu1 %v20263_v51  ;;  %18343 = vmatmul.mubr.f32.vlgmr.msra.gmra.mxu0 %v20938_v12  ;;  %v5144_v57 = vpop.f32.mrf.mxu1 }
 0x3df   : > { %18354 = vmatprep.subr.mxu0 %v19443_v31  ;;  %18383 = vmatprep.subr.mxu1 %v19443_v31  ;;  %v8700_v38 = vpop.permute.xlu0 %8699 }
 0x3e0   : > { %18355 = vmatpush3.msra.mxu0 %v20280_v3  ;;  %18384 = vmatpush3.msra.mxu1 %v20272_v46  ;;  %v8707_v54 = vsel %vm3325_vm7, 0.0, %v8700_v38  ;;  %v17993_v27 = vpop.f32.mrf.mxu1  ;;  %v4904_v24 = vpop.f32.mrf.mxu0 }
 0x3e1   : > { %v8705_v13 = vpop.permute.xlu1 %8704  ;;  %18356 = vmatprep.subr.mxu0 %v19443_v31  ;;  %18385 = vmatprep.subr.mxu1 %v19443_v31  ;;  %v4991_v12 = vadd.f32 %v4990_v30, %v4904_v24 }
 0x3e2   : > { %v8708_v17 = vsel %vm3327_vm8, %v8707_v54, %v8705_v13  ;;  %18357 = vmatpush3.msra.mxu0 %v20290_v34  ;;  %18386 = vmatpush3.msra.mxu1 %v20284_v7  ;;  %v17966_v21 = vpop.f32.mrf.mxu0 }
 0x3e3   : > { %v8710_v47 = vsel %vm3340_vm9, %v8708_v17, 0  ;;  %18387 = vmatprep.mubr.msk.f32.mxu1 %vm19446_vm6, %v19443_v31  ;;  %18358 = vmatprep.subr.mxu0 %v19443_v31 }
 0x3e4   : > { %v21095_v40 = vand.u32 4294901760, %v8710_v47  ;;  %18388 = vmatmul.mubr.f32.vlgmr.msra.gmra.mxu1 %v20910_v52  ;;  %18399 = vmatprep.subr.mxu1 %v19443_v31  ;;  %v5298_v18 = vpop.f32.mrf.mxu1 }
 0x3e5   : > { %18359 = vmatpush3.msra.mxu0 %v20301_v53  ;;  %18360 = vmatprep.mubr.msk.f32.mxu0 %vm19446_vm6, %v19443_v31 }
 0x3e6   : > { %18400 = vmatpush3.msra.mxu1 %v20445_v23  ;;  %18361 = vmatmul.mubr.f32.vlgmr.msra.gmra.mxu0 %v20915_v49  ;;  %v18011_v39 = vpop.f32.mrf.mxu1  ;;  %v21107_v1 = vsub.f32 %v8710_v47, %v21095_v40 }
 0x3e7   : > { %18372 = vmatprep.subr.mxu0 %v19443_v31  ;;  %18401 = vmatprep.subr.mxu1 %v19443_v31  ;;  %v5068_v19 = vpop.f32.mrf.mxu0 }
 0x3e8   : > { %18373 = vmatpush3.msra.mxu0 %v20294_v10  ;;  %18402 = vmatpush3.msra.mxu1 %v20458_v59  ;;  %v5069_v16 = vadd.f32 %v5068_v19, %v4991_v12  ;;  %v21121_v41 = vand.u32 4294901760, %v21107_v1 }
 0x3e9   : > { %18374 = vmatprep.subr.mxu0 %v19443_v31  ;;  %18403 = vmatprep.subr.mxu1 %v19443_v31  ;;  %v17984_v2 = vpop.f32.mrf.mxu0 }
 0x3ea   : > { %18375 = vmatpush3.msra.mxu0 %v20306_v29  ;;  %18404 = vmatpush3.msra.mxu1 %v20465_v62  ;;  %v5145_v49 = vadd.f32 %v5144_v57, %v5069_v16  ;;  %v8783_v30 = vsub.f32 %v21107_v1, %v21121_v41 }
 0x3eb   : > { %18405 = vmatprep.mubr.msk.f32.mxu1 %vm19446_vm6, %v19443_v31  ;;  %18376 = vmatprep.subr.mxu0 %v19443_v31 }
 0x3ec   : > { %18406 = vmatmul.mubr.f32.vlgmr.msra.gmra.mxu1 %v21095_v40  ;;  %18417 = vmatprep.subr.mxu1 %v19443_v31  ;;  %v5462_v42 = vpop.f32.mrf.mxu1  ;;  %v21143_v38 = vand.u32 4294901760, %v8783_v30 }
 0x3ed   : > { %18377 = vmatpush3.msra.mxu0 %v20320_v63  ;;  %18378 = vmatprep.mubr.msk.f32.mxu0 %vm19446_vm6, %v19443_v31 }
 0x3ee   : > { %18418 = vmatpush3.msra.mxu1 %v20371_v15  ;;  %18379 = vmatmul.mubr.f32.vlgmr.msra.gmra.mxu0 %v20910_v52  ;;  %v18029_v35 = vpop.f32.mrf.mxu1 }
 0x3ef   : > { %18390 = vmatprep.subr.mxu0 %v19443_v31  ;;  %18419 = vmatprep.subr.mxu1 %v19443_v31  ;;  %v5224_v20 = vpop.f32.mrf.mxu0 }
 0x3f0   : > { %18391 = vmatpush3.msra.mxu0 %v20371_v15  ;;  %18420 = vmatpush3.msra.mxu1 %v20387_v28  ;;  %v5225_v9 = vadd.f32 %v5224_v20, %v5145_v49 }
 0x3f1   : > { %18392 = vmatprep.subr.mxu0 %v19443_v31  ;;  %18421 = vmatprep.subr.mxu1 %v19443_v31  ;;  %v18002_v57 = vpop.f32.mrf.mxu0 }
 0x3f2   : > { %18393 = vmatpush3.msra.mxu0 %v20387_v28  ;;  %18422 = vmatpush3.msra.mxu1 %v20397_v8  ;;  %v5299_v52 = vadd.f32 %v5298_v18, %v5225_v9 }
 0x3f3   : > { %18423 = vmatprep.mubr.msk.f32.mxu1 %vm19446_vm6, %v19443_v31  ;;  %18394 = vmatprep.subr.mxu0 %v19443_v31 }
 0x3f4   : > { %18424 = vmatmul.mubr.f32.vlgmr.msra.gmra.mxu1 %v21121_v41  ;;  %18435 = vmatprep.subr.mxu1 %v19443_v31 }
 0x3f5   : > { %18395 = vmatpush3.msra.mxu0 %v20397_v8  ;;  %18396 = vmatprep.mubr.msk.f32.mxu0 %vm19446_vm6, %v19443_v31  ;;  %v5616_v54 = vpop.f32.mrf.mxu1 }
 0x3f6   : > { %18436 = vmatpush3.msra.mxu1 %v20371_v15  ;;  %18397 = vmatmul.mubr.f32.vlgmr.msra.gmra.mxu0 %v21143_v38 }
 0x3f7   : > { %18408 = vmatprep.subr.mxu0 %v19443_v31  ;;  %18437 = vmatprep.subr.mxu1 %v19443_v31  ;;  %v5376_v27 = vpop.f32.mrf.mxu0  ;;  %v18047_v24 = vpop.f32.mrf.mxu1 }
 0x3f8   : > { %18409 = vmatpush3.msra.mxu0 %v20393_v4  ;;  %18438 = vmatpush3.msra.mxu1 %v20387_v28  ;;  %v9204_v13 = vpop.permute.xlu0 %9203  ;;  %v5377_v12 = vadd.f32 %v5376_v27, %v5299_v52 }
 0x3f9   : > { %v9211_v17 = vsel %vm3325_vm7, 0.0, %v9204_v13  ;;  %18410 = vmatprep.subr.mxu0 %v19443_v31  ;;  %18439 = vmatprep.subr.mxu1 %v19443_v31  ;;  %v18020_v21 = vpop.f32.mrf.mxu0 }
 0x3fa   : > { %v9209_v47 = vpop.permute.xlu1 %9208  ;;  %18411 = vmatpush3.msra.mxu0 %v20405_v44  ;;  %18440 = vmatpush3.msra.mxu1 %v20397_v8  ;;  %v5463_v18 = vadd.f32 %v5462_v42, %v5377_v12 }
 0x3fb   : > { %v9212_v39 = vsel %vm3327_vm8, %v9211_v17, %v9209_v47  ;;  %18441 = vmatprep.mubr.msk.f32.mxu1 %vm19446_vm6, %v19443_v31  ;;  %18412 = vmatprep.subr.mxu0 %v19443_v31 }
 0x3fc   : > { %v9214_v19 = vsel %vm3340_vm9, %v9212_v39, 0  ;;  %18442 = vmatmul.mubr.f32.vlgmr.msra.gmra.mxu1 %v21095_v40  ;;  %18453 = vmatprep.subr.mxu1 %v19443_v31 }
 0x3fd   : > { %v21166_v16 = vand.u32 4294901760, %v9214_v19  ;;  %18413 = vmatpush3.msra.mxu0 %v20416_v37  ;;  %18414 = vmatprep.mubr.msk.f32.mxu0 %vm19446_vm6, %v19443_v31  ;;  %v21171_v2 = vpop.f32.mrf.mxu1 }
 0x3fe   : > { %18454 = vmatpush3.msra.mxu1 %v20170_v56  ;;  %18415 = vmatmul.mubr.f32.vlgmr.msra.gmra.mxu0 %v21107_v1 }
 0x3ff   : > { %18426 = vmatprep.subr.mxu0 %v19443_v31  ;;  %18455 = vmatprep.subr.mxu1 %v19443_v31  ;;  %v5540_v49 = vpop.f32.mrf.mxu0  ;;  %v18065_v42 = vpop.f32.mrf.mxu1  ;;  %v9285_v35 = vsub.f32 %v9214_v19, %v21166_v16 }
 0x400   : > { %18427 = vmatpush3.msra.mxu0 %v20410_v33  ;;  %18456 = vmatpush3.msra.mxu1 %v20185_v36  ;;  %v5541_v20 = vadd.f32 %v5540_v49, %v5463_v18 }
 0x401   : > { %18428 = vmatprep.subr.mxu0 %v19443_v31  ;;  %18457 = vmatprep.subr.mxu1 %v19443_v31  ;;  %v18038_v30 = vpop.f32.mrf.mxu0  ;;  %v9286_v57 = vand.u32 4294901760, %v9285_v35 }
 0x402   : > { %18429 = vmatpush3.msra.mxu0 %v20422_v58  ;;  %18458 = vmatpush3.msra.mxu1 %v20196_v45  ;;  %v21184_v9 = vadd.f32 %v5616_v54, %v5541_v20  ;;  %v10162_v20 = vpop.permute.xlu0 %10161 }
 0x403   : > { %18459 = vmatprep.mubr.msk.f32.mxu1 %vm19446_vm6, %v19443_v31  ;;  %18430 = vmatprep.subr.mxu0 %v19443_v31  ;;  %v9287_v54 = vsub.f32 %v9285_v35, %v9286_v57 }
 0x404   : > { %18460 = vmatmul.mubr.f32.vlgmr.msra.gmra.mxu1 %v21166_v16  ;;  %18471 = vmatprep.subr.mxu1 %v19443_v31 }
 0x405   : > { %18431 = vmatpush3.msra.mxu0 %v20434_v0  ;;  %18432 = vmatprep.mubr.msk.f32.mxu0 %vm19446_vm6, %v19443_v31  ;;  %v9288_v12 = vand.u32 4294901760, %v9287_v54  ;;  %v10169_v54 = vsel %vm3325_vm7, 0.0, %v10162_v20 }
 0x406   : > { %18472 = vmatpush3.msra.mxu1 %v20120_v60  ;;  %18433 = vmatmul.mubr.f32.vlgmr.msra.gmra.mxu0 %v21095_v40 }
 0x407   : > { %18444 = vmatprep.subr.mxu0 %v19443_v31  ;;  %18473 = vmatprep.subr.mxu1 %v19443_v31  ;;  %v21198_v52 = vpop.f32.mrf.mxu0 }
 0x408   : > { %18445 = vmatpush3.msra.mxu0 %v20120_v60  ;;  %18474 = vmatpush3.msra.mxu1 %v20131_v25  ;;  %v21202_v27 = vpop.f32.mrf.mxu1 }
 0x409   : > { %18446 = vmatprep.subr.mxu0 %v19443_v31  ;;  %18475 = vmatprep.subr.mxu1 %v19443_v31  ;;  %v18056_v24 = vpop.f32.mrf.mxu0 }
 0x40a   : > { %18447 = vmatpush3.msra.mxu0 %v20131_v25  ;;  %18476 = vmatpush3.msra.mxu1 %v20146_v61  ;;  %v18083_v13 = vpop.f32.mrf.mxu1  ;;  %v10167_v24 = vpop.permute.xlu1 %10166 }
 0x40b   : > { %18477 = vmatprep.mubr.msk.f32.mxu1 %vm19446_vm6, %v19443_v31  ;;  %18448 = vmatprep.subr.mxu0 %v19443_v31  ;;  %v10170_v13 = vsel %vm3327_vm8, %v10169_v54, %v10167_v24 }
 0x40c   : > { %18478 = vmatmul.mubr.f32.vlgmr.msra.gmra.mxu1 %v9286_v57  ;;  %18489 = vmatprep.subr.mxu1 %v19443_v31 }
 0x40d   : > { %18449 = vmatpush3.msra.mxu0 %v20146_v61  ;;  %18450 = vmatprep.mubr.msk.f32.mxu0 %vm19446_vm6, %v19443_v31 }
 0x40e   : > { %18490 = vmatpush3.msra.mxu1 %v20120_v60  ;;  %18451 = vmatmul.mubr.f32.vlgmr.msra.gmra.mxu0 %v9288_v12  ;;  %v21216_v17 = vpop.f32.mrf.mxu1 }
 0x40f   : > { %18462 = vmatprep.subr.mxu0 %v19443_v31  ;;  %18491 = vmatprep.subr.mxu1 %v19443_v31 }
 0x410   : > { %18463 = vmatpush3.msra.mxu0 %v20129_v43  ;;  %18492 = vmatpush3.msra.mxu1 %v20131_v25  ;;  %v18101_v21 = vpop.f32.mrf.mxu1 }
 0x411   : > { %18464 = vmatprep.subr.mxu0 %v19443_v31  ;;  %18493 = vmatprep.subr.mxu1 %v19443_v31  ;;  %v5862_v47 = vpop.f32.mrf.mxu0 }
 0x412   : > { %18465 = vmatpush3.msra.mxu0 %v20144_v26  ;;  %18494 = vmatpush3.msra.mxu1 %v20146_v61 }
 0x413   : > { %18495 = vmatprep.mubr.msk.f32.mxu1 %vm19446_vm6, %v19443_v31  ;;  %18466 = vmatprep.subr.mxu0 %v19443_v31  ;;  %v18074_v18 = vpop.f32.mrf.mxu0 }
 0x414   : > { %18496 = vmatmul.mubr.f32.vlgmr.msra.gmra.mxu1 %v21166_v16  ;;  %18507 = vmatprep.subr.mxu1 %v19443_v31  ;;  %v10172_v18 = vsel %vm3340_vm9, %v10170_v13, 0 }
 0x415   : > { %18467 = vmatpush3.msra.mxu0 %v20165_v11  ;;  %18468 = vmatprep.mubr.msk.f32.mxu0 %vm19446_vm6, %v19443_v31 }
 0x416   : > { %18508 = vmatpush3.msra.mxu1 %v20328_v14  ;;  %18469 = vmatmul.mubr.f32.vlgmr.msra.gmra.mxu0 %v9285_v35  ;;  %v21235_v39 = vpop.f32.mrf.mxu1 }
 0x417   : > { %18480 = vmatprep.subr.mxu0 %v19443_v31  ;;  %18509 = vmatprep.subr.mxu1 %v19443_v31 }
 0x418   : > { %18481 = vmatpush3.msra.mxu0 %v20141_v48  ;;  %18510 = vmatpush3.msra.mxu1 %v20345_v6  ;;  %v6026_v19 = vpop.f32.mrf.mxu0  ;;  %v18119_v49 = vpop.f32.mrf.mxu1 }
 0x419   : > { %18482 = vmatprep.subr.mxu0 %v19443_v31  ;;  %18511 = vmatprep.subr.mxu1 %v19443_v31 }
 0x41a   : > { %18483 = vmatpush3.msra.mxu0 %v20162_v50  ;;  %18512 = vmatpush3.msra.mxu1 %v20357_v5  ;;  %v18092_v42 = vpop.f32.mrf.mxu0 }
 0x41b   : > { %18513 = vmatprep.mubr.msk.f32.mxu1 %vm19446_vm6, %v19443_v31  ;;  %18484 = vmatprep.subr.mxu0 %v19443_v31 }
 0x41c   : > { %18514 = vmatmul.mubr.f32.vlgmr.msra.gmra.mxu1 %v21095_v40  ;;  %18525 = vmatprep.subr.mxu1 %v19443_v31 }
 0x41d   : > { %18485 = vmatpush3.msra.mxu0 %v20175_v22  ;;  %18486 = vmatprep.mubr.msk.f32.mxu0 %vm19446_vm6, %v19443_v31 }
 0x41e   : > { %18526 = vmatpush3.msra.mxu1 %v20263_v51  ;;  %18487 = vmatmul.mubr.f32.vlgmr.msra.gmra.mxu0 %v21166_v16  ;;  %v6182_v35 = vpop.f32.mrf.mxu0 }
 0x41f   : > { %18498 = vmatprep.subr.mxu0 %v19443_v31  ;;  %18527 = vmatprep.subr.mxu1 %v19443_v31 }
 0x420   : > { %18499 = vmatpush3.msra.mxu0 %v20263_v51  ;;  %18528 = vmatpush3.msra.mxu1 %v20272_v46  ;;  %v18110_v30 = vpop.f32.mrf.mxu0  ;;  %v6452_v57 = vpop.f32.mrf.mxu1 }
 0x421   : > { %18500 = vmatprep.subr.mxu0 %v19443_v31  ;;  %18529 = vmatprep.subr.mxu1 %v19443_v31 }
 0x422   : > { %18501 = vmatpush3.msra.mxu0 %v20272_v46  ;;  %18530 = vmatpush3.msra.mxu1 %v20284_v7  ;;  %v18137_v16 = vpop.f32.mrf.mxu1 }
 0x423   : > { %18531 = vmatprep.mubr.msk.f32.mxu1 %vm19446_vm6, %v19443_v31  ;;  %18502 = vmatprep.subr.mxu0 %v19443_v31 }
 0x424   : > { %18532 = vmatmul.mubr.f32.vlgmr.msra.gmra.mxu1 %v21121_v41  ;;  %18543 = vmatprep.subr.mxu1 %v19443_v31  ;;  %v5949_v41 = vadd.f32 %v21202_v27, %v5862_v47  ;;  %v21288_v47 = vand.u32 4294901760, %v10172_v18 }
 0x425   : > { %18503 = vmatpush3.msra.mxu0 %v20284_v7  ;;  %18504 = vmatprep.mubr.msk.f32.mxu0 %vm19446_vm6, %v19443_v31 }
 0x426   : > { %18544 = vmatpush3.msra.mxu1 %v20263_v51  ;;  %18505 = vmatmul.mubr.f32.vlgmr.msra.gmra.mxu0 %v21143_v38  ;;  %v6606_v12 = vpop.f32.mrf.mxu1  ;;  %v6027_v49 = vadd.f32 %v6026_v19, %v5949_v41  ;;  %v21301_v30 = vsub.f32 %v10172_v18, %v21288_v47 }
 0x427   : > { %18516 = vmatprep.subr.mxu0 %v19443_v31  ;;  %18545 = vmatprep.subr.mxu1 %v19443_v31 }
 0x428   : > { %18517 = vmatpush3.msra.mxu0 %v20280_v3  ;;  %18546 = vmatpush3.msra.mxu1 %v20272_v46  ;;  %v18155_v21 = vpop.f32.mrf.mxu1  ;;  %v6103_v19 = vadd.f32 %v21216_v17, %v6027_v49  ;;  %v5697_v17 = vadd.f32 %v21198_v52, %v21184_v9  ;;  %v21318_v13 = vand.u32 4294901760, %v21301_v30 }
 0x429   : > { %18518 = vmatprep.subr.mxu0 %v19443_v31  ;;  %18547 = vmatprep.subr.mxu1 %v19443_v31  ;;  %v6366_v38 = vpop.f32.mrf.mxu0  ;;  %v10666_v21 = vpop.permute.xlu0 %10665 }
 0x42a   : > { %18519 = vmatpush3.msra.mxu0 %v20290_v34  ;;  %18548 = vmatpush3.msra.mxu1 %v20284_v7  ;;  %v6453_v42 = vadd.f32 %v6452_v57, %v6366_v38  ;;  %v6183_v57 = vadd.f32 %v6182_v35, %v6103_v19  ;;  %v5771_v52 = vadd.f32 %v21171_v2, %v5697_v17 }
 0x42b   : > { %18549 = vmatprep.mubr.msk.f32.mxu1 %vm19446_vm6, %v19443_v31  ;;  %18520 = vmatprep.subr.mxu0 %v19443_v31  ;;  %v18128_v27 = vpop.f32.mrf.mxu0 }
 0x42c   : > { %18550 = vmatmul.mubr.f32.vlgmr.msra.gmra.mxu1 %v21095_v40  ;;  %18561 = vmatprep.subr.mxu1 %v19443_v31  ;;  %v6257_v24 = vadd.f32 %v21235_v39, %v6183_v57  ;;  %v10671_v27 = vpop.permute.xlu1 %10670 }
 0x42d   : > { %18521 = vmatpush3.msra.mxu0 %v20301_v53  ;;  %18522 = vmatprep.mubr.msk.f32.mxu0 %vm19446_vm6, %v19443_v31 }
 0x42e   : > { %18562 = vmatpush3.msra.mxu1 %v20445_v23  ;;  %18523 = vmatmul.mubr.f32.vlgmr.msra.gmra.mxu0 %v21107_v1  ;;  %v6760_v20 = vpop.f32.mrf.mxu1  ;;  %v6260_v41 = vadd.f32 %v6257_v24, %v5771_v52 }
 0x42f   : > { %18534 = vmatprep.subr.mxu0 %v19443_v31  ;;  %18563 = vmatprep.subr.mxu1 %v19443_v31 }
 0x430   : > { %18535 = vmatpush3.msra.mxu0 %v20294_v10  ;;  %18564 = vmatpush3.msra.mxu1 %v20458_v59  ;;  %v18173_v16 = vpop.f32.mrf.mxu1  ;;  %v21345_v19 = vadd.f32 %v21050_v55, %v6260_v41 }
 0x431   : > { %18536 = vmatprep.subr.mxu0 %v19443_v31  ;;  %18565 = vmatprep.subr.mxu1 %v19443_v31  ;;  %v6530_v1 = vpop.f32.mrf.mxu0 }
 0x432   : > { %18537 = vmatpush3.msra.mxu0 %v20306_v29  ;;  %18566 = vmatpush3.msra.mxu1 %v20465_v62  ;;  %v6531_v54 = vadd.f32 %v6530_v1, %v6453_v42  ;;  %v10673_v42 = vsel %vm3325_vm7, 0.0, %v10666_v21  ;;  %v6262_v55 = vsel %vm2872_vm1, %v21345_v19, 0.0 }
 0x433   : > { %18567 = vmatprep.mubr.msk.f32.mxu1 %vm19446_vm6, %v19443_v31  ;;  %18538 = vmatprep.subr.mxu0 %v19443_v31  ;;  %v18146_v35 = vpop.f32.mrf.mxu0  ;;  %v10674_v16 = vsel %vm3327_vm8, %v10673_v42, %v10671_v27 }
 0x434   : > { %18568 = vmatmul.mubr.f32.vlgmr.msra.gmra.mxu1 %v21288_v47  ;;  %18579 = vmatprep.subr.mxu1 %v19443_v31  ;;  %v6607_v9 = vadd.f32 %v6606_v12, %v6531_v54  ;;  %v10245_v12 = vsub.f32 %v21301_v30, %v21318_v13  ;;  %v10676_v54 = vsel %vm3340_vm9, %v10674_v16, 0 }
 0x435   : > { %18539 = vmatpush3.msra.mxu0 %v20320_v63  ;;  %18540 = vmatprep.mubr.msk.f32.mxu0 %vm19446_vm6, %v19443_v31  ;;  %v21368_v52 = vand.u32 4294901760, %v10676_v54 }
 0x436   : > { %18580 = vmatpush3.msra.mxu1 %v20371_v15  ;;  %18541 = vmatmul.mubr.f32.vlgmr.msra.gmra.mxu0 %v21095_v40  ;;  %v21341_v49 = vand.u32 4294901760, %v10245_v12 }
 0x437   : > { %18552 = vmatprep.subr.mxu0 %v19443_v31  ;;  %18581 = vmatprep.subr.mxu1 %v19443_v31  ;;  %v6924_v39 = vpop.f32.mrf.mxu1 }
 0x438   : > { %18553 = vmatpush3.msra.mxu0 %v20371_v15  ;;  %18582 = vmatpush3.msra.mxu1 %v20387_v28 }
 0x439   : > { %18554 = vmatprep.subr.mxu0 %v19443_v31  ;;  %18583 = vmatprep.subr.mxu1 %v19443_v31  ;;  %v6686_v2 = vpop.f32.mrf.mxu0  ;;  %v18191_v40 = vpop.f32.mrf.mxu1 }
 0x43a   : > { %18555 = vmatpush3.msra.mxu0 %v20387_v28  ;;  %18584 = vmatpush3.msra.mxu1 %v20397_v8  ;;  %v6687_v18 = vadd.f32 %v6686_v2, %v6607_v9 }
 0x43b   : > { %18585 = vmatprep.mubr.msk.f32.mxu1 %vm19446_vm6, %v19443_v31  ;;  %18556 = vmatprep.subr.mxu0 %v19443_v31  ;;  %v18164_v38 = vpop.f32.mrf.mxu0 }
 0x43c   : > { %18586 = vmatmul.mubr.f32.vlgmr.msra.gmra.mxu1 %v21318_v13  ;;  %18597 = vmatprep.subr.mxu1 %v19443_v31  ;;  %v6761_v57 = vadd.f32 %v6760_v20, %v6687_v18 }
 0x43d   : > { %18557 = vmatpush3.msra.mxu0 %v20397_v8  ;;  %18558 = vmatprep.mubr.msk.f32.mxu0 %vm19446_vm6, %v19443_v31 }
 0x43e   : > { %18598 = vmatpush3.msra.mxu1 %v20371_v15  ;;  %18559 = vmatmul.mubr.f32.vlgmr.msra.gmra.mxu0 %v21341_v49 }
 0x43f   : > { %18570 = vmatprep.subr.mxu0 %v19443_v31  ;;  %18599 = vmatprep.subr.mxu1 %v19443_v31  ;;  %v7078_v1 = vpop.f32.mrf.mxu1 }
 0x440   : > { %18571 = vmatpush3.msra.mxu0 %v20393_v4  ;;  %18600 = vmatpush3.msra.mxu1 %v20387_v28 }
 0x441   : > { %18572 = vmatprep.subr.mxu0 %v19443_v31  ;;  %18601 = vmatprep.subr.mxu1 %v19443_v31  ;;  %v6838_v20 = vpop.f32.mrf.mxu0  ;;  %v18209_v17 = vpop.f32.mrf.mxu1 }
 0x442   : > { %18573 = vmatpush3.msra.mxu0 %v20405_v44  ;;  %18602 = vmatpush3.msra.mxu1 %v20397_v8  ;;  %v6839_v35 = vadd.f32 %v6838_v20, %v6761_v57  ;;  %v11624_v17 = vpop.permute.xlu0 %11623 }
 0x443   : > { %18603 = vmatprep.mubr.msk.f32.mxu1 %vm19446_vm6, %v19443_v31  ;;  %6263 = vadd.xlane.f32.xlu0 %v6262_v55  ;;  %v18182_v24 = vpop.f32.mrf.mxu0 }
 0x444   : > { %18574 = vmatprep.subr.mxu0 %v19443_v31  ;;  %18604 = vmatmul.mubr.f32.vlgmr.msra.gmra.mxu1 %v21288_v47  ;;  %v6925_v9 = vadd.f32 %v6924_v39, %v6839_v35  ;;  %v10747_v39 = vsub.f32 %v10676_v54, %v21368_v52  ;;  %v11631_v35 = vsel %vm3325_vm7, 0.0, %v11624_v17  ;;  %v11629_v24 = vpop.permute.xlu1 %11628 }
 0x445   : > { %18615 = vmatprep.subr.mxu1 %v19443_v31  ;;  %18575 = vmatpush3.msra.mxu0 %v20416_v37 }
 0x446   : > { %18576 = vmatprep.mubr.msk.f32.mxu0 %vm19446_vm6, %v19443_v31  ;;  %18616 = vmatpush3.msra.mxu1 %v20170_v56  ;;  %v10748_v18 = vand.u32 4294901760, %v10747_v39 }
 0x447   : > { %18577 = vmatmul.mubr.f32.vlgmr.msra.gmra.mxu0 %v21301_v30  ;;  %18588 = vmatprep.subr.mxu0 %v19443_v31  ;;  %v7232_v41 = vpop.f32.mrf.mxu1 }
 0x448   : > { %18617 = vmatprep.subr.mxu1 %v19443_v31  ;;  %18589 = vmatpush3.msra.mxu0 %v20410_v33  ;;  %v10749_v27 = vsub.f32 %v10747_v39, %v10748_v18 }
 0x449   : > { %18618 = vmatpush3.msra.mxu1 %v20185_v36  ;;  %18590 = vmatprep.subr.mxu0 %v19443_v31  ;;  %v18227_v12 = vpop.f32.mrf.mxu1 }
 0x44a   : > { %18619 = vmatprep.subr.mxu1 %v19443_v31  ;;  %18591 = vmatpush3.msra.mxu0 %v20422_v58  ;;  %v7002_v21 = vpop.f32.mrf.mxu0  ;;  %v10750_v55 = vand.u32 4294901760, %v10749_v27 }
 0x44b   : > { %18620 = vmatpush3.msra.mxu1 %v20196_v45  ;;  %18621 = vmatprep.mubr.msk.f32.mxu1 %vm19446_vm6, %v19443_v31  ;;  %v7003_v2 = vadd.f32 %v7002_v21, %v6925_v9 }
 0x44c   : > { %18592 = vmatprep.subr.mxu0 %v19443_v31  ;;  %18622 = vmatmul.mubr.f32.vlgmr.msra.gmra.mxu1 %v21368_v52  ;;  %v18200_v40 = vpop.f32.mrf.mxu0 }
 0x44d   : > { %18633 = vmatprep.subr.mxu1 %v19443_v31  ;;  %18593 = vmatpush3.msra.mxu0 %v20434_v0  ;;  %v7079_v38 = vadd.f32 %v7078_v1, %v7003_v2 }
 0x44e   : > { %18594 = vmatprep.mubr.msk.f32.mxu0 %vm19446_vm6, %v19443_v31  ;;  %18634 = vmatpush3.msra.mxu1 %v20120_v60 }
 0x44f   : > { %18595 = vmatmul.mubr.f32.vlgmr.msra.gmra.mxu0 %v21288_v47  ;;  %18606 = vmatprep.subr.mxu0 %v19443_v31 }
 0x450   : > { %18635 = vmatprep.subr.mxu1 %v19443_v31  ;;  %18607 = vmatpush3.msra.mxu0 %v20120_v60  ;;  %v7158_v42 = vpop.f32.mrf.mxu0 }
 0x451   : > { %18636 = vmatpush3.msra.mxu1 %v20131_v25  ;;  %18608 = vmatprep.subr.mxu0 %v19443_v31  ;;  %v7159_v57 = vadd.f32 %v7158_v42, %v7079_v38 }
 0x452   : > { %18637 = vmatprep.subr.mxu1 %v19443_v31  ;;  %18609 = vmatpush3.msra.mxu0 %v20131_v25  ;;  %v18218_v16 = vpop.f32.mrf.mxu0 }
 0x453   : > { %18638 = vmatpush3.msra.mxu1 %v20146_v61  ;;  %18639 = vmatprep.mubr.msk.f32.mxu1 %vm19446_vm6, %v19443_v31  ;;  %v21405_v1 = vadd.f32 %v7232_v41, %v7159_v57 }
 0x454   : > { %18610 = vmatprep.subr.mxu0 %v19443_v31  ;;  %18640 = vmatmul.mubr.f32.vlgmr.msra.gmra.mxu1 %v10748_v18 }
 0x455   : > { %18651 = vmatprep.subr.mxu1 %v19443_v31  ;;  %18611 = vmatpush3.msra.mxu0 %v20146_v61 }
 0x456   : > { %18612 = vmatprep.mubr.msk.f32.mxu0 %vm19446_vm6, %v19443_v31  ;;  %18652 = vmatpush3.msra.mxu1 %v20120_v60 }
 0x457   : > { %18613 = vmatmul.mubr.f32.vlgmr.msra.gmra.mxu0 %v10750_v55  ;;  %18624 = vmatprep.subr.mxu0 %v19443_v31 }
 0x458   : > { %18653 = vmatprep.subr.mxu1 %v19443_v31  ;;  %18625 = vmatpush3.msra.mxu0 %v20129_v43 }
 0x459   : > { %18654 = vmatpush3.msra.mxu1 %v20131_v25  ;;  %18626 = vmatprep.subr.mxu0 %v19443_v31 }
 0x45a   : > { %18655 = vmatprep.subr.mxu1 %v19443_v31  ;;  %18627 = vmatpush3.msra.mxu0 %v20144_v26 }
 0x45b   : > { %18656 = vmatpush3.msra.mxu1 %v20146_v61  ;;  %18657 = vmatprep.mubr.msk.f32.mxu1 %vm19446_vm6, %v19443_v31 }
 0x45c   : > { %18628 = vmatprep.subr.mxu0 %v19443_v31  ;;  %18658 = vmatmul.mubr.f32.vlgmr.msra.gmra.mxu1 %v21368_v52 }
 0x45d   : > { %18669 = vmatprep.subr.mxu1 %v19443_v31  ;;  %18629 = vmatpush3.msra.mxu0 %v20165_v11 }
 0x45e   : > { %18630 = vmatprep.mubr.msk.f32.mxu0 %vm19446_vm6, %v19443_v31  ;;  %18670 = vmatpush3.msra.mxu1 %v20328_v14 }
 0x45f   : > { %18631 = vmatmul.mubr.f32.vlgmr.msra.gmra.mxu0 %v10747_v39  ;;  %18642 = vmatprep.subr.mxu0 %v19443_v31 }
 0x460   : > { %18671 = vmatprep.subr.mxu1 %v19443_v31  ;;  %18643 = vmatpush3.msra.mxu0 %v20141_v48 }
 0x461   : > { %18672 = vmatpush3.msra.mxu1 %v20345_v6  ;;  %18644 = vmatprep.subr.mxu0 %v19443_v31 }
 0x462   : > { %18673 = vmatprep.subr.mxu1 %v19443_v31  ;;  %18645 = vmatpush3.msra.mxu0 %v20162_v50 }
 0x463   : > { %18674 = vmatpush3.msra.mxu1 %v20357_v5  ;;  %18675 = vmatprep.mubr.msk.f32.mxu1 %vm19446_vm6, %v19443_v31 }
 0x464   : > { %18646 = vmatprep.subr.mxu0 %v19443_v31  ;;  %18676 = vmatmul.mubr.f32.vlgmr.msra.gmra.mxu1 %v21288_v47 }
 0x465   : > { %18687 = vmatprep.subr.mxu1 %v19443_v31  ;;  %18647 = vmatpush3.msra.mxu0 %v20175_v22 }
 0x466   : > { %18648 = vmatprep.mubr.msk.f32.mxu0 %vm19446_vm6, %v19443_v31  ;;  %18688 = vmatpush3.msra.mxu1 %v20263_v51 }
 0x467   : > { %18649 = vmatmul.mubr.f32.vlgmr.msra.gmra.mxu0 %v21368_v52  ;;  %18660 = vmatprep.subr.mxu0 %v19443_v31  ;;  %v7410_v20 = vpop.f32.mrf.mxu1  ;;  %v11632_v52 = vsel %vm3327_vm8, %v11631_v35, %v11629_v24 }
 0x468   : > { %18689 = vmatprep.subr.mxu1 %v19443_v31  ;;  %18661 = vmatpush3.msra.mxu0 %v20263_v51  ;;  %v11634_v21 = vsel %vm3340_vm9, %v11632_v52, 0 }
 0x469   : > { %18690 = vmatpush3.msra.mxu1 %v20272_v46  ;;  %18662 = vmatprep.subr.mxu0 %v19443_v31  ;;  %v18245_v54 = vpop.f32.mrf.mxu1  ;;  %v21481_v2 = vand.u32 4294901760, %v11634_v21 }
 0x46a   : > { %18691 = vmatprep.subr.mxu1 %v19443_v31  ;;  %18663 = vmatpush3.msra.mxu0 %v20272_v46 }
 0x46b   : > { %18692 = vmatpush3.msra.mxu1 %v20284_v7  ;;  %18693 = vmatprep.mubr.msk.f32.mxu1 %vm19446_vm6, %v19443_v31  ;;  %v21493_v27 = vsub.f32 %v11634_v21, %v21481_v2 }
 0x46c   : > { %18664 = vmatprep.subr.mxu0 %v19443_v31  ;;  %18694 = vmatmul.mubr.f32.vlgmr.msra.gmra.mxu1 %v21318_v13 }
 0x46d   : > { %18705 = vmatprep.subr.mxu1 %v19443_v31  ;;  %18665 = vmatpush3.msra.mxu0 %v20284_v7  ;;  %v7564_v9 = vpop.f32.mrf.mxu1  ;;  %v21507_v16 = vand.u32 4294901760, %v21493_v27 }
 0x46e   : > { %18666 = vmatprep.mubr.msk.f32.mxu0 %vm19446_vm6, %v19443_v31  ;;  %18706 = vmatpush3.msra.mxu1 %v20263_v51 }
 0x46f   : > { %18667 = vmatmul.mubr.f32.vlgmr.msra.gmra.mxu0 %v21341_v49  ;;  %18678 = vmatprep.subr.mxu0 %v19443_v31  ;;  %v18263_v13 = vpop.f32.mrf.mxu1  ;;  %v7324_v41 = vpop.f32.mrf.mxu0  ;;  %v11707_v35 = vsub.f32 %v21493_v27, %v21507_v16 }
 0x470   : > { %18707 = vmatprep.subr.mxu1 %v19443_v31  ;;  %18679 = vmatpush3.msra.mxu0 %v20280_v3  ;;  %v7411_v39 = vadd.f32 %v7410_v20, %v7324_v41  ;;  %v12133_v41 = vpop.permute.xlu1 %12132 }
 0x471   : > { %18708 = vmatpush3.msra.mxu1 %v20272_v46  ;;  %18680 = vmatprep.subr.mxu0 %v19443_v31  ;;  %v18236_v12 = vpop.f32.mrf.mxu0 }
 0x472   : > { %18709 = vmatprep.subr.mxu1 %v19443_v31  ;;  %18681 = vmatpush3.msra.mxu0 %v20290_v34 }
 0x473   : > { %18710 = vmatpush3.msra.mxu1 %v20284_v7  ;;  %18711 = vmatprep.mubr.msk.f32.mxu1 %vm19446_vm6, %v19443_v31  ;;  %v7718_v49 = vpop.f32.mrf.mxu1 }
 0x474   : > { %18682 = vmatprep.subr.mxu0 %v19443_v31  ;;  %18712 = vmatmul.mubr.f32.vlgmr.msra.gmra.mxu1 %v21288_v47 }
 0x475   : > { %18723 = vmatprep.subr.mxu1 %v19443_v31  ;;  %18683 = vmatpush3.msra.mxu0 %v20301_v53  ;;  %v18281_v40 = vpop.f32.mrf.mxu1 }
 0x476   : > { %18684 = vmatprep.mubr.msk.f32.mxu0 %vm19446_vm6, %v19443_v31  ;;  %18724 = vmatpush3.msra.mxu1 %v20445_v23  ;;  %v7488_v18 = vpop.f32.mrf.mxu0 }
 0x477   : > { %18685 = vmatmul.mubr.f32.vlgmr.msra.gmra.mxu0 %v21301_v30  ;;  %18696 = vmatprep.subr.mxu0 %v19443_v31  ;;  %v7489_v38 = vadd.f32 %v7488_v18, %v7411_v39  ;;  %v21533_v39 = vand.u32 4294901760, %v11707_v35 }
 0x478   : > { %18725 = vmatprep.subr.mxu1 %v19443_v31  ;;  %18697 = vmatpush3.msra.mxu0 %v20294_v10  ;;  %v18254_v42 = vpop.f32.mrf.mxu0 }
 0x479   : > { %18726 = vmatpush3.msra.mxu1 %v20458_v59  ;;  %18698 = vmatprep.subr.mxu0 %v19443_v31  ;;  %v7565_v57 = vadd.f32 %v7564_v9, %v7489_v38 }
 0x47a   : > { %18727 = vmatprep.subr.mxu1 %v19443_v31  ;;  %18699 = vmatpush3.msra.mxu0 %v20306_v29 }
 0x47b   : > { %18728 = vmatpush3.msra.mxu1 %v20465_v62  ;;  %18729 = vmatprep.mubr.msk.f32.mxu1 %vm19446_vm6, %v19443_v31  ;;  %v7914_v30 = vpop.f32.mrf.mxu1 }
 0x47c   : > { %18700 = vmatprep.subr.mxu0 %v19443_v31  ;;  %18730 = vmatmul.mubr.f32.vlgmr.msra.gmra.mxu1 %v21481_v2 }
 0x47d   : > { %18741 = vmatprep.subr.mxu1 %v19443_v31  ;;  %18701 = vmatpush3.msra.mxu0 %v20320_v63  ;;  %v18299_v55 = vpop.f32.mrf.mxu1 }
 0x47e   : > { %18702 = vmatprep.mubr.msk.f32.mxu0 %vm19446_vm6, %v19443_v31  ;;  %18742 = vmatpush3.msra.mxu1 %v20371_v15  ;;  %v7644_v20 = vpop.f32.mrf.mxu0 }
 0x47f   : > { %18703 = vmatmul.mubr.f32.vlgmr.msra.gmra.mxu0 %v21288_v47  ;;  %18714 = vmatprep.subr.mxu0 %v19443_v31  ;;  %v7645_v17 = vadd.f32 %v7644_v20, %v7565_v57  ;;  %v12128_v47 = vpop.permute.xlu0 %12127 }
 0x480   : > { %18743 = vmatprep.subr.mxu1 %v19443_v31  ;;  %18715 = vmatpush3.msra.mxu0 %v20371_v15  ;;  %v18272_v54 = vpop.f32.mrf.mxu0  ;;  %v12135_v13 = vsel %vm3325_vm7, 0.0, %v12128_v47 }
 0x481   : > { %18744 = vmatpush3.msra.mxu1 %v20387_v28  ;;  %18716 = vmatprep.subr.mxu0 %v19443_v31  ;;  %v7719_v24 = vadd.f32 %v7718_v49, %v7645_v17  ;;  %v12136_v21 = vsel %vm3327_vm8, %v12135_v13, %v12133_v41 }
 0x482   : > { %18745 = vmatprep.subr.mxu1 %v19443_v31  ;;  %18717 = vmatpush3.msra.mxu0 %v20387_v28  ;;  %v12138_v18 = vsel %vm3340_vm9, %v12136_v21, 0 }
 0x483   : > { %18746 = vmatpush3.msra.mxu1 %v20397_v8  ;;  %18747 = vmatprep.mubr.msk.f32.mxu1 %vm19446_vm6, %v19443_v31  ;;  %v21526_v9 = vadd.f32 %v7719_v24, %v21405_v1  ;;  %v8068_v52 = vpop.f32.mrf.mxu1  ;;  %v21553_v42 = vand.u32 4294901760, %v12138_v18 }
 0x484   : > { %18718 = vmatprep.subr.mxu0 %v19443_v31  ;;  %18748 = vmatmul.mubr.f32.vlgmr.msra.gmra.mxu1 %v21507_v16 }
 0x485   : > { %18759 = vmatprep.subr.mxu1 %v19443_v31  ;;  %18719 = vmatpush3.msra.mxu0 %v20397_v8  ;;  %v18317_v12 = vpop.f32.mrf.mxu1  ;;  %v21565_v17 = vsub.f32 %v12138_v18, %v21553_v42 }
 0x486   : > { %18720 = vmatprep.mubr.msk.f32.mxu0 %vm19446_vm6, %v19443_v31  ;;  %18760 = vmatpush3.msra.mxu1 %v20371_v15  ;;  %v7828_v1 = vpop.f32.mrf.mxu0 }
 0x487   : > { %18721 = vmatmul.mubr.f32.vlgmr.msra.gmra.mxu0 %v21533_v39  ;;  %18732 = vmatprep.subr.mxu0 %v19443_v31  ;;  %v7915_v49 = vadd.f32 %v7914_v30, %v7828_v1  ;;  %v12210_v24 = vand.u32 4294901760, %v21565_v17 }
 0x488   : > { %18761 = vmatprep.subr.mxu1 %v19443_v31  ;;  %18733 = vmatpush3.msra.mxu0 %v20393_v4  ;;  %v18290_v40 = vpop.f32.mrf.mxu0 }
 0x489   : > { %18762 = vmatpush3.msra.mxu1 %v20387_v28  ;;  %18734 = vmatprep.subr.mxu0 %v19443_v31  ;;  %v12211_v12 = vsub.f32 %v21565_v17, %v12210_v24 }
 0x48a   : > { %18763 = vmatprep.subr.mxu1 %v19443_v31  ;;  %18735 = vmatpush3.msra.mxu0 %v20405_v44 }
 0x48b   : > { %18764 = vmatpush3.msra.mxu1 %v20397_v8  ;;  %18765 = vmatprep.mubr.msk.f32.mxu1 %vm19446_vm6, %v19443_v31  ;;  %v8222_v38 = vpop.f32.mrf.mxu1 }
 0x48c   : > { %18736 = vmatprep.subr.mxu0 %v19443_v31  ;;  %18766 = vmatmul.mubr.f32.vlgmr.msra.gmra.mxu1 %v21481_v2 }
 0x48d   : > { %18777 = vmatprep.subr.mxu1 %v19443_v31  ;;  %18737 = vmatpush3.msra.mxu0 %v20416_v37  ;;  %v18335_v57 = vpop.f32.mrf.mxu1 }
 0x48e   : > { %18738 = vmatprep.mubr.msk.f32.mxu0 %vm19446_vm6, %v19443_v31  ;;  %18778 = vmatpush3.msra.mxu1 %v20170_v56  ;;  %v7992_v30 = vpop.f32.mrf.mxu0 }
 0x48f   : > { %18739 = vmatmul.mubr.f32.vlgmr.msra.gmra.mxu0 %v21493_v27  ;;  %18750 = vmatprep.subr.mxu0 %v19443_v31  ;;  %v7993_v55 = vadd.f32 %v7992_v30, %v7915_v49  ;;  %v12212_v49 = vand.u32 4294901760, %v12211_v12 }
 0x490   : > { %18779 = vmatprep.subr.mxu1 %v19443_v31  ;;  %18751 = vmatpush3.msra.mxu0 %v20410_v33  ;;  %v18308_v20 = vpop.f32.mrf.mxu0 }
 0x491   : > { %18780 = vmatpush3.msra.mxu1 %v20185_v36  ;;  %18752 = vmatprep.subr.mxu0 %v19443_v31  ;;  %v8069_v54 = vadd.f32 %v8068_v52, %v7993_v55 }
 0x492   : > { %18781 = vmatprep.subr.mxu1 %v19443_v31  ;;  %18753 = vmatpush3.msra.mxu0 %v20422_v58 }
 0x493   : > { %18782 = vmatpush3.msra.mxu1 %v20196_v45  ;;  %18783 = vmatprep.mubr.msk.f32.mxu1 %vm19446_vm6, %v19443_v31  ;;  %v8386_v35 = vpop.f32.mrf.mxu1 }
 0x494   : > { %18754 = vmatprep.subr.mxu0 %v19443_v31  ;;  %18784 = vmatmul.mubr.f32.vlgmr.msra.gmra.mxu1 %v21553_v42 }
 0x495   : > { %18795 = vmatprep.subr.mxu1 %v19443_v31  ;;  %18755 = vmatpush3.msra.mxu0 %v20434_v0  ;;  %v18353_v47 = vpop.f32.mrf.mxu1 }
 0x496   : > { %18756 = vmatprep.mubr.msk.f32.mxu0 %vm19446_vm6, %v19443_v31  ;;  %18796 = vmatpush3.msra.mxu1 %v20120_v60  ;;  %v8148_v52 = vpop.f32.mrf.mxu0 }
 0x497   : > { %18757 = vmatmul.mubr.f32.vlgmr.msra.gmra.mxu0 %v21481_v2  ;;  %18768 = vmatprep.subr.mxu0 %v19443_v31  ;;  %v8149_v13 = vadd.f32 %v8148_v52, %v8069_v54 }
 0x498   : > { %18797 = vmatprep.subr.mxu1 %v19443_v31  ;;  %18769 = vmatpush3.msra.mxu0 %v20120_v60  ;;  %v18326_v41 = vpop.f32.mrf.mxu0 }
 0x499   : > { %18798 = vmatpush3.msra.mxu1 %v20131_v25  ;;  %18770 = vmatprep.subr.mxu0 %v19443_v31  ;;  %v8223_v1 = vadd.f32 %v8222_v38, %v8149_v13 }
 0x49a   : > { %18799 = vmatprep.subr.mxu1 %v19443_v31  ;;  %18771 = vmatpush3.msra.mxu0 %v20131_v25 }
 0x49b   : > { %18800 = vmatpush3.msra.mxu1 %v20146_v61  ;;  %18801 = vmatprep.mubr.msk.f32.mxu1 %vm19446_vm6, %v19443_v31 }
 0x49c   : > { %18772 = vmatprep.subr.mxu0 %v19443_v31  ;;  %18802 = vmatmul.mubr.f32.vlgmr.msra.gmra.mxu1 %v12210_v24  ;;  %v8540_v21 = vpop.f32.mrf.mxu1 }
 0x49d   : > { %18813 = vmatprep.subr.mxu1 %v19443_v31  ;;  %18773 = vmatpush3.msra.mxu0 %v20146_v61 }
 0x49e   : > { %18774 = vmatprep.mubr.msk.f32.mxu0 %vm19446_vm6, %v19443_v31  ;;  %18814 = vmatpush3.msra.mxu1 %v20120_v60  ;;  %v8300_v40 = vpop.f32.mrf.mxu0  ;;  %v18371_v18 = vpop.f32.mrf.mxu1 }
 0x49f   : > { %18775 = vmatmul.mubr.f32.vlgmr.msra.gmra.mxu0 %v12212_v49  ;;  %18786 = vmatprep.subr.mxu0 %v19443_v31  ;;  %v8301_v38 = vadd.f32 %v8300_v40, %v8223_v1  ;;  %v13091_v49 = vpop.permute.xlu1 %13090 }
 0x4a0   : > { %18815 = vmatprep.subr.mxu1 %v19443_v31  ;;  %18787 = vmatpush3.msra.mxu0 %v20129_v43  ;;  %v18344_v57 = vpop.f32.mrf.mxu0 }
 0x4a1   : > { %18816 = vmatpush3.msra.mxu1 %v20131_v25  ;;  %18788 = vmatprep.subr.mxu0 %v19443_v31  ;;  %v8387_v30 = vadd.f32 %v8386_v35, %v8301_v38 }
 0x4a2   : > { %18817 = vmatprep.subr.mxu1 %v19443_v31  ;;  %18789 = vmatpush3.msra.mxu0 %v20144_v26 }
 0x4a3   : > { %18818 = vmatpush3.msra.mxu1 %v20146_v61  ;;  %18819 = vmatprep.mubr.msk.f32.mxu1 %vm19446_vm6, %v19443_v31 }
 0x4a4   : > { %18790 = vmatprep.subr.mxu0 %v19443_v31  ;;  %18820 = vmatmul.mubr.f32.vlgmr.msra.gmra.mxu1 %v21553_v42  ;;  %v8694_v55 = vpop.f32.mrf.mxu1 }
 0x4a5   : > { %18831 = vmatprep.subr.mxu1 %v19443_v31  ;;  %18791 = vmatpush3.msra.mxu0 %v20165_v11 }
 0x4a6   : > { %18792 = vmatprep.mubr.msk.f32.mxu0 %vm19446_vm6, %v19443_v31  ;;  %18832 = vmatpush3.msra.mxu1 %v20328_v14  ;;  %v8464_v20 = vpop.f32.mrf.mxu0  ;;  %v18389_v54 = vpop.f32.mrf.mxu1 }
 0x4a7   : > { %18793 = vmatmul.mubr.f32.vlgmr.msra.gmra.mxu0 %v21565_v17  ;;  %18804 = vmatprep.subr.mxu0 %v19443_v31  ;;  %v8465_v35 = vadd.f32 %v8464_v20, %v8387_v30 }
 0x4a8   : > { %18833 = vmatprep.subr.mxu1 %v19443_v31  ;;  %18805 = vmatpush3.msra.mxu0 %v20141_v48  ;;  %v18362_v24 = vpop.f32.mrf.mxu0 }
 0x4a9   : > { %18834 = vmatpush3.msra.mxu1 %v20345_v6  ;;  %18806 = vmatprep.subr.mxu0 %v19443_v31  ;;  %v8541_v47 = vadd.f32 %v8540_v21, %v8465_v35  ;;  %v13086_v21 = vpop.permute.xlu0 %13085 }
 0x4aa   : > { %18835 = vmatprep.subr.mxu1 %v19443_v31  ;;  %18807 = vmatpush3.msra.mxu0 %v20162_v50 }
 0x4ab   : > { %18836 = vmatpush3.msra.mxu1 %v20357_v5  ;;  %18837 = vmatprep.mubr.msk.f32.mxu1 %vm19446_vm6, %v19443_v31 }
 0x4ac   : > { %18808 = vmatprep.subr.mxu0 %v19443_v31  ;;  %18838 = vmatmul.mubr.f32.vlgmr.msra.gmra.mxu1 %v21481_v2  ;;  %v8872_v17 = vpop.f32.mrf.mxu1 }
 0x4ad   : > { %18849 = vmatprep.subr.mxu1 %v19443_v31  ;;  %18809 = vmatpush3.msra.mxu0 %v20175_v22 }
 0x4ae   : > { %18810 = vmatprep.mubr.msk.f32.mxu0 %vm19446_vm6, %v19443_v31  ;;  %18850 = vmatpush3.msra.mxu1 %v20263_v51  ;;  %v8620_v52 = vpop.f32.mrf.mxu0  ;;  %v18407_v13 = vpop.f32.mrf.mxu1 }
 0x4af   : > { %18811 = vmatmul.mubr.f32.vlgmr.msra.gmra.mxu0 %v21553_v42  ;;  %18822 = vmatprep.subr.mxu0 %v19443_v31  ;;  %v8621_v41 = vadd.f32 %v8620_v52, %v8541_v47  ;;  %v13093_v42 = vsel %vm3325_vm7, 0.0, %v13086_v21 }
 0x4b0   : > { %18851 = vmatprep.subr.mxu1 %v19443_v31  ;;  %18823 = vmatpush3.msra.mxu0 %v20263_v51  ;;  %v18380_v12 = vpop.f32.mrf.mxu0  ;;  %v13094_v57 = vsel %vm3327_vm8, %v13093_v42, %v13091_v49 }
 0x4b1   : > { %18852 = vmatpush3.msra.mxu1 %v20272_v46  ;;  %18824 = vmatprep.subr.mxu0 %v19443_v31  ;;  %v21641_v1 = vadd.f32 %v8694_v55, %v8621_v41  ;;  %v13096_v55 = vsel %vm3340_vm9, %v13094_v57, 0  ;;  %v21704_v41 = vld [vmem:[%s22360_s7] ss:$0 sm:$0xff] }
 0x4b2   : > { %18853 = vmatprep.subr.mxu1 %v19443_v31  ;;  %18825 = vmatpush3.msra.mxu0 %v20272_v46  ;;  %v21671_v20 = vand.u32 4294901760, %v13096_v55  ;;  %v21708_v12 = vadd.f32 %v21704_v41, %v21526_v9 }
 0x4b3   : > { %18854 = vmatpush3.msra.mxu1 %v20284_v7  ;;  %18855 = vmatprep.mubr.msk.f32.mxu1 %vm19446_vm6, %v19443_v31 }
 0x4b4   : > { %18826 = vmatprep.subr.mxu0 %v19443_v31  ;;  %18856 = vmatmul.mubr.f32.vlgmr.msra.gmra.mxu1 %v21507_v16  ;;  %v9026_v40 = vpop.f32.mrf.mxu1 }
 0x4b5   : > { %18867 = vmatprep.subr.mxu1 %v19443_v31  ;;  %18827 = vmatpush3.msra.mxu0 %v20284_v7 }
 0x4b6   : > { %18828 = vmatprep.mubr.msk.f32.mxu0 %vm19446_vm6, %v19443_v31  ;;  %18868 = vmatpush3.msra.mxu1 %v20263_v51  ;;  %v8786_v18 = vpop.f32.mrf.mxu0  ;;  %v18425_v38 = vpop.f32.mrf.mxu1 }
 0x4b7   : > { %18829 = vmatmul.mubr.f32.vlgmr.msra.gmra.mxu0 %v21533_v39  ;;  %18840 = vmatprep.subr.mxu0 %v19443_v31  ;;  %v8873_v16 = vadd.f32 %v8872_v17, %v8786_v18  ;;  %v21683_v17 = vsub.f32 %v13096_v55, %v21671_v20  ;;  %v7724_v18 = vsel %vm2872_vm1, %v21708_v12, 0.0 }
 0x4b8   : > { %18869 = vmatprep.subr.mxu1 %v19443_v31  ;;  %18841 = vmatpush3.msra.mxu0 %v20280_v3  ;;  %v18398_v30 = vpop.f32.mrf.mxu0 }
 0x4b9   : > { %18870 = vmatpush3.msra.mxu1 %v20272_v46  ;;  %18842 = vmatprep.subr.mxu0 %v19443_v31  ;;  %v21697_v13 = vand.u32 4294901760, %v21683_v17  ;;  %v13595_v30 = vpop.permute.xlu1 %13594 }
 0x4ba   : > { %18871 = vmatprep.subr.mxu1 %v19443_v31  ;;  %18843 = vmatpush3.msra.mxu0 %v20290_v34 }
 0x4bb   : > { %18872 = vmatpush3.msra.mxu1 %v20284_v7  ;;  %18873 = vmatprep.mubr.msk.f32.mxu1 %vm19446_vm6, %v19443_v31  ;;  %v13169_v9 = vsub.f32 %v21683_v17, %v21697_v13 }
 0x4bc   : > { %18844 = vmatprep.subr.mxu0 %v19443_v31  ;;  %18874 = vmatmul.mubr.f32.vlgmr.msra.gmra.mxu1 %v21481_v2  ;;  %v9180_v39 = vpop.f32.mrf.mxu1 }
 0x4bd   : > { %18885 = vmatprep.subr.mxu1 %v19443_v31  ;;  %18845 = vmatpush3.msra.mxu0 %v20301_v53 }
 0x4be   : > { %18846 = vmatprep.mubr.msk.f32.mxu0 %vm19446_vm6, %v19443_v31  ;;  %18886 = vmatpush3.msra.mxu1 %v20445_v23  ;;  %v8950_v54 = vpop.f32.mrf.mxu0  ;;  %v18443_v35 = vpop.f32.mrf.mxu1 }
 0x4bf   : > { %18847 = vmatmul.mubr.f32.vlgmr.msra.gmra.mxu0 %v21493_v27  ;;  %18858 = vmatprep.subr.mxu0 %v19443_v31  ;;  %v8951_v24 = vadd.f32 %v8950_v54, %v8873_v16 }
 0x4c0   : > { %18887 = vmatprep.subr.mxu1 %v19443_v31  ;;  %18859 = vmatpush3.msra.mxu0 %v20294_v10  ;;  %v18416_v47 = vpop.f32.mrf.mxu0 }
 0x4c1   : > { %18888 = vmatpush3.msra.mxu1 %v20458_v59  ;;  %18860 = vmatprep.subr.mxu0 %v19443_v31  ;;  %v9027_v52 = vadd.f32 %v9026_v40, %v8951_v24 }
 0x4c2   : > { %18889 = vmatprep.subr.mxu1 %v19443_v31  ;;  %18861 = vmatpush3.msra.mxu0 %v20306_v29 }
 0x4c3   : > { %18890 = vmatpush3.msra.mxu1 %v20465_v62  ;;  %18891 = vmatprep.mubr.msk.f32.mxu1 %vm19446_vm6, %v19443_v31 }
 0x4c4   : > { %18862 = vmatprep.subr.mxu0 %v19443_v31  ;;  %18892 = vmatmul.mubr.f32.vlgmr.msra.gmra.mxu1 %v21671_v20  ;;  %v21694_v27 = vpop.f32.mrf.mxu1 }
 0x4c5   : > { %18903 = vmatprep.subr.mxu1 %v19443_v31  ;;  %18863 = vmatpush3.msra.mxu0 %v20320_v63 }
 0x4c6   : > { %18864 = vmatprep.mubr.msk.f32.mxu0 %vm19446_vm6, %v19443_v31  ;;  %18904 = vmatpush3.msra.mxu1 %v20371_v15  ;;  %v9106_v21 = vpop.f32.mrf.mxu0  ;;  %v18461_v42 = vpop.f32.mrf.mxu1 }
 0x4c7   : > { %18865 = vmatmul.mubr.f32.vlgmr.msra.gmra.mxu0 %v21481_v2  ;;  %18876 = vmatprep.subr.mxu0 %v19443_v31  ;;  %v9107_v49 = vadd.f32 %v9106_v21, %v9027_v52  ;;  %v13590_v2 = vpop.permute.xlu0 %13589 }
 0x4c8   : > { %18905 = vmatprep.subr.mxu1 %v19443_v31  ;;  %18877 = vmatpush3.msra.mxu0 %v20371_v15  ;;  %v18434_v40 = vpop.f32.mrf.mxu0  ;;  %v13597_v16 = vsel %vm3325_vm7, 0.0, %v13590_v2 }
 0x4c9   : > { %18906 = vmatpush3.msra.mxu1 %v20387_v28  ;;  %18878 = vmatprep.subr.mxu0 %v19443_v31  ;;  %v9181_v38 = vadd.f32 %v9180_v39, %v9107_v49  ;;  %v21737_v39 = vand.u32 4294901760, %v13169_v9  ;;  %v13598_v35 = vsel %vm3327_vm8, %v13597_v16, %v13595_v30 }
 0x4ca   : > { %18907 = vmatprep.subr.mxu1 %v19443_v31  ;;  %18879 = vmatpush3.msra.mxu0 %v20387_v28  ;;  %v13600_v47 = vsel %vm3340_vm9, %v13598_v35, 0 }
 0x4cb   : > { %18908 = vmatpush3.msra.mxu1 %v20397_v8  ;;  %18909 = vmatprep.mubr.msk.f32.mxu1 %vm19446_vm6, %v19443_v31  ;;  %v21729_v57 = vadd.f32 %v9181_v38, %v21641_v1  ;;  %v21761_v21 = vand.u32 4294901760, %v13600_v47 }
 0x4cc   : > { %7725 = vadd.xlane.f32.xlu1 %v7724_v18  ;;  %18880 = vmatprep.subr.mxu0 %v19443_v31  ;;  %v21733_v55 = vpop.f32.mrf.mxu1 }
 0x4cd   : > { %18910 = vmatmul.mubr.f32.vlgmr.msra.gmra.mxu1 %v21697_v13  ;;  %18921 = vmatprep.subr.mxu1 %v19443_v31  ;;  %v13671_v9 = vsub.f32 %v13600_v47, %v21761_v21  ;;  %v14553_v47 = vpop.permute.xlu1 %14552 }
 0x4ce   : > { %18881 = vmatpush3.msra.mxu0 %v20397_v8  ;;  %18882 = vmatprep.mubr.msk.f32.mxu0 %vm19446_vm6, %v19443_v31  ;;  %v21742_v1 = vpop.f32.mrf.mxu0  ;;  %v18479_v54 = vpop.f32.mrf.mxu1 }
 0x4cf   : > { %18922 = vmatpush3.msra.mxu1 %v20371_v15  ;;  %18883 = vmatmul.mubr.f32.vlgmr.msra.gmra.mxu0 %v21737_v39  ;;  %v13672_v18 = vand.u32 4294901760, %v13671_v9 }
 0x4d0   : > { %18894 = vmatprep.subr.mxu0 %v19443_v31  ;;  %18923 = vmatprep.subr.mxu1 %v19443_v31  ;;  %v18452_v24 = vpop.f32.mrf.mxu0 }
 0x4d1   : > { %18895 = vmatpush3.msra.mxu0 %v20393_v4  ;;  %18924 = vmatpush3.msra.mxu1 %v20387_v28  ;;  %v13673_v2 = vsub.f32 %v13671_v9, %v13672_v18 }
 0x4d2   : > { %18896 = vmatprep.subr.mxu0 %v19443_v31  ;;  %18925 = vmatprep.subr.mxu1 %v19443_v31 }
 0x4d3   : > { %18897 = vmatpush3.msra.mxu0 %v20405_v44  ;;  %18926 = vmatpush3.msra.mxu1 %v20397_v8  ;;  %v13674_v30 = vand.u32 4294901760, %v13673_v2 }
 0x4d4   : > { %18927 = vmatprep.mubr.msk.f32.mxu1 %vm19446_vm6, %v19443_v31  ;;  %18898 = vmatprep.subr.mxu0 %v19443_v31  ;;  %v21759_v52 = vpop.f32.mrf.mxu1 }
 0x4d5   : > { %18928 = vmatmul.mubr.f32.vlgmr.msra.gmra.mxu1 %v21671_v20  ;;  %18939 = vmatprep.subr.mxu1 %v19443_v31 }
 0x4d6   : > { %18899 = vmatpush3.msra.mxu0 %v20416_v37  ;;  %18900 = vmatprep.mubr.msk.f32.mxu0 %vm19446_vm6, %v19443_v31  ;;  %v21768_v42 = vpop.f32.mrf.mxu0  ;;  %v18497_v49 = vpop.f32.mrf.mxu1 }
 0x4d7   : > { %18940 = vmatpush3.msra.mxu1 %v20170_v56  ;;  %18901 = vmatmul.mubr.f32.vlgmr.msra.gmra.mxu0 %v21683_v17 }
 0x4d8   : > { %18912 = vmatprep.subr.mxu0 %v19443_v31  ;;  %18941 = vmatprep.subr.mxu1 %v19443_v31  ;;  %v18470_v40 = vpop.f32.mrf.mxu0 }
 0x4d9   : > { %18913 = vmatpush3.msra.mxu0 %v20410_v33  ;;  %18942 = vmatpush3.msra.mxu1 %v20185_v36 }
 0x4da   : > { %18914 = vmatprep.subr.mxu0 %v19443_v31  ;;  %18943 = vmatprep.subr.mxu1 %v19443_v31 }
 0x4db   : > { %18915 = vmatpush3.msra.mxu0 %v20422_v58  ;;  %18944 = vmatpush3.msra.mxu1 %v20196_v45 }
 0x4dc   : > { %18945 = vmatprep.mubr.msk.f32.mxu1 %vm19446_vm6, %v19443_v31  ;;  %18916 = vmatprep.subr.mxu0 %v19443_v31  ;;  %v21784_v56 = vpop.f32.mrf.mxu1 }
 0x4dd   : > { %18946 = vmatmul.mubr.f32.vlgmr.msra.gmra.mxu1 %v21761_v21  ;;  %18957 = vmatprep.subr.mxu1 %v19443_v31 }
 0x4de   : > { %18917 = vmatpush3.msra.mxu0 %v20434_v0  ;;  %18918 = vmatprep.mubr.msk.f32.mxu0 %vm19446_vm6, %v19443_v31  ;;  %v21791_v36 = vpop.f32.mrf.mxu0  ;;  %v18515_v45 = vpop.f32.mrf.mxu1 }
 0x4df   : > { %18958 = vmatpush3.msra.mxu1 %v20120_v60  ;;  %18919 = vmatmul.mubr.f32.vlgmr.msra.gmra.mxu0 %v21671_v20 }
 0x4e0   : > { %18930 = vmatprep.subr.mxu0 %v19443_v31  ;;  %18959 = vmatprep.subr.mxu1 %v19443_v31  ;;  %v18488_v38 = vpop.f32.mrf.mxu0 }
 0x4e1   : > { %18931 = vmatpush3.msra.mxu0 %v20120_v60  ;;  %18960 = vmatpush3.msra.mxu1 %v20131_v25 }
 0x4e2   : > { %18932 = vmatprep.subr.mxu0 %v19443_v31  ;;  %18961 = vmatprep.subr.mxu1 %v19443_v31 }
 0x4e3   : > { %18933 = vmatpush3.msra.mxu0 %v20131_v25  ;;  %18962 = vmatpush3.msra.mxu1 %v20146_v61 }
 0x4e4   : > { %18963 = vmatprep.mubr.msk.f32.mxu1 %vm19446_vm6, %v19443_v31  ;;  %18934 = vmatprep.subr.mxu0 %v19443_v31  ;;  %v21806_v16 = vpop.f32.mrf.mxu1 }
 0x4e5   : > { %18964 = vmatmul.mubr.f32.vlgmr.msra.gmra.mxu1 %v13672_v18  ;;  %18975 = vmatprep.subr.mxu1 %v19443_v31 }
 0x4e6   : > { %18935 = vmatpush3.msra.mxu0 %v20146_v61  ;;  %18936 = vmatprep.mubr.msk.f32.mxu0 %vm19446_vm6, %v19443_v31  ;;  %v21812_v54 = vpop.f32.mrf.mxu0  ;;  %v18533_v35 = vpop.f32.mrf.mxu1 }
 0x4e7   : > { %18976 = vmatpush3.msra.mxu1 %v20120_v60  ;;  %18937 = vmatmul.mubr.f32.vlgmr.msra.gmra.mxu0 %v13674_v30 }
 0x4e8   : > { %18948 = vmatprep.subr.mxu0 %v19443_v31  ;;  %18977 = vmatprep.subr.mxu1 %v19443_v31  ;;  %v18506_v24 = vpop.f32.mrf.mxu0 }
 0x4e9   : > { %18949 = vmatpush3.msra.mxu0 %v20129_v43  ;;  %18978 = vmatpush3.msra.mxu1 %v20131_v25 }
 0x4ea   : > { %18950 = vmatprep.subr.mxu0 %v19443_v31  ;;  %18979 = vmatprep.subr.mxu1 %v19443_v31 }
 0x4eb   : > { %18951 = vmatpush3.msra.mxu0 %v20144_v26  ;;  %18980 = vmatpush3.msra.mxu1 %v20146_v61 }
 0x4ec   : > { %18981 = vmatprep.mubr.msk.f32.mxu1 %vm19446_vm6, %v19443_v31  ;;  %18952 = vmatprep.subr.mxu0 %v19443_v31  ;;  %v21826_v60 = vpop.f32.mrf.mxu1 }
 0x4ed   : > { %18982 = vmatmul.mubr.f32.vlgmr.msra.gmra.mxu1 %v21761_v21  ;;  %18993 = vmatprep.subr.mxu1 %v19443_v31 }
 0x4ee   : > { %18953 = vmatpush3.msra.mxu0 %v20165_v11  ;;  %18954 = vmatprep.mubr.msk.f32.mxu0 %vm19446_vm6, %v19443_v31  ;;  %v21833_v43 = vpop.f32.mrf.mxu0  ;;  %v18551_v25 = vpop.f32.mrf.mxu1 }
 0x4ef   : > { %18994 = vmatpush3.msra.mxu1 %v20328_v14  ;;  %18955 = vmatmul.mubr.f32.vlgmr.msra.gmra.mxu0 %v13671_v9 }
 0x4f0   : > { %18966 = vmatprep.subr.mxu0 %v19443_v31  ;;  %18995 = vmatprep.subr.mxu1 %v19443_v31  ;;  %v18524_v26 = vpop.f32.mrf.mxu0 }
 0x4f1   : > { %18967 = vmatpush3.msra.mxu0 %v20141_v48  ;;  %18996 = vmatpush3.msra.mxu1 %v20345_v6  ;;  %v9377_v48 = vadd.f32 %v21694_v27, %v21742_v1  ;;  %v14548_v6 = vpop.permute.xlu0 %14547 }
 0x4f2   : > { %18968 = vmatprep.subr.mxu0 %v19443_v31  ;;  %18997 = vmatprep.subr.mxu1 %v19443_v31  ;;  %v14555_v1 = vsel %vm3325_vm7, 0.0, %v14548_v6 }
 0x4f3   : > { %18969 = vmatpush3.msra.mxu0 %v20162_v50  ;;  %18998 = vmatpush3.msra.mxu1 %v20357_v5  ;;  %v9455_v14 = vadd.f32 %v21768_v42, %v9377_v48 }
 0x4f4   : > { %18999 = vmatprep.mubr.msk.f32.mxu1 %vm19446_vm6, %v19443_v31  ;;  %18970 = vmatprep.subr.mxu0 %v19443_v31  ;;  %v21847_v61 = vpop.f32.mrf.mxu1 }
 0x4f5   : > { %19000 = vmatmul.mubr.f32.vlgmr.msra.gmra.mxu1 %v21671_v20  ;;  %19011 = vmatprep.subr.mxu1 %v19443_v31  ;;  %v9531_v5 = vadd.f32 %v21733_v55, %v9455_v14 }
 0x4f6   : > { %18971 = vmatpush3.msra.mxu0 %v20175_v22  ;;  %18972 = vmatprep.mubr.msk.f32.mxu0 %vm19446_vm6, %v19443_v31  ;;  %v21856_v50 = vpop.f32.mrf.mxu0  ;;  %v18569_v11 = vpop.f32.mrf.mxu1 }
 0x4f7   : > { %19012 = vmatpush3.msra.mxu1 %v20263_v51  ;;  %18973 = vmatmul.mubr.f32.vlgmr.msra.gmra.mxu0 %v21761_v21  ;;  %v9611_v21 = vadd.f32 %v21791_v36, %v9531_v5 }
 0x4f8   : > { %18984 = vmatprep.subr.mxu0 %v19443_v31  ;;  %19013 = vmatprep.subr.mxu1 %v19443_v31  ;;  %v18542_v22 = vpop.f32.mrf.mxu0 }
 0x4f9   : > { %18985 = vmatpush3.msra.mxu0 %v20263_v51  ;;  %19014 = vmatpush3.msra.mxu1 %v20272_v46  ;;  %v9685_v40 = vadd.f32 %v21759_v52, %v9611_v21 }
 0x4fa   : > { %18986 = vmatprep.subr.mxu0 %v19443_v31  ;;  %19015 = vmatprep.subr.mxu1 %v19443_v31 }
 0x4fb   : > { %18987 = vmatpush3.msra.mxu0 %v20272_v46  ;;  %19016 = vmatpush3.msra.mxu1 %v20284_v7 }
 0x4fc   : > { %19017 = vmatprep.mubr.msk.f32.mxu1 %vm19446_vm6, %v19443_v31  ;;  %18988 = vmatprep.subr.mxu0 %v19443_v31  ;;  %v10488_v27 = vpop.f32.mrf.mxu1 }
 0x4fd   : > { %19018 = vmatmul.mubr.f32.vlgmr.msra.gmra.mxu1 %v21697_v13  ;;  %19029 = vmatprep.subr.mxu1 %v19443_v31  ;;  %v14556_v13 = vsel %vm3327_vm8, %v14555_v1, %v14553_v47 }
 0x4fe   : > { %18989 = vmatpush3.msra.mxu0 %v20284_v7  ;;  %18990 = vmatprep.mubr.msk.f32.mxu0 %vm19446_vm6, %v19443_v31  ;;  %v10248_v42 = vpop.f32.mrf.mxu0  ;;  %v18587_v49 = vpop.f32.mrf.mxu1 }
 0x4ff   : > { %19030 = vmatpush3.msra.mxu1 %v20263_v51  ;;  %18991 = vmatmul.mubr.f32.vlgmr.msra.gmra.mxu0 %v21737_v39  ;;  %v14558_v51 = vsel %vm3340_vm9, %v14556_v13, 0  ;;  %v10335_v9 = vadd.f32 %v21847_v61, %v10248_v42 }
 0x500   : > { %19002 = vmatprep.subr.mxu0 %v19443_v31  ;;  %19031 = vmatprep.subr.mxu1 %v19443_v31  ;;  %v18560_v55 = vpop.f32.mrf.mxu0  ;;  %v21899_v39 = vand.u32 4294901760, %v14558_v51 }
 0x501   : > { %19003 = vmatpush3.msra.mxu0 %v20280_v3  ;;  %19032 = vmatpush3.msra.mxu1 %v20272_v46  ;;  %v9763_v3 = vadd.f32 %v21812_v54, %v9685_v40 }
 0x502   : > { %19004 = vmatprep.subr.mxu0 %v19443_v31  ;;  %19033 = vmatprep.subr.mxu1 %v19443_v31  ;;  %v21913_v18 = vsub.f32 %v14558_v51, %v21899_v39 }
 0x503   : > { %19005 = vmatpush3.msra.mxu0 %v20290_v34  ;;  %19034 = vmatpush3.msra.mxu1 %v20284_v7  ;;  %v9849_v52 = vadd.f32 %v21784_v56, %v9763_v3 }
 0x504   : > { %19035 = vmatprep.mubr.msk.f32.mxu1 %vm19446_vm6, %v19443_v31  ;;  %19006 = vmatprep.subr.mxu0 %v19443_v31  ;;  %v10642_v46 = vpop.f32.mrf.mxu1  ;;  %v14630_v56 = vand.u32 4294901760, %v21913_v18 }
 0x505   : > { %19036 = vmatmul.mubr.f32.vlgmr.msra.gmra.mxu1 %v21671_v20  ;;  %19047 = vmatprep.subr.mxu1 %v19443_v31 }
 0x506   : > { %19007 = vmatpush3.msra.mxu0 %v20301_v53  ;;  %19008 = vmatprep.mubr.msk.f32.mxu0 %vm19446_vm6, %v19443_v31  ;;  %v18605_v7 = vpop.f32.mrf.mxu1 }
 0x507   : > { %19048 = vmatpush3.msra.mxu1 %v20445_v23  ;;  %19009 = vmatmul.mubr.f32.vlgmr.msra.gmra.mxu0 %v21683_v17  ;;  %v10412_v34 = vpop.f32.mrf.mxu0  ;;  %v9927_v23 = vadd.f32 %v21833_v43, %v9849_v52 }
 0x508   : > { %19020 = vmatprep.subr.mxu0 %v19443_v31  ;;  %19049 = vmatprep.subr.mxu1 %v19443_v31  ;;  %v10413_v17 = vadd.f32 %v10412_v34, %v10335_v9 }
 0x509   : > { %19021 = vmatpush3.msra.mxu0 %v20294_v10  ;;  %19050 = vmatpush3.msra.mxu1 %v20458_v59  ;;  %v18578_v53 = vpop.f32.mrf.mxu0  ;;  %v21929_v59 = vadd.f32 %v21704_v41, %v21729_v57 }
 0x50a   : > { %19022 = vmatprep.subr.mxu0 %v19443_v31  ;;  %19051 = vmatprep.subr.mxu1 %v19443_v31 }
 0x50b   : > { %19023 = vmatpush3.msra.mxu0 %v20306_v29  ;;  %19052 = vmatpush3.msra.mxu1 %v20465_v62  ;;  %v10003_v29 = vadd.f32 %v21806_v16, %v9927_v23  ;;  %v10489_v62 = vadd.f32 %v10488_v27, %v10413_v17  ;;  %v14631_v16 = vsub.f32 %v21913_v18, %v14630_v56 }
 0x50c   : > { %19053 = vmatprep.mubr.msk.f32.mxu1 %vm19446_vm6, %v19443_v31  ;;  %19024 = vmatprep.subr.mxu0 %v19443_v31  ;;  %v21923_v10 = vpop.f32.mrf.mxu1 }
 0x50d   : > { %19054 = vmatmul.mubr.f32.vlgmr.msra.gmra.mxu1 %v21899_v39  ;;  %19065 = vmatprep.subr.mxu1 %v19443_v31  ;;  %v10083_v57 = vadd.f32 %v21856_v50, %v10003_v29  ;;  %v14632_v35 = vand.u32 4294901760, %v14631_v16 }
 0x50e   : > { %19025 = vmatpush3.msra.mxu0 %v20320_v63  ;;  %19026 = vmatprep.mubr.msk.f32.mxu0 %vm19446_vm6, %v19443_v31  ;;  %v18623_v36 = vpop.f32.mrf.mxu1  ;;  %v9186_v63 = vsel %vm2872_vm1, %v21929_v59, 0.0 }
 0x50f   : > { %19066 = vmatpush3.msra.mxu1 %v20371_v15  ;;  %19027 = vmatmul.mubr.f32.vlgmr.msra.gmra.mxu0 %v21671_v20  ;;  %v10568_v45 = vpop.f32.mrf.mxu0  ;;  %v10157_v30 = vadd.f32 %v21826_v60, %v10083_v57 }
 0x510   : > { %19038 = vmatprep.subr.mxu0 %v19443_v31  ;;  %19067 = vmatprep.subr.mxu1 %v19443_v31  ;;  %v10569_v38 = vadd.f32 %v10568_v45, %v10489_v62 }
 0x511   : > { %19039 = vmatpush3.msra.mxu0 %v20371_v15  ;;  %19068 = vmatpush3.msra.mxu1 %v20387_v28  ;;  %v18596_v2 = vpop.f32.mrf.mxu0 }
 0x512   : > { %19040 = vmatprep.subr.mxu0 %v19443_v31  ;;  %19069 = vmatprep.subr.mxu1 %v19443_v31  ;;  %v10643_v20 = vadd.f32 %v10642_v46, %v10569_v38 }
 0x513   : > { %19041 = vmatpush3.msra.mxu0 %v20387_v28  ;;  %19070 = vmatpush3.msra.mxu1 %v20397_v8 }
 0x514   : > { %19071 = vmatprep.mubr.msk.f32.mxu1 %vm19446_vm6, %v19443_v31  ;;  %9187 = vadd.xlane.f32.xlu0 %v9186_v63  ;;  %v21953_v54 = vpop.f32.mrf.mxu1  ;;  %v10646_v24 = vadd.f32 %v10643_v20, %v10157_v30 }
 0x515   : > { %19042 = vmatprep.subr.mxu0 %v19443_v31  ;;  %19072 = vmatmul.mubr.f32.vlgmr.msra.gmra.mxu1 %v14630_v56 }
 0x516   : > { %19083 = vmatprep.subr.mxu1 %v19443_v31  ;;  %19043 = vmatpush3.msra.mxu0 %v20397_v8  ;;  %v18641_v43 = vpop.f32.mrf.mxu1  ;;  %v21967_v26 = vadd.f32 %v21704_v41, %v10646_v24 }
 0x517   : > { %19044 = vmatprep.mubr.msk.f32.mxu0 %vm19446_vm6, %v19443_v31  ;;  %19084 = vmatpush3.msra.mxu1 %v20371_v15  ;;  %v10752_v25 = vpop.f32.mrf.mxu0 }
 0x518   : > { %19045 = vmatmul.mubr.f32.vlgmr.msra.gmra.mxu0 %v14632_v35  ;;  %19056 = vmatprep.subr.mxu0 %v19443_v31 }
 0x519   : > { %19085 = vmatprep.subr.mxu1 %v19443_v31  ;;  %19057 = vmatpush3.msra.mxu0 %v20393_v4  ;;  %v18614_v60 = vpop.f32.mrf.mxu0 }
 0x51a   : > { %19086 = vmatpush3.msra.mxu1 %v20387_v28  ;;  %19058 = vmatprep.subr.mxu0 %v19443_v31  ;;  %v10648_v28 = vsel %vm2872_vm1, %v21967_v26, 0.0 }
 0x51b   : > { %19087 = vmatprep.subr.mxu1 %v19443_v31  ;;  %19059 = vmatpush3.msra.mxu0 %v20405_v44 }
 0x51c   : > { %19088 = vmatpush3.msra.mxu1 %v20397_v8  ;;  %19089 = vmatprep.mubr.msk.f32.mxu1 %vm19446_vm6, %v19443_v31  ;;  %v11146_v15 = vpop.f32.mrf.mxu1 }
 0x51d   : > { %19060 = vmatprep.subr.mxu0 %v19443_v31  ;;  %19090 = vmatmul.mubr.f32.vlgmr.msra.gmra.mxu1 %v21899_v39 }
 0x51e   : > { %19061 = vmatpush3.msra.mxu0 %v20416_v37  ;;  %19062 = vmatprep.mubr.msk.f32.mxu0 %vm19446_vm6, %v19443_v31  ;;  %v18659_v4 = vpop.f32.mrf.mxu1 }
 0x51f   : > { %19063 = vmatmul.mubr.f32.vlgmr.msra.gmra.mxu0 %v21913_v18  ;;  %19074 = vmatprep.subr.mxu0 %v19443_v31  ;;  %v10916_v8 = vpop.f32.mrf.mxu0 }
 0x520   : > { %19075 = vmatpush3.msra.mxu0 %v20410_v33  ;;  %19080 = vmatprep.mubr.msk.f32.mxu0 %vm19446_vm6, %v19443_v31 }
 0x521   : > { %19076 = vmatprep.subr.mxu0 %v19443_v31  ;;  %10649 = vadd.xlane.f32.xlu1 %v10648_v28  ;;  %v18632_v44 = vpop.f32.mrf.mxu0 }
 0x522   : > { %19077 = vmatpush3.msra.mxu0 %v20422_v58  ;;  %19097 = vmatprep.subr.mxu1 %v19443_v31 }
 0x523   : > { %19078 = vmatprep.subr.mxu0 %v19443_v31  ;;  %19099 = vmatprep.mubr.msk.f32.mxu1 %vm19446_vm6, %v19443_v31 }
 0x524   : > { %19079 = vmatpush3.msra.mxu0 %v20434_v0  ;;  %v11310_v37 = vpop.f32.mrf.mxu1  ;;  %v10839_v0 = vadd.f32 %v21923_v10, %v10752_v25 }
 0x525   : > { %19081 = vmatmul.mubr.f32.vlgmr.msra.gmra.mxu0 %v21899_v39  ;;  %19092 = vmatprep.subr.mxu0 %v19443_v31 }
 0x526   : > { %v18677_v33 = vpop.f32.mrf.mxu1  ;;  %19094 = vmatprep.mubr.msk.f32.mxu0 %vm19446_vm6, %v19443_v31  ;;  %v10917_v47 = vadd.f32 %v10916_v8, %v10839_v0 }
 0x527   : > { %v11072_v61 = vpop.f32.mrf.mxu0 }
 0x528   : > { %v10993_v13 = vadd.f32 %v21953_v54, %v10917_v47 }
 0x529   : > { %v18650_v58 = vpop.f32.mrf.mxu0 }
 0x52a   : > { %v11073_v55 = vadd.f32 %v11072_v61, %v10993_v13 }
 0x52c   : > { %v11464_v48 = vpop.f32.mrf.mxu1  ;;  %v11147_v46 = vadd.f32 %v11146_v15, %v11073_v55 }
 0x52e   : > { %v18695_v50 = vpop.f32.mrf.mxu1 }
 0x52f   : > { %v11224_v11 = vpop.f32.mrf.mxu0 }
 0x530   : > { %v11225_v7 = vadd.f32 %v11224_v11, %v11147_v46 }
 0x531   : > { %v18668_v14 = vpop.f32.mrf.mxu0 }
 0x532   : > { %v11311_v52 = vadd.f32 %v11310_v37, %v11225_v7 }
 0x534   : > { %v11618_v22 = vpop.f32.mrf.mxu1 }
 0x536   : > { %v18713_v6 = vpop.f32.mrf.mxu1 }
 0x537   : > { %v11388_v5 = vpop.f32.mrf.mxu0 }
 0x538   : > { %v11389_v18 = vadd.f32 %v11388_v5, %v11311_v52 }
 0x539   : > { %v18686_v27 = vpop.f32.mrf.mxu0 }
 0x53a   : > { %v11465_v56 = vadd.f32 %v11464_v48, %v11389_v18 }
 0x53c   : > { %v11796_v1 = vpop.f32.mrf.mxu1 }
 0x53e   : > { %v18731_v21 = vpop.f32.mrf.mxu1 }
 0x53f   : > { %v11544_v42 = vpop.f32.mrf.mxu0 }
 0x540   : > { %v11545_v62 = vadd.f32 %v11544_v42, %v11465_v56 }
 0x541   : > { %v18704_v49 = vpop.f32.mrf.mxu0 }
 0x542   : > { %v11619_v2 = vadd.f32 %v11618_v22, %v11545_v62 }
 0x544   : > { %v11950_v40 = vpop.f32.mrf.mxu1 }
 0x546   : > { %v18749_v51 = vpop.f32.mrf.mxu1 }
 0x547   : > { %v11710_v3 = vpop.f32.mrf.mxu0 }
 0x548   : > { %v11797_v23 = vadd.f32 %v11796_v1, %v11710_v3 }
 0x549   : > { %v18722_v39 = vpop.f32.mrf.mxu0 }
 0x54c   : > { %v12104_v34 = vpop.f32.mrf.mxu1 }
 0x54e   : > { %v18767_v9 = vpop.f32.mrf.mxu1 }
 0x54f   : > { %v11874_v53 = vpop.f32.mrf.mxu0 }
 0x550   : > { %v11875_v10 = vadd.f32 %v11874_v53, %v11797_v23 }
 0x551   : > { %v18740_v17 = vpop.f32.mrf.mxu0 }
 0x552   : > { %v11951_v36 = vadd.f32 %v11950_v40, %v11875_v10  ;;  %v4790_v10 = vpop.xlane.xlu0 %4789 }
 0x554   : > { %v12300_v29 = vpop.f32.mrf.mxu1 }
 0x556   : > { %v18785_v45 = vpop.f32.mrf.mxu1 }
 0x557   : > { %v12030_v57 = vpop.f32.mrf.mxu0 }
 0x558   : > { %v12031_v38 = vadd.f32 %v12030_v57, %v11951_v36  ;;  %v4791_v57 = vmul.f32 0.125, %v4790_v10 }
 0x559   : > { %v18758_v63 = vpop.f32.mrf.mxu0 }
 0x55a   : > { %v12105_v16 = vadd.f32 %v12104_v34, %v12031_v38  ;;  %v6264_v63 = vpop.xlane.xlu0 %6263 }
 0x55c   : > { %v12108_v20 = vadd.f32 %v12105_v16, %v11619_v2  ;;  %v12454_v30 = vpop.f32.mrf.mxu1 }
 0x55e   : > { %v18803_v54 = vpop.f32.mrf.mxu1  ;;  %v22000_v35 = vadd.f32 %v21704_v41, %v12108_v20 }
 0x55f   : > { %v12214_v24 = vpop.f32.mrf.mxu0  ;;  %v6265_v54 = vmul.f32 0.125, %v6264_v63 }
 0x560   : > { %v12110_v43 = vsel %vm2872_vm1, %v22000_v35, 0.0  ;;  %v12301_v5 = vadd.f32 %v12300_v29, %v12214_v24 }
 0x561   : > { %v18776_v25 = vpop.f32.mrf.mxu0  ;;  %12111 = vadd.xlane.f32.xlu0 %v12110_v43 }
 0x562   : > { %v7726_v25 = vpop.xlane.xlu1 %7725 }
 0x564   : > { %v12608_v60 = vpop.f32.mrf.mxu1 }
 0x566   : > { %v18821_v15 = vpop.f32.mrf.mxu1 }
 0x567   : > { %v12378_v28 = vpop.f32.mrf.mxu0 }
 0x568   : > { %v12379_v0 = vadd.f32 %v12378_v28, %v12301_v5 }
 0x569   : > { %v18794_v4 = vpop.f32.mrf.mxu0 }
 0x56a   : > { %v12455_v42 = vadd.f32 %v12454_v30, %v12379_v0  ;;  %v22005_v30 = vsub.f32 %v21060_v32, %v4791_v57  ;;  %v22011_v4 = vsub.f32 %v21345_v19, %v6265_v54 }
 0x56c   : > { %v12772_v8 = vpop.f32.mrf.mxu1 }
 0x56e   : > { %v18839_v44 = vpop.f32.mrf.mxu1 }
 0x56f   : > { %v12534_v37 = vpop.f32.mrf.mxu0  ;;  %v4793_v44 = vmul.f32 %v22005_v30, %v22005_v30 }
 0x570   : > { %v12535_v49 = vadd.f32 %v12534_v37, %v12455_v42 }
 0x571   : > { %v18812_v33 = vpop.f32.mrf.mxu0 }
 0x572   : > { %v12609_v51 = vadd.f32 %v12608_v60, %v12535_v49 }
 0x574   : > { %v12926_v61 = vpop.f32.mrf.mxu1 }
 0x576   : > { %v18857_v58 = vpop.f32.mrf.mxu1 }
 0x577   : > { %v12686_v48 = vpop.f32.mrf.mxu0  ;;  %v6267_v58 = vmul.f32 %v22011_v4, %v22011_v4 }
 0x578   : > { %v12687_v46 = vadd.f32 %v12686_v48, %v12609_v51 }
 0x579   : > { %v18830_v50 = vpop.f32.mrf.mxu0 }
 0x57a   : > { %v12773_v7 = vadd.f32 %v12772_v8, %v12687_v46 }
 0x57c   : > { %v13080_v11 = vpop.f32.mrf.mxu1 }
 0x57e   : > { %v18875_v14 = vpop.f32.mrf.mxu1 }
 0x57f   : > { %v12850_v22 = vpop.f32.mrf.mxu0 }
 0x580   : > { %v12851_v9 = vadd.f32 %v12850_v22, %v12773_v7  ;;  %v6268_v22 = vsel %vm2872_vm1, %v6267_v58, 0.0 }
 0x581   : > { %v18848_v6 = vpop.f32.mrf.mxu0 }
 0x582   : > { %v12927_v17 = vadd.f32 %v12926_v61, %v12851_v9  ;;  %v4794_v61 = vsel %vm2872_vm1, %v4793_v44, 0.0 }
 0x584   : > { %v13258_v27 = vpop.f32.mrf.mxu1 }
 0x586   : > { %v18893_v1 = vpop.f32.mrf.mxu1 }
 0x587   : > { %v13006_v47 = vpop.f32.mrf.mxu0 }
 0x588   : > { %v13007_v29 = vadd.f32 %v13006_v47, %v12927_v17 }
 0x589   : > { %v18866_v21 = vpop.f32.mrf.mxu0 }
 0x58a   : > { %v13081_v16 = vadd.f32 %v13080_v11, %v13007_v29 }
 0x58d   : > { %v13412_v13 = vpop.f32.mrf.mxu1 }
 0x58f   : > { %v13172_v55 = vpop.f32.mrf.mxu0  ;;  %v18911_v40 = vpop.f32.mrf.mxu1 }
 0x590   : > { %v13259_v53 = vadd.f32 %v13258_v27, %v13172_v55 }
 0x591   : > { %v18884_v3 = vpop.f32.mrf.mxu0 }
 0x595   : > { %v13566_v39 = vpop.f32.mrf.mxu1 }
 0x597   : > { %v13336_v34 = vpop.f32.mrf.mxu0  ;;  %v18929_v52 = vpop.f32.mrf.mxu1 }
 0x598   : > { %v13337_v23 = vadd.f32 %v13336_v34, %v13259_v53 }
 0x599   : > { %v18902_v18 = vpop.f32.mrf.mxu0 }
 0x59a   : > { %v13413_v62 = vadd.f32 %v13412_v13, %v13337_v23 }
 0x59d   : > { %v13762_v56 = vpop.f32.mrf.mxu1 }
 0x59f   : > { %v13492_v36 = vpop.f32.mrf.mxu0  ;;  %v18947_v45 = vpop.f32.mrf.mxu1 }
 0x5a0   : > { %v13493_v38 = vadd.f32 %v13492_v36, %v13413_v62 }
 0x5a1   : > { %v18920_v2 = vpop.f32.mrf.mxu0 }
 0x5a2   : > { %v13567_v20 = vadd.f32 %v13566_v39, %v13493_v38 }
 0x5a4   : > { %v13570_v24 = vadd.f32 %v13567_v20, %v13081_v16 }
 0x5a5   : > { %v13916_v43 = vpop.f32.mrf.mxu1 }
 0x5a6   : > { %v22008_v60 = vadd.f32 %v21704_v41, %v13570_v24 }
 0x5a7   : > { %v13676_v15 = vpop.f32.mrf.mxu0  ;;  %v18965_v28 = vpop.f32.mrf.mxu1 }
 0x5a8   : > { %v13572_v8 = vsel %vm2872_vm1, %v22008_v60, 0.0  ;;  %v13763_v3 = vadd.f32 %v13762_v56, %v13676_v15  ;;  %v7727_v15 = vmul.f32 0.125, %v7726_v25  ;;  %v9188_v28 = vpop.xlane.xlu0 %9187 }
 0x5a9   : > { %v18938_v32 = vpop.f32.mrf.mxu0  ;;  %13573 = vadd.xlane.f32.xlu1 %v13572_v8 }
 0x5aa   : > { %v10650_v37 = vpop.xlane.xlu1 %10649 }
 0x5ab   : > { %v10651_v33 = vmul.f32 0.125, %v10650_v37 }
 0x5ad   : > { %v14070_v48 = vpop.f32.mrf.mxu1  ;;  %4795 = vadd.xlane.f32.xlu1 %v4794_v61  ;;  %v22021_v19 = vsub.f32 %v21967_v26, %v10651_v33  ;;  %v22028_v33 = vsub.f32 %v21708_v12, %v7727_v15  ;;  %v9189_v61 = vmul.f32 0.125, %v9188_v28 }
 0x5af   : > { %v13840_v50 = vpop.f32.mrf.mxu0  ;;  %v18983_v11 = vpop.f32.mrf.mxu1  ;;  %v10653_v14 = vmul.f32 %v22021_v19, %v22021_v19  ;;  %v7729_v25 = vmul.f32 %v22028_v33, %v22028_v33 }
 0x5b0   : > { %v13841_v46 = vadd.f32 %v13840_v50, %v13763_v3 }
 0x5b1   : > { %v18956_v6 = vpop.f32.mrf.mxu0  ;;  %6269 = vadd.xlane.f32.xlu1 %v6268_v22  ;;  %v10654_v5 = vsel %vm2872_vm1, %v10653_v14, 0.0  ;;  %v22032_v14 = vsub.f32 %v21929_v59, %v9189_v61  ;;  %v7730_v12 = vsel %vm2872_vm1, %v7729_v25, 0.0 }
 0x5b2   : > { %v13917_v52 = vadd.f32 %v13916_v43, %v13841_v46 }
 0x5b5   : > { %v14234_v27 = vpop.f32.mrf.mxu1  ;;  %10655 = vadd.xlane.f32.xlu1 %v10654_v5  ;;  %v9191_v5 = vmul.f32 %v22032_v14, %v22032_v14 }
 0x5b7   : > { %v13996_v0 = vpop.f32.mrf.mxu0  ;;  %v19001_v1 = vpop.f32.mrf.mxu1  ;;  %v9192_v59 = vsel %vm2872_vm1, %v9191_v5, 0.0 }
 0x5b8   : > { %v13997_v53 = vadd.f32 %v13996_v0, %v13917_v52 }
 0x5b9   : > { %v18974_v47 = vpop.f32.mrf.mxu0 }
 0x5ba   : > { %v14071_v23 = vadd.f32 %v14070_v48, %v13997_v53 }
 0x5bd   : > { %v14388_v21 = vpop.f32.mrf.mxu1 }
 0x5bf   : > { %v14148_v42 = vpop.f32.mrf.mxu0  ;;  %v19019_v26 = vpop.f32.mrf.mxu1 }
 0x5c0   : > { %v14149_v10 = vadd.f32 %v14148_v42, %v14071_v23 }
 0x5c1   : > { %v18992_v49 = vpop.f32.mrf.mxu0 }
 0x5c2   : > { %v14235_v36 = vadd.f32 %v14234_v27, %v14149_v10 }
 0x5c5   : > { %v14542_v13 = vpop.f32.mrf.mxu1 }
 0x5c7   : > { %v14312_v55 = vpop.f32.mrf.mxu0  ;;  %v19037_v40 = vpop.f32.mrf.mxu1 }
 0x5c8   : > { %v14313_v57 = vadd.f32 %v14312_v55, %v14235_v36 }
 0x5c9   : > { %v19010_v51 = vpop.f32.mrf.mxu0 }
 0x5ca   : > { %v14389_v20 = vadd.f32 %v14388_v21, %v14313_v57 }
 0x5cd   : > { %v14720_v39 = vpop.f32.mrf.mxu1 }
 0x5cf   : > { %v14468_v7 = vpop.f32.mrf.mxu0  ;;  %v19055_v34 = vpop.f32.mrf.mxu1 }
 0x5d0   : > { %v14469_v54 = vadd.f32 %v14468_v7, %v14389_v20 }
 0x5d1   : > { %v19028_v9 = vpop.f32.mrf.mxu0 }
 0x5d2   : > { %v14543_v32 = vadd.f32 %v14542_v13, %v14469_v54 }
 0x5d5   : > { %v14874_v18 = vpop.f32.mrf.mxu1 }
 0x5d7   : > { %v19073_v17 = vpop.f32.mrf.mxu1 }
 0x5d8   : > { %v14634_v29 = vpop.f32.mrf.mxu0 }
 0x5d9   : > { %v14721_v38 = vadd.f32 %v14720_v39, %v14634_v29 }
 0x5da   : > { %v19046_v62 = vpop.f32.mrf.mxu0 }
 0x5dd   : > { %v15028_v45 = vpop.f32.mrf.mxu1 }
 0x5df   : > { %v14798_v63 = vpop.f32.mrf.mxu0  ;;  %v19091_v2 = vpop.f32.mrf.mxu1 }
 0x5e0   : > { %v14799_v56 = vadd.f32 %v14798_v63, %v14721_v38 }
 0x5e1   : > { %v19064_v16 = vpop.f32.mrf.mxu0 }
 0x5e2   : > { %v14875_v24 = vadd.f32 %v14874_v18, %v14799_v56 }
 0x5e5   : > { %v14954_v43 = vpop.f32.mrf.mxu0 }
 0x5e6   : > { %v14955_v8 = vadd.f32 %v14954_v43, %v14875_v24 }
 0x5e7   : > { %v19082_v44 = vpop.f32.mrf.mxu0 }
 0x5e8   : > { %v15029_v37 = vadd.f32 %v15028_v45, %v14955_v8 }
 0x5ea   : > { %v15032_v58 = vadd.f32 %v15029_v37, %v14543_v32  ;;  %v12112_v48 = vpop.xlane.xlu0 %12111 }
 0x5eb   : > { %v12113_v11 = vmul.f32 0.125, %v12112_v48  ;;  %v17162_v48 = vld [vmem:[%s22361_s8] ss:$0 sm:$0xff] }
 0x5ec   : > { %v15033_v50 = vadd.f32 %v21704_v41, %v15032_v58 }
 0x5ed   : > { %v22038_v6 = vsub.f32 %v22000_v35, %v12113_v11 }
 0x5ee   : > { %v15034_v22 = vsel %vm2872_vm1, %v15033_v50, 0.0 }
 0x5ef   : > { %15035 = vadd.xlane.f32.xlu0 %v15034_v22  ;;  %v12115_v41 = vmul.f32 %v22038_v6, %v22038_v6 }
 0x5f1   : > { %v12116_v27 = vsel %vm2872_vm1, %v12115_v41, 0.0 }
 0x5f3   : > { %7731 = vadd.xlane.f32.xlu0 %v7730_v12 }
 0x5f7   : > { %9193 = vadd.xlane.f32.xlu0 %v9192_v59 }
 0x5fb   : > { %12117 = vadd.xlane.f32.xlu0 %v12116_v27 }
 0x632   : > { %v13574_v0 = vpop.xlane.xlu1 %13573 }
 0x633   : > { %v13575_v1 = vmul.f32 0.125, %v13574_v0 }
 0x635   : > { %v22048_v35 = vsub.f32 %v22008_v60, %v13575_v1  ;;  %v17164_v60 = vld [vmem:[%s22363_s10 + $0x8] sm:$0xff] }
 0x636   : > { %v22061_v40 = vand.u32 4294901760, %v17164_v60  ;;  %v4796_v7 = vpop.xlane.xlu1 %4795 }
 0x637   : > { %v13577_v47 = vmul.f32 %v22048_v35, %v22048_v35  ;;  %v4797_v9 = vmul.f32 0.125, %v4796_v7 }
 0x638   : > { %v22064_v51 = vsub.f32 %v17164_v60, %v22061_v40  ;;  %19093 = vmatpush3.msra.mxu0 %v22061_v40 }
 0x639   : > { %v13578_v21 = vsel %vm2872_vm1, %v13577_v47, 0.0  ;;  %19102 = vmatprep.subr.mxu0 %v19443_v31  ;;  %v4798_v29 = vadd.f32 1e-06, %v4797_v9 }
 0x63a   : > { %13579 = vadd.xlane.f32.xlu1 %v13578_v21  ;;  %v15193_v3 = vand.u32 4294901760, %v22064_v51  ;;  %v6270_v52 = vpop.xlane.xlu1 %6269 }
 0x63b   : > { %v6271_v18 = vmul.f32 0.125, %v6270_v52  ;;  %19328 = vrsqrt.f32 %v4798_v29 }
 0x63c   : > { %v15194_v46 = vsub.f32 %v22064_v51, %v15193_v3 }
 0x63d   : > { %v6272_v36 = vadd.f32 1e-06, %v6271_v18 }
 0x63e   : > { %v15195_v39 = vand.u32 4294901760, %v15194_v46  ;;  %v10656_v23 = vpop.xlane.xlu1 %10655 }
 0x63f   : > { %v10657_v45 = vmul.f32 0.125, %v10656_v23  ;;  %19330 = vrsqrt.f32 %v6272_v36  ;;  %v15050_v36 = vld [vmem:[%s22363_s10] sm:$0xff] }
 0x640   : > { %19098 = vmatpush3.msra.mxu1 %v15195_v39 }
 0x641   : > { %19107 = vmatprep.subr.mxu1 %v19443_v31  ;;  %v10658_v16 = vadd.f32 1e-06, %v10657_v45 }
 0x648   : > { %v19329_v24 = vpop.eup %19328 }
 0x649   : > { %v4800_v44 = vmul.f32 %v19329_v24, %v22005_v30  ;;  %v17163_v30 = vld [vmem:[%s22362_s9] ss:$0 sm:$0xff] }
 0x64b   : > { %v4807_v12 = vmul.f32 %v17162_v48, %v4800_v44 }
 0x64c   : > { %v19331_v43 = vpop.eup %19330 }
 0x64d   : > { %v6274_v32 = vmul.f32 %v19331_v43, %v22011_v4  ;;  %v4814_v0 = vadd.f32 %v17163_v30, %v4807_v12 }
 0x64f   : > { %v6275_v5 = vmul.f32 %v17162_v48, %v6274_v32 }
 0x678   : > { %v15036_v42 = vpop.xlane.xlu0 %15035 }
 0x679   : > { %v15037_v26 = vmul.f32 0.125, %v15036_v42 }
 0x67b   : > { %v22053_v49 = vsub.f32 %v15033_v50, %v15037_v26 }
 0x67c   : > { %v7732_v34 = vpop.xlane.xlu0 %7731 }
 0x67d   : > { %v15039_v13 = vmul.f32 %v22053_v49, %v22053_v49  ;;  %v7733_v17 = vmul.f32 0.125, %v7732_v34 }
 0x67f   : > { %v15040_v55 = vsel %vm2872_vm1, %v15039_v13, 0.0  ;;  %v7734_v57 = vadd.f32 1e-06, %v7733_v17  ;;  %v22086_v13 = vmax.f32 %v4814_v0, 0.0  ;;  %v17165_v0 = vld [vmem:[%s22363_s10 + $0x10] sm:$0xff]  ;;  %vm16930_vm1 = vcmask 261120  }
 0x680   : > { %15041 = vadd.xlane.f32.xlu0 %v15040_v55  ;;  %v9194_v53 = vpop.xlane.xlu0 %9193 }
 0x681   : > { %v9195_v10 = vmul.f32 0.125, %v9194_v53  ;;  %19332 = vrsqrt.f32 %v7734_v57 }
 0x683   : > { %v9196_v63 = vadd.f32 1e-06, %v9195_v10 }
 0x684   : > { %v12118_v62 = vpop.xlane.xlu0 %12117 }
 0x685   : > { %v12119_v2 = vmul.f32 0.125, %v12118_v62  ;;  %19334 = vrsqrt.f32 %v9196_v63 }
 0x686   : > { %19336 = vrsqrt.f32 %v10658_v16 }
 0x687   : > { %v12120_v20 = vadd.f32 1e-06, %v12119_v2 }
 0x689   : > { %19338 = vrsqrt.f32 %v12120_v20  ;;  %v22119_v20 = vand.u32 4294901760, %v15050_v36 }
 0x68e   : > { %v19333_v15 = vpop.eup %19332 }
 0x68f   : > { %v7736_v37 = vmul.f32 %v19333_v15, %v22028_v33 }
 0x691   : > { %v7737_v41 = vmul.f32 %v17162_v48, %v7736_v37 }
 0x692   : > { %v19335_v28 = vpop.eup %19334 }
 0x693   : > { %v19337_v58 = vpop.eup %19336  ;;  %v9198_v50 = vmul.f32 %v19335_v28, %v22032_v14  ;;  %v6276_v14 = vadd.f32 %v17163_v30, %v6275_v5  ;;  %v7738_v1 = vadd.f32 %v17163_v30, %v7737_v41  ;;  %v15994_v41 = vrot.slane %v22086_v13, 2 }
 0x694   : > { %v10660_v4 = vmul.f32 %v19337_v58, %v22021_v19  ;;  %v22133_v58 = vsub.f32 %v15050_v36, %v22119_v20 }
 0x695   : > { %v9199_v33 = vmul.f32 %v17162_v48, %v9198_v50  ;;  %v22088_v55 = vmax.f32 %v6276_v14, 0.0  ;;  %v22090_v60 = vmax.f32 %v7738_v1, 0.0 }
 0x696   : > { %v19339_v11 = vpop.eup %19338  ;;  %v10661_v47 = vmul.f32 %v17162_v48, %v10660_v4 }
 0x697   : > { %v12122_v59 = vmul.f32 %v19339_v11, %v22038_v6  ;;  %v9200_v21 = vadd.f32 %v17163_v30, %v9199_v33  ;;  %v15530_v7 = vrot.slane %v22088_v55, 7  ;;  %v15064_v34 = vrot.slane %v22090_v60, 7 }
 0x698   : > { %v10662_v46 = vadd.f32 %v17163_v30, %v10661_v47  ;;  %v15532_v53 = vrot.slane %v22090_v60, 6  ;;  %v15995_v11 = vrot.slane %v22088_v55, 1 }
 0x699   : > { %v12123_v42 = vmul.f32 %v17162_v48, %v12122_v59  ;;  %v22092_v19 = vmax.f32 %v9200_v21, 0.0  ;;  %v15655_v59 = vand.u32 4294901760, %v22133_v58 }
 0x69a   : > { %v22097_v9 = vmax.f32 %v10662_v46, 0.0  ;;  %v15996_v14 = vsel %vm15062_vm10, %v15995_v11, %v15994_v41 }
 0x69b   : > { %v12124_v39 = vadd.f32 %v17163_v30, %v12123_v42  ;;  %v15067_v23 = vrot.slane %v22092_v19, 6  ;;  %v15534_v10 = vrot.slane %v22092_v19, 5  ;;  %v15998_v4 = vrot.slane %v22092_v19, 7 }
 0x69c   : > { %v15070_v63 = vrot.slane %v22097_v9, 5  ;;  %v15536_v15 = vrot.slane %v22097_v9, 4  ;;  %v15997_v47 = vsel %vm15065_vm11, %v22090_v60, %v15996_v14  ;;  %v16000_v42 = vrot.slane %v22097_v9, 6 }
 0x69d   : > { %v22100_v18 = vmax.f32 %v12124_v39, 0.0  ;;  %v15999_v21 = vsel %vm15068_vm12, %v15998_v4, %v15997_v47  ;;  %v15656_v39 = vsub.f32 %v22133_v58, %v15655_v59 }
 0x69f   : > { %v15073_v2 = vrot.slane %v22100_v18, 4  ;;  %v15538_v24 = vrot.slane %v22100_v18, 3  ;;  %v15657_v36 = vand.u32 4294901760, %v15656_v39 }
 0x6c3   : > { %v13580_v38 = vpop.xlane.xlu1 %13579 }
 0x6c4   : > { %v13581_v56 = vmul.f32 0.125, %v13580_v38 }
 0x6c6   : > { %v13582_v54 = vadd.f32 1e-06, %v13581_v56 }
 0x6c8   : > { %19340 = vrsqrt.f32 %v13582_v54 }
 0x6d5   : > { %v19341_v25 = vpop.eup %19340 }
 0x6d6   : > { %v13584_v27 = vmul.f32 %v19341_v25, %v22048_v35  ;;  %v15061_v35 = vrot.slane %v22086_v13, 1 }
 0x6d8   : > { %v13585_v26 = vmul.f32 %v17162_v48, %v13584_v27  ;;  %v15063_v62 = vsel %vm15062_vm10, %v22088_v55, %v15061_v35  ;;  %v22169_v35 = vand.u32 4294901760, %v17165_v0 }
 0x6d9   : > { %v15066_v57 = vsel %vm15065_vm11, %v15064_v34, %v15063_v62 }
 0x6da   : > { %v13586_v6 = vadd.f32 %v17163_v30, %v13585_v26  ;;  %v15069_v38 = vsel %vm15068_vm12, %v15067_v23, %v15066_v57  ;;  %v16002_v26 = vrot.slane %v22100_v18, 5  ;;  %v16460_v23 = vrot.slane %v22088_v55, 2 }
 0x6db   : > { %v15072_v44 = vsel %vm15071_vm14, %v15070_v63, %v15069_v38  ;;  %v22185_v57 = vsub.f32 %v17165_v0, %v22169_v35  ;;  %v16459_v55 = vrot.slane %v22086_v13, 3 }
 0x6dc   : > { %v22105_v29 = vmax.f32 %v13586_v6, 0.0  ;;  %v15075_v32 = vsel %vm15074_vm13, %v15073_v2, %v15072_v44 }
 0x6de   : > { %v15076_v43 = vrot.slane %v22105_v29, 3  ;;  %v15540_v28 = vrot.slane %v22105_v29, 2 }
 0x709   : > { %v15042_v8 = vpop.xlane.xlu0 %15041 }
 0x70a   : > { %v15043_v61 = vmul.f32 0.125, %v15042_v8 }
 0x70c   : > { %v15044_v22 = vadd.f32 1e-06, %v15043_v61 }
 0x70e   : > { %19342 = vrsqrt.f32 %v15044_v22  ;;  %v15078_v22 = vsel %vm15077_vm15, %v15076_v43, %v15075_v32 }
 0x71b   : > { %v19343_v52 = vpop.eup %19342 }
 0x71c   : > { %v15046_v17 = vmul.f32 %v19343_v52, %v22053_v49  ;;  %v15531_v49 = vsel %vm15062_vm10, %v15530_v7, %v22086_v13  ;;  %v16004_v7 = vrot.slane %v22105_v29, 4  ;;  %v16001_v52 = vsel %vm15071_vm14, %v16000_v42, %v15999_v21 }
 0x71d   : > { %v15533_v56 = vsel %vm15065_vm11, %v15532_v53, %v15531_v49  ;;  %v16461_v49 = vsel %vm15062_vm10, %v16460_v23, %v16459_v55  ;;  %v16119_v13 = vand.u32 4294901760, %v22185_v57 }
 0x71e   : > { %v15047_v45 = vmul.f32 %v17162_v48, %v15046_v17  ;;  %v15535_v54 = vsel %vm15068_vm12, %v15534_v10, %v15533_v56  ;;  %v16462_v17 = vrot.slane %v22090_v60, 1  ;;  %v16003_v10 = vsel %vm15074_vm13, %v16002_v26, %v16001_v52  ;;  %v17166_v56 = vld [vmem:[%s22363_s10 + $0x18] sm:$0xff] }
 0x71f   : > { %v15537_v37 = vsel %vm15071_vm14, %v15536_v15, %v15535_v54  ;;  %v16005_v60 = vsel %vm15077_vm15, %v16004_v7, %v16003_v10  ;;  %v16465_v54 = vrot.slane %v22097_v9, 7  ;;  %v22223_v15 = vand.u32 4294901760, %v17166_v56 }
 0x720   : > { %v15048_v16 = vadd.f32 %v17163_v30, %v15047_v45  ;;  %v15539_v48 = vsel %vm15074_vm13, %v15538_v24, %v15537_v37  ;;  %v16463_v63 = vsel %vm15065_vm11, %v16462_v17, %v16461_v49  ;;  %v16467_v24 = vrot.slane %v22100_v18, 6 }
 0x721   : > { %v15541_v25 = vsel %vm15077_vm15, %v15540_v28, %v15539_v48  ;;  %v22240_v37 = vsub.f32 %v17166_v56, %v22223_v15 }
 0x722   : > { %v22126_v8 = vmax.f32 %v15048_v16, 0.0  ;;  %v16464_v16 = vsel %vm15068_vm12, %v22092_v19, %v16463_v63  ;;  %v16469_v19 = vrot.slane %v22105_v29, 5 }
 0x723   : > { %v16466_v9 = vsel %vm15071_vm14, %v16465_v54, %v16464_v16  ;;  %v16584_v48 = vand.u32 4294901760, %v22240_v37 }
 0x724   : > { %v15079_v61 = vrot.slane %v22126_v8, 2  ;;  %v15542_v50 = vrot.slane %v22126_v8, 1  ;;  %v16006_v53 = vrot.slane %v22126_v8, 3  ;;  %v16471_v18 = vrot.slane %v22126_v8, 4 }
 0x725   : > { %v16468_v28 = vsel %vm15074_vm13, %v16467_v24, %v16466_v9 }
 0x726   : > { %v15081_v12 = vsel %vm15080_vm0, %v15079_v61, %v15078_v22  ;;  %v15543_v5 = vsel %vm15080_vm0, %v15542_v50, %v15541_v25  ;;  %v16470_v8 = vsel %vm15077_vm15, %v16469_v19, %v16468_v28  ;;  %v16585_v22 = vsub.f32 %v22240_v37, %v16584_v48 }
 0x727   : > { %v15082_v30 = vsel %vm3325_vm7, %v15081_v12, 0  ;;  %v15544_v27 = vsel %vm3325_vm7, %v15543_v5, 0  ;;  %v16472_v61 = vsel %vm15080_vm0, %v16471_v18, %v16470_v8 }
 0x728   : > { %v22145_v33 = vand.u32 4294901760, %v15082_v30  ;;  %v22167_v6 = vand.u32 4294901760, %v15544_v27  ;;  %v16473_v50 = vsel %vm3325_vm7, %v16472_v61, 0  ;;  %v16586_v12 = vand.u32 4294901760, %v16585_v22 }
 0x729   : > { %v16541_v25 = vand.u32 4294901760, %v16473_v50 }
 0x72a   : > { %v15151_v1 = vsub.f32 %v15082_v30, %v22145_v33  ;;  %19100 = vmatmul.mubr.f32.vlgmr.msra.gmra.mxu1 %v22145_v33  ;;  %v22182_v45 = vsub.f32 %v15544_v27, %v22167_v6 }
 0x72b   : > { %19108 = vmatpush3.msra.mxu1 %v22061_v40  ;;  %19109 = vmatprep.mubr.msk.f32.mxu1 %vm19446_vm6, %v19443_v31  ;;  %v16542_v5 = vsub.f32 %v16473_v50, %v16541_v25 }
 0x72c   : > { %v15152_v46 = vand.u32 4294901760, %v15151_v1  ;;  %19117 = vmatprep.subr.mxu1 %v19443_v31  ;;  %v15614_v38 = vand.u32 4294901760, %v22182_v45 }
 0x72d   : > { %v16543_v41 = vand.u32 4294901760, %v16542_v5 }
 0x72e   : > { %19110 = vmatmul.mubr.f32.vlgmr.msra.gmra.mxu1 %v15152_v46  ;;  %v15153_v34 = vsub.f32 %v15151_v1, %v15152_v46  ;;  %v15615_v43 = vsub.f32 %v22182_v45, %v15614_v38 }
 0x72f   : > { %19118 = vmatpush3.msra.mxu1 %v22061_v40  ;;  %19119 = vmatprep.mubr.msk.f32.mxu1 %vm19446_vm6, %v19443_v31  ;;  %v16007_v40 = vsel %vm15080_vm0, %v16006_v53, %v16005_v60  ;;  %v16544_v30 = vsub.f32 %v16542_v5, %v16543_v41 }
 0x730   : > { %v15154_v62 = vand.u32 4294901760, %v15153_v34  ;;  %19127 = vmatprep.subr.mxu1 %v19443_v31  ;;  %v16008_v2 = vsel %vm3325_vm7, %v16007_v40, 0  ;;  %v15616_v44 = vand.u32 4294901760, %v15615_v43 }
 0x731   : > { %v16545_v4 = vand.u32 4294901760, %v16544_v30 }
 0x732   : > { %19095 = vmatmul.mubr.f32.vlgmr.msra.gmra.mxu0 %v15154_v62  ;;  %19120 = vmatmul.mubr.f32.vlgmr.msra.gmra.mxu1 %v22145_v33 }
 0x733   : > { %19103 = vmatpush3.msra.mxu0 %v22064_v51  ;;  %19104 = vmatprep.mubr.msk.f32.mxu0 %vm19446_vm6, %v19443_v31  ;;  %v16120_v51 = vsub.f32 %v22185_v57, %v16119_v13 }
 0x734   : > { %19112 = vmatprep.subr.mxu0 %v19443_v31  ;;  %19128 = vmatpush3.msra.mxu1 %v15657_v36 }
 0x735   : > { %19129 = vmatprep.mubr.msk.f32.mxu1 %vm19446_vm6, %v19443_v31  ;;  %19137 = vmatprep.subr.mxu1 %v19443_v31  ;;  %v16121_v29 = vand.u32 4294901760, %v16120_v51 }
 0x736   : > { %19105 = vmatmul.mubr.f32.vlgmr.msra.gmra.mxu0 %v15151_v1  ;;  %19130 = vmatmul.mubr.f32.vlgmr.msra.gmra.mxu1 %v22167_v6 }
 0x737   : > { %19113 = vmatpush3.msra.mxu0 %v15193_v3  ;;  %19114 = vmatprep.mubr.msk.f32.mxu0 %vm19446_vm6, %v19443_v31  ;;  %v22221_v3 = vand.u32 4294901760, %v16008_v2 }
 0x738   : > { %19122 = vmatprep.subr.mxu0 %v19443_v31  ;;  %19138 = vmatpush3.msra.mxu1 %v22119_v20 }
 0x739   : > { %19139 = vmatprep.mubr.msk.f32.mxu1 %vm19446_vm6, %v19443_v31  ;;  %19147 = vmatprep.subr.mxu1 %v19443_v31  ;;  %v16077_v32 = vsub.f32 %v16008_v2, %v22221_v3 }
 0x73a   : > { %19115 = vmatmul.mubr.f32.vlgmr.msra.gmra.mxu0 %v22145_v33  ;;  %19140 = vmatmul.mubr.f32.vlgmr.msra.gmra.mxu1 %v15614_v38 }
 0x73b   : > { %19123 = vmatpush3.msra.mxu0 %v22119_v20  ;;  %19124 = vmatprep.mubr.msk.f32.mxu0 %vm19446_vm6, %v19443_v31 }
 0x73c   : > { %19132 = vmatprep.subr.mxu0 %v19443_v31  ;;  %19148 = vmatpush3.msra.mxu1 %v22119_v20  ;;  %v16078_v20 = vand.u32 4294901760, %v16077_v32 }
 0x73d   : > { %19149 = vmatprep.mubr.msk.f32.mxu1 %vm19446_vm6, %v19443_v31  ;;  %19157 = vmatprep.subr.mxu1 %v19443_v31 }
 0x73e   : > { %19125 = vmatmul.mubr.f32.vlgmr.msra.gmra.mxu0 %v15616_v44  ;;  %19150 = vmatmul.mubr.f32.vlgmr.msra.gmra.mxu1 %v22167_v6  ;;  %v16079_v11 = vsub.f32 %v16077_v32, %v16078_v20 }
 0x73f   : > { %19133 = vmatpush3.msra.mxu0 %v22133_v58  ;;  %19134 = vmatprep.mubr.msk.f32.mxu0 %vm19446_vm6, %v19443_v31 }
 0x740   : > { %19142 = vmatprep.subr.mxu0 %v19443_v31  ;;  %19158 = vmatpush3.msra.mxu1 %v16121_v29  ;;  %v16080_v58 = vand.u32 4294901760, %v16079_v11 }
 0x741   : > { %19159 = vmatprep.mubr.msk.f32.mxu1 %vm19446_vm6, %v19443_v31  ;;  %19167 = vmatprep.subr.mxu1 %v19443_v31 }
 0x742   : > { %19135 = vmatmul.mubr.f32.vlgmr.msra.gmra.mxu0 %v22182_v45  ;;  %19160 = vmatmul.mubr.f32.vlgmr.msra.gmra.mxu1 %v22221_v3 }
 0x743   : > { %19143 = vmatpush3.msra.mxu0 %v15655_v59  ;;  %19144 = vmatprep.mubr.msk.f32.mxu0 %vm19446_vm6, %v19443_v31 }
 0x744   : > { %19152 = vmatprep.subr.mxu0 %v19443_v31  ;;  %19168 = vmatpush3.msra.mxu1 %v22169_v35 }
 0x745   : > { %19169 = vmatprep.mubr.msk.f32.mxu1 %vm19446_vm6, %v19443_v31  ;;  %19177 = vmatprep.subr.mxu1 %v19443_v31 }
 0x746   : > { %19145 = vmatmul.mubr.f32.vlgmr.msra.gmra.mxu0 %v22167_v6  ;;  %19170 = vmatmul.mubr.f32.vlgmr.msra.gmra.mxu1 %v16078_v20 }
 0x747   : > { %19153 = vmatpush3.msra.mxu0 %v22169_v35  ;;  %19154 = vmatprep.mubr.msk.f32.mxu0 %vm19446_vm6, %v19443_v31 }
 0x748   : > { %19162 = vmatprep.subr.mxu0 %v19443_v31  ;;  %19178 = vmatpush3.msra.mxu1 %v22169_v35 }
 0x749   : > { %19179 = vmatprep.mubr.msk.f32.mxu1 %vm19446_vm6, %v19443_v31  ;;  %19187 = vmatprep.subr.mxu1 %v19443_v31 }
 0x74a   : > { %19155 = vmatmul.mubr.f32.vlgmr.msra.gmra.mxu0 %v16080_v58  ;;  %19180 = vmatmul.mubr.f32.vlgmr.msra.gmra.mxu1 %v22221_v3 }
 0x74b   : > { %19163 = vmatpush3.msra.mxu0 %v22185_v57  ;;  %19164 = vmatprep.mubr.msk.f32.mxu0 %vm19446_vm6, %v19443_v31 }
 0x74c   : > { %19172 = vmatprep.subr.mxu0 %v19443_v31  ;;  %19188 = vmatpush3.msra.mxu1 %v16586_v12 }
 0x74d   : > { %19189 = vmatprep.mubr.msk.f32.mxu1 %vm19446_vm6, %v19443_v31  ;;  %19197 = vmatprep.subr.mxu1 %v19443_v31 }
 0x74e   : > { %19165 = vmatmul.mubr.f32.vlgmr.msra.gmra.mxu0 %v16077_v32  ;;  %19190 = vmatmul.mubr.f32.vlgmr.msra.gmra.mxu1 %v16541_v25 }
 0x74f   : > { %19173 = vmatpush3.msra.mxu0 %v16119_v13  ;;  %19174 = vmatprep.mubr.msk.f32.mxu0 %vm19446_vm6, %v19443_v31 }
 0x750   : > { %19182 = vmatprep.subr.mxu0 %v19443_v31  ;;  %19198 = vmatpush3.msra.mxu1 %v22223_v15 }
 0x751   : > { %19199 = vmatprep.mubr.msk.f32.mxu1 %vm19446_vm6, %v19443_v31  ;;  %19207 = vmatprep.subr.mxu1 %v19443_v31 }
 0x752   : > { %19175 = vmatmul.mubr.f32.vlgmr.msra.gmra.mxu0 %v22221_v3  ;;  %19200 = vmatmul.mubr.f32.vlgmr.msra.gmra.mxu1 %v16543_v41 }
 0x753   : > { %19183 = vmatpush3.msra.mxu0 %v22223_v15  ;;  %19184 = vmatprep.mubr.msk.f32.mxu0 %vm19446_vm6, %v19443_v31 }
 0x754   : > { %19192 = vmatprep.subr.mxu0 %v19443_v31  ;;  %19208 = vmatpush3.msra.mxu1 %v22223_v15 }
 0x755   : > { %19209 = vmatprep.mubr.msk.f32.mxu1 %vm19446_vm6, %v19443_v31 }
 0x756   : > { %19185 = vmatmul.mubr.f32.vlgmr.msra.gmra.mxu0 %v16545_v4  ;;  %19210 = vmatmul.mubr.f32.vlgmr.msra.gmra.mxu1 %v16541_v25 }
 0x757   : > { %19193 = vmatpush3.msra.mxu0 %v22240_v37  ;;  %19194 = vmatprep.mubr.msk.f32.mxu0 %vm19446_vm6, %v19443_v31 }
 0x758   : > { %19202 = vmatprep.subr.mxu0 %v19443_v31 }
 0x75a   : > { %19195 = vmatmul.mubr.f32.vlgmr.msra.gmra.mxu0 %v16542_v5 }
 0x75b   : > { %19203 = vmatpush3.msra.mxu0 %v16584_v48  ;;  %19204 = vmatprep.mubr.msk.f32.mxu0 %vm19446_vm6, %v19443_v31 }
 0x75e   : > { %19205 = vmatmul.mubr.f32.vlgmr.msra.gmra.mxu0 %v16541_v25 }
 0x7ea   : > { %v15232_v33 = vpop.f32.mrf.mxu1 }
 0x7ec   : > { %v19101_v59 = vpop.f32.mrf.mxu1 }
 0x7ee   : > { %v15380_v27 = vpop.f32.mrf.mxu1 }
 0x7f0   : > { %v19111_v0 = vpop.f32.mrf.mxu1 }
 0x7f2   : > { %v15156_v14 = vpop.f32.mrf.mxu0  ;;  %v15526_v1 = vpop.f32.mrf.mxu1 }
 0x7f3   : > { %v15233_v6 = vadd.f32 %v15232_v33, %v15156_v14 }
 0x7f4   : > { %v19096_v47 = vpop.f32.mrf.mxu0  ;;  %v19121_v21 = vpop.f32.mrf.mxu1 }
 0x7f5   : > { %v17167_v47 = vld [vmem:[%s22364_s11] ss:$0 sm:$0xff] }
 0x7f6   : > { %v15306_v42 = vpop.f32.mrf.mxu0  ;;  %v15694_v26 = vpop.f32.mrf.mxu1 }
 0x7f7   : > { %v15307_v34 = vadd.f32 %v15306_v42, %v15233_v6 }
 0x7f8   : > { %v19106_v46 = vpop.f32.mrf.mxu0  ;;  %v19131_v39 = vpop.f32.mrf.mxu1 }
 0x7f9   : > { %v15381_v17 = vadd.f32 %v15380_v27, %v15307_v34 }
 0x7fa   : > { %v15454_v35 = vpop.f32.mrf.mxu0  ;;  %v15842_v7 = vpop.f32.mrf.mxu1 }
 0x7fb   : > { %v15455_v57 = vadd.f32 %v15454_v35, %v15381_v17 }
 0x7fc   : > { %v19116_v52 = vpop.f32.mrf.mxu0  ;;  %v19141_v53 = vpop.f32.mrf.mxu1 }
 0x7fd   : > { %v15527_v38 = vadd.f32 %v15526_v1, %v15455_v57 }
 0x7fe   : > { %v15618_v31 = vpop.f32.mrf.mxu0  ;;  %v15988_v23 = vpop.f32.mrf.mxu1 }
 0x7ff   : > { %v15619_v16 = vadd.f32 %v15618_v31, %v15527_v38 }
 0x800   : > { %v19126_v10 = vpop.f32.mrf.mxu0  ;;  %v19151_v62 = vpop.f32.mrf.mxu1 }
 0x801   : > { %v15695_v3 = vadd.f32 %v15694_v26, %v15619_v16 }
 0x802   : > { %v15768_v36 = vpop.f32.mrf.mxu0  ;;  %v16158_v45 = vpop.f32.mrf.mxu1 }
 0x803   : > { %v15769_v29 = vadd.f32 %v15768_v36, %v15695_v3 }
 0x804   : > { %v19136_v55 = vpop.f32.mrf.mxu0  ;;  %v19161_v60 = vpop.f32.mrf.mxu1 }
 0x805   : > { %v15843_v48 = vadd.f32 %v15842_v7, %v15769_v29 }
 0x806   : > { %v15916_v40 = vpop.f32.mrf.mxu0  ;;  %v16306_v49 = vpop.f32.mrf.mxu1 }
 0x807   : > { %v15917_v12 = vadd.f32 %v15916_v40, %v15843_v48 }
 0x808   : > { %v19146_v13 = vpop.f32.mrf.mxu0  ;;  %v19171_v63 = vpop.f32.mrf.mxu1 }
 0x809   : > { %v15989_v59 = vadd.f32 %v15988_v23, %v15917_v12 }
 0x80a   : > { %v16082_v2 = vpop.f32.mrf.mxu0  ;;  %v16452_v56 = vpop.f32.mrf.mxu1 }
 0x80b   : > { %v16159_v15 = vadd.f32 %v16158_v45, %v16082_v2 }
 0x80c   : > { %v19156_v54 = vpop.f32.mrf.mxu0  ;;  %v19181_v24 = vpop.f32.mrf.mxu1 }
 0x80e   : > { %v16232_v43 = vpop.f32.mrf.mxu0  ;;  %v16623_v51 = vpop.f32.mrf.mxu1 }
 0x80f   : > { %v16233_v18 = vadd.f32 %v16232_v43, %v16159_v15 }
 0x810   : > { %v19166_v19 = vpop.f32.mrf.mxu0  ;;  %v19191_v9 = vpop.f32.mrf.mxu1 }
 0x811   : > { %v16307_v8 = vadd.f32 %v16306_v49, %v16233_v18 }
 0x812   : > { %v16380_v28 = vpop.f32.mrf.mxu0  ;;  %v16771_v44 = vpop.f32.mrf.mxu1 }
 0x813   : > { %v16381_v22 = vadd.f32 %v16380_v28, %v16307_v8 }
 0x814   : > { %v19176_v32 = vpop.f32.mrf.mxu0  ;;  %v19201_v37 = vpop.f32.mrf.mxu1 }
 0x815   : > { %v16453_v30 = vadd.f32 %v16452_v56, %v16381_v22 }
 0x816   : > { %v16547_v61 = vpop.f32.mrf.mxu0  ;;  %v16917_v20 = vpop.f32.mrf.mxu1 }
 0x817   : > { %v16624_v25 = vadd.f32 %v16623_v51, %v16547_v61  ;;  %v16456_v14 = vadd.f32 %v16453_v30, %v15989_v59 }
 0x818   : > { %v19186_v50 = vpop.f32.mrf.mxu0  ;;  %v19211_v11 = vpop.f32.mrf.mxu1 }
 0x81a   : > { %v16697_v58 = vpop.f32.mrf.mxu0 }
 0x81b   : > { %v16698_v5 = vadd.f32 %v16697_v58, %v16624_v25 }
 0x81c   : > { %v19196_v41 = vpop.f32.mrf.mxu0 }
 0x81d   : > { %v16772_v4 = vadd.f32 %v16771_v44, %v16698_v5 }
 0x81e   : > { %v16845_v33 = vpop.f32.mrf.mxu0 }
 0x81f   : > { %v16846_v27 = vadd.f32 %v16845_v33, %v16772_v4 }
 0x820   : > { %v19206_v0 = vpop.f32.mrf.mxu0 }
 0x821   : > { %v16918_v1 = vadd.f32 %v16917_v20, %v16846_v27 }
 0x823   : > { %v16921_v21 = vadd.f32 %v16918_v1, %v16456_v14 }
 0x825   : > { %v16929_v42 = vadd.f32 %v17167_v47, %v16921_v21 }
 0x827   : > { %16931 = vst.msk [vmem:[%s720_s19] sm:$0xff] %vm16930_vm1, %v16929_v42 }
 0x828   : > { %19358 = shalt.err (!%p19355_p8)
}
 0x829   : > { %s19359_s15 = scalar_lea.hbm %s16945_s0, 128  ;;  %s19363_s19 = scalar_lea.hbm %s22365_s12, 256 }
 0x82a   : > { %p19360_p11 = scmp.ne.s32.totalorder %s16945_s0, %s19359_s15  ;;  %p19364_p0 = scmp.lt.s32.totalorder %s16945_s0, %s22365_s12 }
 0x82b   : > { %p19365_p1 = scmp.lt.s32.totalorder %s19363_s19, %s19359_s15 }
 0x82c   : > { %p19361_p12 = pnand %p19360_p11, %p19552_p5 }
 0x82d   : > { %p19366_p2 = por %p19365_p1, %p19364_p0 }
 0x82e   : > { %p19362_p13 = pneg %p19361_p12 }
 0x830   : > { %p19367_p10 = pnand %p19366_p2, %p19362_p13 }
 0x832   : > { %19370 = shalt.err (!%p19367_p10)
}
 0x833   : > { %19213 = dma.vmem_to_hbm [thread:$0]  (%p19552_p5), %s16948_s26, 128, %s16945_s0, %s16933_s2  }
 0x834 PF: > { %s16959_s3 = sand.u32 1, %s19417_s20   ;;  %p22377_p3 = scmp.ge.s32.totalorder %s19437_s25, 2 }
 0x835   : > { %s16960_s16 = scalar_lea.sflag [#allocation5], %s16959_s3 }
 0x836   : > { %p19216_p4 = pnand %p22377_p3, %p19563_p9 }
 0x838   : > { %p19217_p6 = pneg %p19216_p4 }
 0x83a   : > { %19412 = dma.done.wait (%p19217_p6), %s16960_s16, 128  }
 0x83b   : > { %19414 = vsyncadd (%p19217_p6), %s16960_s16, 4294967168  ;;  %s25_s25 = sadd.s32 1, %s19437_s25   ;;  %s22378_s20 = smov %s19421_s21 }
 0x83c   : > { %p22_p7 = scmp.ge.s32.totalorder %s25_s25, 4   ;;  %s22379_s21 = smov %s19425_s22 }
 0x83d   : > { %s22380_s22 = smov %s19561_s13  ;;  %s22381_s23 = smov %s19433_s24 }
 0x83e   : > { %s22382_s24 = smov %s22384_s28  ;;  %24 = sbr.rel (!%p22_p7) target bundleno = 8 (0x8), region = 255 }
 0x843   :  { %16965 = vsyncpa [#allocation5], 1 }
 0x844   :  { %16967 = vsyncpa [#allocation5 + $0x1], 1 }

</bundles_post_ra>
